<compile_context>
chip_gen: v7x
topology: tpu7x:2x2x1
jax: 0.10.0
libtpu: 0.0.40
codegen_flags: <defaults>
</compile_context>

<pallas_src>
import functools
import math

import jax
import jax.numpy as jnp
from jax.experimental import pallas as pl
from jax.experimental.pallas import tpu as pltpu

# ----------------------------- configuration --------------------------------
B = 2            # batch of images
C_IN = 3         # image channels
IMG = 16         # image resolution (stand-in for CLIP's 224)
PATCH = 8        # patch size -> 2x2 = 4 patches
N_PATCH = (IMG // PATCH) ** 2
PATCH_DIM = C_IN * PATCH * PATCH

D_TXT = 32       # text transformer width   (stand-in for 512)
D_VIS = 32       # vision transformer width (stand-in for 768)
N_HEADS = 4
EMBED = 16       # shared image/text embedding dim
N_LAYERS = 2     # transformer depth (text and vision)

N_CLS = 3        # number of classnames
N_CTX = 2        # MAPLE_N_CTX
PROMPT_DEPTH = 2 # MAPLE_PROMPT_DEPTH  -> 1 compound prompt per modality
L_TXT = 1 + N_CTX + 5          # SOS + ctx + suffix tokens = 8
L_VIS = 1 + N_PATCH + N_CTX    # CLS + patches + visual ctx tokens = 7 (real)
L_VIS_PAD = 8                  # padded to one 8-sublane tile; pad key masked

_NEG = -1e30
_VMEM = pl.BlockSpec(memory_space=pltpu.MemorySpace.VMEM)
_SMEM = pl.BlockSpec(memory_space=pltpu.MemorySpace.SMEM)


# --------------------------- in-kernel building blocks -----------------------
def _ln(x, g, b, eps=1e-5):
    """LayerNorm over the last axis. x: [M, D]; g/b broadcastable [1, D]."""
    x = x.astype(jnp.float32)
    mu = jnp.mean(x, axis=-1, keepdims=True)
    var = jnp.mean(jnp.square(x - mu), axis=-1, keepdims=True)
    return (x - mu) * jax.lax.rsqrt(var + eps) * g + b


def _replace_rows(x, rep, seq_len, start):
    """Overwrite rows [start, start+rep.rows) of EVERY seq_len-row block of x.

    Value-level masked select (no partial stores): MaPLe deep-prompt token
    replacement between transformer layers.
    """
    n_rep = rep.shape[0]
    rows = x.shape[0]
    idx = jax.lax.broadcasted_iota(jnp.int32, (rows, 1), 0)
    if (seq_len & (seq_len - 1)) == 0:
        pos = jnp.bitwise_and(idx, seq_len - 1)
    else:
        pos = idx % seq_len
    out = x
    for j in range(n_rep):
        out = jnp.where(pos == start + j, rep[j:j + 1, :], out)
    return out


def _transformer_block(x, w_attn_ref, w_fc_ref, w_mlp_ref, vecs_ref, layer,
                       n_seq, seq_len, d, heads, attn_bias):
    """One CLIP pre-norm residual attention block on the whole [n_seq*L, d]
    activation value.  All sequences are processed at once via a single
    batch-dim einsum; head outputs are concatenated for ONE out-projection."""
    dh = d // heads
    scale = 1.0 / math.sqrt(dh)

    vec = vecs_ref[layer]                          # [8, 4d] packed vectors
    ln1_g, ln1_b = vec[0:1, :d], vec[1:2, :d]
    ln2_g, ln2_b = vec[2:3, :d], vec[3:4, :d]
    qkv_b = vec[4:5, :3 * d]
    out_b = vec[5:6, :d]
    fc_b = vec[6:7, :4 * d]
    mlp_b = vec[7:8, :d]

    # ---- multi-head self-attention (pre-LN) ----
    h = _ln(x, ln1_g, ln1_b)
    q = jnp.dot(h, w_attn_ref[layer, 0], preferred_element_type=jnp.float32) + qkv_b[:, 0:d]
    k = jnp.dot(h, w_attn_ref[layer, 1], preferred_element_type=jnp.float32) + qkv_b[:, d:2 * d]
    v = jnp.dot(h, w_attn_ref[layer, 2], preferred_element_type=jnp.float32) + qkv_b[:, 2 * d:3 * d]
    q3 = q.reshape(n_seq, seq_len, d)
    k3 = k.reshape(n_seq, seq_len, d)
    v3 = v.reshape(n_seq, seq_len, d)

    head_outs = []
    for hh in range(heads):                        # 4 whole-buffer iterations
        c0 = hh * dh
        qh = q3[:, :, c0:c0 + dh]
        kh = k3[:, :, c0:c0 + dh]
        vh = v3[:, :, c0:c0 + dh]
        s = jnp.einsum('sld,smd->slm', qh, kh,
                       preferred_element_type=jnp.float32) * scale + attn_bias
        s = s - jnp.max(s, axis=-1, keepdims=True)
        p = jnp.exp(s)
        p = p / jnp.sum(p, axis=-1, keepdims=True)
        oh = jnp.einsum('slm,smd->sld', p, vh,
                        preferred_element_type=jnp.float32)      # [S, L, dh]
        head_outs.append(oh)
    attn = jnp.concatenate(head_outs, axis=-1).reshape(n_seq * seq_len, d)
    attn = jnp.dot(attn, w_attn_ref[layer, 3],
                   preferred_element_type=jnp.float32) + out_b
    x = x + attn

    # ---- MLP (pre-LN, QuickGELU) ----
    h = _ln(x, ln2_g, ln2_b)
    h = jnp.dot(h, w_fc_ref[layer], preferred_element_type=jnp.float32) + fc_b
    h = h * jax.nn.sigmoid(1.702 * h)
    h = jnp.dot(h, w_mlp_ref[layer], preferred_element_type=jnp.float32) + mlp_b
    return x + h


# ------------------------------ fused kernel ---------------------------------
def _custom_clip_kernel(
        # SMEM scalars
        eot_ref, scale_ref,
        # text encoder
        txt_x0_ref, txt_deep_ref, txt_w_attn_ref, txt_w_fc_ref, txt_w_mlp_ref,
        txt_vecs_ref, txt_final_ref, txt_proj_ref,
        # vision encoder (+ prompt-learner projections)
        patches_ref, conv_w_ref, vis_fixed_ref, ctx_ref, vprojs_w_ref,
        vprojs_b_ref, vis_w_attn_ref, vis_w_fc_ref, vis_w_mlp_ref,
        vis_vecs_ref, vis_ln_ref, vis_proj_ref,
        # output + scratch
        out_ref, xt_scratch,
        *, batch):
    f32 = jnp.float32

    # ======================= text encoder =======================
    x = txt_x0_ref[...]                               # [N_CLS*L_TXT, D_TXT]

    # CLIP text transformer uses a causal attention mask.
    ri = jax.lax.broadcasted_iota(jnp.int32, (L_TXT, L_TXT), 0)
    ci = jax.lax.broadcasted_iota(jnp.int32, (L_TXT, L_TXT), 1)
    causal_bias = jnp.where(ci <= ri, 0.0, _NEG).astype(f32)

    for i in range(N_LAYERS):
        # MaPLe: layers 0 < i < PROMPT_DEPTH replace the learned-context slots.
        if 0 < i < PROMPT_DEPTH:
            x = _replace_rows(x, txt_deep_ref[i - 1], L_TXT, start=1)
        x = _transformer_block(x, txt_w_attn_ref, txt_w_fc_ref, txt_w_mlp_ref,
                               txt_vecs_ref, i, N_CLS, L_TXT, D_TXT, N_HEADS,
                               causal_bias)

    # EOT pooling: dynamic row gather via SMEM indices, then ln_final + proj
    # (LayerNorm is row-wise, so gather-then-LN == LN-then-gather).
    xt_scratch[...] = x
    rows = []
    for n in range(N_CLS):
        rows.append(xt_scratch[pl.ds(eot_ref[n], 1), :])
    pooled = jnp.concatenate(rows, axis=0)            # [N_CLS, D_TXT]
    pooled = _ln(pooled, txt_final_ref[0:1, :], txt_final_ref[1:2, :])
    txt_feat = jnp.dot(pooled, txt_proj_ref[...],
                       preferred_element_type=f32)    # [N_CLS, EMBED]

    # ======================= vision encoder =====================
    # MultiModalPromptLearner projections: shared visual ctx + deep prompts.
    shared_ctx = (jnp.dot(ctx_ref[...], vprojs_w_ref[0],
                          preferred_element_type=f32) + vprojs_b_ref[0:1, :])
    deep_vis = [
        jnp.dot(txt_deep_ref[j], vprojs_w_ref[j + 1],
                preferred_element_type=f32) + vprojs_b_ref[j + 1:j + 2, :]
        for j in range(PROMPT_DEPTH - 1)
    ]

    # Patch embedding (conv1 with kernel==stride rewritten as a matmul) and
    # token assembly as whole-value concatenations (single logical buffer).
    conv_w = conv_w_ref[...]
    fixed = vis_fixed_ref[...]                        # row0 = cls+pos0, rest = pos
    pad_rows = jnp.zeros((L_VIS_PAD - L_VIS, D_VIS), f32)
    seqs = []
    for b in range(batch):
        pe = jnp.dot(patches_ref[b], conv_w, preferred_element_type=f32)
        seqs.append(jnp.concatenate(
            [fixed[0:1, :], pe + fixed[1:, :], shared_ctx, pad_rows], axis=0))
    xv = jnp.concatenate(seqs, axis=0)                # [B*L_VIS_PAD, D_VIS]

    xv = _ln(xv, vis_ln_ref[0:1, :], vis_ln_ref[1:2, :])      # ln_pre

    # Mask the padding token as a key (queries over it are never read).
    cvi = jax.lax.broadcasted_iota(jnp.int32, (L_VIS_PAD, L_VIS_PAD), 1)
    pad_bias = jnp.where(cvi < L_VIS, 0.0, _NEG).astype(f32)

    for i in range(N_LAYERS):
        if 0 < i < PROMPT_DEPTH:
            xv = _replace_rows(xv, deep_vis[i - 1], L_VIS_PAD,
                               start=1 + N_PATCH)
        xv = _transformer_block(xv, vis_w_attn_ref, vis_w_fc_ref, vis_w_mlp_ref,
                                vis_vecs_ref, i, batch, L_VIS_PAD, D_VIS,
                                N_HEADS, pad_bias)

    # ln_post on the CLS token, then final projection.
    cls_rows = jnp.concatenate(
        [xv[b * L_VIS_PAD:b * L_VIS_PAD + 1, :] for b in range(batch)], axis=0)
    cls_rows = _ln(cls_rows, vis_ln_ref[2:3, :], vis_ln_ref[3:4, :])
    img_feat = jnp.dot(cls_rows, vis_proj_ref[...],
                       preferred_element_type=f32)    # [B, EMBED]

    # ======================= CLIP logits =========================
    img_n = img_feat / jnp.sqrt(jnp.sum(img_feat * img_feat, axis=-1, keepdims=True))
    txt_n = txt_feat / jnp.sqrt(jnp.sum(txt_feat * txt_feat, axis=-1, keepdims=True))
    logits = jax.lax.dot_general(img_n, txt_n, (((1,), (1,)), ((), ())),
                                 preferred_element_type=f32)
    out_ref[...] = scale_ref[0] * logits


# ------------------------------ model forward --------------------------------
def custom_clip_forward(params, image):
    """CustomCLIP.forward() — one fused Pallas kernel."""
    plp = params["prompt_learner"]
    te = params["text_encoder"]
    ie = params["image_encoder"]
    b = image.shape[0]

    # ---------------- XLA-side layout glue (no model compute) ----------------
    # construct_prompts: cat(prefix, ctx, suffix) + positional embedding.
    ctx_b = jnp.broadcast_to(plp["ctx"][None], (N_CLS, N_CTX, D_TXT))
    prompts = jnp.concatenate([plp["token_prefix"], ctx_b, plp["token_suffix"]],
                              axis=1)
    txt_x0 = (prompts + te["pos_emb"][None]).reshape(N_CLS * L_TXT, D_TXT)

    # EOT row indices in the flattened [N_CLS*L_TXT] layout.
    eot = jnp.argmax(params["tokenized_prompts"], axis=-1).astype(jnp.int32)
    eot_rows = jnp.arange(N_CLS, dtype=jnp.int32) * L_TXT + eot

    # Patchify (conv1 with kernel==stride==PATCH becomes a matmul in-kernel).
    gh = gw = IMG // PATCH
    patches = image.reshape(b, C_IN, gh, PATCH, gw, PATCH)
    patches = patches.transpose(0, 2, 4, 1, 3, 5).reshape(b, N_PATCH, PATCH_DIM)

    # cls+pos[0] and pos[1:] skeleton for the vision tokens.
    vis_fixed = jnp.concatenate(
        [ie["class_embedding"][None] + ie["pos_emb"][0:1], ie["pos_emb"][1:]],
        axis=0)

    # Prompt-learner projections stacked: [0]=proj (shared ctx), [1:]=compound.
    vprojs_w = jnp.concatenate([plp["proj_w"][None], plp["cpp_w"]], axis=0)
    vprojs_b = jnp.concatenate([plp["proj_b"][None], plp["cpp_b"]], axis=0)

    scale = jnp.exp(params["logit_scale"]).reshape(1)

    args = (
        eot_rows, scale,
        txt_x0, plp["compound_prompts_text"],
        te["blocks"]["w_attn"], te["blocks"]["w_fc"], te["blocks"]["w_mlp"],
        te["blocks"]["vecs"], te["ln_final"], te["text_projection"],
        patches, ie["conv_w"], vis_fixed, plp["ctx"], vprojs_w, vprojs_b,
        ie["blocks"]["w_attn"], ie["blocks"]["w_fc"], ie["blocks"]["w_mlp"],
        ie["blocks"]["vecs"], ie["ln_pre_post"], ie["proj"],
    )

    return pl.pallas_call(
        functools.partial(_custom_clip_kernel, batch=b),
        out_shape=jax.ShapeDtypeStruct((b, N_CLS), jnp.float32),
        in_specs=[_SMEM, _SMEM] + [_VMEM] * (len(args) - 2),
        out_specs=_VMEM,
        scratch_shapes=[pltpu.VMEM((N_CLS * L_TXT, D_TXT), jnp.float32)],
    )(*args)


# ------------------------------ parameter init --------------------------------
def _normal(key, shape, std=0.02):
    return std * jax.random.normal(key, shape, jnp.float32)


def _init_blocks(key, d, n_layers):
    """Per-layer weights packed for a single DMA per weight kind.

    w_attn: [L, 4, D, D]  (q, k, v, out projections)
    w_fc  : [L, D, 4D]    w_mlp: [L, 4D, D]
    vecs  : [L, 8, 4D]    rows = ln1_g, ln1_b, ln2_g, ln2_b, qkv_b, out_b,
                                 fc_b, mlp_b (zero-padded to 4D lanes)
    """
    k1, k2, k3 = jax.random.split(key, 3)
    vecs = jnp.zeros((n_layers, 8, 4 * d), jnp.float32)
    vecs = vecs.at[:, 0, :d].set(1.0)   # ln_1 gamma
    vecs = vecs.at[:, 2, :d].set(1.0)   # ln_2 gamma  (all biases zero-init)
    return dict(
        w_attn=_normal(k1, (n_layers, 4, d, d)),
        w_fc=_normal(k2, (n_layers, d, 4 * d)),
        w_mlp=_normal(k3, (n_layers, 4 * d, d)),
        vecs=vecs,
    )


def init_params(key):
    keys = jax.random.split(key, 16)
    ki = iter(keys)

    # TODO(synk): clip.tokenize / token_embedding have no Pallas equivalent —
    # replaced by deterministic synthetic token embeddings + EOT positions.
    tokenized = jnp.zeros((N_CLS, L_TXT), jnp.int32)
    eot_pos = jnp.array([4, 5, 7], jnp.int32)
    tokenized = tokenized.at[jnp.arange(N_CLS), eot_pos].set(999)

    prompt_learner = dict(
        ctx=_normal(next(ki), (N_CTX, D_TXT)),
        proj_w=_normal(next(ki), (D_TXT, D_VIS)),
        proj_b=jnp.zeros((D_VIS,), jnp.float32),
        compound_prompts_text=_normal(next(ki), (PROMPT_DEPTH - 1, N_CTX, D_TXT)),
        cpp_w=_normal(next(ki), (PROMPT_DEPTH - 1, D_TXT, D_VIS)),
        cpp_b=jnp.zeros((PROMPT_DEPTH - 1, D_VIS), jnp.float32),
        token_prefix=_normal(next(ki), (N_CLS, 1, D_TXT)),
        token_suffix=_normal(next(ki), (N_CLS, L_TXT - 1 - N_CTX, D_TXT)),
    )

    text_encoder = dict(
        pos_emb=_normal(next(ki), (L_TXT, D_TXT), std=0.01),
        blocks=_init_blocks(next(ki), D_TXT, N_LAYERS),
        ln_final=jnp.stack([jnp.ones((D_TXT,), jnp.float32),
                            jnp.zeros((D_TXT,), jnp.float32)]),
        text_projection=_normal(next(ki), (D_TXT, EMBED)),
    )

    image_encoder = dict(
        conv_w=_normal(next(ki), (PATCH_DIM, D_VIS)),
        class_embedding=_normal(next(ki), (D_VIS,)),
        pos_emb=_normal(next(ki), (1 + N_PATCH, D_VIS), std=0.01),
        ln_pre_post=jnp.stack([jnp.ones((D_VIS,), jnp.float32),   # ln_pre g
                               jnp.zeros((D_VIS,), jnp.float32),  # ln_pre b
                               jnp.ones((D_VIS,), jnp.float32),   # ln_post g
                               jnp.zeros((D_VIS,), jnp.float32)]),# ln_post b
        blocks=_init_blocks(next(ki), D_VIS, N_LAYERS),
        proj=_normal(next(ki), (D_VIS, EMBED)),
    )

    return dict(
        prompt_learner=prompt_learner,
        text_encoder=text_encoder,
        image_encoder=image_encoder,
        tokenized_prompts=tokenized,
        logit_scale=jnp.asarray(math.log(1.0 / 0.07), jnp.float32),
    )


# ------------------------------------ main ------------------------------------
if __name__ == "__main__":
    key = jax.random.PRNGKey(0)
    pkey, xkey = jax.random.split(key)
    params = init_params(pkey)
    image = jax.random.normal(xkey, (B, C_IN, IMG, IMG), jnp.float32)  # NCHW

    fwd = jax.jit(custom_clip_forward)
    logits = jax.block_until_ready(fwd(params, image))
    assert logits.shape == (B, N_CLS), logits.shape
    assert bool(jnp.all(jnp.isfinite(logits)))
    print("KERNEL_OK")
</pallas_src>

<mosaic_0001>
module attributes {stable_mosaic.version = 11 : i64} {
  func.func @_custom_clip_kernel(%arg0: memref<3xi32, #tpu.memory_space<smem>>, %arg1: memref<1xf32, #tpu.memory_space<smem>>, %arg2: memref<24x32xf32, #tpu.memory_space<vmem>>, %arg3: memref<1x2x32xf32, #tpu.memory_space<vmem>>, %arg4: memref<2x4x32x32xf32, #tpu.memory_space<vmem>>, %arg5: memref<2x32x128xf32, #tpu.memory_space<vmem>>, %arg6: memref<2x128x32xf32, #tpu.memory_space<vmem>>, %arg7: memref<2x8x128xf32, #tpu.memory_space<vmem>>, %arg8: memref<2x32xf32, #tpu.memory_space<vmem>>, %arg9: memref<32x16xf32, #tpu.memory_space<vmem>>, %arg10: memref<2x4x192xf32, #tpu.memory_space<vmem>>, %arg11: memref<192x32xf32, #tpu.memory_space<vmem>>, %arg12: memref<5x32xf32, #tpu.memory_space<vmem>>, %arg13: memref<2x32xf32, #tpu.memory_space<vmem>>, %arg14: memref<2x32x32xf32, #tpu.memory_space<vmem>>, %arg15: memref<2x32xf32, #tpu.memory_space<vmem>>, %arg16: memref<2x4x32x32xf32, #tpu.memory_space<vmem>>, %arg17: memref<2x32x128xf32, #tpu.memory_space<vmem>>, %arg18: memref<2x128x32xf32, #tpu.memory_space<vmem>>, %arg19: memref<2x8x128xf32, #tpu.memory_space<vmem>>, %arg20: memref<4x32xf32, #tpu.memory_space<vmem>>, %arg21: memref<32x16xf32, #tpu.memory_space<vmem>>, %arg22: memref<2x3xf32, #tpu.memory_space<vmem>>, %arg23: memref<24x32xf32, #tpu.memory_space<vmem>>) attributes {dimension_semantics = [], scalar_prefetch = 0 : i64, scratch_operands = 1 : i64, tpu.core_type = #tpu.core_type<tc>} {
    %c0 = arith.constant 0 : index
    %c0_0 = arith.constant 0 : index
    %0 = vector.load %arg2[%c0, %c0_0] : memref<24x32xf32, #tpu.memory_space<vmem>>, vector<24x32xf32>
    %1 = tpu.iota {dimensions = array<i32: 0>} : vector<8x8xi32>
    %2 = tpu.iota {dimensions = array<i32: 1>} : vector<8x8xi32>
    %3 = arith.cmpi sle, %2, %1 : vector<8x8xi32>
    %cst = arith.constant 0.000000e+00 : f32
    %cst_1 = arith.constant -1.000000e+30 : f32
    %4 = vector.broadcast %cst : f32 to vector<8x8xf32>
    %5 = vector.broadcast %cst_1 : f32 to vector<8x8xf32>
    %6 = arith.select %3, %4, %5 : vector<8x8xi1>, vector<8x8xf32>
    %c0_2 = arith.constant 0 : index
    %c0_3 = arith.constant 0 : index
    %c0_4 = arith.constant 0 : index
    %7 = vector.load %arg7[%c0_2, %c0_3, %c0_4] : memref<2x8x128xf32, #tpu.memory_space<vmem>>, vector<1x8x128xf32>
    %8 = vector.shape_cast %7 : vector<1x8x128xf32> to vector<8x128xf32>
    %9 = vector.extract_strided_slice %8 {offsets = [0, 0], sizes = [1, 32], strides = [1, 1]} : vector<8x128xf32> to vector<1x32xf32>
    %10 = vector.extract_strided_slice %8 {offsets = [1, 0], sizes = [1, 32], strides = [1, 1]} : vector<8x128xf32> to vector<1x32xf32>
    %11 = vector.extract_strided_slice %8 {offsets = [2, 0], sizes = [1, 32], strides = [1, 1]} : vector<8x128xf32> to vector<1x32xf32>
    %12 = vector.extract_strided_slice %8 {offsets = [3, 0], sizes = [1, 32], strides = [1, 1]} : vector<8x128xf32> to vector<1x32xf32>
    %13 = vector.extract_strided_slice %8 {offsets = [4, 0], sizes = [1, 96], strides = [1, 1]} : vector<8x128xf32> to vector<1x96xf32>
    %14 = vector.extract_strided_slice %8 {offsets = [5, 0], sizes = [1, 32], strides = [1, 1]} : vector<8x128xf32> to vector<1x32xf32>
    %15 = vector.extract_strided_slice %8 {offsets = [6, 0], sizes = [1, 128], strides = [1, 1]} : vector<8x128xf32> to vector<1x128xf32>
    %16 = vector.extract_strided_slice %8 {offsets = [7, 0], sizes = [1, 32], strides = [1, 1]} : vector<8x128xf32> to vector<1x32xf32>
    %cst_5 = arith.constant dense<0.000000e+00> : vector<24xf32>
    %17 = vector.multi_reduction <add>, %0, %cst_5 [1] : vector<24x32xf32> to vector<24xf32>
    %18 = vector.shape_cast %17 : vector<24xf32> to vector<24x1xf32>
    %cst_6 = arith.constant 3.200000e+01 : f32
    %19 = vector.broadcast %cst_6 : f32 to vector<24x1xf32>
    %20 = arith.divf %18, %19 : vector<24x1xf32>
    %21 = vector.broadcast %20 : vector<24x1xf32> to vector<24x32xf32>
    %22 = arith.subf %0, %21 : vector<24x32xf32>
    %23 = arith.mulf %22, %22 : vector<24x32xf32>
    %cst_7 = arith.constant dense<0.000000e+00> : vector<24xf32>
    %24 = vector.multi_reduction <add>, %23, %cst_7 [1] : vector<24x32xf32> to vector<24xf32>
    %25 = vector.shape_cast %24 : vector<24xf32> to vector<24x1xf32>
    %cst_8 = arith.constant 3.200000e+01 : f32
    %26 = vector.broadcast %cst_8 : f32 to vector<24x1xf32>
    %27 = arith.divf %25, %26 : vector<24x1xf32>
    %28 = vector.broadcast %20 : vector<24x1xf32> to vector<24x32xf32>
    %29 = arith.subf %0, %28 : vector<24x32xf32>
    %cst_9 = arith.constant 9.99999974E-6 : f32
    %30 = vector.broadcast %cst_9 : f32 to vector<24x1xf32>
    %31 = arith.addf %27, %30 : vector<24x1xf32>
    %32 = math.rsqrt %31 : vector<24x1xf32>
    %33 = vector.broadcast %32 : vector<24x1xf32> to vector<24x32xf32>
    %34 = arith.mulf %29, %33 : vector<24x32xf32>
    %35 = vector.broadcast %9 : vector<1x32xf32> to vector<24x32xf32>
    %36 = arith.mulf %34, %35 : vector<24x32xf32>
    %37 = vector.broadcast %10 : vector<1x32xf32> to vector<24x32xf32>
    %38 = arith.addf %36, %37 : vector<24x32xf32>
    %c0_10 = arith.constant 0 : index
    %c0_11 = arith.constant 0 : index
    %c0_12 = arith.constant 0 : index
    %c0_13 = arith.constant 0 : index
    %39 = vector.load %arg4[%c0_10, %c0_11, %c0_12, %c0_13] : memref<2x4x32x32xf32, #tpu.memory_space<vmem>>, vector<1x1x32x32xf32>
    %40 = vector.shape_cast %39 : vector<1x1x32x32xf32> to vector<32x32xf32>
    %cst_14 = arith.constant dense<0.000000e+00> : vector<24x32xf32>
    %41 = tpu.matmul %38, %40, %cst_14 {dimension_numbers = #tpu.dot_dimension_numbers<[1], [0], [0], [1], [0, 0, 1, 1], [], []>} : vector<24x32xf32>, vector<32x32xf32>, vector<24x32xf32> -> vector<24x32xf32>
    %42 = vector.extract_strided_slice %13 {offsets = [0, 0], sizes = [1, 32], strides = [1, 1]} : vector<1x96xf32> to vector<1x32xf32>
    %43 = vector.broadcast %42 : vector<1x32xf32> to vector<24x32xf32>
    %44 = arith.addf %41, %43 : vector<24x32xf32>
    %c0_15 = arith.constant 0 : index
    %c1 = arith.constant 1 : index
    %c0_16 = arith.constant 0 : index
    %c0_17 = arith.constant 0 : index
    %45 = vector.load %arg4[%c0_15, %c1, %c0_16, %c0_17] : memref<2x4x32x32xf32, #tpu.memory_space<vmem>>, vector<1x1x32x32xf32>
    %46 = vector.shape_cast %45 : vector<1x1x32x32xf32> to vector<32x32xf32>
    %cst_18 = arith.constant dense<0.000000e+00> : vector<24x32xf32>
    %47 = tpu.matmul %38, %46, %cst_18 {dimension_numbers = #tpu.dot_dimension_numbers<[1], [0], [0], [1], [0, 0, 1, 1], [], []>} : vector<24x32xf32>, vector<32x32xf32>, vector<24x32xf32> -> vector<24x32xf32>
    %48 = vector.extract_strided_slice %13 {offsets = [0, 32], sizes = [1, 32], strides = [1, 1]} : vector<1x96xf32> to vector<1x32xf32>
    %49 = vector.broadcast %48 : vector<1x32xf32> to vector<24x32xf32>
    %50 = arith.addf %47, %49 : vector<24x32xf32>
    %c0_19 = arith.constant 0 : index
    %c2 = arith.constant 2 : index
    %c0_20 = arith.constant 0 : index
    %c0_21 = arith.constant 0 : index
    %51 = vector.load %arg4[%c0_19, %c2, %c0_20, %c0_21] : memref<2x4x32x32xf32, #tpu.memory_space<vmem>>, vector<1x1x32x32xf32>
    %52 = vector.shape_cast %51 : vector<1x1x32x32xf32> to vector<32x32xf32>
    %cst_22 = arith.constant dense<0.000000e+00> : vector<24x32xf32>
    %53 = tpu.matmul %38, %52, %cst_22 {dimension_numbers = #tpu.dot_dimension_numbers<[1], [0], [0], [1], [0, 0, 1, 1], [], []>} : vector<24x32xf32>, vector<32x32xf32>, vector<24x32xf32> -> vector<24x32xf32>
    %54 = vector.extract_strided_slice %13 {offsets = [0, 64], sizes = [1, 32], strides = [1, 1]} : vector<1x96xf32> to vector<1x32xf32>
    %55 = vector.broadcast %54 : vector<1x32xf32> to vector<24x32xf32>
    %56 = arith.addf %53, %55 : vector<24x32xf32>
    %57 = vector.shape_cast %44 : vector<24x32xf32> to vector<3x8x32xf32>
    %58 = vector.shape_cast %50 : vector<24x32xf32> to vector<3x8x32xf32>
    %59 = vector.shape_cast %56 : vector<24x32xf32> to vector<3x8x32xf32>
    %60 = vector.extract_strided_slice %57 {offsets = [0, 0, 0], sizes = [3, 8, 8], strides = [1, 1, 1]} : vector<3x8x32xf32> to vector<3x8x8xf32>
    %61 = vector.extract_strided_slice %58 {offsets = [0, 0, 0], sizes = [3, 8, 8], strides = [1, 1, 1]} : vector<3x8x32xf32> to vector<3x8x8xf32>
    %62 = vector.extract_strided_slice %59 {offsets = [0, 0, 0], sizes = [3, 8, 8], strides = [1, 1, 1]} : vector<3x8x32xf32> to vector<3x8x8xf32>
    "tpu.trace_start"() <{level = 10 : i32, message = "sld,smd->slm"}> : () -> ()
    %cst_23 = arith.constant dense<0.000000e+00> : vector<3x8x8xf32>
    %63 = tpu.matmul %60, %61, %cst_23 {dimension_numbers = #tpu.dot_dimension_numbers<[2], [2], [1], [1], [0, 0, 0, 1, 1, 1], [0], [0]>} : vector<3x8x8xf32>, vector<3x8x8xf32>, vector<3x8x8xf32> -> vector<3x8x8xf32>
    "tpu.trace_stop"() : () -> ()
    %cst_24 = arith.constant 0.353553385 : f32
    %64 = vector.broadcast %cst_24 : f32 to vector<3x8x8xf32>
    %65 = arith.mulf %63, %64 : vector<3x8x8xf32>
    %66 = vector.shape_cast %6 : vector<8x8xf32> to vector<1x8x8xf32>
    %67 = vector.broadcast %66 : vector<1x8x8xf32> to vector<3x8x8xf32>
    %68 = arith.addf %65, %67 : vector<3x8x8xf32>
    %cst_25 = arith.constant dense<0xFF800000> : vector<3x8xf32>
    %69 = vector.multi_reduction <maximumf>, %68, %cst_25 [2] : vector<3x8x8xf32> to vector<3x8xf32>
    %70 = vector.shape_cast %69 : vector<3x8xf32> to vector<3x8x1xf32>
    %71 = vector.broadcast %70 : vector<3x8x1xf32> to vector<3x8x8xf32>
    %72 = arith.subf %68, %71 : vector<3x8x8xf32>
    %73 = math.exp %72 : vector<3x8x8xf32>
    %cst_26 = arith.constant dense<0.000000e+00> : vector<3x8xf32>
    %74 = vector.multi_reduction <add>, %73, %cst_26 [2] : vector<3x8x8xf32> to vector<3x8xf32>
    %75 = vector.shape_cast %74 : vector<3x8xf32> to vector<3x8x1xf32>
    %76 = vector.broadcast %75 : vector<3x8x1xf32> to vector<3x8x8xf32>
    %77 = arith.divf %73, %76 : vector<3x8x8xf32>
    "tpu.trace_start"() <{level = 10 : i32, message = "slm,smd->sld"}> : () -> ()
    %cst_27 = arith.constant dense<0.000000e+00> : vector<3x8x8xf32>
    %78 = tpu.matmul %77, %62, %cst_27 {dimension_numbers = #tpu.dot_dimension_numbers<[2], [1], [1], [2], [0, 0, 0, 1, 1, 2], [0], [0]>} : vector<3x8x8xf32>, vector<3x8x8xf32>, vector<3x8x8xf32> -> vector<3x8x8xf32>
    "tpu.trace_stop"() : () -> ()
    %79 = vector.extract_strided_slice %57 {offsets = [0, 0, 8], sizes = [3, 8, 8], strides = [1, 1, 1]} : vector<3x8x32xf32> to vector<3x8x8xf32>
    %80 = vector.extract_strided_slice %58 {offsets = [0, 0, 8], sizes = [3, 8, 8], strides = [1, 1, 1]} : vector<3x8x32xf32> to vector<3x8x8xf32>
    %81 = vector.extract_strided_slice %59 {offsets = [0, 0, 8], sizes = [3, 8, 8], strides = [1, 1, 1]} : vector<3x8x32xf32> to vector<3x8x8xf32>
    "tpu.trace_start"() <{level = 10 : i32, message = "sld,smd->slm"}> : () -> ()
    %cst_28 = arith.constant dense<0.000000e+00> : vector<3x8x8xf32>
    %82 = tpu.matmul %79, %80, %cst_28 {dimension_numbers = #tpu.dot_dimension_numbers<[2], [2], [1], [1], [0, 0, 0, 1, 1, 1], [0], [0]>} : vector<3x8x8xf32>, vector<3x8x8xf32>, vector<3x8x8xf32> -> vector<3x8x8xf32>
    "tpu.trace_stop"() : () -> ()
    %cst_29 = arith.constant 0.353553385 : f32
    %83 = vector.broadcast %cst_29 : f32 to vector<3x8x8xf32>
    %84 = arith.mulf %82, %83 : vector<3x8x8xf32>
    %85 = vector.shape_cast %6 : vector<8x8xf32> to vector<1x8x8xf32>
    %86 = vector.broadcast %85 : vector<1x8x8xf32> to vector<3x8x8xf32>
    %87 = arith.addf %84, %86 : vector<3x8x8xf32>
    %cst_30 = arith.constant dense<0xFF800000> : vector<3x8xf32>
    %88 = vector.multi_reduction <maximumf>, %87, %cst_30 [2] : vector<3x8x8xf32> to vector<3x8xf32>
    %89 = vector.shape_cast %88 : vector<3x8xf32> to vector<3x8x1xf32>
    %90 = vector.broadcast %89 : vector<3x8x1xf32> to vector<3x8x8xf32>
    %91 = arith.subf %87, %90 : vector<3x8x8xf32>
    %92 = math.exp %91 : vector<3x8x8xf32>
    %cst_31 = arith.constant dense<0.000000e+00> : vector<3x8xf32>
    %93 = vector.multi_reduction <add>, %92, %cst_31 [2] : vector<3x8x8xf32> to vector<3x8xf32>
    %94 = vector.shape_cast %93 : vector<3x8xf32> to vector<3x8x1xf32>
    %95 = vector.broadcast %94 : vector<3x8x1xf32> to vector<3x8x8xf32>
    %96 = arith.divf %92, %95 : vector<3x8x8xf32>
    "tpu.trace_start"() <{level = 10 : i32, message = "slm,smd->sld"}> : () -> ()
    %cst_32 = arith.constant dense<0.000000e+00> : vector<3x8x8xf32>
    %97 = tpu.matmul %96, %81, %cst_32 {dimension_numbers = #tpu.dot_dimension_numbers<[2], [1], [1], [2], [0, 0, 0, 1, 1, 2], [0], [0]>} : vector<3x8x8xf32>, vector<3x8x8xf32>, vector<3x8x8xf32> -> vector<3x8x8xf32>
    "tpu.trace_stop"() : () -> ()
    %98 = vector.extract_strided_slice %57 {offsets = [0, 0, 16], sizes = [3, 8, 8], strides = [1, 1, 1]} : vector<3x8x32xf32> to vector<3x8x8xf32>
    %99 = vector.extract_strided_slice %58 {offsets = [0, 0, 16], sizes = [3, 8, 8], strides = [1, 1, 1]} : vector<3x8x32xf32> to vector<3x8x8xf32>
    %100 = vector.extract_strided_slice %59 {offsets = [0, 0, 16], sizes = [3, 8, 8], strides = [1, 1, 1]} : vector<3x8x32xf32> to vector<3x8x8xf32>
    "tpu.trace_start"() <{level = 10 : i32, message = "sld,smd->slm"}> : () -> ()
    %cst_33 = arith.constant dense<0.000000e+00> : vector<3x8x8xf32>
    %101 = tpu.matmul %98, %99, %cst_33 {dimension_numbers = #tpu.dot_dimension_numbers<[2], [2], [1], [1], [0, 0, 0, 1, 1, 1], [0], [0]>} : vector<3x8x8xf32>, vector<3x8x8xf32>, vector<3x8x8xf32> -> vector<3x8x8xf32>
    "tpu.trace_stop"() : () -> ()
    %cst_34 = arith.constant 0.353553385 : f32
    %102 = vector.broadcast %cst_34 : f32 to vector<3x8x8xf32>
    %103 = arith.mulf %101, %102 : vector<3x8x8xf32>
    %104 = vector.shape_cast %6 : vector<8x8xf32> to vector<1x8x8xf32>
    %105 = vector.broadcast %104 : vector<1x8x8xf32> to vector<3x8x8xf32>
    %106 = arith.addf %103, %105 : vector<3x8x8xf32>
    %cst_35 = arith.constant dense<0xFF800000> : vector<3x8xf32>
    %107 = vector.multi_reduction <maximumf>, %106, %cst_35 [2] : vector<3x8x8xf32> to vector<3x8xf32>
    %108 = vector.shape_cast %107 : vector<3x8xf32> to vector<3x8x1xf32>
    %109 = vector.broadcast %108 : vector<3x8x1xf32> to vector<3x8x8xf32>
    %110 = arith.subf %106, %109 : vector<3x8x8xf32>
    %111 = math.exp %110 : vector<3x8x8xf32>
    %cst_36 = arith.constant dense<0.000000e+00> : vector<3x8xf32>
    %112 = vector.multi_reduction <add>, %111, %cst_36 [2] : vector<3x8x8xf32> to vector<3x8xf32>
    %113 = vector.shape_cast %112 : vector<3x8xf32> to vector<3x8x1xf32>
    %114 = vector.broadcast %113 : vector<3x8x1xf32> to vector<3x8x8xf32>
    %115 = arith.divf %111, %114 : vector<3x8x8xf32>
    "tpu.trace_start"() <{level = 10 : i32, message = "slm,smd->sld"}> : () -> ()
    %cst_37 = arith.constant dense<0.000000e+00> : vector<3x8x8xf32>
    %116 = tpu.matmul %115, %100, %cst_37 {dimension_numbers = #tpu.dot_dimension_numbers<[2], [1], [1], [2], [0, 0, 0, 1, 1, 2], [0], [0]>} : vector<3x8x8xf32>, vector<3x8x8xf32>, vector<3x8x8xf32> -> vector<3x8x8xf32>
    "tpu.trace_stop"() : () -> ()
    %117 = vector.extract_strided_slice %57 {offsets = [0, 0, 24], sizes = [3, 8, 8], strides = [1, 1, 1]} : vector<3x8x32xf32> to vector<3x8x8xf32>
    %118 = vector.extract_strided_slice %58 {offsets = [0, 0, 24], sizes = [3, 8, 8], strides = [1, 1, 1]} : vector<3x8x32xf32> to vector<3x8x8xf32>
    %119 = vector.extract_strided_slice %59 {offsets = [0, 0, 24], sizes = [3, 8, 8], strides = [1, 1, 1]} : vector<3x8x32xf32> to vector<3x8x8xf32>
    "tpu.trace_start"() <{level = 10 : i32, message = "sld,smd->slm"}> : () -> ()
    %cst_38 = arith.constant dense<0.000000e+00> : vector<3x8x8xf32>
    %120 = tpu.matmul %117, %118, %cst_38 {dimension_numbers = #tpu.dot_dimension_numbers<[2], [2], [1], [1], [0, 0, 0, 1, 1, 1], [0], [0]>} : vector<3x8x8xf32>, vector<3x8x8xf32>, vector<3x8x8xf32> -> vector<3x8x8xf32>
    "tpu.trace_stop"() : () -> ()
    %cst_39 = arith.constant 0.353553385 : f32
    %121 = vector.broadcast %cst_39 : f32 to vector<3x8x8xf32>
    %122 = arith.mulf %120, %121 : vector<3x8x8xf32>
    %123 = vector.shape_cast %6 : vector<8x8xf32> to vector<1x8x8xf32>
    %124 = vector.broadcast %123 : vector<1x8x8xf32> to vector<3x8x8xf32>
    %125 = arith.addf %122, %124 : vector<3x8x8xf32>
    %cst_40 = arith.constant dense<0xFF800000> : vector<3x8xf32>
    %126 = vector.multi_reduction <maximumf>, %125, %cst_40 [2] : vector<3x8x8xf32> to vector<3x8xf32>
    %127 = vector.shape_cast %126 : vector<3x8xf32> to vector<3x8x1xf32>
    %128 = vector.broadcast %127 : vector<3x8x1xf32> to vector<3x8x8xf32>
    %129 = arith.subf %125, %128 : vector<3x8x8xf32>
    %130 = math.exp %129 : vector<3x8x8xf32>
    %cst_41 = arith.constant dense<0.000000e+00> : vector<3x8xf32>
    %131 = vector.multi_reduction <add>, %130, %cst_41 [2] : vector<3x8x8xf32> to vector<3x8xf32>
    %132 = vector.shape_cast %131 : vector<3x8xf32> to vector<3x8x1xf32>
    %133 = vector.broadcast %132 : vector<3x8x1xf32> to vector<3x8x8xf32>
    %134 = arith.divf %130, %133 : vector<3x8x8xf32>
    "tpu.trace_start"() <{level = 10 : i32, message = "slm,smd->sld"}> : () -> ()
    %cst_42 = arith.constant dense<0.000000e+00> : vector<3x8x8xf32>
    %135 = tpu.matmul %134, %119, %cst_42 {dimension_numbers = #tpu.dot_dimension_numbers<[2], [1], [1], [2], [0, 0, 0, 1, 1, 2], [0], [0]>} : vector<3x8x8xf32>, vector<3x8x8xf32>, vector<3x8x8xf32> -> vector<3x8x8xf32>
    "tpu.trace_stop"() : () -> ()
    %136 = tpu.concatenate %78, %97, %116, %135 in 2 : vector<3x8x8xf32>, vector<3x8x8xf32>, vector<3x8x8xf32>, vector<3x8x8xf32> -> vector<3x8x32xf32>
    %137 = vector.shape_cast %136 : vector<3x8x32xf32> to vector<24x32xf32>
    %c0_43 = arith.constant 0 : index
    %c3 = arith.constant 3 : index
    %c0_44 = arith.constant 0 : index
    %c0_45 = arith.constant 0 : index
    %138 = vector.load %arg4[%c0_43, %c3, %c0_44, %c0_45] : memref<2x4x32x32xf32, #tpu.memory_space<vmem>>, vector<1x1x32x32xf32>
    %139 = vector.shape_cast %138 : vector<1x1x32x32xf32> to vector<32x32xf32>
    %cst_46 = arith.constant dense<0.000000e+00> : vector<24x32xf32>
    %140 = tpu.matmul %137, %139, %cst_46 {dimension_numbers = #tpu.dot_dimension_numbers<[1], [0], [0], [1], [0, 0, 1, 1], [], []>} : vector<24x32xf32>, vector<32x32xf32>, vector<24x32xf32> -> vector<24x32xf32>
    %141 = vector.broadcast %14 : vector<1x32xf32> to vector<24x32xf32>
    %142 = arith.addf %140, %141 : vector<24x32xf32>
    %143 = arith.addf %0, %142 : vector<24x32xf32>
    %cst_47 = arith.constant dense<0.000000e+00> : vector<24xf32>
    %144 = vector.multi_reduction <add>, %143, %cst_47 [1] : vector<24x32xf32> to vector<24xf32>
    %145 = vector.shape_cast %144 : vector<24xf32> to vector<24x1xf32>
    %cst_48 = arith.constant 3.200000e+01 : f32
    %146 = vector.broadcast %cst_48 : f32 to vector<24x1xf32>
    %147 = arith.divf %145, %146 : vector<24x1xf32>
    %148 = vector.broadcast %147 : vector<24x1xf32> to vector<24x32xf32>
    %149 = arith.subf %143, %148 : vector<24x32xf32>
    %150 = arith.mulf %149, %149 : vector<24x32xf32>
    %cst_49 = arith.constant dense<0.000000e+00> : vector<24xf32>
    %151 = vector.multi_reduction <add>, %150, %cst_49 [1] : vector<24x32xf32> to vector<24xf32>
    %152 = vector.shape_cast %151 : vector<24xf32> to vector<24x1xf32>
    %cst_50 = arith.constant 3.200000e+01 : f32
    %153 = vector.broadcast %cst_50 : f32 to vector<24x1xf32>
    %154 = arith.divf %152, %153 : vector<24x1xf32>
    %155 = vector.broadcast %147 : vector<24x1xf32> to vector<24x32xf32>
    %156 = arith.subf %143, %155 : vector<24x32xf32>
    %cst_51 = arith.constant 9.99999974E-6 : f32
    %157 = vector.broadcast %cst_51 : f32 to vector<24x1xf32>
    %158 = arith.addf %154, %157 : vector<24x1xf32>
    %159 = math.rsqrt %158 : vector<24x1xf32>
    %160 = vector.broadcast %159 : vector<24x1xf32> to vector<24x32xf32>
    %161 = arith.mulf %156, %160 : vector<24x32xf32>
    %162 = vector.broadcast %11 : vector<1x32xf32> to vector<24x32xf32>
    %163 = arith.mulf %161, %162 : vector<24x32xf32>
    %164 = vector.broadcast %12 : vector<1x32xf32> to vector<24x32xf32>
    %165 = arith.addf %163, %164 : vector<24x32xf32>
    %c0_52 = arith.constant 0 : index
    %c0_53 = arith.constant 0 : index
    %c0_54 = arith.constant 0 : index
    %166 = vector.load %arg5[%c0_52, %c0_53, %c0_54] : memref<2x32x128xf32, #tpu.memory_space<vmem>>, vector<1x32x128xf32>
    %167 = vector.shape_cast %166 : vector<1x32x128xf32> to vector<32x128xf32>
    %cst_55 = arith.constant dense<0.000000e+00> : vector<24x128xf32>
    %168 = tpu.matmul %165, %167, %cst_55 {dimension_numbers = #tpu.dot_dimension_numbers<[1], [0], [0], [1], [0, 0, 1, 1], [], []>} : vector<24x32xf32>, vector<32x128xf32>, vector<24x128xf32> -> vector<24x128xf32>
    %169 = vector.broadcast %15 : vector<1x128xf32> to vector<24x128xf32>
    %170 = arith.addf %168, %169 : vector<24x128xf32>
    %cst_56 = arith.constant 1.702000e+00 : f32
    %171 = vector.broadcast %cst_56 : f32 to vector<24x128xf32>
    %172 = arith.mulf %171, %170 : vector<24x128xf32>
    %173 = arith.negf %172 : vector<24x128xf32>
    %174 = math.exp %173 : vector<24x128xf32>
    %cst_57 = arith.constant 1.000000e+00 : f32
    %175 = vector.broadcast %cst_57 : f32 to vector<24x128xf32>
    %176 = arith.addf %175, %174 : vector<24x128xf32>
    %177 = arith.divf %175, %176 : vector<24x128xf32>
    %178 = arith.mulf %170, %177 : vector<24x128xf32>
    %c0_58 = arith.constant 0 : index
    %c0_59 = arith.constant 0 : index
    %c0_60 = arith.constant 0 : index
    %179 = vector.load %arg6[%c0_58, %c0_59, %c0_60] : memref<2x128x32xf32, #tpu.memory_space<vmem>>, vector<1x128x32xf32>
    %180 = vector.shape_cast %179 : vector<1x128x32xf32> to vector<128x32xf32>
    %cst_61 = arith.constant dense<0.000000e+00> : vector<24x32xf32>
    %181 = tpu.matmul %178, %180, %cst_61 {dimension_numbers = #tpu.dot_dimension_numbers<[1], [0], [0], [1], [0, 0, 1, 1], [], []>} : vector<24x128xf32>, vector<128x32xf32>, vector<24x32xf32> -> vector<24x32xf32>
    %182 = vector.broadcast %16 : vector<1x32xf32> to vector<24x32xf32>
    %183 = arith.addf %181, %182 : vector<24x32xf32>
    %184 = arith.addf %143, %183 : vector<24x32xf32>
    %c0_62 = arith.constant 0 : index
    %c0_63 = arith.constant 0 : index
    %c0_64 = arith.constant 0 : index
    %185 = vector.load %arg3[%c0_62, %c0_63, %c0_64] : memref<1x2x32xf32, #tpu.memory_space<vmem>>, vector<1x2x32xf32>
    %186 = vector.shape_cast %185 : vector<1x2x32xf32> to vector<2x32xf32>
    %187 = tpu.iota {dimensions = array<i32: 0>} : vector<24x1xi32>
    %c7_i32 = arith.constant 7 : i32
    %188 = vector.broadcast %c7_i32 : i32 to vector<24x1xi32>
    %189 = arith.andi %187, %188 : vector<24x1xi32>
    %c1_i32 = arith.constant 1 : i32
    %190 = vector.broadcast %c1_i32 : i32 to vector<24x1xi32>
    %191 = arith.cmpi eq, %189, %190 : vector<24x1xi32>
    %192 = vector.extract_strided_slice %186 {offsets = [0, 0], sizes = [1, 32], strides = [1, 1]} : vector<2x32xf32> to vector<1x32xf32>
    %193 = vector.shape_cast %191 : vector<24x1xi1> to vector<24x1xi1>
    %194 = vector.broadcast %193 : vector<24x1xi1> to vector<24x32xi1>
    %195 = vector.shape_cast %192 : vector<1x32xf32> to vector<1x32xf32>
    %196 = vector.broadcast %195 : vector<1x32xf32> to vector<24x32xf32>
    %197 = arith.select %194, %196, %184 : vector<24x32xi1>, vector<24x32xf32>
    %c2_i32 = arith.constant 2 : i32
    %198 = vector.broadcast %c2_i32 : i32 to vector<24x1xi32>
    %199 = arith.cmpi eq, %189, %198 : vector<24x1xi32>
    %200 = vector.extract_strided_slice %186 {offsets = [1, 0], sizes = [1, 32], strides = [1, 1]} : vector<2x32xf32> to vector<1x32xf32>
    %201 = vector.shape_cast %199 : vector<24x1xi1> to vector<24x1xi1>
    %202 = vector.broadcast %201 : vector<24x1xi1> to vector<24x32xi1>
    %203 = vector.shape_cast %200 : vector<1x32xf32> to vector<1x32xf32>
    %204 = vector.broadcast %203 : vector<1x32xf32> to vector<24x32xf32>
    %205 = arith.select %202, %204, %197 : vector<24x32xi1>, vector<24x32xf32>
    %c1_65 = arith.constant 1 : index
    %c0_66 = arith.constant 0 : index
    %c0_67 = arith.constant 0 : index
    %206 = vector.load %arg7[%c1_65, %c0_66, %c0_67] : memref<2x8x128xf32, #tpu.memory_space<vmem>>, vector<1x8x128xf32>
    %207 = vector.shape_cast %206 : vector<1x8x128xf32> to vector<8x128xf32>
    %208 = vector.extract_strided_slice %207 {offsets = [0, 0], sizes = [1, 32], strides = [1, 1]} : vector<8x128xf32> to vector<1x32xf32>
    %209 = vector.extract_strided_slice %207 {offsets = [1, 0], sizes = [1, 32], strides = [1, 1]} : vector<8x128xf32> to vector<1x32xf32>
    %210 = vector.extract_strided_slice %207 {offsets = [2, 0], sizes = [1, 32], strides = [1, 1]} : vector<8x128xf32> to vector<1x32xf32>
    %211 = vector.extract_strided_slice %207 {offsets = [3, 0], sizes = [1, 32], strides = [1, 1]} : vector<8x128xf32> to vector<1x32xf32>
    %212 = vector.extract_strided_slice %207 {offsets = [4, 0], sizes = [1, 96], strides = [1, 1]} : vector<8x128xf32> to vector<1x96xf32>
    %213 = vector.extract_strided_slice %207 {offsets = [5, 0], sizes = [1, 32], strides = [1, 1]} : vector<8x128xf32> to vector<1x32xf32>
    %214 = vector.extract_strided_slice %207 {offsets = [6, 0], sizes = [1, 128], strides = [1, 1]} : vector<8x128xf32> to vector<1x128xf32>
    %215 = vector.extract_strided_slice %207 {offsets = [7, 0], sizes = [1, 32], strides = [1, 1]} : vector<8x128xf32> to vector<1x32xf32>
    %cst_68 = arith.constant dense<0.000000e+00> : vector<24xf32>
    %216 = vector.multi_reduction <add>, %205, %cst_68 [1] : vector<24x32xf32> to vector<24xf32>
    %217 = vector.shape_cast %216 : vector<24xf32> to vector<24x1xf32>
    %cst_69 = arith.constant 3.200000e+01 : f32
    %218 = vector.broadcast %cst_69 : f32 to vector<24x1xf32>
    %219 = arith.divf %217, %218 : vector<24x1xf32>
    %220 = vector.broadcast %219 : vector<24x1xf32> to vector<24x32xf32>
    %221 = arith.subf %205, %220 : vector<24x32xf32>
    %222 = arith.mulf %221, %221 : vector<24x32xf32>
    %cst_70 = arith.constant dense<0.000000e+00> : vector<24xf32>
    %223 = vector.multi_reduction <add>, %222, %cst_70 [1] : vector<24x32xf32> to vector<24xf32>
    %224 = vector.shape_cast %223 : vector<24xf32> to vector<24x1xf32>
    %cst_71 = arith.constant 3.200000e+01 : f32
    %225 = vector.broadcast %cst_71 : f32 to vector<24x1xf32>
    %226 = arith.divf %224, %225 : vector<24x1xf32>
    %227 = vector.broadcast %219 : vector<24x1xf32> to vector<24x32xf32>
    %228 = arith.subf %205, %227 : vector<24x32xf32>
    %cst_72 = arith.constant 9.99999974E-6 : f32
    %229 = vector.broadcast %cst_72 : f32 to vector<24x1xf32>
    %230 = arith.addf %226, %229 : vector<24x1xf32>
    %231 = math.rsqrt %230 : vector<24x1xf32>
    %232 = vector.broadcast %231 : vector<24x1xf32> to vector<24x32xf32>
    %233 = arith.mulf %228, %232 : vector<24x32xf32>
    %234 = vector.broadcast %208 : vector<1x32xf32> to vector<24x32xf32>
    %235 = arith.mulf %233, %234 : vector<24x32xf32>
    %236 = vector.broadcast %209 : vector<1x32xf32> to vector<24x32xf32>
    %237 = arith.addf %235, %236 : vector<24x32xf32>
    %c1_73 = arith.constant 1 : index
    %c0_74 = arith.constant 0 : index
    %c0_75 = arith.constant 0 : index
    %c0_76 = arith.constant 0 : index
    %238 = vector.load %arg4[%c1_73, %c0_74, %c0_75, %c0_76] : memref<2x4x32x32xf32, #tpu.memory_space<vmem>>, vector<1x1x32x32xf32>
    %239 = vector.shape_cast %238 : vector<1x1x32x32xf32> to vector<32x32xf32>
    %cst_77 = arith.constant dense<0.000000e+00> : vector<24x32xf32>
    %240 = tpu.matmul %237, %239, %cst_77 {dimension_numbers = #tpu.dot_dimension_numbers<[1], [0], [0], [1], [0, 0, 1, 1], [], []>} : vector<24x32xf32>, vector<32x32xf32>, vector<24x32xf32> -> vector<24x32xf32>
    %241 = vector.extract_strided_slice %212 {offsets = [0, 0], sizes = [1, 32], strides = [1, 1]} : vector<1x96xf32> to vector<1x32xf32>
    %242 = vector.broadcast %241 : vector<1x32xf32> to vector<24x32xf32>
    %243 = arith.addf %240, %242 : vector<24x32xf32>
    %c1_78 = arith.constant 1 : index
    %c1_79 = arith.constant 1 : index
    %c0_80 = arith.constant 0 : index
    %c0_81 = arith.constant 0 : index
    %244 = vector.load %arg4[%c1_78, %c1_79, %c0_80, %c0_81] : memref<2x4x32x32xf32, #tpu.memory_space<vmem>>, vector<1x1x32x32xf32>
    %245 = vector.shape_cast %244 : vector<1x1x32x32xf32> to vector<32x32xf32>
    %cst_82 = arith.constant dense<0.000000e+00> : vector<24x32xf32>
    %246 = tpu.matmul %237, %245, %cst_82 {dimension_numbers = #tpu.dot_dimension_numbers<[1], [0], [0], [1], [0, 0, 1, 1], [], []>} : vector<24x32xf32>, vector<32x32xf32>, vector<24x32xf32> -> vector<24x32xf32>
    %247 = vector.extract_strided_slice %212 {offsets = [0, 32], sizes = [1, 32], strides = [1, 1]} : vector<1x96xf32> to vector<1x32xf32>
    %248 = vector.broadcast %247 : vector<1x32xf32> to vector<24x32xf32>
    %249 = arith.addf %246, %248 : vector<24x32xf32>
    %c1_83 = arith.constant 1 : index
    %c2_84 = arith.constant 2 : index
    %c0_85 = arith.constant 0 : index
    %c0_86 = arith.constant 0 : index
    %250 = vector.load %arg4[%c1_83, %c2_84, %c0_85, %c0_86] : memref<2x4x32x32xf32, #tpu.memory_space<vmem>>, vector<1x1x32x32xf32>
    %251 = vector.shape_cast %250 : vector<1x1x32x32xf32> to vector<32x32xf32>
    %cst_87 = arith.constant dense<0.000000e+00> : vector<24x32xf32>
    %252 = tpu.matmul %237, %251, %cst_87 {dimension_numbers = #tpu.dot_dimension_numbers<[1], [0], [0], [1], [0, 0, 1, 1], [], []>} : vector<24x32xf32>, vector<32x32xf32>, vector<24x32xf32> -> vector<24x32xf32>
    %253 = vector.extract_strided_slice %212 {offsets = [0, 64], sizes = [1, 32], strides = [1, 1]} : vector<1x96xf32> to vector<1x32xf32>
    %254 = vector.broadcast %253 : vector<1x32xf32> to vector<24x32xf32>
    %255 = arith.addf %252, %254 : vector<24x32xf32>
    %256 = vector.shape_cast %243 : vector<24x32xf32> to vector<3x8x32xf32>
    %257 = vector.shape_cast %249 : vector<24x32xf32> to vector<3x8x32xf32>
    %258 = vector.shape_cast %255 : vector<24x32xf32> to vector<3x8x32xf32>
    %259 = vector.extract_strided_slice %256 {offsets = [0, 0, 0], sizes = [3, 8, 8], strides = [1, 1, 1]} : vector<3x8x32xf32> to vector<3x8x8xf32>
    %260 = vector.extract_strided_slice %257 {offsets = [0, 0, 0], sizes = [3, 8, 8], strides = [1, 1, 1]} : vector<3x8x32xf32> to vector<3x8x8xf32>
    %261 = vector.extract_strided_slice %258 {offsets = [0, 0, 0], sizes = [3, 8, 8], strides = [1, 1, 1]} : vector<3x8x32xf32> to vector<3x8x8xf32>
    "tpu.trace_start"() <{level = 10 : i32, message = "sld,smd->slm"}> : () -> ()
    %cst_88 = arith.constant dense<0.000000e+00> : vector<3x8x8xf32>
    %262 = tpu.matmul %259, %260, %cst_88 {dimension_numbers = #tpu.dot_dimension_numbers<[2], [2], [1], [1], [0, 0, 0, 1, 1, 1], [0], [0]>} : vector<3x8x8xf32>, vector<3x8x8xf32>, vector<3x8x8xf32> -> vector<3x8x8xf32>
    "tpu.trace_stop"() : () -> ()
    %cst_89 = arith.constant 0.353553385 : f32
    %263 = vector.broadcast %cst_89 : f32 to vector<3x8x8xf32>
    %264 = arith.mulf %262, %263 : vector<3x8x8xf32>
    %265 = vector.shape_cast %6 : vector<8x8xf32> to vector<1x8x8xf32>
    %266 = vector.broadcast %265 : vector<1x8x8xf32> to vector<3x8x8xf32>
    %267 = arith.addf %264, %266 : vector<3x8x8xf32>
    %cst_90 = arith.constant dense<0xFF800000> : vector<3x8xf32>
    %268 = vector.multi_reduction <maximumf>, %267, %cst_90 [2] : vector<3x8x8xf32> to vector<3x8xf32>
    %269 = vector.shape_cast %268 : vector<3x8xf32> to vector<3x8x1xf32>
    %270 = vector.broadcast %269 : vector<3x8x1xf32> to vector<3x8x8xf32>
    %271 = arith.subf %267, %270 : vector<3x8x8xf32>
    %272 = math.exp %271 : vector<3x8x8xf32>
    %cst_91 = arith.constant dense<0.000000e+00> : vector<3x8xf32>
    %273 = vector.multi_reduction <add>, %272, %cst_91 [2] : vector<3x8x8xf32> to vector<3x8xf32>
    %274 = vector.shape_cast %273 : vector<3x8xf32> to vector<3x8x1xf32>
    %275 = vector.broadcast %274 : vector<3x8x1xf32> to vector<3x8x8xf32>
    %276 = arith.divf %272, %275 : vector<3x8x8xf32>
    "tpu.trace_start"() <{level = 10 : i32, message = "slm,smd->sld"}> : () -> ()
    %cst_92 = arith.constant dense<0.000000e+00> : vector<3x8x8xf32>
    %277 = tpu.matmul %276, %261, %cst_92 {dimension_numbers = #tpu.dot_dimension_numbers<[2], [1], [1], [2], [0, 0, 0, 1, 1, 2], [0], [0]>} : vector<3x8x8xf32>, vector<3x8x8xf32>, vector<3x8x8xf32> -> vector<3x8x8xf32>
    "tpu.trace_stop"() : () -> ()
    %278 = vector.extract_strided_slice %256 {offsets = [0, 0, 8], sizes = [3, 8, 8], strides = [1, 1, 1]} : vector<3x8x32xf32> to vector<3x8x8xf32>
    %279 = vector.extract_strided_slice %257 {offsets = [0, 0, 8], sizes = [3, 8, 8], strides = [1, 1, 1]} : vector<3x8x32xf32> to vector<3x8x8xf32>
    %280 = vector.extract_strided_slice %258 {offsets = [0, 0, 8], sizes = [3, 8, 8], strides = [1, 1, 1]} : vector<3x8x32xf32> to vector<3x8x8xf32>
    "tpu.trace_start"() <{level = 10 : i32, message = "sld,smd->slm"}> : () -> ()
    %cst_93 = arith.constant dense<0.000000e+00> : vector<3x8x8xf32>
    %281 = tpu.matmul %278, %279, %cst_93 {dimension_numbers = #tpu.dot_dimension_numbers<[2], [2], [1], [1], [0, 0, 0, 1, 1, 1], [0], [0]>} : vector<3x8x8xf32>, vector<3x8x8xf32>, vector<3x8x8xf32> -> vector<3x8x8xf32>
    "tpu.trace_stop"() : () -> ()
    %cst_94 = arith.constant 0.353553385 : f32
    %282 = vector.broadcast %cst_94 : f32 to vector<3x8x8xf32>
    %283 = arith.mulf %281, %282 : vector<3x8x8xf32>
    %284 = vector.shape_cast %6 : vector<8x8xf32> to vector<1x8x8xf32>
    %285 = vector.broadcast %284 : vector<1x8x8xf32> to vector<3x8x8xf32>
    %286 = arith.addf %283, %285 : vector<3x8x8xf32>
    %cst_95 = arith.constant dense<0xFF800000> : vector<3x8xf32>
    %287 = vector.multi_reduction <maximumf>, %286, %cst_95 [2] : vector<3x8x8xf32> to vector<3x8xf32>
    %288 = vector.shape_cast %287 : vector<3x8xf32> to vector<3x8x1xf32>
    %289 = vector.broadcast %288 : vector<3x8x1xf32> to vector<3x8x8xf32>
    %290 = arith.subf %286, %289 : vector<3x8x8xf32>
    %291 = math.exp %290 : vector<3x8x8xf32>
    %cst_96 = arith.constant dense<0.000000e+00> : vector<3x8xf32>
    %292 = vector.multi_reduction <add>, %291, %cst_96 [2] : vector<3x8x8xf32> to vector<3x8xf32>
    %293 = vector.shape_cast %292 : vector<3x8xf32> to vector<3x8x1xf32>
    %294 = vector.broadcast %293 : vector<3x8x1xf32> to vector<3x8x8xf32>
    %295 = arith.divf %291, %294 : vector<3x8x8xf32>
    "tpu.trace_start"() <{level = 10 : i32, message = "slm,smd->sld"}> : () -> ()
    %cst_97 = arith.constant dense<0.000000e+00> : vector<3x8x8xf32>
    %296 = tpu.matmul %295, %280, %cst_97 {dimension_numbers = #tpu.dot_dimension_numbers<[2], [1], [1], [2], [0, 0, 0, 1, 1, 2], [0], [0]>} : vector<3x8x8xf32>, vector<3x8x8xf32>, vector<3x8x8xf32> -> vector<3x8x8xf32>
    "tpu.trace_stop"() : () -> ()
    %297 = vector.extract_strided_slice %256 {offsets = [0, 0, 16], sizes = [3, 8, 8], strides = [1, 1, 1]} : vector<3x8x32xf32> to vector<3x8x8xf32>
    %298 = vector.extract_strided_slice %257 {offsets = [0, 0, 16], sizes = [3, 8, 8], strides = [1, 1, 1]} : vector<3x8x32xf32> to vector<3x8x8xf32>
    %299 = vector.extract_strided_slice %258 {offsets = [0, 0, 16], sizes = [3, 8, 8], strides = [1, 1, 1]} : vector<3x8x32xf32> to vector<3x8x8xf32>
    "tpu.trace_start"() <{level = 10 : i32, message = "sld,smd->slm"}> : () -> ()
    %cst_98 = arith.constant dense<0.000000e+00> : vector<3x8x8xf32>
    %300 = tpu.matmul %297, %298, %cst_98 {dimension_numbers = #tpu.dot_dimension_numbers<[2], [2], [1], [1], [0, 0, 0, 1, 1, 1], [0], [0]>} : vector<3x8x8xf32>, vector<3x8x8xf32>, vector<3x8x8xf32> -> vector<3x8x8xf32>
    "tpu.trace_stop"() : () -> ()
    %cst_99 = arith.constant 0.353553385 : f32
    %301 = vector.broadcast %cst_99 : f32 to vector<3x8x8xf32>
    %302 = arith.mulf %300, %301 : vector<3x8x8xf32>
    %303 = vector.shape_cast %6 : vector<8x8xf32> to vector<1x8x8xf32>
    %304 = vector.broadcast %303 : vector<1x8x8xf32> to vector<3x8x8xf32>
    %305 = arith.addf %302, %304 : vector<3x8x8xf32>
    %cst_100 = arith.constant dense<0xFF800000> : vector<3x8xf32>
    %306 = vector.multi_reduction <maximumf>, %305, %cst_100 [2] : vector<3x8x8xf32> to vector<3x8xf32>
    %307 = vector.shape_cast %306 : vector<3x8xf32> to vector<3x8x1xf32>
    %308 = vector.broadcast %307 : vector<3x8x1xf32> to vector<3x8x8xf32>
    %309 = arith.subf %305, %308 : vector<3x8x8xf32>
    %310 = math.exp %309 : vector<3x8x8xf32>
    %cst_101 = arith.constant dense<0.000000e+00> : vector<3x8xf32>
    %311 = vector.multi_reduction <add>, %310, %cst_101 [2] : vector<3x8x8xf32> to vector<3x8xf32>
    %312 = vector.shape_cast %311 : vector<3x8xf32> to vector<3x8x1xf32>
    %313 = vector.broadcast %312 : vector<3x8x1xf32> to vector<3x8x8xf32>
    %314 = arith.divf %310, %313 : vector<3x8x8xf32>
    "tpu.trace_start"() <{level = 10 : i32, message = "slm,smd->sld"}> : () -> ()
    %cst_102 = arith.constant dense<0.000000e+00> : vector<3x8x8xf32>
    %315 = tpu.matmul %314, %299, %cst_102 {dimension_numbers = #tpu.dot_dimension_numbers<[2], [1], [1], [2], [0, 0, 0, 1, 1, 2], [0], [0]>} : vector<3x8x8xf32>, vector<3x8x8xf32>, vector<3x8x8xf32> -> vector<3x8x8xf32>
    "tpu.trace_stop"() : () -> ()
    %316 = vector.extract_strided_slice %256 {offsets = [0, 0, 24], sizes = [3, 8, 8], strides = [1, 1, 1]} : vector<3x8x32xf32> to vector<3x8x8xf32>
    %317 = vector.extract_strided_slice %257 {offsets = [0, 0, 24], sizes = [3, 8, 8], strides = [1, 1, 1]} : vector<3x8x32xf32> to vector<3x8x8xf32>
    %318 = vector.extract_strided_slice %258 {offsets = [0, 0, 24], sizes = [3, 8, 8], strides = [1, 1, 1]} : vector<3x8x32xf32> to vector<3x8x8xf32>
    "tpu.trace_start"() <{level = 10 : i32, message = "sld,smd->slm"}> : () -> ()
    %cst_103 = arith.constant dense<0.000000e+00> : vector<3x8x8xf32>
    %319 = tpu.matmul %316, %317, %cst_103 {dimension_numbers = #tpu.dot_dimension_numbers<[2], [2], [1], [1], [0, 0, 0, 1, 1, 1], [0], [0]>} : vector<3x8x8xf32>, vector<3x8x8xf32>, vector<3x8x8xf32> -> vector<3x8x8xf32>
    "tpu.trace_stop"() : () -> ()
    %cst_104 = arith.constant 0.353553385 : f32
    %320 = vector.broadcast %cst_104 : f32 to vector<3x8x8xf32>
    %321 = arith.mulf %319, %320 : vector<3x8x8xf32>
    %322 = vector.shape_cast %6 : vector<8x8xf32> to vector<1x8x8xf32>
    %323 = vector.broadcast %322 : vector<1x8x8xf32> to vector<3x8x8xf32>
    %324 = arith.addf %321, %323 : vector<3x8x8xf32>
    %cst_105 = arith.constant dense<0xFF800000> : vector<3x8xf32>
    %325 = vector.multi_reduction <maximumf>, %324, %cst_105 [2] : vector<3x8x8xf32> to vector<3x8xf32>
    %326 = vector.shape_cast %325 : vector<3x8xf32> to vector<3x8x1xf32>
    %327 = vector.broadcast %326 : vector<3x8x1xf32> to vector<3x8x8xf32>
    %328 = arith.subf %324, %327 : vector<3x8x8xf32>
    %329 = math.exp %328 : vector<3x8x8xf32>
    %cst_106 = arith.constant dense<0.000000e+00> : vector<3x8xf32>
    %330 = vector.multi_reduction <add>, %329, %cst_106 [2] : vector<3x8x8xf32> to vector<3x8xf32>
    %331 = vector.shape_cast %330 : vector<3x8xf32> to vector<3x8x1xf32>
    %332 = vector.broadcast %331 : vector<3x8x1xf32> to vector<3x8x8xf32>
    %333 = arith.divf %329, %332 : vector<3x8x8xf32>
    "tpu.trace_start"() <{level = 10 : i32, message = "slm,smd->sld"}> : () -> ()
    %cst_107 = arith.constant dense<0.000000e+00> : vector<3x8x8xf32>
    %334 = tpu.matmul %333, %318, %cst_107 {dimension_numbers = #tpu.dot_dimension_numbers<[2], [1], [1], [2], [0, 0, 0, 1, 1, 2], [0], [0]>} : vector<3x8x8xf32>, vector<3x8x8xf32>, vector<3x8x8xf32> -> vector<3x8x8xf32>
    "tpu.trace_stop"() : () -> ()
    %335 = tpu.concatenate %277, %296, %315, %334 in 2 : vector<3x8x8xf32>, vector<3x8x8xf32>, vector<3x8x8xf32>, vector<3x8x8xf32> -> vector<3x8x32xf32>
    %336 = vector.shape_cast %335 : vector<3x8x32xf32> to vector<24x32xf32>
    %c1_108 = arith.constant 1 : index
    %c3_109 = arith.constant 3 : index
    %c0_110 = arith.constant 0 : index
    %c0_111 = arith.constant 0 : index
    %337 = vector.load %arg4[%c1_108, %c3_109, %c0_110, %c0_111] : memref<2x4x32x32xf32, #tpu.memory_space<vmem>>, vector<1x1x32x32xf32>
    %338 = vector.shape_cast %337 : vector<1x1x32x32xf32> to vector<32x32xf32>
    %cst_112 = arith.constant dense<0.000000e+00> : vector<24x32xf32>
    %339 = tpu.matmul %336, %338, %cst_112 {dimension_numbers = #tpu.dot_dimension_numbers<[1], [0], [0], [1], [0, 0, 1, 1], [], []>} : vector<24x32xf32>, vector<32x32xf32>, vector<24x32xf32> -> vector<24x32xf32>
    %340 = vector.broadcast %213 : vector<1x32xf32> to vector<24x32xf32>
    %341 = arith.addf %339, %340 : vector<24x32xf32>
    %342 = arith.addf %205, %341 : vector<24x32xf32>
    %cst_113 = arith.constant dense<0.000000e+00> : vector<24xf32>
    %343 = vector.multi_reduction <add>, %342, %cst_113 [1] : vector<24x32xf32> to vector<24xf32>
    %344 = vector.shape_cast %343 : vector<24xf32> to vector<24x1xf32>
    %cst_114 = arith.constant 3.200000e+01 : f32
    %345 = vector.broadcast %cst_114 : f32 to vector<24x1xf32>
    %346 = arith.divf %344, %345 : vector<24x1xf32>
    %347 = vector.broadcast %346 : vector<24x1xf32> to vector<24x32xf32>
    %348 = arith.subf %342, %347 : vector<24x32xf32>
    %349 = arith.mulf %348, %348 : vector<24x32xf32>
    %cst_115 = arith.constant dense<0.000000e+00> : vector<24xf32>
    %350 = vector.multi_reduction <add>, %349, %cst_115 [1] : vector<24x32xf32> to vector<24xf32>
    %351 = vector.shape_cast %350 : vector<24xf32> to vector<24x1xf32>
    %cst_116 = arith.constant 3.200000e+01 : f32
    %352 = vector.broadcast %cst_116 : f32 to vector<24x1xf32>
    %353 = arith.divf %351, %352 : vector<24x1xf32>
    %354 = vector.broadcast %346 : vector<24x1xf32> to vector<24x32xf32>
    %355 = arith.subf %342, %354 : vector<24x32xf32>
    %cst_117 = arith.constant 9.99999974E-6 : f32
    %356 = vector.broadcast %cst_117 : f32 to vector<24x1xf32>
    %357 = arith.addf %353, %356 : vector<24x1xf32>
    %358 = math.rsqrt %357 : vector<24x1xf32>
    %359 = vector.broadcast %358 : vector<24x1xf32> to vector<24x32xf32>
    %360 = arith.mulf %355, %359 : vector<24x32xf32>
    %361 = vector.broadcast %210 : vector<1x32xf32> to vector<24x32xf32>
    %362 = arith.mulf %360, %361 : vector<24x32xf32>
    %363 = vector.broadcast %211 : vector<1x32xf32> to vector<24x32xf32>
    %364 = arith.addf %362, %363 : vector<24x32xf32>
    %c1_118 = arith.constant 1 : index
    %c0_119 = arith.constant 0 : index
    %c0_120 = arith.constant 0 : index
    %365 = vector.load %arg5[%c1_118, %c0_119, %c0_120] : memref<2x32x128xf32, #tpu.memory_space<vmem>>, vector<1x32x128xf32>
    %366 = vector.shape_cast %365 : vector<1x32x128xf32> to vector<32x128xf32>
    %cst_121 = arith.constant dense<0.000000e+00> : vector<24x128xf32>
    %367 = tpu.matmul %364, %366, %cst_121 {dimension_numbers = #tpu.dot_dimension_numbers<[1], [0], [0], [1], [0, 0, 1, 1], [], []>} : vector<24x32xf32>, vector<32x128xf32>, vector<24x128xf32> -> vector<24x128xf32>
    %368 = vector.broadcast %214 : vector<1x128xf32> to vector<24x128xf32>
    %369 = arith.addf %367, %368 : vector<24x128xf32>
    %cst_122 = arith.constant 1.702000e+00 : f32
    %370 = vector.broadcast %cst_122 : f32 to vector<24x128xf32>
    %371 = arith.mulf %370, %369 : vector<24x128xf32>
    %372 = arith.negf %371 : vector<24x128xf32>
    %373 = math.exp %372 : vector<24x128xf32>
    %cst_123 = arith.constant 1.000000e+00 : f32
    %374 = vector.broadcast %cst_123 : f32 to vector<24x128xf32>
    %375 = arith.addf %374, %373 : vector<24x128xf32>
    %376 = arith.divf %374, %375 : vector<24x128xf32>
    %377 = arith.mulf %369, %376 : vector<24x128xf32>
    %c1_124 = arith.constant 1 : index
    %c0_125 = arith.constant 0 : index
    %c0_126 = arith.constant 0 : index
    %378 = vector.load %arg6[%c1_124, %c0_125, %c0_126] : memref<2x128x32xf32, #tpu.memory_space<vmem>>, vector<1x128x32xf32>
    %379 = vector.shape_cast %378 : vector<1x128x32xf32> to vector<128x32xf32>
    %cst_127 = arith.constant dense<0.000000e+00> : vector<24x32xf32>
    %380 = tpu.matmul %377, %379, %cst_127 {dimension_numbers = #tpu.dot_dimension_numbers<[1], [0], [0], [1], [0, 0, 1, 1], [], []>} : vector<24x128xf32>, vector<128x32xf32>, vector<24x32xf32> -> vector<24x32xf32>
    %381 = vector.broadcast %215 : vector<1x32xf32> to vector<24x32xf32>
    %382 = arith.addf %380, %381 : vector<24x32xf32>
    %383 = arith.addf %342, %382 : vector<24x32xf32>
    %c0_128 = arith.constant 0 : index
    %c0_129 = arith.constant 0 : index
    %384 = vector.load %arg23[%c0_128, %c0_129] : memref<24x32xf32, #tpu.memory_space<vmem>>, vector<24x32xf32>
    tpu.vector_store %arg23[%c0_128, %c0_129], %383 {strides = array<i32>} : memref<24x32xf32, #tpu.memory_space<vmem>>, vector<24x32xf32>,
    %c0_130 = arith.constant 0 : index
    %385 = memref.load %arg0[%c0_130] : memref<3xi32, #tpu.memory_space<smem>>
    %386 = arith.index_cast %385 : i32 to index
    %c0_131 = arith.constant 0 : index
    %387 = vector.load %arg23[%386, %c0_131] : memref<24x32xf32, #tpu.memory_space<vmem>>, vector<1x32xf32>
    %c1_132 = arith.constant 1 : index
    %388 = memref.load %arg0[%c1_132] : memref<3xi32, #tpu.memory_space<smem>>
    %389 = arith.index_cast %388 : i32 to index
    %c0_133 = arith.constant 0 : index
    %390 = vector.load %arg23[%389, %c0_133] : memref<24x32xf32, #tpu.memory_space<vmem>>, vector<1x32xf32>
    %c2_134 = arith.constant 2 : index
    %391 = memref.load %arg0[%c2_134] : memref<3xi32, #tpu.memory_space<smem>>
    %392 = arith.index_cast %391 : i32 to index
    %c0_135 = arith.constant 0 : index
    %393 = vector.load %arg23[%392, %c0_135] : memref<24x32xf32, #tpu.memory_space<vmem>>, vector<1x32xf32>
    %394 = tpu.concatenate %387, %390, %393 in 0 : vector<1x32xf32>, vector<1x32xf32>, vector<1x32xf32> -> vector<3x32xf32>
    %c0_136 = arith.constant 0 : index
    %c0_137 = arith.constant 0 : index
    %395 = vector.load %arg8[%c0_136, %c0_137] : memref<2x32xf32, #tpu.memory_space<vmem>>, vector<1x32xf32>
    %c1_138 = arith.constant 1 : index
    %c0_139 = arith.constant 0 : index
    %396 = vector.load %arg8[%c1_138, %c0_139] : memref<2x32xf32, #tpu.memory_space<vmem>>, vector<1x32xf32>
    %cst_140 = arith.constant dense<0.000000e+00> : vector<3xf32>
    %397 = vector.multi_reduction <add>, %394, %cst_140 [1] : vector<3x32xf32> to vector<3xf32>
    %398 = vector.shape_cast %397 : vector<3xf32> to vector<3x1xf32>
    %cst_141 = arith.constant 3.200000e+01 : f32
    %399 = vector.broadcast %cst_141 : f32 to vector<3x1xf32>
    %400 = arith.divf %398, %399 : vector<3x1xf32>
    %401 = vector.broadcast %400 : vector<3x1xf32> to vector<3x32xf32>
    %402 = arith.subf %394, %401 : vector<3x32xf32>
    %403 = arith.mulf %402, %402 : vector<3x32xf32>
    %cst_142 = arith.constant dense<0.000000e+00> : vector<3xf32>
    %404 = vector.multi_reduction <add>, %403, %cst_142 [1] : vector<3x32xf32> to vector<3xf32>
    %405 = vector.shape_cast %404 : vector<3xf32> to vector<3x1xf32>
    %cst_143 = arith.constant 3.200000e+01 : f32
    %406 = vector.broadcast %cst_143 : f32 to vector<3x1xf32>
    %407 = arith.divf %405, %406 : vector<3x1xf32>
    %408 = vector.broadcast %400 : vector<3x1xf32> to vector<3x32xf32>
    %409 = arith.subf %394, %408 : vector<3x32xf32>
    %cst_144 = arith.constant 9.99999974E-6 : f32
    %410 = vector.broadcast %cst_144 : f32 to vector<3x1xf32>
    %411 = arith.addf %407, %410 : vector<3x1xf32>
    %412 = math.rsqrt %411 : vector<3x1xf32>
    %413 = vector.broadcast %412 : vector<3x1xf32> to vector<3x32xf32>
    %414 = arith.mulf %409, %413 : vector<3x32xf32>
    %415 = vector.broadcast %395 : vector<1x32xf32> to vector<3x32xf32>
    %416 = arith.mulf %414, %415 : vector<3x32xf32>
    %417 = vector.broadcast %396 : vector<1x32xf32> to vector<3x32xf32>
    %418 = arith.addf %416, %417 : vector<3x32xf32>
    %c0_145 = arith.constant 0 : index
    %c0_146 = arith.constant 0 : index
    %419 = vector.load %arg9[%c0_145, %c0_146] : memref<32x16xf32, #tpu.memory_space<vmem>>, vector<32x16xf32>
    %cst_147 = arith.constant dense<0.000000e+00> : vector<3x16xf32>
    %420 = tpu.matmul %418, %419, %cst_147 {dimension_numbers = #tpu.dot_dimension_numbers<[1], [0], [0], [1], [0, 0, 1, 1], [], []>} : vector<3x32xf32>, vector<32x16xf32>, vector<3x16xf32> -> vector<3x16xf32>
    %c0_148 = arith.constant 0 : index
    %c0_149 = arith.constant 0 : index
    %421 = vector.load %arg13[%c0_148, %c0_149] : memref<2x32xf32, #tpu.memory_space<vmem>>, vector<2x32xf32>
    %c0_150 = arith.constant 0 : index
    %c0_151 = arith.constant 0 : index
    %c0_152 = arith.constant 0 : index
    %422 = vector.load %arg14[%c0_150, %c0_151, %c0_152] : memref<2x32x32xf32, #tpu.memory_space<vmem>>, vector<1x32x32xf32>
    %423 = vector.shape_cast %422 : vector<1x32x32xf32> to vector<32x32xf32>
    %cst_153 = arith.constant dense<0.000000e+00> : vector<2x32xf32>
    %424 = tpu.matmul %421, %423, %cst_153 {dimension_numbers = #tpu.dot_dimension_numbers<[1], [0], [0], [1], [0, 0, 1, 1], [], []>} : vector<2x32xf32>, vector<32x32xf32>, vector<2x32xf32> -> vector<2x32xf32>
    %c0_154 = arith.constant 0 : index
    %c0_155 = arith.constant 0 : index
    %425 = vector.load %arg15[%c0_154, %c0_155] : memref<2x32xf32, #tpu.memory_space<vmem>>, vector<1x32xf32>
    %426 = vector.broadcast %425 : vector<1x32xf32> to vector<2x32xf32>
    %427 = arith.addf %424, %426 : vector<2x32xf32>
    %c0_156 = arith.constant 0 : index
    %c0_157 = arith.constant 0 : index
    %c0_158 = arith.constant 0 : index
    %428 = vector.load %arg3[%c0_156, %c0_157, %c0_158] : memref<1x2x32xf32, #tpu.memory_space<vmem>>, vector<1x2x32xf32>
    %429 = vector.shape_cast %428 : vector<1x2x32xf32> to vector<2x32xf32>
    %c1_159 = arith.constant 1 : index
    %c0_160 = arith.constant 0 : index
    %c0_161 = arith.constant 0 : index
    %430 = vector.load %arg14[%c1_159, %c0_160, %c0_161] : memref<2x32x32xf32, #tpu.memory_space<vmem>>, vector<1x32x32xf32>
    %431 = vector.shape_cast %430 : vector<1x32x32xf32> to vector<32x32xf32>
    %cst_162 = arith.constant dense<0.000000e+00> : vector<2x32xf32>
    %432 = tpu.matmul %429, %431, %cst_162 {dimension_numbers = #tpu.dot_dimension_numbers<[1], [0], [0], [1], [0, 0, 1, 1], [], []>} : vector<2x32xf32>, vector<32x32xf32>, vector<2x32xf32> -> vector<2x32xf32>
    %c1_163 = arith.constant 1 : index
    %c0_164 = arith.constant 0 : index
    %433 = vector.load %arg15[%c1_163, %c0_164] : memref<2x32xf32, #tpu.memory_space<vmem>>, vector<1x32xf32>
    %434 = vector.broadcast %433 : vector<1x32xf32> to vector<2x32xf32>
    %435 = arith.addf %432, %434 : vector<2x32xf32>
    %c0_165 = arith.constant 0 : index
    %c0_166 = arith.constant 0 : index
    %436 = vector.load %arg11[%c0_165, %c0_166] : memref<192x32xf32, #tpu.memory_space<vmem>>, vector<192x32xf32>
    %c0_167 = arith.constant 0 : index
    %c0_168 = arith.constant 0 : index
    %437 = vector.load %arg12[%c0_167, %c0_168] : memref<5x32xf32, #tpu.memory_space<vmem>>, vector<5x32xf32>
    %cst_169 = arith.constant 0.000000e+00 : f32
    %438 = vector.broadcast %cst_169 : f32 to vector<1x32xf32>
    %c0_170 = arith.constant 0 : index
    %c0_171 = arith.constant 0 : index
    %c0_172 = arith.constant 0 : index
    %439 = vector.load %arg10[%c0_170, %c0_171, %c0_172] : memref<2x4x192xf32, #tpu.memory_space<vmem>>, vector<1x4x192xf32>
    %440 = vector.shape_cast %439 : vector<1x4x192xf32> to vector<4x192xf32>
    %cst_173 = arith.constant dense<0.000000e+00> : vector<4x32xf32>
    %441 = tpu.matmul %440, %436, %cst_173 {dimension_numbers = #tpu.dot_dimension_numbers<[1], [0], [0], [1], [0, 0, 1, 1], [], []>} : vector<4x192xf32>, vector<192x32xf32>, vector<4x32xf32> -> vector<4x32xf32>
    %442 = vector.extract_strided_slice %437 {offsets = [0, 0], sizes = [1, 32], strides = [1, 1]} : vector<5x32xf32> to vector<1x32xf32>
    %443 = vector.extract_strided_slice %437 {offsets = [1, 0], sizes = [4, 32], strides = [1, 1]} : vector<5x32xf32> to vector<4x32xf32>
    %444 = arith.addf %441, %443 : vector<4x32xf32>
    %445 = tpu.concatenate %442, %444, %427, %438 in 0 : vector<1x32xf32>, vector<4x32xf32>, vector<2x32xf32>, vector<1x32xf32> -> vector<8x32xf32>
    %c1_174 = arith.constant 1 : index
    %c0_175 = arith.constant 0 : index
    %c0_176 = arith.constant 0 : index
    %446 = vector.load %arg10[%c1_174, %c0_175, %c0_176] : memref<2x4x192xf32, #tpu.memory_space<vmem>>, vector<1x4x192xf32>
    %447 = vector.shape_cast %446 : vector<1x4x192xf32> to vector<4x192xf32>
    %cst_177 = arith.constant dense<0.000000e+00> : vector<4x32xf32>
    %448 = tpu.matmul %447, %436, %cst_177 {dimension_numbers = #tpu.dot_dimension_numbers<[1], [0], [0], [1], [0, 0, 1, 1], [], []>} : vector<4x192xf32>, vector<192x32xf32>, vector<4x32xf32> -> vector<4x32xf32>
    %449 = vector.extract_strided_slice %437 {offsets = [0, 0], sizes = [1, 32], strides = [1, 1]} : vector<5x32xf32> to vector<1x32xf32>
    %450 = vector.extract_strided_slice %437 {offsets = [1, 0], sizes = [4, 32], strides = [1, 1]} : vector<5x32xf32> to vector<4x32xf32>
    %451 = arith.addf %448, %450 : vector<4x32xf32>
    %452 = tpu.concatenate %449, %451, %427, %438 in 0 : vector<1x32xf32>, vector<4x32xf32>, vector<2x32xf32>, vector<1x32xf32> -> vector<8x32xf32>
    %453 = tpu.concatenate %445, %452 in 0 : vector<8x32xf32>, vector<8x32xf32> -> vector<16x32xf32>
    %c0_178 = arith.constant 0 : index
    %c0_179 = arith.constant 0 : index
    %454 = vector.load %arg20[%c0_178, %c0_179] : memref<4x32xf32, #tpu.memory_space<vmem>>, vector<1x32xf32>
    %c1_180 = arith.constant 1 : index
    %c0_181 = arith.constant 0 : index
    %455 = vector.load %arg20[%c1_180, %c0_181] : memref<4x32xf32, #tpu.memory_space<vmem>>, vector<1x32xf32>
    %cst_182 = arith.constant dense<0.000000e+00> : vector<16xf32>
    %456 = vector.multi_reduction <add>, %453, %cst_182 [1] : vector<16x32xf32> to vector<16xf32>
    %457 = vector.shape_cast %456 : vector<16xf32> to vector<16x1xf32>
    %cst_183 = arith.constant 3.200000e+01 : f32
    %458 = vector.broadcast %cst_183 : f32 to vector<16x1xf32>
    %459 = arith.divf %457, %458 : vector<16x1xf32>
    %460 = vector.broadcast %459 : vector<16x1xf32> to vector<16x32xf32>
    %461 = arith.subf %453, %460 : vector<16x32xf32>
    %462 = arith.mulf %461, %461 : vector<16x32xf32>
    %cst_184 = arith.constant dense<0.000000e+00> : vector<16xf32>
    %463 = vector.multi_reduction <add>, %462, %cst_184 [1] : vector<16x32xf32> to vector<16xf32>
    %464 = vector.shape_cast %463 : vector<16xf32> to vector<16x1xf32>
    %cst_185 = arith.constant 3.200000e+01 : f32
    %465 = vector.broadcast %cst_185 : f32 to vector<16x1xf32>
    %466 = arith.divf %464, %465 : vector<16x1xf32>
    %467 = vector.broadcast %459 : vector<16x1xf32> to vector<16x32xf32>
    %468 = arith.subf %453, %467 : vector<16x32xf32>
    %cst_186 = arith.constant 9.99999974E-6 : f32
    %469 = vector.broadcast %cst_186 : f32 to vector<16x1xf32>
    %470 = arith.addf %466, %469 : vector<16x1xf32>
    %471 = math.rsqrt %470 : vector<16x1xf32>
    %472 = vector.broadcast %471 : vector<16x1xf32> to vector<16x32xf32>
    %473 = arith.mulf %468, %472 : vector<16x32xf32>
    %474 = vector.broadcast %454 : vector<1x32xf32> to vector<16x32xf32>
    %475 = arith.mulf %473, %474 : vector<16x32xf32>
    %476 = vector.broadcast %455 : vector<1x32xf32> to vector<16x32xf32>
    %477 = arith.addf %475, %476 : vector<16x32xf32>
    %478 = tpu.iota {dimensions = array<i32: 1>} : vector<8x8xi32>
    %c7_i32_187 = arith.constant 7 : i32
    %479 = vector.broadcast %c7_i32_187 : i32 to vector<8x8xi32>
    %480 = arith.cmpi slt, %478, %479 : vector<8x8xi32>
    %cst_188 = arith.constant 0.000000e+00 : f32
    %cst_189 = arith.constant -1.000000e+30 : f32
    %481 = vector.broadcast %cst_188 : f32 to vector<8x8xf32>
    %482 = vector.broadcast %cst_189 : f32 to vector<8x8xf32>
    %483 = arith.select %480, %481, %482 : vector<8x8xi1>, vector<8x8xf32>
    %c0_190 = arith.constant 0 : index
    %c0_191 = arith.constant 0 : index
    %c0_192 = arith.constant 0 : index
    %484 = vector.load %arg19[%c0_190, %c0_191, %c0_192] : memref<2x8x128xf32, #tpu.memory_space<vmem>>, vector<1x8x128xf32>
    %485 = vector.shape_cast %484 : vector<1x8x128xf32> to vector<8x128xf32>
    %486 = vector.extract_strided_slice %485 {offsets = [0, 0], sizes = [1, 32], strides = [1, 1]} : vector<8x128xf32> to vector<1x32xf32>
    %487 = vector.extract_strided_slice %485 {offsets = [1, 0], sizes = [1, 32], strides = [1, 1]} : vector<8x128xf32> to vector<1x32xf32>
    %488 = vector.extract_strided_slice %485 {offsets = [2, 0], sizes = [1, 32], strides = [1, 1]} : vector<8x128xf32> to vector<1x32xf32>
    %489 = vector.extract_strided_slice %485 {offsets = [3, 0], sizes = [1, 32], strides = [1, 1]} : vector<8x128xf32> to vector<1x32xf32>
    %490 = vector.extract_strided_slice %485 {offsets = [4, 0], sizes = [1, 96], strides = [1, 1]} : vector<8x128xf32> to vector<1x96xf32>
    %491 = vector.extract_strided_slice %485 {offsets = [5, 0], sizes = [1, 32], strides = [1, 1]} : vector<8x128xf32> to vector<1x32xf32>
    %492 = vector.extract_strided_slice %485 {offsets = [6, 0], sizes = [1, 128], strides = [1, 1]} : vector<8x128xf32> to vector<1x128xf32>
    %493 = vector.extract_strided_slice %485 {offsets = [7, 0], sizes = [1, 32], strides = [1, 1]} : vector<8x128xf32> to vector<1x32xf32>
    %cst_193 = arith.constant dense<0.000000e+00> : vector<16xf32>
    %494 = vector.multi_reduction <add>, %477, %cst_193 [1] : vector<16x32xf32> to vector<16xf32>
    %495 = vector.shape_cast %494 : vector<16xf32> to vector<16x1xf32>
    %cst_194 = arith.constant 3.200000e+01 : f32
    %496 = vector.broadcast %cst_194 : f32 to vector<16x1xf32>
    %497 = arith.divf %495, %496 : vector<16x1xf32>
    %498 = vector.broadcast %497 : vector<16x1xf32> to vector<16x32xf32>
    %499 = arith.subf %477, %498 : vector<16x32xf32>
    %500 = arith.mulf %499, %499 : vector<16x32xf32>
    %cst_195 = arith.constant dense<0.000000e+00> : vector<16xf32>
    %501 = vector.multi_reduction <add>, %500, %cst_195 [1] : vector<16x32xf32> to vector<16xf32>
    %502 = vector.shape_cast %501 : vector<16xf32> to vector<16x1xf32>
    %cst_196 = arith.constant 3.200000e+01 : f32
    %503 = vector.broadcast %cst_196 : f32 to vector<16x1xf32>
    %504 = arith.divf %502, %503 : vector<16x1xf32>
    %505 = vector.broadcast %497 : vector<16x1xf32> to vector<16x32xf32>
    %506 = arith.subf %477, %505 : vector<16x32xf32>
    %cst_197 = arith.constant 9.99999974E-6 : f32
    %507 = vector.broadcast %cst_197 : f32 to vector<16x1xf32>
    %508 = arith.addf %504, %507 : vector<16x1xf32>
    %509 = math.rsqrt %508 : vector<16x1xf32>
    %510 = vector.broadcast %509 : vector<16x1xf32> to vector<16x32xf32>
    %511 = arith.mulf %506, %510 : vector<16x32xf32>
    %512 = vector.broadcast %486 : vector<1x32xf32> to vector<16x32xf32>
    %513 = arith.mulf %511, %512 : vector<16x32xf32>
    %514 = vector.broadcast %487 : vector<1x32xf32> to vector<16x32xf32>
    %515 = arith.addf %513, %514 : vector<16x32xf32>
    %c0_198 = arith.constant 0 : index
    %c0_199 = arith.constant 0 : index
    %c0_200 = arith.constant 0 : index
    %c0_201 = arith.constant 0 : index
    %516 = vector.load %arg16[%c0_198, %c0_199, %c0_200, %c0_201] : memref<2x4x32x32xf32, #tpu.memory_space<vmem>>, vector<1x1x32x32xf32>
    %517 = vector.shape_cast %516 : vector<1x1x32x32xf32> to vector<32x32xf32>
    %cst_202 = arith.constant dense<0.000000e+00> : vector<16x32xf32>
    %518 = tpu.matmul %515, %517, %cst_202 {dimension_numbers = #tpu.dot_dimension_numbers<[1], [0], [0], [1], [0, 0, 1, 1], [], []>} : vector<16x32xf32>, vector<32x32xf32>, vector<16x32xf32> -> vector<16x32xf32>
    %519 = vector.extract_strided_slice %490 {offsets = [0, 0], sizes = [1, 32], strides = [1, 1]} : vector<1x96xf32> to vector<1x32xf32>
    %520 = vector.broadcast %519 : vector<1x32xf32> to vector<16x32xf32>
    %521 = arith.addf %518, %520 : vector<16x32xf32>
    %c0_203 = arith.constant 0 : index
    %c1_204 = arith.constant 1 : index
    %c0_205 = arith.constant 0 : index
    %c0_206 = arith.constant 0 : index
    %522 = vector.load %arg16[%c0_203, %c1_204, %c0_205, %c0_206] : memref<2x4x32x32xf32, #tpu.memory_space<vmem>>, vector<1x1x32x32xf32>
    %523 = vector.shape_cast %522 : vector<1x1x32x32xf32> to vector<32x32xf32>
    %cst_207 = arith.constant dense<0.000000e+00> : vector<16x32xf32>
    %524 = tpu.matmul %515, %523, %cst_207 {dimension_numbers = #tpu.dot_dimension_numbers<[1], [0], [0], [1], [0, 0, 1, 1], [], []>} : vector<16x32xf32>, vector<32x32xf32>, vector<16x32xf32> -> vector<16x32xf32>
    %525 = vector.extract_strided_slice %490 {offsets = [0, 32], sizes = [1, 32], strides = [1, 1]} : vector<1x96xf32> to vector<1x32xf32>
    %526 = vector.broadcast %525 : vector<1x32xf32> to vector<16x32xf32>
    %527 = arith.addf %524, %526 : vector<16x32xf32>
    %c0_208 = arith.constant 0 : index
    %c2_209 = arith.constant 2 : index
    %c0_210 = arith.constant 0 : index
    %c0_211 = arith.constant 0 : index
    %528 = vector.load %arg16[%c0_208, %c2_209, %c0_210, %c0_211] : memref<2x4x32x32xf32, #tpu.memory_space<vmem>>, vector<1x1x32x32xf32>
    %529 = vector.shape_cast %528 : vector<1x1x32x32xf32> to vector<32x32xf32>
    %cst_212 = arith.constant dense<0.000000e+00> : vector<16x32xf32>
    %530 = tpu.matmul %515, %529, %cst_212 {dimension_numbers = #tpu.dot_dimension_numbers<[1], [0], [0], [1], [0, 0, 1, 1], [], []>} : vector<16x32xf32>, vector<32x32xf32>, vector<16x32xf32> -> vector<16x32xf32>
    %531 = vector.extract_strided_slice %490 {offsets = [0, 64], sizes = [1, 32], strides = [1, 1]} : vector<1x96xf32> to vector<1x32xf32>
    %532 = vector.broadcast %531 : vector<1x32xf32> to vector<16x32xf32>
    %533 = arith.addf %530, %532 : vector<16x32xf32>
    %534 = vector.shape_cast %521 : vector<16x32xf32> to vector<2x8x32xf32>
    %535 = vector.shape_cast %527 : vector<16x32xf32> to vector<2x8x32xf32>
    %536 = vector.shape_cast %533 : vector<16x32xf32> to vector<2x8x32xf32>
    %537 = vector.extract_strided_slice %534 {offsets = [0, 0, 0], sizes = [2, 8, 8], strides = [1, 1, 1]} : vector<2x8x32xf32> to vector<2x8x8xf32>
    %538 = vector.extract_strided_slice %535 {offsets = [0, 0, 0], sizes = [2, 8, 8], strides = [1, 1, 1]} : vector<2x8x32xf32> to vector<2x8x8xf32>
    %539 = vector.extract_strided_slice %536 {offsets = [0, 0, 0], sizes = [2, 8, 8], strides = [1, 1, 1]} : vector<2x8x32xf32> to vector<2x8x8xf32>
    "tpu.trace_start"() <{level = 10 : i32, message = "sld,smd->slm"}> : () -> ()
    %cst_213 = arith.constant dense<0.000000e+00> : vector<2x8x8xf32>
    %540 = tpu.matmul %537, %538, %cst_213 {dimension_numbers = #tpu.dot_dimension_numbers<[2], [2], [1], [1], [0, 0, 0, 1, 1, 1], [0], [0]>} : vector<2x8x8xf32>, vector<2x8x8xf32>, vector<2x8x8xf32> -> vector<2x8x8xf32>
    "tpu.trace_stop"() : () -> ()
    %cst_214 = arith.constant 0.353553385 : f32
    %541 = vector.broadcast %cst_214 : f32 to vector<2x8x8xf32>
    %542 = arith.mulf %540, %541 : vector<2x8x8xf32>
    %543 = vector.shape_cast %483 : vector<8x8xf32> to vector<1x8x8xf32>
    %544 = vector.broadcast %543 : vector<1x8x8xf32> to vector<2x8x8xf32>
    %545 = arith.addf %542, %544 : vector<2x8x8xf32>
    %cst_215 = arith.constant dense<0xFF800000> : vector<2x8xf32>
    %546 = vector.multi_reduction <maximumf>, %545, %cst_215 [2] : vector<2x8x8xf32> to vector<2x8xf32>
    %547 = vector.shape_cast %546 : vector<2x8xf32> to vector<2x8x1xf32>
    %548 = vector.broadcast %547 : vector<2x8x1xf32> to vector<2x8x8xf32>
    %549 = arith.subf %545, %548 : vector<2x8x8xf32>
    %550 = math.exp %549 : vector<2x8x8xf32>
    %cst_216 = arith.constant dense<0.000000e+00> : vector<2x8xf32>
    %551 = vector.multi_reduction <add>, %550, %cst_216 [2] : vector<2x8x8xf32> to vector<2x8xf32>
    %552 = vector.shape_cast %551 : vector<2x8xf32> to vector<2x8x1xf32>
    %553 = vector.broadcast %552 : vector<2x8x1xf32> to vector<2x8x8xf32>
    %554 = arith.divf %550, %553 : vector<2x8x8xf32>
    "tpu.trace_start"() <{level = 10 : i32, message = "slm,smd->sld"}> : () -> ()
    %cst_217 = arith.constant dense<0.000000e+00> : vector<2x8x8xf32>
    %555 = tpu.matmul %554, %539, %cst_217 {dimension_numbers = #tpu.dot_dimension_numbers<[2], [1], [1], [2], [0, 0, 0, 1, 1, 2], [0], [0]>} : vector<2x8x8xf32>, vector<2x8x8xf32>, vector<2x8x8xf32> -> vector<2x8x8xf32>
    "tpu.trace_stop"() : () -> ()
    %556 = vector.extract_strided_slice %534 {offsets = [0, 0, 8], sizes = [2, 8, 8], strides = [1, 1, 1]} : vector<2x8x32xf32> to vector<2x8x8xf32>
    %557 = vector.extract_strided_slice %535 {offsets = [0, 0, 8], sizes = [2, 8, 8], strides = [1, 1, 1]} : vector<2x8x32xf32> to vector<2x8x8xf32>
    %558 = vector.extract_strided_slice %536 {offsets = [0, 0, 8], sizes = [2, 8, 8], strides = [1, 1, 1]} : vector<2x8x32xf32> to vector<2x8x8xf32>
    "tpu.trace_start"() <{level = 10 : i32, message = "sld,smd->slm"}> : () -> ()
    %cst_218 = arith.constant dense<0.000000e+00> : vector<2x8x8xf32>
    %559 = tpu.matmul %556, %557, %cst_218 {dimension_numbers = #tpu.dot_dimension_numbers<[2], [2], [1], [1], [0, 0, 0, 1, 1, 1], [0], [0]>} : vector<2x8x8xf32>, vector<2x8x8xf32>, vector<2x8x8xf32> -> vector<2x8x8xf32>
    "tpu.trace_stop"() : () -> ()
    %cst_219 = arith.constant 0.353553385 : f32
    %560 = vector.broadcast %cst_219 : f32 to vector<2x8x8xf32>
    %561 = arith.mulf %559, %560 : vector<2x8x8xf32>
    %562 = vector.shape_cast %483 : vector<8x8xf32> to vector<1x8x8xf32>
    %563 = vector.broadcast %562 : vector<1x8x8xf32> to vector<2x8x8xf32>
    %564 = arith.addf %561, %563 : vector<2x8x8xf32>
    %cst_220 = arith.constant dense<0xFF800000> : vector<2x8xf32>
    %565 = vector.multi_reduction <maximumf>, %564, %cst_220 [2] : vector<2x8x8xf32> to vector<2x8xf32>
    %566 = vector.shape_cast %565 : vector<2x8xf32> to vector<2x8x1xf32>
    %567 = vector.broadcast %566 : vector<2x8x1xf32> to vector<2x8x8xf32>
    %568 = arith.subf %564, %567 : vector<2x8x8xf32>
    %569 = math.exp %568 : vector<2x8x8xf32>
    %cst_221 = arith.constant dense<0.000000e+00> : vector<2x8xf32>
    %570 = vector.multi_reduction <add>, %569, %cst_221 [2] : vector<2x8x8xf32> to vector<2x8xf32>
    %571 = vector.shape_cast %570 : vector<2x8xf32> to vector<2x8x1xf32>
    %572 = vector.broadcast %571 : vector<2x8x1xf32> to vector<2x8x8xf32>
    %573 = arith.divf %569, %572 : vector<2x8x8xf32>
    "tpu.trace_start"() <{level = 10 : i32, message = "slm,smd->sld"}> : () -> ()
    %cst_222 = arith.constant dense<0.000000e+00> : vector<2x8x8xf32>
    %574 = tpu.matmul %573, %558, %cst_222 {dimension_numbers = #tpu.dot_dimension_numbers<[2], [1], [1], [2], [0, 0, 0, 1, 1, 2], [0], [0]>} : vector<2x8x8xf32>, vector<2x8x8xf32>, vector<2x8x8xf32> -> vector<2x8x8xf32>
    "tpu.trace_stop"() : () -> ()
    %575 = vector.extract_strided_slice %534 {offsets = [0, 0, 16], sizes = [2, 8, 8], strides = [1, 1, 1]} : vector<2x8x32xf32> to vector<2x8x8xf32>
    %576 = vector.extract_strided_slice %535 {offsets = [0, 0, 16], sizes = [2, 8, 8], strides = [1, 1, 1]} : vector<2x8x32xf32> to vector<2x8x8xf32>
    %577 = vector.extract_strided_slice %536 {offsets = [0, 0, 16], sizes = [2, 8, 8], strides = [1, 1, 1]} : vector<2x8x32xf32> to vector<2x8x8xf32>
    "tpu.trace_start"() <{level = 10 : i32, message = "sld,smd->slm"}> : () -> ()
    %cst_223 = arith.constant dense<0.000000e+00> : vector<2x8x8xf32>
    %578 = tpu.matmul %575, %576, %cst_223 {dimension_numbers = #tpu.dot_dimension_numbers<[2], [2], [1], [1], [0, 0, 0, 1, 1, 1], [0], [0]>} : vector<2x8x8xf32>, vector<2x8x8xf32>, vector<2x8x8xf32> -> vector<2x8x8xf32>
    "tpu.trace_stop"() : () -> ()
    %cst_224 = arith.constant 0.353553385 : f32
    %579 = vector.broadcast %cst_224 : f32 to vector<2x8x8xf32>
    %580 = arith.mulf %578, %579 : vector<2x8x8xf32>
    %581 = vector.shape_cast %483 : vector<8x8xf32> to vector<1x8x8xf32>
    %582 = vector.broadcast %581 : vector<1x8x8xf32> to vector<2x8x8xf32>
    %583 = arith.addf %580, %582 : vector<2x8x8xf32>
    %cst_225 = arith.constant dense<0xFF800000> : vector<2x8xf32>
    %584 = vector.multi_reduction <maximumf>, %583, %cst_225 [2] : vector<2x8x8xf32> to vector<2x8xf32>
    %585 = vector.shape_cast %584 : vector<2x8xf32> to vector<2x8x1xf32>
    %586 = vector.broadcast %585 : vector<2x8x1xf32> to vector<2x8x8xf32>
    %587 = arith.subf %583, %586 : vector<2x8x8xf32>
    %588 = math.exp %587 : vector<2x8x8xf32>
    %cst_226 = arith.constant dense<0.000000e+00> : vector<2x8xf32>
    %589 = vector.multi_reduction <add>, %588, %cst_226 [2] : vector<2x8x8xf32> to vector<2x8xf32>
    %590 = vector.shape_cast %589 : vector<2x8xf32> to vector<2x8x1xf32>
    %591 = vector.broadcast %590 : vector<2x8x1xf32> to vector<2x8x8xf32>
    %592 = arith.divf %588, %591 : vector<2x8x8xf32>
    "tpu.trace_start"() <{level = 10 : i32, message = "slm,smd->sld"}> : () -> ()
    %cst_227 = arith.constant dense<0.000000e+00> : vector<2x8x8xf32>
    %593 = tpu.matmul %592, %577, %cst_227 {dimension_numbers = #tpu.dot_dimension_numbers<[2], [1], [1], [2], [0, 0, 0, 1, 1, 2], [0], [0]>} : vector<2x8x8xf32>, vector<2x8x8xf32>, vector<2x8x8xf32> -> vector<2x8x8xf32>
    "tpu.trace_stop"() : () -> ()
    %594 = vector.extract_strided_slice %534 {offsets = [0, 0, 24], sizes = [2, 8, 8], strides = [1, 1, 1]} : vector<2x8x32xf32> to vector<2x8x8xf32>
    %595 = vector.extract_strided_slice %535 {offsets = [0, 0, 24], sizes = [2, 8, 8], strides = [1, 1, 1]} : vector<2x8x32xf32> to vector<2x8x8xf32>
    %596 = vector.extract_strided_slice %536 {offsets = [0, 0, 24], sizes = [2, 8, 8], strides = [1, 1, 1]} : vector<2x8x32xf32> to vector<2x8x8xf32>
    "tpu.trace_start"() <{level = 10 : i32, message = "sld,smd->slm"}> : () -> ()
    %cst_228 = arith.constant dense<0.000000e+00> : vector<2x8x8xf32>
    %597 = tpu.matmul %594, %595, %cst_228 {dimension_numbers = #tpu.dot_dimension_numbers<[2], [2], [1], [1], [0, 0, 0, 1, 1, 1], [0], [0]>} : vector<2x8x8xf32>, vector<2x8x8xf32>, vector<2x8x8xf32> -> vector<2x8x8xf32>
    "tpu.trace_stop"() : () -> ()
    %cst_229 = arith.constant 0.353553385 : f32
    %598 = vector.broadcast %cst_229 : f32 to vector<2x8x8xf32>
    %599 = arith.mulf %597, %598 : vector<2x8x8xf32>
    %600 = vector.shape_cast %483 : vector<8x8xf32> to vector<1x8x8xf32>
    %601 = vector.broadcast %600 : vector<1x8x8xf32> to vector<2x8x8xf32>
    %602 = arith.addf %599, %601 : vector<2x8x8xf32>
    %cst_230 = arith.constant dense<0xFF800000> : vector<2x8xf32>
    %603 = vector.multi_reduction <maximumf>, %602, %cst_230 [2] : vector<2x8x8xf32> to vector<2x8xf32>
    %604 = vector.shape_cast %603 : vector<2x8xf32> to vector<2x8x1xf32>
    %605 = vector.broadcast %604 : vector<2x8x1xf32> to vector<2x8x8xf32>
    %606 = arith.subf %602, %605 : vector<2x8x8xf32>
    %607 = math.exp %606 : vector<2x8x8xf32>
    %cst_231 = arith.constant dense<0.000000e+00> : vector<2x8xf32>
    %608 = vector.multi_reduction <add>, %607, %cst_231 [2] : vector<2x8x8xf32> to vector<2x8xf32>
    %609 = vector.shape_cast %608 : vector<2x8xf32> to vector<2x8x1xf32>
    %610 = vector.broadcast %609 : vector<2x8x1xf32> to vector<2x8x8xf32>
    %611 = arith.divf %607, %610 : vector<2x8x8xf32>
    "tpu.trace_start"() <{level = 10 : i32, message = "slm,smd->sld"}> : () -> ()
    %cst_232 = arith.constant dense<0.000000e+00> : vector<2x8x8xf32>
    %612 = tpu.matmul %611, %596, %cst_232 {dimension_numbers = #tpu.dot_dimension_numbers<[2], [1], [1], [2], [0, 0, 0, 1, 1, 2], [0], [0]>} : vector<2x8x8xf32>, vector<2x8x8xf32>, vector<2x8x8xf32> -> vector<2x8x8xf32>
    "tpu.trace_stop"() : () -> ()
    %613 = tpu.concatenate %555, %574, %593, %612 in 2 : vector<2x8x8xf32>, vector<2x8x8xf32>, vector<2x8x8xf32>, vector<2x8x8xf32> -> vector<2x8x32xf32>
    %614 = vector.shape_cast %613 : vector<2x8x32xf32> to vector<16x32xf32>
    %c0_233 = arith.constant 0 : index
    %c3_234 = arith.constant 3 : index
    %c0_235 = arith.constant 0 : index
    %c0_236 = arith.constant 0 : index
    %615 = vector.load %arg16[%c0_233, %c3_234, %c0_235, %c0_236] : memref<2x4x32x32xf32, #tpu.memory_space<vmem>>, vector<1x1x32x32xf32>
    %616 = vector.shape_cast %615 : vector<1x1x32x32xf32> to vector<32x32xf32>
    %cst_237 = arith.constant dense<0.000000e+00> : vector<16x32xf32>
    %617 = tpu.matmul %614, %616, %cst_237 {dimension_numbers = #tpu.dot_dimension_numbers<[1], [0], [0], [1], [0, 0, 1, 1], [], []>} : vector<16x32xf32>, vector<32x32xf32>, vector<16x32xf32> -> vector<16x32xf32>
    %618 = vector.broadcast %491 : vector<1x32xf32> to vector<16x32xf32>
    %619 = arith.addf %617, %618 : vector<16x32xf32>
    %620 = arith.addf %477, %619 : vector<16x32xf32>
    %cst_238 = arith.constant dense<0.000000e+00> : vector<16xf32>
    %621 = vector.multi_reduction <add>, %620, %cst_238 [1] : vector<16x32xf32> to vector<16xf32>
    %622 = vector.shape_cast %621 : vector<16xf32> to vector<16x1xf32>
    %cst_239 = arith.constant 3.200000e+01 : f32
    %623 = vector.broadcast %cst_239 : f32 to vector<16x1xf32>
    %624 = arith.divf %622, %623 : vector<16x1xf32>
    %625 = vector.broadcast %624 : vector<16x1xf32> to vector<16x32xf32>
    %626 = arith.subf %620, %625 : vector<16x32xf32>
    %627 = arith.mulf %626, %626 : vector<16x32xf32>
    %cst_240 = arith.constant dense<0.000000e+00> : vector<16xf32>
    %628 = vector.multi_reduction <add>, %627, %cst_240 [1] : vector<16x32xf32> to vector<16xf32>
    %629 = vector.shape_cast %628 : vector<16xf32> to vector<16x1xf32>
    %cst_241 = arith.constant 3.200000e+01 : f32
    %630 = vector.broadcast %cst_241 : f32 to vector<16x1xf32>
    %631 = arith.divf %629, %630 : vector<16x1xf32>
    %632 = vector.broadcast %624 : vector<16x1xf32> to vector<16x32xf32>
    %633 = arith.subf %620, %632 : vector<16x32xf32>
    %cst_242 = arith.constant 9.99999974E-6 : f32
    %634 = vector.broadcast %cst_242 : f32 to vector<16x1xf32>
    %635 = arith.addf %631, %634 : vector<16x1xf32>
    %636 = math.rsqrt %635 : vector<16x1xf32>
    %637 = vector.broadcast %636 : vector<16x1xf32> to vector<16x32xf32>
    %638 = arith.mulf %633, %637 : vector<16x32xf32>
    %639 = vector.broadcast %488 : vector<1x32xf32> to vector<16x32xf32>
    %640 = arith.mulf %638, %639 : vector<16x32xf32>
    %641 = vector.broadcast %489 : vector<1x32xf32> to vector<16x32xf32>
    %642 = arith.addf %640, %641 : vector<16x32xf32>
    %c0_243 = arith.constant 0 : index
    %c0_244 = arith.constant 0 : index
    %c0_245 = arith.constant 0 : index
    %643 = vector.load %arg17[%c0_243, %c0_244, %c0_245] : memref<2x32x128xf32, #tpu.memory_space<vmem>>, vector<1x32x128xf32>
    %644 = vector.shape_cast %643 : vector<1x32x128xf32> to vector<32x128xf32>
    %cst_246 = arith.constant dense<0.000000e+00> : vector<16x128xf32>
    %645 = tpu.matmul %642, %644, %cst_246 {dimension_numbers = #tpu.dot_dimension_numbers<[1], [0], [0], [1], [0, 0, 1, 1], [], []>} : vector<16x32xf32>, vector<32x128xf32>, vector<16x128xf32> -> vector<16x128xf32>
    %646 = vector.broadcast %492 : vector<1x128xf32> to vector<16x128xf32>
    %647 = arith.addf %645, %646 : vector<16x128xf32>
    %cst_247 = arith.constant 1.702000e+00 : f32
    %648 = vector.broadcast %cst_247 : f32 to vector<16x128xf32>
    %649 = arith.mulf %648, %647 : vector<16x128xf32>
    %650 = arith.negf %649 : vector<16x128xf32>
    %651 = math.exp %650 : vector<16x128xf32>
    %cst_248 = arith.constant 1.000000e+00 : f32
    %652 = vector.broadcast %cst_248 : f32 to vector<16x128xf32>
    %653 = arith.addf %652, %651 : vector<16x128xf32>
    %654 = arith.divf %652, %653 : vector<16x128xf32>
    %655 = arith.mulf %647, %654 : vector<16x128xf32>
    %c0_249 = arith.constant 0 : index
    %c0_250 = arith.constant 0 : index
    %c0_251 = arith.constant 0 : index
    %656 = vector.load %arg18[%c0_249, %c0_250, %c0_251] : memref<2x128x32xf32, #tpu.memory_space<vmem>>, vector<1x128x32xf32>
    %657 = vector.shape_cast %656 : vector<1x128x32xf32> to vector<128x32xf32>
    %cst_252 = arith.constant dense<0.000000e+00> : vector<16x32xf32>
    %658 = tpu.matmul %655, %657, %cst_252 {dimension_numbers = #tpu.dot_dimension_numbers<[1], [0], [0], [1], [0, 0, 1, 1], [], []>} : vector<16x128xf32>, vector<128x32xf32>, vector<16x32xf32> -> vector<16x32xf32>
    %659 = vector.broadcast %493 : vector<1x32xf32> to vector<16x32xf32>
    %660 = arith.addf %658, %659 : vector<16x32xf32>
    %661 = arith.addf %620, %660 : vector<16x32xf32>
    %662 = tpu.iota {dimensions = array<i32: 0>} : vector<16x1xi32>
    %c7_i32_253 = arith.constant 7 : i32
    %663 = vector.broadcast %c7_i32_253 : i32 to vector<16x1xi32>
    %664 = arith.andi %662, %663 : vector<16x1xi32>
    %c5_i32 = arith.constant 5 : i32
    %665 = vector.broadcast %c5_i32 : i32 to vector<16x1xi32>
    %666 = arith.cmpi eq, %664, %665 : vector<16x1xi32>
    %667 = vector.extract_strided_slice %435 {offsets = [0, 0], sizes = [1, 32], strides = [1, 1]} : vector<2x32xf32> to vector<1x32xf32>
    %668 = vector.shape_cast %666 : vector<16x1xi1> to vector<16x1xi1>
    %669 = vector.broadcast %668 : vector<16x1xi1> to vector<16x32xi1>
    %670 = vector.shape_cast %667 : vector<1x32xf32> to vector<1x32xf32>
    %671 = vector.broadcast %670 : vector<1x32xf32> to vector<16x32xf32>
    %672 = arith.select %669, %671, %661 : vector<16x32xi1>, vector<16x32xf32>
    %c6_i32 = arith.constant 6 : i32
    %673 = vector.broadcast %c6_i32 : i32 to vector<16x1xi32>
    %674 = arith.cmpi eq, %664, %673 : vector<16x1xi32>
    %675 = vector.extract_strided_slice %435 {offsets = [1, 0], sizes = [1, 32], strides = [1, 1]} : vector<2x32xf32> to vector<1x32xf32>
    %676 = vector.shape_cast %674 : vector<16x1xi1> to vector<16x1xi1>
    %677 = vector.broadcast %676 : vector<16x1xi1> to vector<16x32xi1>
    %678 = vector.shape_cast %675 : vector<1x32xf32> to vector<1x32xf32>
    %679 = vector.broadcast %678 : vector<1x32xf32> to vector<16x32xf32>
    %680 = arith.select %677, %679, %672 : vector<16x32xi1>, vector<16x32xf32>
    %c1_254 = arith.constant 1 : index
    %c0_255 = arith.constant 0 : index
    %c0_256 = arith.constant 0 : index
    %681 = vector.load %arg19[%c1_254, %c0_255, %c0_256] : memref<2x8x128xf32, #tpu.memory_space<vmem>>, vector<1x8x128xf32>
    %682 = vector.shape_cast %681 : vector<1x8x128xf32> to vector<8x128xf32>
    %683 = vector.extract_strided_slice %682 {offsets = [0, 0], sizes = [1, 32], strides = [1, 1]} : vector<8x128xf32> to vector<1x32xf32>
    %684 = vector.extract_strided_slice %682 {offsets = [1, 0], sizes = [1, 32], strides = [1, 1]} : vector<8x128xf32> to vector<1x32xf32>
    %685 = vector.extract_strided_slice %682 {offsets = [2, 0], sizes = [1, 32], strides = [1, 1]} : vector<8x128xf32> to vector<1x32xf32>
    %686 = vector.extract_strided_slice %682 {offsets = [3, 0], sizes = [1, 32], strides = [1, 1]} : vector<8x128xf32> to vector<1x32xf32>
    %687 = vector.extract_strided_slice %682 {offsets = [4, 0], sizes = [1, 96], strides = [1, 1]} : vector<8x128xf32> to vector<1x96xf32>
    %688 = vector.extract_strided_slice %682 {offsets = [5, 0], sizes = [1, 32], strides = [1, 1]} : vector<8x128xf32> to vector<1x32xf32>
    %689 = vector.extract_strided_slice %682 {offsets = [6, 0], sizes = [1, 128], strides = [1, 1]} : vector<8x128xf32> to vector<1x128xf32>
    %690 = vector.extract_strided_slice %682 {offsets = [7, 0], sizes = [1, 32], strides = [1, 1]} : vector<8x128xf32> to vector<1x32xf32>
    %cst_257 = arith.constant dense<0.000000e+00> : vector<16xf32>
    %691 = vector.multi_reduction <add>, %680, %cst_257 [1] : vector<16x32xf32> to vector<16xf32>
    %692 = vector.shape_cast %691 : vector<16xf32> to vector<16x1xf32>
    %cst_258 = arith.constant 3.200000e+01 : f32
    %693 = vector.broadcast %cst_258 : f32 to vector<16x1xf32>
    %694 = arith.divf %692, %693 : vector<16x1xf32>
    %695 = vector.broadcast %694 : vector<16x1xf32> to vector<16x32xf32>
    %696 = arith.subf %680, %695 : vector<16x32xf32>
    %697 = arith.mulf %696, %696 : vector<16x32xf32>
    %cst_259 = arith.constant dense<0.000000e+00> : vector<16xf32>
    %698 = vector.multi_reduction <add>, %697, %cst_259 [1] : vector<16x32xf32> to vector<16xf32>
    %699 = vector.shape_cast %698 : vector<16xf32> to vector<16x1xf32>
    %cst_260 = arith.constant 3.200000e+01 : f32
    %700 = vector.broadcast %cst_260 : f32 to vector<16x1xf32>
    %701 = arith.divf %699, %700 : vector<16x1xf32>
    %702 = vector.broadcast %694 : vector<16x1xf32> to vector<16x32xf32>
    %703 = arith.subf %680, %702 : vector<16x32xf32>
    %cst_261 = arith.constant 9.99999974E-6 : f32
    %704 = vector.broadcast %cst_261 : f32 to vector<16x1xf32>
    %705 = arith.addf %701, %704 : vector<16x1xf32>
    %706 = math.rsqrt %705 : vector<16x1xf32>
    %707 = vector.broadcast %706 : vector<16x1xf32> to vector<16x32xf32>
    %708 = arith.mulf %703, %707 : vector<16x32xf32>
    %709 = vector.broadcast %683 : vector<1x32xf32> to vector<16x32xf32>
    %710 = arith.mulf %708, %709 : vector<16x32xf32>
    %711 = vector.broadcast %684 : vector<1x32xf32> to vector<16x32xf32>
    %712 = arith.addf %710, %711 : vector<16x32xf32>
    %c1_262 = arith.constant 1 : index
    %c0_263 = arith.constant 0 : index
    %c0_264 = arith.constant 0 : index
    %c0_265 = arith.constant 0 : index
    %713 = vector.load %arg16[%c1_262, %c0_263, %c0_264, %c0_265] : memref<2x4x32x32xf32, #tpu.memory_space<vmem>>, vector<1x1x32x32xf32>
    %714 = vector.shape_cast %713 : vector<1x1x32x32xf32> to vector<32x32xf32>
    %cst_266 = arith.constant dense<0.000000e+00> : vector<16x32xf32>
    %715 = tpu.matmul %712, %714, %cst_266 {dimension_numbers = #tpu.dot_dimension_numbers<[1], [0], [0], [1], [0, 0, 1, 1], [], []>} : vector<16x32xf32>, vector<32x32xf32>, vector<16x32xf32> -> vector<16x32xf32>
    %716 = vector.extract_strided_slice %687 {offsets = [0, 0], sizes = [1, 32], strides = [1, 1]} : vector<1x96xf32> to vector<1x32xf32>
    %717 = vector.broadcast %716 : vector<1x32xf32> to vector<16x32xf32>
    %718 = arith.addf %715, %717 : vector<16x32xf32>
    %c1_267 = arith.constant 1 : index
    %c1_268 = arith.constant 1 : index
    %c0_269 = arith.constant 0 : index
    %c0_270 = arith.constant 0 : index
    %719 = vector.load %arg16[%c1_267, %c1_268, %c0_269, %c0_270] : memref<2x4x32x32xf32, #tpu.memory_space<vmem>>, vector<1x1x32x32xf32>
    %720 = vector.shape_cast %719 : vector<1x1x32x32xf32> to vector<32x32xf32>
    %cst_271 = arith.constant dense<0.000000e+00> : vector<16x32xf32>
    %721 = tpu.matmul %712, %720, %cst_271 {dimension_numbers = #tpu.dot_dimension_numbers<[1], [0], [0], [1], [0, 0, 1, 1], [], []>} : vector<16x32xf32>, vector<32x32xf32>, vector<16x32xf32> -> vector<16x32xf32>
    %722 = vector.extract_strided_slice %687 {offsets = [0, 32], sizes = [1, 32], strides = [1, 1]} : vector<1x96xf32> to vector<1x32xf32>
    %723 = vector.broadcast %722 : vector<1x32xf32> to vector<16x32xf32>
    %724 = arith.addf %721, %723 : vector<16x32xf32>
    %c1_272 = arith.constant 1 : index
    %c2_273 = arith.constant 2 : index
    %c0_274 = arith.constant 0 : index
    %c0_275 = arith.constant 0 : index
    %725 = vector.load %arg16[%c1_272, %c2_273, %c0_274, %c0_275] : memref<2x4x32x32xf32, #tpu.memory_space<vmem>>, vector<1x1x32x32xf32>
    %726 = vector.shape_cast %725 : vector<1x1x32x32xf32> to vector<32x32xf32>
    %cst_276 = arith.constant dense<0.000000e+00> : vector<16x32xf32>
    %727 = tpu.matmul %712, %726, %cst_276 {dimension_numbers = #tpu.dot_dimension_numbers<[1], [0], [0], [1], [0, 0, 1, 1], [], []>} : vector<16x32xf32>, vector<32x32xf32>, vector<16x32xf32> -> vector<16x32xf32>
    %728 = vector.extract_strided_slice %687 {offsets = [0, 64], sizes = [1, 32], strides = [1, 1]} : vector<1x96xf32> to vector<1x32xf32>
    %729 = vector.broadcast %728 : vector<1x32xf32> to vector<16x32xf32>
    %730 = arith.addf %727, %729 : vector<16x32xf32>
    %731 = vector.shape_cast %718 : vector<16x32xf32> to vector<2x8x32xf32>
    %732 = vector.shape_cast %724 : vector<16x32xf32> to vector<2x8x32xf32>
    %733 = vector.shape_cast %730 : vector<16x32xf32> to vector<2x8x32xf32>
    %734 = vector.extract_strided_slice %731 {offsets = [0, 0, 0], sizes = [2, 8, 8], strides = [1, 1, 1]} : vector<2x8x32xf32> to vector<2x8x8xf32>
    %735 = vector.extract_strided_slice %732 {offsets = [0, 0, 0], sizes = [2, 8, 8], strides = [1, 1, 1]} : vector<2x8x32xf32> to vector<2x8x8xf32>
    %736 = vector.extract_strided_slice %733 {offsets = [0, 0, 0], sizes = [2, 8, 8], strides = [1, 1, 1]} : vector<2x8x32xf32> to vector<2x8x8xf32>
    "tpu.trace_start"() <{level = 10 : i32, message = "sld,smd->slm"}> : () -> ()
    %cst_277 = arith.constant dense<0.000000e+00> : vector<2x8x8xf32>
    %737 = tpu.matmul %734, %735, %cst_277 {dimension_numbers = #tpu.dot_dimension_numbers<[2], [2], [1], [1], [0, 0, 0, 1, 1, 1], [0], [0]>} : vector<2x8x8xf32>, vector<2x8x8xf32>, vector<2x8x8xf32> -> vector<2x8x8xf32>
    "tpu.trace_stop"() : () -> ()
    %cst_278 = arith.constant 0.353553385 : f32
    %738 = vector.broadcast %cst_278 : f32 to vector<2x8x8xf32>
    %739 = arith.mulf %737, %738 : vector<2x8x8xf32>
    %740 = vector.shape_cast %483 : vector<8x8xf32> to vector<1x8x8xf32>
    %741 = vector.broadcast %740 : vector<1x8x8xf32> to vector<2x8x8xf32>
    %742 = arith.addf %739, %741 : vector<2x8x8xf32>
    %cst_279 = arith.constant dense<0xFF800000> : vector<2x8xf32>
    %743 = vector.multi_reduction <maximumf>, %742, %cst_279 [2] : vector<2x8x8xf32> to vector<2x8xf32>
    %744 = vector.shape_cast %743 : vector<2x8xf32> to vector<2x8x1xf32>
    %745 = vector.broadcast %744 : vector<2x8x1xf32> to vector<2x8x8xf32>
    %746 = arith.subf %742, %745 : vector<2x8x8xf32>
    %747 = math.exp %746 : vector<2x8x8xf32>
    %cst_280 = arith.constant dense<0.000000e+00> : vector<2x8xf32>
    %748 = vector.multi_reduction <add>, %747, %cst_280 [2] : vector<2x8x8xf32> to vector<2x8xf32>
    %749 = vector.shape_cast %748 : vector<2x8xf32> to vector<2x8x1xf32>
    %750 = vector.broadcast %749 : vector<2x8x1xf32> to vector<2x8x8xf32>
    %751 = arith.divf %747, %750 : vector<2x8x8xf32>
    "tpu.trace_start"() <{level = 10 : i32, message = "slm,smd->sld"}> : () -> ()
    %cst_281 = arith.constant dense<0.000000e+00> : vector<2x8x8xf32>
    %752 = tpu.matmul %751, %736, %cst_281 {dimension_numbers = #tpu.dot_dimension_numbers<[2], [1], [1], [2], [0, 0, 0, 1, 1, 2], [0], [0]>} : vector<2x8x8xf32>, vector<2x8x8xf32>, vector<2x8x8xf32> -> vector<2x8x8xf32>
    "tpu.trace_stop"() : () -> ()
    %753 = vector.extract_strided_slice %731 {offsets = [0, 0, 8], sizes = [2, 8, 8], strides = [1, 1, 1]} : vector<2x8x32xf32> to vector<2x8x8xf32>
    %754 = vector.extract_strided_slice %732 {offsets = [0, 0, 8], sizes = [2, 8, 8], strides = [1, 1, 1]} : vector<2x8x32xf32> to vector<2x8x8xf32>
    %755 = vector.extract_strided_slice %733 {offsets = [0, 0, 8], sizes = [2, 8, 8], strides = [1, 1, 1]} : vector<2x8x32xf32> to vector<2x8x8xf32>
    "tpu.trace_start"() <{level = 10 : i32, message = "sld,smd->slm"}> : () -> ()
    %cst_282 = arith.constant dense<0.000000e+00> : vector<2x8x8xf32>
    %756 = tpu.matmul %753, %754, %cst_282 {dimension_numbers = #tpu.dot_dimension_numbers<[2], [2], [1], [1], [0, 0, 0, 1, 1, 1], [0], [0]>} : vector<2x8x8xf32>, vector<2x8x8xf32>, vector<2x8x8xf32> -> vector<2x8x8xf32>
    "tpu.trace_stop"() : () -> ()
    %cst_283 = arith.constant 0.353553385 : f32
    %757 = vector.broadcast %cst_283 : f32 to vector<2x8x8xf32>
    %758 = arith.mulf %756, %757 : vector<2x8x8xf32>
    %759 = vector.shape_cast %483 : vector<8x8xf32> to vector<1x8x8xf32>
    %760 = vector.broadcast %759 : vector<1x8x8xf32> to vector<2x8x8xf32>
    %761 = arith.addf %758, %760 : vector<2x8x8xf32>
    %cst_284 = arith.constant dense<0xFF800000> : vector<2x8xf32>
    %762 = vector.multi_reduction <maximumf>, %761, %cst_284 [2] : vector<2x8x8xf32> to vector<2x8xf32>
    %763 = vector.shape_cast %762 : vector<2x8xf32> to vector<2x8x1xf32>
    %764 = vector.broadcast %763 : vector<2x8x1xf32> to vector<2x8x8xf32>
    %765 = arith.subf %761, %764 : vector<2x8x8xf32>
    %766 = math.exp %765 : vector<2x8x8xf32>
    %cst_285 = arith.constant dense<0.000000e+00> : vector<2x8xf32>
    %767 = vector.multi_reduction <add>, %766, %cst_285 [2] : vector<2x8x8xf32> to vector<2x8xf32>
    %768 = vector.shape_cast %767 : vector<2x8xf32> to vector<2x8x1xf32>
    %769 = vector.broadcast %768 : vector<2x8x1xf32> to vector<2x8x8xf32>
    %770 = arith.divf %766, %769 : vector<2x8x8xf32>
    "tpu.trace_start"() <{level = 10 : i32, message = "slm,smd->sld"}> : () -> ()
    %cst_286 = arith.constant dense<0.000000e+00> : vector<2x8x8xf32>
    %771 = tpu.matmul %770, %755, %cst_286 {dimension_numbers = #tpu.dot_dimension_numbers<[2], [1], [1], [2], [0, 0, 0, 1, 1, 2], [0], [0]>} : vector<2x8x8xf32>, vector<2x8x8xf32>, vector<2x8x8xf32> -> vector<2x8x8xf32>
    "tpu.trace_stop"() : () -> ()
    %772 = vector.extract_strided_slice %731 {offsets = [0, 0, 16], sizes = [2, 8, 8], strides = [1, 1, 1]} : vector<2x8x32xf32> to vector<2x8x8xf32>
    %773 = vector.extract_strided_slice %732 {offsets = [0, 0, 16], sizes = [2, 8, 8], strides = [1, 1, 1]} : vector<2x8x32xf32> to vector<2x8x8xf32>
    %774 = vector.extract_strided_slice %733 {offsets = [0, 0, 16], sizes = [2, 8, 8], strides = [1, 1, 1]} : vector<2x8x32xf32> to vector<2x8x8xf32>
    "tpu.trace_start"() <{level = 10 : i32, message = "sld,smd->slm"}> : () -> ()
    %cst_287 = arith.constant dense<0.000000e+00> : vector<2x8x8xf32>
    %775 = tpu.matmul %772, %773, %cst_287 {dimension_numbers = #tpu.dot_dimension_numbers<[2], [2], [1], [1], [0, 0, 0, 1, 1, 1], [0], [0]>} : vector<2x8x8xf32>, vector<2x8x8xf32>, vector<2x8x8xf32> -> vector<2x8x8xf32>
    "tpu.trace_stop"() : () -> ()
    %cst_288 = arith.constant 0.353553385 : f32
    %776 = vector.broadcast %cst_288 : f32 to vector<2x8x8xf32>
    %777 = arith.mulf %775, %776 : vector<2x8x8xf32>
    %778 = vector.shape_cast %483 : vector<8x8xf32> to vector<1x8x8xf32>
    %779 = vector.broadcast %778 : vector<1x8x8xf32> to vector<2x8x8xf32>
    %780 = arith.addf %777, %779 : vector<2x8x8xf32>
    %cst_289 = arith.constant dense<0xFF800000> : vector<2x8xf32>
    %781 = vector.multi_reduction <maximumf>, %780, %cst_289 [2] : vector<2x8x8xf32> to vector<2x8xf32>
    %782 = vector.shape_cast %781 : vector<2x8xf32> to vector<2x8x1xf32>
    %783 = vector.broadcast %782 : vector<2x8x1xf32> to vector<2x8x8xf32>
    %784 = arith.subf %780, %783 : vector<2x8x8xf32>
    %785 = math.exp %784 : vector<2x8x8xf32>
    %cst_290 = arith.constant dense<0.000000e+00> : vector<2x8xf32>
    %786 = vector.multi_reduction <add>, %785, %cst_290 [2] : vector<2x8x8xf32> to vector<2x8xf32>
    %787 = vector.shape_cast %786 : vector<2x8xf32> to vector<2x8x1xf32>
    %788 = vector.broadcast %787 : vector<2x8x1xf32> to vector<2x8x8xf32>
    %789 = arith.divf %785, %788 : vector<2x8x8xf32>
    "tpu.trace_start"() <{level = 10 : i32, message = "slm,smd->sld"}> : () -> ()
    %cst_291 = arith.constant dense<0.000000e+00> : vector<2x8x8xf32>
    %790 = tpu.matmul %789, %774, %cst_291 {dimension_numbers = #tpu.dot_dimension_numbers<[2], [1], [1], [2], [0, 0, 0, 1, 1, 2], [0], [0]>} : vector<2x8x8xf32>, vector<2x8x8xf32>, vector<2x8x8xf32> -> vector<2x8x8xf32>
    "tpu.trace_stop"() : () -> ()
    %791 = vector.extract_strided_slice %731 {offsets = [0, 0, 24], sizes = [2, 8, 8], strides = [1, 1, 1]} : vector<2x8x32xf32> to vector<2x8x8xf32>
    %792 = vector.extract_strided_slice %732 {offsets = [0, 0, 24], sizes = [2, 8, 8], strides = [1, 1, 1]} : vector<2x8x32xf32> to vector<2x8x8xf32>
    %793 = vector.extract_strided_slice %733 {offsets = [0, 0, 24], sizes = [2, 8, 8], strides = [1, 1, 1]} : vector<2x8x32xf32> to vector<2x8x8xf32>
    "tpu.trace_start"() <{level = 10 : i32, message = "sld,smd->slm"}> : () -> ()
    %cst_292 = arith.constant dense<0.000000e+00> : vector<2x8x8xf32>
    %794 = tpu.matmul %791, %792, %cst_292 {dimension_numbers = #tpu.dot_dimension_numbers<[2], [2], [1], [1], [0, 0, 0, 1, 1, 1], [0], [0]>} : vector<2x8x8xf32>, vector<2x8x8xf32>, vector<2x8x8xf32> -> vector<2x8x8xf32>
    "tpu.trace_stop"() : () -> ()
    %cst_293 = arith.constant 0.353553385 : f32
    %795 = vector.broadcast %cst_293 : f32 to vector<2x8x8xf32>
    %796 = arith.mulf %794, %795 : vector<2x8x8xf32>
    %797 = vector.shape_cast %483 : vector<8x8xf32> to vector<1x8x8xf32>
    %798 = vector.broadcast %797 : vector<1x8x8xf32> to vector<2x8x8xf32>
    %799 = arith.addf %796, %798 : vector<2x8x8xf32>
    %cst_294 = arith.constant dense<0xFF800000> : vector<2x8xf32>
    %800 = vector.multi_reduction <maximumf>, %799, %cst_294 [2] : vector<2x8x8xf32> to vector<2x8xf32>
    %801 = vector.shape_cast %800 : vector<2x8xf32> to vector<2x8x1xf32>
    %802 = vector.broadcast %801 : vector<2x8x1xf32> to vector<2x8x8xf32>
    %803 = arith.subf %799, %802 : vector<2x8x8xf32>
    %804 = math.exp %803 : vector<2x8x8xf32>
    %cst_295 = arith.constant dense<0.000000e+00> : vector<2x8xf32>
    %805 = vector.multi_reduction <add>, %804, %cst_295 [2] : vector<2x8x8xf32> to vector<2x8xf32>
    %806 = vector.shape_cast %805 : vector<2x8xf32> to vector<2x8x1xf32>
    %807 = vector.broadcast %806 : vector<2x8x1xf32> to vector<2x8x8xf32>
    %808 = arith.divf %804, %807 : vector<2x8x8xf32>
    "tpu.trace_start"() <{level = 10 : i32, message = "slm,smd->sld"}> : () -> ()
    %cst_296 = arith.constant dense<0.000000e+00> : vector<2x8x8xf32>
    %809 = tpu.matmul %808, %793, %cst_296 {dimension_numbers = #tpu.dot_dimension_numbers<[2], [1], [1], [2], [0, 0, 0, 1, 1, 2], [0], [0]>} : vector<2x8x8xf32>, vector<2x8x8xf32>, vector<2x8x8xf32> -> vector<2x8x8xf32>
    "tpu.trace_stop"() : () -> ()
    %810 = tpu.concatenate %752, %771, %790, %809 in 2 : vector<2x8x8xf32>, vector<2x8x8xf32>, vector<2x8x8xf32>, vector<2x8x8xf32> -> vector<2x8x32xf32>
    %811 = vector.shape_cast %810 : vector<2x8x32xf32> to vector<16x32xf32>
    %c1_297 = arith.constant 1 : index
    %c3_298 = arith.constant 3 : index
    %c0_299 = arith.constant 0 : index
    %c0_300 = arith.constant 0 : index
    %812 = vector.load %arg16[%c1_297, %c3_298, %c0_299, %c0_300] : memref<2x4x32x32xf32, #tpu.memory_space<vmem>>, vector<1x1x32x32xf32>
    %813 = vector.shape_cast %812 : vector<1x1x32x32xf32> to vector<32x32xf32>
    %cst_301 = arith.constant dense<0.000000e+00> : vector<16x32xf32>
    %814 = tpu.matmul %811, %813, %cst_301 {dimension_numbers = #tpu.dot_dimension_numbers<[1], [0], [0], [1], [0, 0, 1, 1], [], []>} : vector<16x32xf32>, vector<32x32xf32>, vector<16x32xf32> -> vector<16x32xf32>
    %815 = vector.broadcast %688 : vector<1x32xf32> to vector<16x32xf32>
    %816 = arith.addf %814, %815 : vector<16x32xf32>
    %817 = arith.addf %680, %816 : vector<16x32xf32>
    %cst_302 = arith.constant dense<0.000000e+00> : vector<16xf32>
    %818 = vector.multi_reduction <add>, %817, %cst_302 [1] : vector<16x32xf32> to vector<16xf32>
    %819 = vector.shape_cast %818 : vector<16xf32> to vector<16x1xf32>
    %cst_303 = arith.constant 3.200000e+01 : f32
    %820 = vector.broadcast %cst_303 : f32 to vector<16x1xf32>
    %821 = arith.divf %819, %820 : vector<16x1xf32>
    %822 = vector.broadcast %821 : vector<16x1xf32> to vector<16x32xf32>
    %823 = arith.subf %817, %822 : vector<16x32xf32>
    %824 = arith.mulf %823, %823 : vector<16x32xf32>
    %cst_304 = arith.constant dense<0.000000e+00> : vector<16xf32>
    %825 = vector.multi_reduction <add>, %824, %cst_304 [1] : vector<16x32xf32> to vector<16xf32>
    %826 = vector.shape_cast %825 : vector<16xf32> to vector<16x1xf32>
    %cst_305 = arith.constant 3.200000e+01 : f32
    %827 = vector.broadcast %cst_305 : f32 to vector<16x1xf32>
    %828 = arith.divf %826, %827 : vector<16x1xf32>
    %829 = vector.broadcast %821 : vector<16x1xf32> to vector<16x32xf32>
    %830 = arith.subf %817, %829 : vector<16x32xf32>
    %cst_306 = arith.constant 9.99999974E-6 : f32
    %831 = vector.broadcast %cst_306 : f32 to vector<16x1xf32>
    %832 = arith.addf %828, %831 : vector<16x1xf32>
    %833 = math.rsqrt %832 : vector<16x1xf32>
    %834 = vector.broadcast %833 : vector<16x1xf32> to vector<16x32xf32>
    %835 = arith.mulf %830, %834 : vector<16x32xf32>
    %836 = vector.broadcast %685 : vector<1x32xf32> to vector<16x32xf32>
    %837 = arith.mulf %835, %836 : vector<16x32xf32>
    %838 = vector.broadcast %686 : vector<1x32xf32> to vector<16x32xf32>
    %839 = arith.addf %837, %838 : vector<16x32xf32>
    %c1_307 = arith.constant 1 : index
    %c0_308 = arith.constant 0 : index
    %c0_309 = arith.constant 0 : index
    %840 = vector.load %arg17[%c1_307, %c0_308, %c0_309] : memref<2x32x128xf32, #tpu.memory_space<vmem>>, vector<1x32x128xf32>
    %841 = vector.shape_cast %840 : vector<1x32x128xf32> to vector<32x128xf32>
    %cst_310 = arith.constant dense<0.000000e+00> : vector<16x128xf32>
    %842 = tpu.matmul %839, %841, %cst_310 {dimension_numbers = #tpu.dot_dimension_numbers<[1], [0], [0], [1], [0, 0, 1, 1], [], []>} : vector<16x32xf32>, vector<32x128xf32>, vector<16x128xf32> -> vector<16x128xf32>
    %843 = vector.broadcast %689 : vector<1x128xf32> to vector<16x128xf32>
    %844 = arith.addf %842, %843 : vector<16x128xf32>
    %cst_311 = arith.constant 1.702000e+00 : f32
    %845 = vector.broadcast %cst_311 : f32 to vector<16x128xf32>
    %846 = arith.mulf %845, %844 : vector<16x128xf32>
    %847 = arith.negf %846 : vector<16x128xf32>
    %848 = math.exp %847 : vector<16x128xf32>
    %cst_312 = arith.constant 1.000000e+00 : f32
    %849 = vector.broadcast %cst_312 : f32 to vector<16x128xf32>
    %850 = arith.addf %849, %848 : vector<16x128xf32>
    %851 = arith.divf %849, %850 : vector<16x128xf32>
    %852 = arith.mulf %844, %851 : vector<16x128xf32>
    %c1_313 = arith.constant 1 : index
    %c0_314 = arith.constant 0 : index
    %c0_315 = arith.constant 0 : index
    %853 = vector.load %arg18[%c1_313, %c0_314, %c0_315] : memref<2x128x32xf32, #tpu.memory_space<vmem>>, vector<1x128x32xf32>
    %854 = vector.shape_cast %853 : vector<1x128x32xf32> to vector<128x32xf32>
    %cst_316 = arith.constant dense<0.000000e+00> : vector<16x32xf32>
    %855 = tpu.matmul %852, %854, %cst_316 {dimension_numbers = #tpu.dot_dimension_numbers<[1], [0], [0], [1], [0, 0, 1, 1], [], []>} : vector<16x128xf32>, vector<128x32xf32>, vector<16x32xf32> -> vector<16x32xf32>
    %856 = vector.broadcast %690 : vector<1x32xf32> to vector<16x32xf32>
    %857 = arith.addf %855, %856 : vector<16x32xf32>
    %858 = arith.addf %817, %857 : vector<16x32xf32>
    %859 = vector.extract_strided_slice %858 {offsets = [0, 0], sizes = [1, 32], strides = [1, 1]} : vector<16x32xf32> to vector<1x32xf32>
    %860 = vector.extract_strided_slice %858 {offsets = [8, 0], sizes = [1, 32], strides = [1, 1]} : vector<16x32xf32> to vector<1x32xf32>
    %861 = tpu.concatenate %859, %860 in 0 : vector<1x32xf32>, vector<1x32xf32> -> vector<2x32xf32>
    %c2_317 = arith.constant 2 : index
    %c0_318 = arith.constant 0 : index
    %862 = vector.load %arg20[%c2_317, %c0_318] : memref<4x32xf32, #tpu.memory_space<vmem>>, vector<1x32xf32>
    %c3_319 = arith.constant 3 : index
    %c0_320 = arith.constant 0 : index
    %863 = vector.load %arg20[%c3_319, %c0_320] : memref<4x32xf32, #tpu.memory_space<vmem>>, vector<1x32xf32>
    %cst_321 = arith.constant dense<0.000000e+00> : vector<2xf32>
    %864 = vector.multi_reduction <add>, %861, %cst_321 [1] : vector<2x32xf32> to vector<2xf32>
    %865 = vector.shape_cast %864 : vector<2xf32> to vector<2x1xf32>
    %cst_322 = arith.constant 3.200000e+01 : f32
    %866 = vector.broadcast %cst_322 : f32 to vector<2x1xf32>
    %867 = arith.divf %865, %866 : vector<2x1xf32>
    %868 = vector.broadcast %867 : vector<2x1xf32> to vector<2x32xf32>
    %869 = arith.subf %861, %868 : vector<2x32xf32>
    %870 = arith.mulf %869, %869 : vector<2x32xf32>
    %cst_323 = arith.constant dense<0.000000e+00> : vector<2xf32>
    %871 = vector.multi_reduction <add>, %870, %cst_323 [1] : vector<2x32xf32> to vector<2xf32>
    %872 = vector.shape_cast %871 : vector<2xf32> to vector<2x1xf32>
    %cst_324 = arith.constant 3.200000e+01 : f32
    %873 = vector.broadcast %cst_324 : f32 to vector<2x1xf32>
    %874 = arith.divf %872, %873 : vector<2x1xf32>
    %875 = vector.broadcast %867 : vector<2x1xf32> to vector<2x32xf32>
    %876 = arith.subf %861, %875 : vector<2x32xf32>
    %cst_325 = arith.constant 9.99999974E-6 : f32
    %877 = vector.broadcast %cst_325 : f32 to vector<2x1xf32>
    %878 = arith.addf %874, %877 : vector<2x1xf32>
    %879 = math.rsqrt %878 : vector<2x1xf32>
    %880 = vector.broadcast %879 : vector<2x1xf32> to vector<2x32xf32>
    %881 = arith.mulf %876, %880 : vector<2x32xf32>
    %882 = vector.broadcast %862 : vector<1x32xf32> to vector<2x32xf32>
    %883 = arith.mulf %881, %882 : vector<2x32xf32>
    %884 = vector.broadcast %863 : vector<1x32xf32> to vector<2x32xf32>
    %885 = arith.addf %883, %884 : vector<2x32xf32>
    %c0_326 = arith.constant 0 : index
    %c0_327 = arith.constant 0 : index
    %886 = vector.load %arg21[%c0_326, %c0_327] : memref<32x16xf32, #tpu.memory_space<vmem>>, vector<32x16xf32>
    %cst_328 = arith.constant dense<0.000000e+00> : vector<2x16xf32>
    %887 = tpu.matmul %885, %886, %cst_328 {dimension_numbers = #tpu.dot_dimension_numbers<[1], [0], [0], [1], [0, 0, 1, 1], [], []>} : vector<2x32xf32>, vector<32x16xf32>, vector<2x16xf32> -> vector<2x16xf32>
    %888 = arith.mulf %887, %887 : vector<2x16xf32>
    %cst_329 = arith.constant dense<0.000000e+00> : vector<2xf32>
    %889 = vector.multi_reduction <add>, %888, %cst_329 [1] : vector<2x16xf32> to vector<2xf32>
    %890 = vector.shape_cast %889 : vector<2xf32> to vector<2x1xf32>
    %891 = math.sqrt %890 : vector<2x1xf32>
    %892 = vector.broadcast %891 : vector<2x1xf32> to vector<2x16xf32>
    %893 = arith.divf %887, %892 : vector<2x16xf32>
    %894 = arith.mulf %420, %420 : vector<3x16xf32>
    %cst_330 = arith.constant dense<0.000000e+00> : vector<3xf32>
    %895 = vector.multi_reduction <add>, %894, %cst_330 [1] : vector<3x16xf32> to vector<3xf32>
    %896 = vector.shape_cast %895 : vector<3xf32> to vector<3x1xf32>
    %897 = math.sqrt %896 : vector<3x1xf32>
    %898 = vector.broadcast %897 : vector<3x1xf32> to vector<3x16xf32>
    %899 = arith.divf %420, %898 : vector<3x16xf32>
    %cst_331 = arith.constant dense<0.000000e+00> : vector<2x3xf32>
    %900 = tpu.matmul %893, %899, %cst_331 {dimension_numbers = #tpu.dot_dimension_numbers<[1], [1], [0], [0], [0, 0, 1, 0], [], []>} : vector<2x16xf32>, vector<3x16xf32>, vector<2x3xf32> -> vector<2x3xf32>
    %c0_332 = arith.constant 0 : index
    %901 = memref.load %arg1[%c0_332] : memref<1xf32, #tpu.memory_space<smem>>
    %902 = vector.broadcast %901 : f32 to vector<2x3xf32>
    %903 = arith.mulf %902, %900 : vector<2x3xf32>
    %c0_333 = arith.constant 0 : index
    %c0_334 = arith.constant 0 : index
    %904 = vector.load %arg22[%c0_333, %c0_334] : memref<2x3xf32, #tpu.memory_space<vmem>>, vector<2x3xf32>
    tpu.vector_store %arg22[%c0_333, %c0_334], %903 {strides = array<i32>} : memref<2x3xf32, #tpu.memory_space<vmem>>, vector<2x3xf32>,
    return
  }
}

</mosaic_0001>

<bundles_post_ra>
// kernel: custom_clip_forward.1
= control target key start
LH: loop header
LB: loop body
LE: loop exit
PB: predicated region body
PF: predicated region fallthrough
CT: control target
= control target key end

     0   :  { %s14867_s0 = inlined_call_operand.vmem [shape: s32[3], index: 0, kind: input, shape index: {}]   ;;  %s14868_s1 = inlined_call_operand.<no memory space> [shape: f32[1], index: 1, kind: input, shape index: {}]   ;;  %s14869_s2 = inlined_call_operand.vmem [shape: f32[24,32], index: 2, kind: input, shape index: {}]   ;;  %s14870_s3 = inlined_call_operand.vmem [shape: f32[1,2,32], index: 3, kind: input, shape index: {}]   ;;  %s14871_s4 = inlined_call_operand.vmem [shape: f32[2,4,32,32], index: 4, kind: input, shape index: {}]   ;;  %s14872_s5 = inlined_call_operand.vmem [shape: f32[2,32,128], index: 5, kind: input, shape index: {}]   ;;  %s14873_s6 = inlined_call_operand.vmem [shape: f32[2,128,32], index: 6, kind: input, shape index: {}]   ;;  %s14874_s7 = inlined_call_operand.vmem [shape: f32[2,8,128], index: 7, kind: input, shape index: {}]   ;;  %s14875_s8 = inlined_call_operand.vmem [shape: f32[2,32], index: 8, kind: input, shape index: {}]   ;;  %s14876_s9 = inlined_call_operand.vmem [shape: f32[32,16], index: 9, kind: input, shape index: {}]   ;;  %s14877_s10 = inlined_call_operand.vmem [shape: f32[2,4,192], index: 10, kind: input, shape index: {}]   ;;  %s14878_s11 = inlined_call_operand.vmem [shape: f32[192,32], index: 11, kind: input, shape index: {}]   ;;  %s14879_s12 = inlined_call_operand.vmem [shape: f32[5,32], index: 12, kind: input, shape index: {}]   ;;  %s14880_s13 = inlined_call_operand.vmem [shape: f32[2,32], index: 13, kind: input, shape index: {}]   ;;  %s14881_s14 = inlined_call_operand.vmem [shape: f32[2,32,32], index: 14, kind: input, shape index: {}]   ;;  %s14882_s15 = inlined_call_operand.vmem [shape: f32[2,32], index: 15, kind: input, shape index: {}]   ;;  %s14883_s16 = inlined_call_operand.vmem [shape: f32[2,4,32,32], index: 16, kind: input, shape index: {}]   ;;  %s14884_s17 = inlined_call_operand.vmem [shape: f32[2,32,128], index: 17, kind: input, shape index: {}]   ;;  %s14885_s18 = inlined_call_operand.vmem [shape: f32[2,128,32], index: 18, kind: input, shape index: {}]   ;;  %s14886_s19 = inlined_call_operand.vmem [shape: f32[2,8,128], index: 19, kind: input, shape index: {}]   ;;  %s14887_s20 = inlined_call_operand.vmem [shape: f32[4,32], index: 20, kind: input, shape index: {}]   ;;  %s14888_s21 = inlined_call_operand.vmem [shape: f32[32,16], index: 21, kind: input, shape index: {}]   ;;  %s14889_s22 = inlined_call_operand.hbm [shape: f32[2,3], index: 22, kind: output, shape index: {}]  }
   0x1   :  { %14912 = sst [smem:[#allocation10_spill]] %s14867_s0 }
   0x2   :  { %14913 = sst [smem:[#allocation11_spill]] %s14868_s1 }
   0x3   :  { %14914 = sst [smem:[#allocation12_spill]] %s14869_s2 }
   0x4   :  { %14915 = sst [smem:[#allocation13_spill]] %s14870_s3 }
   0x5   :  { %14916 = sst [smem:[#allocation14_spill]] %s14871_s4 }
   0x6   :  { %14917 = sst [smem:[#allocation15_spill]] %s14872_s5 }
   0x7   :  { %14918 = sst [smem:[#allocation16_spill]] %s14873_s6 }
   0x8   :  { %14919 = sst [smem:[#allocation17_spill]] %s14889_s22 }
   0x9   :  { %28 = vsyncpa [#allocation6], 0 }
   0xa   :  { %29 = vsyncpa [#allocation5], 0  ;;  %s14920_s29 = sld [smem:[#allocation10_spill]] }
  0x10   :  { %s36_s30 = sshll.u32 %s14920_s29, 4  ;;  %s37_s30 = int_to_ptr.vmem [resolvable:$true] %s36_s30 }
  0x11   :  { %s12588_s4 = scalar_lea.vmem %s37_s30, 16  ;;  %p12593_p1 = scmp.lt.s32.totalorder %s37_s30, %s37_s30 }
  0x12   :  { %p12589_p0 = scmp.ne.s32.totalorder %s37_s30, %s12588_s4  ;;  %p12594_p2 = scmp.lt.s32.totalorder %s12588_s4, %s12588_s4 }
  0x14   :  { %p12595_p3 = por %p12594_p2, %p12593_p1 }
  0x16   :  { %p12596_p4 = pnand %p12595_p3, %p12589_p0 }
  0x18   :  { %12599 = shalt.err (!%p12596_p4)
}
  0x19   :  { %s12626_s0 = smov [#allocation4]  }
  0x1a   :  { %39 = dma.vmem_to_smem %s37_s30, 16, %s12626_s0, [#allocation6]  }
  0x1b   :  { %12622 = dma.done.wait [#allocation6], 16  }
  0x1c   :  { %12623 = vsyncadd [#allocation6], 4294967280 }
  0x1d   :  { %85 = sfence }
  0x1e   :  { %s14921_s5 = sld [smem:[#allocation12_spill]]  ;;  %vm96_vm0 = vcmask 261120   ;;  %s14922_s3 = sld [smem:[#allocation14_spill]]  ;;  %v12627_v24 = vmov 0.0|0.0   ;;  %vm12628_vm1 = vmmov 0   ;;  %v12629_v30 = vmov 0.0  }
  0x1f   :  { %11959 = vmatprep.subr.bf16.mxu0 %v12627_v24  ;;  %12307 = vmatprep.subr.bf16.mxu1 %v12627_v24  ;;  %v89_v35 = vlaneseq  ;;  %v95_v38 = vld [vmem:[%s14874_s7] sm:$0xff]  ;;  %s14909_s4 = smov 96   ;;  %s14905_s0 = smov 64   ;;  %vm425_vm2 = vcmask 64512   ;;  %vm2457_vm4 = vcmask 130048   ;;  %vm2461_vm5 = vcmask 195584  }
  0x20   :  { %11086 = vmatprep.mubr.msk.f32.mxu0 %vm12628_vm1, %v12629_v30  ;;  %11109 = vmatprep.mubr.msk.f32.mxu1 %vm12628_vm1, %v12629_v30  ;;  %s14907_s28 = smov 120   ;;  %s14897_s29 = smov 112   ;;  %vm5646_vm12 = vcmask 1040384   ;;  %vm5648_vm13 = vcmask 1041408   ;;  %vm5652_vm14 = vcmask 256000   ;;  %vm5951_vm15 = vcmask 523264  }
  0x21   :  { %v12820_v36 = vshrl.u32 %v89_v35, 7  ;;  %s14895_s30 = smov 104   ;;  %s14903_s23 = smov 8  }
  0x22   :  { %s14901_s1 = smov 16   ;;  %s14899_s24 = smov 24  }
  0x23   :  { %v12823_v37 = vsub.s32 4, %v12820_v36  ;;  %v12836_v49 = vsub.s32 0, %v12820_v36  ;;  %v12839_v50 = vsub.s32 1, %v12820_v36  ;;  %s14923_s6 = sld [smem:[#allocation15_spill]]  ;;  %s14925_s25 = sld [smem:[#allocation13_spill]] }
  0x24   :  { %v86_v0 = vld [vmem:[%s14921_s5] sm:$0xff]  ;;  %v88_v1 = vld [vmem:[%s14921_s5 + $0x10] sm:$0xff]  ;;  %v87_v2 = vld [vmem:[%s14921_s5 + $0x8] sm:$0xff]  ;;  %s14927_s27 = smov 104  }
  0x25   :  { %v97_v3 = vsel %vm96_vm0, %v86_v0, 0.0  ;;  %v103_v4 = vsel %vm96_vm0, %v88_v1, 0.0  ;;  %v100_v5 = vsel %vm96_vm0, %v87_v2, 0.0  ;;  %v151_v21 = vld [vmem:[%s14922_s3] sm:$0xff]  ;;  %v152_v22 = vld [vmem:[%s14922_s3 + $0x8] sm:$0xff]  ;;  %v153_v23 = vld [vmem:[%s14922_s3 + $0x10] sm:$0xff]  ;;  %v12829_v39 = vrot.slane %v95_v38, %v12823_v37 }
  0x26   :  { %98 = vadd.xlane.f32.xlu0 %v97_v3  ;;  %104 = vadd.xlane.f32.xlu1 %v103_v4  ;;  %v11960_v25 = vpack.c.bf16 %v152_v22, %v151_v21  ;;  %v154_v26 = vld [vmem:[%s14922_s3 + $0x18] sm:$0xff]  ;;  %v10394_v27 = vld [vmem:[%s14922_s3 + $0x20] sm:$0xff]  ;;  %v10395_v28 = vld [vmem:[%s14922_s3 + $0x28] sm:$0xff]  ;;  %v140_v51 = vrot.slane %v95_v38, %v12836_v49  ;;  %v147_v54 = vrot.slane %v95_v38, %v12839_v50 }
  0x27   :  { %v11966_v29 = vpack.c.bf16 %v10395_v28, %v10394_v27  ;;  %v11963_v31 = vpack.c.bf16 %v154_v26, %v153_v23  ;;  %v10396_v32 = vld [vmem:[%s14922_s3 + $0x30] sm:$0xff]  ;;  %v10397_v33 = vld [vmem:[%s14922_s3 + $0x38] sm:$0xff] }
  0x28   :  { %11961 = vmatpush3.bf16.msra.mxu0 %v11960_v25  ;;  %v11969_v34 = vpack.c.bf16 %v10397_v33, %v10396_v32  ;;  %v10403_v4 = vld [vmem:[%s14922_s3 + $0x50] sm:$0xff] }
  0x29   :  { %11962 = vmatprep.subr.bf16.mxu0 %v12627_v24  ;;  %12309 = vmatpush3.bf16.msra.mxu1 %v11966_v29 }
  0x2a   :  { %101 = vadd.xlane.f32.xlu0 %v100_v5  ;;  %12308 = vmatprep.subr.bf16.mxu1 %v12627_v24  ;;  %v10404_v5 = vld [vmem:[%s14922_s3 + $0x58] sm:$0xff] }
  0x2c   :  { %11964 = vmatpush3.bf16.msra.mxu0 %v11963_v31 }
  0x2d   :  { %11965 = vmatprep.subr.bf16.mxu0 %v12627_v24  ;;  %12310 = vmatpush3.bf16.msra.mxu1 %v11969_v34 }
  0x2e   :  { %11129 = vmatprep.subr.mxu1 %v12629_v30 }
  0xb3   :  { %v99_v6 = vpop.xlane.xlu0 %98  ;;  %v105_v7 = vpop.xlane.xlu1 %104 }
  0xb4   :  { %v107_v8 = vmul.f32 0.03125, %v99_v6  ;;  %v109_v9 = vmul.f32 0.03125, %v105_v7  ;;  %v11975_v6 = vpack.c.bf16 %v10404_v5, %v10403_v4 }
  0xb6   :  { %v12770_v10 = vsub.f32 %v86_v0, %v107_v8  ;;  %v12772_v11 = vsub.f32 %v88_v1, %v109_v9  ;;  %v10401_v1 = vld [vmem:[%s14922_s3 + $0x40] sm:$0xff] }
  0xb7   :  { %v102_v12 = vpop.xlane.xlu0 %101 }
  0xb8   :  { %v108_v13 = vmul.f32 0.03125, %v102_v12  ;;  %v113_v14 = vmul.f32 %v12770_v10, %v12770_v10  ;;  %v115_v15 = vmul.f32 %v12772_v11, %v12772_v11 }
  0xba   :  { %v12778_v16 = vsub.f32 %v87_v2, %v108_v13  ;;  %v116_v17 = vsel %vm96_vm0, %v113_v14, 0.0  ;;  %v122_v18 = vsel %vm96_vm0, %v115_v15, 0.0  ;;  %v10402_v2 = vld [vmem:[%s14922_s3 + $0x48] sm:$0xff] }
  0xbb   :  { %117 = vadd.xlane.f32.xlu1 %v116_v17  ;;  %v11972_v3 = vpack.c.bf16 %v10402_v2, %v10401_v1 }
  0xbc   :  { %v114_v19 = vmul.f32 %v12778_v16, %v12778_v16 }
  0xbe   :  { %v119_v20 = vsel %vm96_vm0, %v114_v19, 0.0 }
  0xbf   :  { %123 = vadd.xlane.f32.xlu1 %v122_v18  ;;  %120 = vadd.xlane.f32.xlu0 %v119_v20 }
  0xd5   :  { %254 = vrot.lane.b32.xlu0 %v12829_v39, %s14909_s4 }
  0xd9   :  { %342 = vrot.lane.b32.xlu0 %v12829_v39, %s14905_s0 }
 0x148   :  { %v118_v40 = vpop.xlane.xlu1 %117 }
 0x149   :  { %v125_v41 = vmul.f32 0.03125, %v118_v40  ;;  %v12946_v40 = vand.u32 127, %v89_v35 }
 0x14b   :  { %v128_v42 = vadd.f32 1e-05, %v125_v41  ;;  %vm93_vm3 = vcmp.le.s32.totalorder %v12946_v40, %v12820_v36  ;;  %v12633_v41 = vmov -1e+30  }
 0x14c   :  { %v124_v43 = vpop.xlane.xlu1 %123  ;;  %v121_v44 = vpop.xlane.xlu0 %120 }
 0x14d   :  { %12327 = vrsqrt.f32 %v128_v42  ;;  %v127_v45 = vmul.f32 0.03125, %v124_v43  ;;  %v126_v46 = vmul.f32 0.03125, %v121_v44  ;;  %v12951_v42 = vsel %vm93_vm3, 0.0, %v12633_v41 }
 0x14e   :  { %vm6031_vm3 = vcmask 1044480  }
 0x14f   :  { %v130_v47 = vadd.f32 1e-05, %v127_v45  ;;  %v129_v48 = vadd.f32 1e-05, %v126_v46 }
 0x151   :  { %12329 = vrsqrt.f32 %v130_v47 }
 0x152   :  { %12331 = vrsqrt.f32 %v129_v48 }
 0x157   :  { %v12328_v52 = vpop.eup %12327 }
 0x158   :  { %v134_v53 = vmul.f32 %v12328_v52, %v12770_v10 }
 0x15a   :  { %v141_v55 = vmul.f32 %v140_v51, %v134_v53 }
 0x15b   :  { %v12330_v56 = vpop.eup %12329 }
 0x15c   :  { %v12332_v57 = vpop.eup %12331  ;;  %v148_v58 = vadd.f32 %v147_v54, %v141_v55  ;;  %v136_v59 = vmul.f32 %v12330_v56, %v12772_v11 }
 0x15d   :  { %v135_v60 = vmul.f32 %v12332_v57, %v12778_v16  ;;  %v255_v16 = vpop.permute.xlu0 %254 }
 0x15e   :  { %11087 = vmatmul.mubr.msk.f32.vlgmr.msra.gmra.mrb[0].mxu0 %vm96_vm0, %v148_v58  ;;  %v143_v61 = vmul.f32 %v140_v51, %v136_v59 }
 0x15f   :  { %11089 = vmatprep.mubr.msk.f32.mxu0 %vm12628_vm1, %v12629_v30  ;;  %v142_v62 = vmul.f32 %v140_v51, %v135_v60  ;;  %11967 = vmatpush3.bf16.msra.mxu0 %v11966_v29 }
 0x160   :  { %v150_v63 = vadd.f32 %v147_v54, %v143_v61  ;;  %11968 = vmatprep.subr.bf16.mxu0 %v12627_v24 }
 0x161   :  { %v149_v0 = vadd.f32 %v147_v54, %v142_v62  ;;  %v12903_v23 = vpop.permute.xlu0 %342 }
 0x162   :  { %11110 = vmatmul.mubr.msk.f32.vlgmr.msra.gmra.mrb[0].mxu1 %vm96_vm0, %v150_v63 }
 0x163   :  { %11090 = vmatmul.mubr.msk.f32.gmra.mrb[2].mxu0 %vm96_vm0, %v149_v0  ;;  %11131 = vmatprep.mubr.msk.f32.mxu1 %vm12628_vm1, %v12629_v30 }
 0x164   :  { %11092 = vmatprep.mubr.msk.f32.mxu0 %vm12628_vm1, %v12629_v30  ;;  %11970 = vmatpush3.bf16.msra.mxu0 %v11969_v34 }
 0x165   :  { %11971 = vmatprep.subr.bf16.mxu0 %v12627_v24 }
 0x167   :  { %11093 = vmatmul.mubr.msk.f32.gmra.mrb[4].mxu0 %vm96_vm0, %v150_v63 }
 0x168   :  { %11103 = vmatprep.mubr.msk.f32.mxu0 %vm12628_vm1, %v12629_v30 }
 0x16b   :  { %11104 = vmatmul.mubr.msk.f32.vlgmr.msra.gmra.mrb[6].mxu0 %vm96_vm0, %v148_v58 }
 0x16c   :  { %11973 = vmatpush3.bf16.msra.mxu0 %v11972_v3  ;;  %11106 = vmatprep.mubr.msk.f32.mxu0 %vm12628_vm1, %v12629_v30 }
 0x16d   :  { %11974 = vmatprep.subr.bf16.mxu0 %v12627_v24 }
 0x16f   :  { %11107 = vmatmul.mubr.msk.f32.gmra.mrb[8].mxu0 %vm96_vm0, %v149_v0 }
 0x170   :  { %11976 = vmatpush3.bf16.msra.mxu0 %v11975_v6  ;;  %11120 = vmatprep.mubr.msk.f32.mxu0 %vm12628_vm1, %v12629_v30 }
 0x171   :  { %11144 = vmatprep.subr.mxu0 %v12629_v30 }
 0x173   :  { %11121 = vmatmul.mubr.msk.f32.vlgmr.msra.gmra.mrb[10].mxu0 %vm96_vm0, %v148_v58 }
 0x174   :  { %11123 = vmatprep.mubr.msk.f32.mxu0 %vm12628_vm1, %v12629_v30 }
 0x177   :  { %11124 = vmatmul.mubr.msk.f32.gmra.mrb[12].mxu0 %vm96_vm0, %v149_v0 }
 0x178   :  { %11126 = vmatprep.mubr.msk.f32.mxu0 %vm12628_vm1, %v12629_v30 }
 0x17b   :  { %11127 = vmatmul.mubr.msk.f32.gmra.mrb[14].mxu0 %vm96_vm0, %v150_v63 }
 0x17c   :  { %11146 = vmatprep.mubr.msk.f32.mxu0 %vm12628_vm1, %v12629_v30 }
 0x231   :  { %v234_v7 = vpop.f32.mrb[0].mxu0 }
 0x232   :  { %v12890_v8 = vadd.f32 %v234_v7, %v12829_v39  ;;  %v11088_v9 = vpop.f32.mrb[1].mxu0 }
 0x234   :  { %912 = vrot.lane.b32.xlu0 %v12890_v8, %s14907_s28 }
 0x235   :  { %v333_v10 = vpop.f32.mrb[0].mxu1 }
 0x236   :  { %v239_v11 = vpop.f32.mrb[2].mxu0  ;;  %v11111_v12 = vpop.f32.mrb[1].mxu1  ;;  %v12915_v27 = vadd.f32 %v333_v10, %v255_v16 }
 0x237   :  { %v11091_v13 = vpop.f32.mrb[3].mxu0  ;;  %v12910_v25 = vadd.f32 %v239_v11, %v12829_v39 }
 0x23a   :  { %v244_v14 = vpop.f32.mrb[4].mxu0 }
 0x23b   :  { %v11094_v15 = vpop.f32.mrb[5].mxu0  ;;  %v12927_v31 = vadd.f32 %v244_v14, %v12829_v39 }
 0x23e   :  { %v323_v17 = vpop.f32.mrb[6].mxu0 }
 0x23f   :  { %v12894_v18 = vadd.f32 %v323_v17, %v255_v16  ;;  %v11105_v19 = vpop.f32.mrb[7].mxu0 }
 0x241   :  { %11130 = vmatpush3.xpose.msk.msra.mxu1 %vm425_vm2, %v12894_v18 }
 0x242   :  { %v328_v20 = vpop.f32.mrb[8].mxu0  ;;  %11134 = vmatprep.subr.mxu1 %v12629_v30 }
 0x243   :  { %v12899_v21 = vadd.f32 %v328_v20, %v255_v16  ;;  %v11108_v22 = vpop.f32.mrb[9].mxu0 }
 0x244   :  { %11132 = vmatmul.mubr.msk.f32.vlgmr.msra.gmra.mrb[2].mxu1 %vm425_vm2, %v12890_v8 }
 0x245   :  { %992 = vrot.lane.b32.xlu0 %v12899_v21, %s14907_s28  ;;  %11135 = vmatpush3.xpose.msk.msra.mxu1 %vm425_vm2, %v12899_v21 }
 0x246   :  { %v411_v26 = vpop.f32.mrb[10].mxu0  ;;  %11136 = vmatprep.mubr.msk.f32.mxu1 %vm12628_vm1, %v12629_v30  ;;  %11139 = vmatprep.subr.mxu1 %v12629_v30 }
 0x247   :  { %v12918_v28 = vadd.f32 %v411_v26, %v12903_v23  ;;  %v11122_v29 = vpop.f32.mrb[11].mxu0 }
 0x248   :  { %11137 = vmatmul.mubr.msk.f32.vlgmr.msra.gmra.mrb[4].mxu1 %vm425_vm2, %v12910_v25 }
 0x249   :  { %1070 = vrot.lane.b32.xlu0 %v12915_v27, %s14907_s28  ;;  %11140 = vmatpush3.xpose.msk.msra.mxu1 %vm425_vm2, %v12915_v27 }
 0x24a   :  { %11145 = vmatpush3.msra.mxu0 %v12918_v28  ;;  %v416_v32 = vpop.f32.mrb[12].mxu0  ;;  %11141 = vmatprep.mubr.msk.f32.mxu1 %vm12628_vm1, %v12629_v30 }
 0x24b   :  { %v12933_v33 = vadd.f32 %v416_v32, %v12903_v23  ;;  %v11125_v34 = vpop.f32.mrb[13].mxu0  ;;  %11149 = vmatprep.subr.mxu1 %v12629_v30  ;;  %11154 = vmatprep.subr.mxu0 %v12629_v30 }
 0x24c   :  { %11142 = vmatmul.mubr.msk.f32.vlgmr.msra.gmra.mrb[6].mxu1 %vm425_vm2, %v12927_v31 }
 0x24d   :  { %990 = vrot.lane.b32.xlu0 %v12910_v25, %s14907_s28  ;;  %11150 = vmatpush3.msra.mxu1 %v12933_v33 }
 0x24e   :  { %v421_v38 = vpop.f32.mrb[14].mxu0  ;;  %11151 = vmatprep.mubr.msk.f32.mxu1 %vm12628_vm1, %v12629_v30  ;;  %11159 = vmatprep.subr.mxu1 %v12629_v30 }
 0x24f   :  { %v11128_v39 = vpop.f32.mrb[15].mxu0  ;;  %v12967_v19 = vadd.f32 %v421_v38, %v12903_v23 }
 0x2a6   :  { %v913_v15 = vpop.permute.xlu0 %912 }
 0x2b7   :  { %v993_v20 = vpop.permute.xlu0 %992 }
 0x2bb   :  { %v1071_v32 = vpop.permute.xlu0 %1070 }
 0x2bf   :  { %v991_v34 = vpop.permute.xlu0 %990 }
 0x317   :  { %v498_v43 = vpop.f32.mrb[2].mxu1 }
 0x318   :  { %v654_v44 = vmul.f32 0.35355338, %v498_v43  ;;  %v11133_v45 = vpop.f32.mrb[3].mxu1 }
 0x31a   :  { %v657_v46 = vadd.f32 %v654_v44, %v12951_v42 }
 0x31b   :  { %v574_v47 = vpop.f32.mrb[4].mxu1 }
 0x31c   :  { %v655_v48 = vmul.f32 0.35355338, %v574_v47  ;;  %v11138_v51 = vpop.f32.mrb[5].mxu1  ;;  %v660_v52 = vsel %vm425_vm2, %v657_v46, -inf }
 0x31d   :  { %661 = vmax.xlane.f32.xlu1 %v660_v52 }
 0x31e   :  { %v658_v35 = vadd.f32 %v655_v48, %v12951_v42 }
 0x31f   :  { %v650_v53 = vpop.f32.mrb[6].mxu1 }
 0x320   :  { %v656_v54 = vmul.f32 0.35355338, %v650_v53  ;;  %v11143_v55 = vpop.f32.mrb[7].mxu1  ;;  %v663_v56 = vsel %vm425_vm2, %v658_v35, -inf }
 0x321   :  { %664 = vmax.xlane.f32.xlu1 %v663_v56 }
 0x322   :  { %v659_v57 = vadd.f32 %v656_v54, %v12951_v42 }
 0x324   :  { %v666_v58 = vsel %vm425_vm2, %v659_v57, -inf }
 0x325   :  { %667 = vmax.xlane.f32.xlu1 %v666_v58 }
 0x336   :  { %914 = vrot.lane.b32.xlu1 %v12894_v18, %s14907_s28 }
 0x3aa   :  { %v662_v59 = vpop.xlane.xlu1 %661 }
 0x3ab   :  { %v669_v60 = vsub.f32 %v657_v46, %v662_v59 }
 0x3ad   :  { %v672_v61 = vmul.f32 1.442695, %v669_v60 }
 0x3ae   :  { %v665_v62 = vpop.xlane.xlu1 %664 }
 0x3af   :  { %12333 = vpow2.f32 %v672_v61  ;;  %v670_v63 = vsub.f32 %v658_v35, %v665_v62 }
 0x3b1   :  { %v674_v0 = vmul.f32 1.442695, %v670_v63 }
 0x3b2   :  { %v668_v1 = vpop.xlane.xlu1 %667 }
 0x3b3   :  { %12335 = vpow2.f32 %v674_v0  ;;  %v671_v2 = vsub.f32 %v659_v57, %v668_v1 }
 0x3b5   :  { %v676_v3 = vmul.f32 1.442695, %v671_v2 }
 0x3b6   :  { %v915_v11 = vpop.permute.xlu1 %914 }
 0x3b7   :  { %12337 = vpow2.f32 %v676_v3 }
 0x3b9   :  { %v12334_v4 = vpop.eup %12333 }
 0x3ba   :  { %v678_v5 = vsel %vm425_vm2, %v12334_v4, 0.0 }
 0x3bb   :  { %679 = vadd.xlane.f32.xlu1 %v678_v5 }
 0x3bd   :  { %v12336_v6 = vpop.eup %12335 }
 0x3be   :  { %v681_v7 = vsel %vm425_vm2, %v12336_v6, 0.0 }
 0x3bf   :  { %682 = vadd.xlane.f32.xlu1 %v681_v7 }
 0x3c1   :  { %v12338_v9 = vpop.eup %12337 }
 0x3c2   :  { %v684_v10 = vsel %vm425_vm2, %v12338_v9, 0.0 }
 0x3c3   :  { %685 = vadd.xlane.f32.xlu1 %v684_v10 }
 0x3d4   :  { %1068 = vrot.lane.b32.xlu1 %v12927_v31, %s14907_s28 }
 0x448   :  { %v680_v12 = vpop.xlane.xlu1 %679 }
 0x449   :  { %12339 = vrcp.f32 %v680_v12 }
 0x44c   :  { %v683_v13 = vpop.xlane.xlu1 %682 }
 0x44d   :  { %12341 = vrcp.f32 %v683_v13 }
 0x450   :  { %v686_v14 = vpop.xlane.xlu1 %685 }
 0x451   :  { %12343 = vrcp.f32 %v686_v14 }
 0x453   :  { %v12340_v16 = vpop.eup %12339 }
 0x454   :  { %v688_v17 = vmul.f32 %v12340_v16, %v12334_v4  ;;  %v1069_v38 = vpop.permute.xlu1 %1068 }
 0x456   :  { %11147 = vmatmul.mubr.msk.f32.vlgmr.msra.gmra.mrb[16].mxu0 %vm425_vm2, %v688_v17 }
 0x457   :  { %v12342_v22 = vpop.eup %12341  ;;  %11155 = vmatpush3.msra.mxu0 %v12967_v19  ;;  %11156 = vmatprep.mubr.msk.f32.mxu0 %vm12628_vm1, %v12629_v30 }
 0x458   :  { %v690_v26 = vmul.f32 %v12342_v22, %v12336_v6  ;;  %11164 = vmatprep.subr.mxu0 %v12629_v30 }
 0x45a   :  { %11152 = vmatmul.mubr.msk.f32.vlgmr.msra.gmra.mrb[8].mxu1 %vm425_vm2, %v690_v26 }
 0x45b   :  { %v12344_v29 = vpop.eup %12343  ;;  %11160 = vmatpush3.xpose.msk.msra.mxu1 %vm425_vm2, %v915_v11  ;;  %11161 = vmatprep.mubr.msk.f32.mxu1 %vm12628_vm1, %v12629_v30 }
 0x45c   :  { %11169 = vmatprep.subr.mxu1 %v12629_v30  ;;  %v692_v23 = vmul.f32 %v12344_v29, %v12338_v9 }
 0x45e   :  { %11157 = vmatmul.mubr.msk.f32.vlgmr.msra.gmra.mrb[18].mxu0 %vm425_vm2, %v692_v23  ;;  %11162 = vmatmul.mubr.msk.f32.vlgmr.msra.gmra.mrb[10].mxu1 %vm425_vm2, %v913_v15 }
 0x45f   :  { %11165 = vmatpush3.xpose.msk.msra.mxu0 %vm425_vm2, %v993_v20  ;;  %11170 = vmatpush3.xpose.msk.msra.mxu1 %vm425_vm2, %v1071_v32 }
 0x460   :  { %11166 = vmatprep.mubr.msk.f32.mxu0 %vm12628_vm1, %v12629_v30  ;;  %11171 = vmatprep.mubr.msk.f32.mxu1 %vm12628_vm1, %v12629_v30 }
 0x461   :  { %11174 = vmatprep.subr.mxu0 %v12629_v30  ;;  %11179 = vmatprep.subr.mxu1 %v12629_v30 }
 0x462   :  { %11167 = vmatmul.mubr.msk.f32.vlgmr.msra.gmra.mrb[20].mxu0 %vm425_vm2, %v991_v34  ;;  %11172 = vmatmul.mubr.msk.f32.vlgmr.msra.gmra.mrb[12].mxu1 %vm425_vm2, %v1069_v38 }
 0x463   :  { %11176 = vmatprep.mubr.msk.f32.mxu0 %vm12628_vm1, %v12629_v30  ;;  %11181 = vmatprep.mubr.msk.f32.mxu1 %vm12628_vm1, %v12629_v30 }
 0x529   :  { %v12995_v39 = vpop.f32.mrb[16].mxu0 }
 0x52a   :  { %v11148_v43 = vpop.f32.mrb[17].mxu0 }
 0x52d   :  { %v12997_v44 = vpop.f32.mrb[8].mxu1 }
 0x52e   :  { %v11153_v45 = vpop.f32.mrb[9].mxu1 }
 0x531   :  { %v12999_v46 = vpop.f32.mrb[18].mxu0  ;;  %v986_v47 = vpop.f32.mrb[10].mxu1 }
 0x532   :  { %v1146_v48 = vmul.f32 0.35355338, %v986_v47  ;;  %v11158_v51 = vpop.f32.mrb[19].mxu0  ;;  %v11163_v52 = vpop.f32.mrb[11].mxu1 }
 0x534   :  { %v1149_v35 = vadd.f32 %v1146_v48, %v12951_v42 }
 0x535   :  { %v1064_v53 = vpop.f32.mrb[20].mxu0  ;;  %v1142_v54 = vpop.f32.mrb[12].mxu1 }
 0x536   :  { %v1147_v55 = vmul.f32 0.35355338, %v1064_v53  ;;  %v1148_v56 = vmul.f32 0.35355338, %v1142_v54  ;;  %v11168_v57 = vpop.f32.mrb[21].mxu0  ;;  %v11173_v58 = vpop.f32.mrb[13].mxu1 }
 0x537   :  { %v1152_v59 = vsel %vm425_vm2, %v1149_v35, -inf }
 0x538   :  { %1153 = vmax.xlane.f32.xlu0 %v1152_v59  ;;  %v1151_v60 = vadd.f32 %v1148_v56, %v12951_v42  ;;  %v1150_v61 = vadd.f32 %v1147_v55, %v12951_v42 }
 0x53a   :  { %v1158_v62 = vsel %vm425_vm2, %v1151_v60, -inf  ;;  %v1155_v63 = vsel %vm425_vm2, %v1150_v61, -inf }
 0x53b   :  { %1156 = vmax.xlane.f32.xlu1 %v1155_v63 }
 0x53c   :  { %1159 = vmax.xlane.f32.xlu0 %v1158_v62 }
 0x54c   :  { %1263 = vrot.lane.b32.xlu1 %v12933_v33, %s14907_s28 }
 0x550   :  { %1340 = vrot.lane.b32.xlu1 %v12967_v19, %s14907_s28 }
 0x552   :  { %1186 = vrot.lane.b32.xlu0 %v12918_v28, %s14907_s28 }
 0x554   :  { %1418 = vrot.lane.b32.xlu1 %v12894_v18, %s14897_s29 }
 0x558   :  { %1416 = vrot.lane.b32.xlu1 %v12890_v8, %s14897_s29 }
 0x5c5   :  { %v1154_v0 = vpop.xlane.xlu0 %1153 }
 0x5c6   :  { %v1161_v1 = vsub.f32 %v1149_v35, %v1154_v0 }
 0x5c8   :  { %v1164_v2 = vmul.f32 1.442695, %v1161_v1  ;;  %v1157_v3 = vpop.xlane.xlu1 %1156 }
 0x5c9   :  { %v1162_v4 = vsub.f32 %v1150_v61, %v1157_v3  ;;  %v1160_v5 = vpop.xlane.xlu0 %1159 }
 0x5ca   :  { %12345 = vpow2.f32 %v1164_v2  ;;  %v1163_v6 = vsub.f32 %v1151_v60, %v1160_v5 }
 0x5cb   :  { %v1166_v7 = vmul.f32 1.442695, %v1162_v4 }
 0x5cc   :  { %v1168_v9 = vmul.f32 1.442695, %v1163_v6  ;;  %v1264_v10 = vpop.permute.xlu1 %1263 }
 0x5cd   :  { %12347 = vpow2.f32 %v1166_v7  ;;  %v1187_v11 = vpop.permute.xlu0 %1186  ;;  %11180 = vmatpush3.msra.mxu1 %v1264_v10 }
 0x5ce   :  { %12349 = vpow2.f32 %v1168_v9  ;;  %11175 = vmatpush3.msra.mxu0 %v1187_v11  ;;  %11189 = vmatprep.subr.mxu1 %v12629_v30 }
 0x5cf   :  { %11184 = vmatprep.subr.mxu0 %v12629_v30 }
 0x5d0   :  { %v1341_v20 = vpop.permute.xlu1 %1340 }
 0x5d4   :  { %v12346_v12 = vpop.eup %12345  ;;  %v1419_v22 = vpop.permute.xlu1 %1418 }
 0x5d5   :  { %v1170_v13 = vsel %vm425_vm2, %v12346_v12, 0.0 }
 0x5d6   :  { %1171 = vadd.xlane.f32.xlu0 %v1170_v13 }
 0x5d7   :  { %v12348_v14 = vpop.eup %12347 }
 0x5d8   :  { %v12350_v15 = vpop.eup %12349  ;;  %v1173_v16 = vsel %vm425_vm2, %v12348_v14, 0.0  ;;  %v1417_v26 = vpop.permute.xlu1 %1416 }
 0x5d9   :  { %v1176_v17 = vsel %vm425_vm2, %v12350_v15, 0.0 }
 0x5da   :  { %1174 = vadd.xlane.f32.xlu0 %v1173_v16  ;;  %1177 = vadd.xlane.f32.xlu1 %v1176_v17 }
 0x5eb   :  { %1574 = vrot.lane.b32.xlu1 %v12915_v27, %s14897_s29 }
 0x5f0   :  { %1496 = vrot.lane.b32.xlu0 %v12899_v21, %s14897_s29 }
 0x5f4   :  { %1494 = vrot.lane.b32.xlu0 %v12910_v25, %s14897_s29 }
 0x5f8   :  { %1572 = vrot.lane.b32.xlu0 %v12927_v31, %s14897_s29 }
 0x663   :  { %v1172_v29 = vpop.xlane.xlu0 %1171 }
 0x664   :  { %12351 = vrcp.f32 %v1172_v29 }
 0x667   :  { %v1178_v32 = vpop.xlane.xlu1 %1177  ;;  %v1175_v23 = vpop.xlane.xlu0 %1174 }
 0x668   :  { %12353 = vrcp.f32 %v1178_v32 }
 0x669   :  { %12355 = vrcp.f32 %v1175_v23 }
 0x66b   :  { %v1497_v43 = vpop.permute.xlu0 %1496  ;;  %v1575_v35 = vpop.permute.xlu1 %1574 }
 0x66e   :  { %v12352_v34 = vpop.eup %12351 }
 0x66f   :  { %v1180_v38 = vmul.f32 %v12352_v34, %v12346_v12  ;;  %v1495_v52 = vpop.permute.xlu0 %1494 }
 0x671   :  { %11177 = vmatmul.mubr.msk.f32.vlgmr.msra.gmra.mrb[22].mxu0 %vm425_vm2, %v1180_v38 }
 0x672   :  { %v12354_v45 = vpop.eup %12353  ;;  %11185 = vmatpush3.msra.mxu0 %v1341_v20  ;;  %11186 = vmatprep.mubr.msk.f32.mxu0 %vm12628_vm1, %v12629_v30 }
 0x673   :  { %v12356_v47 = vpop.eup %12355  ;;  %v1184_v48 = vmul.f32 %v12354_v45, %v12350_v15  ;;  %11194 = vmatprep.subr.mxu0 %v12629_v30  ;;  %v1573_v53 = vpop.permute.xlu0 %1572 }
 0x674   :  { %v1182_v51 = vmul.f32 %v12356_v47, %v12348_v14 }
 0x675   :  { %11187 = vmatmul.mubr.msk.f32.vlgmr.msra.gmra.mrb[24].mxu0 %vm425_vm2, %v1184_v48 }
 0x676   :  { %11182 = vmatmul.mubr.msk.f32.vlgmr.msra.gmra.mrb[14].mxu1 %vm425_vm2, %v1182_v51  ;;  %11196 = vmatprep.mubr.msk.f32.mxu0 %vm12628_vm1, %v12629_v30 }
 0x677   :  { %11190 = vmatpush3.xpose.msk.msra.mxu1 %vm425_vm2, %v1419_v22  ;;  %11191 = vmatprep.mubr.msk.f32.mxu1 %vm12628_vm1, %v12629_v30 }
 0x678   :  { %11199 = vmatprep.subr.mxu1 %v12629_v30 }
 0x679   :  { %11195 = vmatpush3.xpose.msk.msra.mxu0 %vm425_vm2, %v1497_v43 }
 0x67a   :  { %11192 = vmatmul.mubr.msk.f32.vlgmr.msra.gmra.mrb[16].mxu1 %vm425_vm2, %v1417_v26  ;;  %11204 = vmatprep.subr.mxu0 %v12629_v30 }
 0x67b   :  { %11200 = vmatpush3.xpose.msk.msra.mxu1 %vm425_vm2, %v1575_v35  ;;  %11201 = vmatprep.mubr.msk.f32.mxu1 %vm12628_vm1, %v12629_v30 }
 0x67c   :  { %11197 = vmatmul.mubr.msk.f32.vlgmr.msra.gmra.mrb[26].mxu0 %vm425_vm2, %v1495_v52  ;;  %11209 = vmatprep.subr.mxu1 %v12629_v30 }
 0x67d   :  { %11206 = vmatprep.mubr.msk.f32.mxu0 %vm12628_vm1, %v12629_v30 }
 0x67e   :  { %11202 = vmatmul.mubr.msk.f32.vlgmr.msra.gmra.mrb[18].mxu1 %vm425_vm2, %v1573_v53 }
 0x67f   :  { %11211 = vmatprep.mubr.msk.f32.mxu1 %vm12628_vm1, %v12629_v30 }
 0x744   :  { %v13055_v54 = vpop.f32.mrb[22].mxu0 }
 0x745   :  { %v11178_v55 = vpop.f32.mrb[23].mxu0 }
 0x748   :  { %v13057_v56 = vpop.f32.mrb[24].mxu0 }
 0x749   :  { %v13059_v57 = vpop.f32.mrb[14].mxu1  ;;  %v11188_v58 = vpop.f32.mrb[25].mxu0 }
 0x74a   :  { %v11183_v59 = vpop.f32.mrb[15].mxu1 }
 0x74d   :  { %v1490_v60 = vpop.f32.mrb[16].mxu1 }
 0x74e   :  { %v1650_v61 = vmul.f32 0.35355338, %v1490_v60  ;;  %v11193_v62 = vpop.f32.mrb[17].mxu1 }
 0x74f   :  { %v1568_v63 = vpop.f32.mrb[26].mxu0 }
 0x750   :  { %v1651_v0 = vmul.f32 0.35355338, %v1568_v63  ;;  %v11198_v1 = vpop.f32.mrb[27].mxu0  ;;  %v1653_v2 = vadd.f32 %v1650_v61, %v12951_v42 }
 0x751   :  { %v1646_v3 = vpop.f32.mrb[18].mxu1 }
 0x752   :  { %v1652_v4 = vmul.f32 0.35355338, %v1646_v3  ;;  %v11203_v5 = vpop.f32.mrb[19].mxu1  ;;  %v1656_v6 = vsel %vm425_vm2, %v1653_v2, -inf  ;;  %v1654_v7 = vadd.f32 %v1651_v0, %v12951_v42 }
 0x753   :  { %1657 = vmax.xlane.f32.xlu1 %v1656_v6 }
 0x754   :  { %v1659_v9 = vsel %vm425_vm2, %v1654_v7, -inf  ;;  %v1655_v10 = vadd.f32 %v1652_v4, %v12951_v42 }
 0x755   :  { %1660 = vmax.xlane.f32.xlu0 %v1659_v9 }
 0x756   :  { %v1662_v11 = vsel %vm425_vm2, %v1655_v10, -inf }
 0x759   :  { %1663 = vmax.xlane.f32.xlu0 %v1662_v11 }
 0x764   :  { %1765 = vrot.lane.b32.xlu1 %v12933_v33, %s14897_s29 }
 0x768   :  { %1841 = vrot.lane.b32.xlu1 %v12967_v19, %s14897_s29 }
 0x76c   :  { %1919 = vrot.lane.b32.xlu1 %v12894_v18, %s14895_s30 }
 0x76f   :  { %1689 = vrot.lane.b32.xlu0 %v12918_v28, %s14897_s29  ;;  %s14929_s29 = smov 16  }
 0x770   :  { %1917 = vrot.lane.b32.xlu1 %v12890_v8, %s14895_s30 }
 0x7e0   :  { %v1658_v12 = vpop.xlane.xlu1 %1657 }
 0x7e1   :  { %v1665_v13 = vsub.f32 %v1653_v2, %v1658_v12 }
 0x7e2   :  { %v1661_v14 = vpop.xlane.xlu0 %1660 }
 0x7e3   :  { %v1668_v15 = vmul.f32 1.442695, %v1665_v13  ;;  %v1666_v16 = vsub.f32 %v1654_v7, %v1661_v14 }
 0x7e4   :  { %v1766_v17 = vpop.permute.xlu1 %1765 }
 0x7e5   :  { %12357 = vpow2.f32 %v1668_v15  ;;  %v1670_v20 = vmul.f32 1.442695, %v1666_v16  ;;  %11210 = vmatpush3.msra.mxu1 %v1766_v17 }
 0x7e6   :  { %v1664_v22 = vpop.xlane.xlu0 %1663  ;;  %11219 = vmatprep.subr.mxu1 %v12629_v30 }
 0x7e7   :  { %12359 = vpow2.f32 %v1670_v20  ;;  %v1667_v18 = vsub.f32 %v1655_v10, %v1664_v22 }
 0x7e8   :  { %v1842_v45 = vpop.permute.xlu1 %1841 }
 0x7e9   :  { %v1672_v26 = vmul.f32 1.442695, %v1667_v18 }
 0x7ea   :  { %v1690_v29 = vpop.permute.xlu0 %1689 }
 0x7eb   :  { %12361 = vpow2.f32 %v1672_v26  ;;  %11205 = vmatpush3.msra.mxu0 %v1690_v29 }
 0x7ec   :  { %11214 = vmatprep.subr.mxu0 %v12629_v30  ;;  %v1920_v47 = vpop.permute.xlu1 %1919 }
 0x7ef   :  { %v12358_v8 = vpop.eup %12357 }
 0x7f0   :  { %v1674_v32 = vsel %vm425_vm2, %v12358_v8, 0.0  ;;  %v1918_v48 = vpop.permute.xlu1 %1917 }
 0x7f1   :  { %v12360_v23 = vpop.eup %12359  ;;  %1675 = vadd.xlane.f32.xlu0 %v1674_v32 }
 0x7f2   :  { %v1677_v34 = vsel %vm425_vm2, %v12360_v23, 0.0 }
 0x7f3   :  { %1678 = vadd.xlane.f32.xlu1 %v1677_v34 }
 0x7f5   :  { %v12362_v38 = vpop.eup %12361 }
 0x7f6   :  { %v1680_v43 = vsel %vm425_vm2, %v12362_v38, 0.0 }
 0x7f7   :  { %1681 = vadd.xlane.f32.xlu0 %v1680_v43 }
 0x804   :  { %1995 = vrot.lane.b32.xlu1 %v12910_v25, %s14895_s30 }
 0x808   :  { %2073 = vrot.lane.b32.xlu1 %v12927_v31, %s14895_s30 }
 0x80d   :  { %1997 = vrot.lane.b32.xlu0 %v12899_v21, %s14895_s30 }
 0x811   :  { %2075 = vrot.lane.b32.xlu0 %v12915_v27, %s14895_s30 }
 0x87e   :  { %v1676_v51 = vpop.xlane.xlu0 %1675 }
 0x87f   :  { %12363 = vrcp.f32 %v1676_v51 }
 0x880   :  { %v1679_v52 = vpop.xlane.xlu1 %1678 }
 0x881   :  { %12365 = vrcp.f32 %v1679_v52 }
 0x884   :  { %v1682_v35 = vpop.xlane.xlu0 %1681  ;;  %v1996_v27 = vpop.permute.xlu1 %1995 }
 0x885   :  { %12367 = vrcp.f32 %v1682_v35 }
 0x888   :  { %v1998_v58 = vpop.permute.xlu0 %1997  ;;  %v2074_v61 = vpop.permute.xlu1 %2073 }
 0x889   :  { %v12364_v53 = vpop.eup %12363 }
 0x88a   :  { %v1684_v25 = vmul.f32 %v12364_v53, %v12358_v8 }
 0x88b   :  { %v12366_v55 = vpop.eup %12365 }
 0x88c   :  { %11207 = vmatmul.mubr.msk.f32.vlgmr.msra.gmra.mrb[28].mxu0 %vm425_vm2, %v1684_v25  ;;  %v1686_v31 = vmul.f32 %v12366_v55, %v12360_v23  ;;  %v2076_v60 = vpop.permute.xlu0 %2075 }
 0x88d   :  { %11215 = vmatpush3.msra.mxu0 %v1842_v45  ;;  %11216 = vmatprep.mubr.msk.f32.mxu0 %vm12628_vm1, %v12629_v30 }
 0x88e   :  { %11212 = vmatmul.mubr.msk.f32.vlgmr.msra.gmra.mrb[20].mxu1 %vm425_vm2, %v1686_v31  ;;  %11224 = vmatprep.subr.mxu0 %v12629_v30 }
 0x88f   :  { %v12368_v21 = vpop.eup %12367  ;;  %11220 = vmatpush3.xpose.msk.msra.mxu1 %vm425_vm2, %v1920_v47  ;;  %11221 = vmatprep.mubr.msk.f32.mxu1 %vm12628_vm1, %v12629_v30 }
 0x890   :  { %11229 = vmatprep.subr.mxu1 %v12629_v30  ;;  %v1688_v59 = vmul.f32 %v12368_v21, %v12362_v38 }
 0x892   :  { %11217 = vmatmul.mubr.msk.f32.vlgmr.msra.gmra.mrb[30].mxu0 %vm425_vm2, %v1688_v59  ;;  %11222 = vmatmul.mubr.msk.f32.vlgmr.msra.gmra.mrb[22].mxu1 %vm425_vm2, %v1918_v48  ;;  %v10444_v59 = vld [vmem:[%s14922_s3 + $0x60] sm:$0xff] }
 0x893   :  { %11230 = vmatpush3.xpose.msk.msra.mxu1 %vm425_vm2, %v2076_v60  ;;  %11226 = vmatprep.mubr.msk.f32.mxu0 %vm12628_vm1, %v12629_v30  ;;  %v10445_v60 = vld [vmem:[%s14922_s3 + $0x68] sm:$0xff] }
 0x894   :  { %11225 = vmatpush3.xpose.msk.msra.mxu0 %vm425_vm2, %v1998_v58  ;;  %11231 = vmatprep.mubr.msk.f32.mxu1 %vm12628_vm1, %v12629_v30 }
 0x895   :  { %11239 = vmatprep.subr.mxu1 %v12629_v30  ;;  %11234 = vmatprep.subr.mxu0 %v12629_v30 }
 0x896   :  { %11232 = vmatmul.mubr.msk.f32.vlgmr.msra.gmra.mrb[24].mxu1 %vm425_vm2, %v2074_v61  ;;  %v10446_v61 = vld [vmem:[%s14922_s3 + $0x70] sm:$0xff] }
 0x897   :  { %11227 = vmatmul.mubr.msk.f32.vlgmr.msra.gmra.mrb[32].mxu0 %vm425_vm2, %v1996_v27  ;;  %11241 = vmatprep.mubr.msk.f32.mxu1 %vm12628_vm1, %v12629_v30 }
 0x898   :  { %11236 = vmatprep.mubr.msk.f32.mxu0 %vm12628_vm1, %v12629_v30 }
 0x95f   :  { %v1761_v62 = vpop.f32.mrb[28].mxu0 }
 0x960   :  { %v11208_v63 = vpop.f32.mrb[29].mxu0 }
 0x961   :  { %v1837_v0 = vpop.f32.mrb[20].mxu1  ;;  %v10447_v63 = vld [vmem:[%s14922_s3 + $0x78] sm:$0xff] }
 0x962   :  { %v11213_v1 = vpop.f32.mrb[21].mxu1 }
 0x965   :  { %v13115_v2 = vpop.f32.mrb[30].mxu0  ;;  %v1991_v3 = vpop.f32.mrb[22].mxu1 }
 0x966   :  { %v2151_v4 = vmul.f32 0.35355338, %v1991_v3  ;;  %v11218_v5 = vpop.f32.mrb[31].mxu0  ;;  %v11223_v6 = vpop.f32.mrb[23].mxu1 }
 0x968   :  { %v2154_v7 = vadd.f32 %v2151_v4, %v12951_v42 }
 0x969   :  { %v2147_v9 = vpop.f32.mrb[24].mxu1 }
 0x96a   :  { %v2069_v10 = vpop.f32.mrb[32].mxu0  ;;  %v2153_v11 = vmul.f32 0.35355338, %v2147_v9  ;;  %v11233_v12 = vpop.f32.mrb[25].mxu1  ;;  %v2157_v13 = vsel %vm425_vm2, %v2154_v7, -inf }
 0x96b   :  { %v2152_v14 = vmul.f32 0.35355338, %v2069_v10  ;;  %v11228_v15 = vpop.f32.mrb[33].mxu0  ;;  %2158 = vmax.xlane.f32.xlu0 %v2157_v13 }
 0x96c   :  { %v2156_v16 = vadd.f32 %v2153_v11, %v12951_v42 }
 0x96d   :  { %v2155_v17 = vadd.f32 %v2152_v14, %v12951_v42 }
 0x96e   :  { %v2163_v20 = vsel %vm425_vm2, %v2156_v16, -inf }
 0x96f   :  { %v2160_v22 = vsel %vm425_vm2, %v2155_v17, -inf  ;;  %2164 = vmax.xlane.f32.xlu0 %v2163_v20 }
 0x970   :  { %2161 = vmax.xlane.f32.xlu1 %v2160_v22 }
 0x981   :  { %2266 = vrot.lane.b32.xlu1 %v12933_v33, %s14895_s30 }
 0x9f8   :  { %v2159_v18 = vpop.xlane.xlu0 %2158 }
 0x9f9   :  { %v2166_v26 = vsub.f32 %v2154_v7, %v2159_v18 }
 0x9fb   :  { %v2169_v29 = vmul.f32 1.442695, %v2166_v26 }
 0x9fc   :  { %v2165_v8 = vpop.xlane.xlu0 %2164 }
 0x9fd   :  { %12369 = vpow2.f32 %v2169_v29  ;;  %v2162_v32 = vpop.xlane.xlu1 %2161  ;;  %v2168_v23 = vsub.f32 %v2156_v16, %v2165_v8  ;;  %v13193_v8 = vsub.s32 5, %v12820_v36 }
 0x9fe   :  { %v2167_v34 = vsub.f32 %v2155_v17, %v2162_v32  ;;  %v13198_v32 = vld [vmem:[%s14874_s7] sm:$0xff] }
 0x9ff   :  { %v2173_v38 = vmul.f32 1.442695, %v2168_v23 }
 0xa00   :  { %v2171_v43 = vmul.f32 1.442695, %v2167_v34 }
 0xa01   :  { %12371 = vpow2.f32 %v2173_v38  ;;  %v2267_v45 = vpop.permute.xlu1 %2266 }
 0xa02   :  { %12373 = vpow2.f32 %v2171_v43  ;;  %11240 = vmatpush3.msra.mxu1 %v2267_v45  ;;  %v12584_v43 = vld [vmem:[%s14921_s5] sm:$0xff] }
 0xa03   :  { %11977 = vmatprep.subr.bf16.mxu1 %v12627_v24 }
 0xa07   :  { %v12370_v47 = vpop.eup %12369 }
 0xa08   :  { %v2175_v48 = vsel %vm425_vm2, %v12370_v47, 0.0 }
 0xa09   :  { %2176 = vadd.xlane.f32.xlu0 %v2175_v48 }
 0xa0b   :  { %v12372_v33 = vpop.eup %12371 }
 0xa0c   :  { %v12374_v51 = vpop.eup %12373  ;;  %v2181_v52 = vsel %vm425_vm2, %v12372_v33, 0.0 }
 0xa0d   :  { %v2178_v35 = vsel %vm425_vm2, %v12374_v51, 0.0  ;;  %2182 = vadd.xlane.f32.xlu1 %v2181_v52  ;;  %v12585_v52 = vld [vmem:[%s14921_s5 + $0x8] sm:$0xff] }
 0xa0e   :  { %2179 = vadd.xlane.f32.xlu0 %v2178_v35 }
 0xa1e   :  { %2342 = vrot.lane.b32.xlu1 %v12967_v19, %s14895_s30 }
 0xa22   :  { %2421 = vrot.lane.b32.xlu1 %v13055_v54, %s14903_s23 }
 0xa24   :  { %2190 = vrot.lane.b32.xlu0 %v12918_v28, %s14895_s30  ;;  %s14924_s30 = sld [smem:[#allocation16_spill]] }
 0xa26   :  { %2435 = vrot.lane.b32.xlu1 %v1837_v0, %s14901_s1  ;;  %v11981_v0 = vpack.c.bf16 %v10447_v63, %v10446_v61 }
 0xa28   :  { %2433 = vrot.lane.b32.xlu0 %v1761_v62, %s14901_s1  ;;  %v11978_v62 = vpack.c.bf16 %v10445_v60, %v10444_v59 }
 0xa2c   :  { %2423 = vrot.lane.b32.xlu0 %v13059_v57, %s14903_s23 }
 0xa96   :  { %v2177_v53 = vpop.xlane.xlu0 %2176 }
 0xa97   :  { %12375 = vrcp.f32 %v2177_v53 }
 0xa9a   :  { %v2183_v25 = vpop.xlane.xlu1 %2182 }
 0xa9b   :  { %12377 = vrcp.f32 %v2183_v25  ;;  %v2180_v19 = vpop.xlane.xlu0 %2179 }
 0xa9c   :  { %12379 = vrcp.f32 %v2180_v19 }
 0xa9e   :  { %v2343_v58 = vpop.permute.xlu1 %2342 }
 0xa9f   :  { %v2191_v55 = vpop.permute.xlu0 %2190 }
 0xaa0   :  { %11235 = vmatpush3.msra.mxu0 %v2191_v55 }
 0xaa1   :  { %v12376_v54 = vpop.eup %12375  ;;  %11244 = vmatprep.subr.mxu0 %v12629_v30 }
 0xaa2   :  { %v2185_v28 = vmul.f32 %v12376_v54, %v12370_v47  ;;  %v2422_v9 = vpop.permute.xlu1 %2421  ;;  %v12586_v54 = vld [vmem:[%s14921_s5 + $0x10] sm:$0xff] }
 0xaa3   :  { %v2434_v10 = vpop.permute.xlu0 %2433  ;;  %v2454_v12 = vsel %vm425_vm2, %v12995_v39, %v2422_v9  ;;  %v2620_v9 = vld [vmem:[%s14923_s6 + $0x8] sm:$0xff] }
 0xaa4   :  { %11237 = vmatmul.mubr.msk.f32.vlgmr.msra.gmra.mrb[34].mxu0 %vm425_vm2, %v2185_v28 }
 0xaa5   :  { %v12378_v31 = vpop.eup %12377  ;;  %11245 = vmatpush3.msra.mxu0 %v2343_v58  ;;  %11246 = vmatprep.mubr.msk.f32.mxu0 %vm12628_vm1, %v12629_v30 }
 0xaa6   :  { %v12380_v57 = vpop.eup %12379  ;;  %v2189_v21 = vmul.f32 %v12378_v31, %v12372_v33  ;;  %11983 = vmatprep.subr.bf16.mxu0 %v12627_v24  ;;  %v2436_v11 = vpop.permute.xlu1 %2435 }
 0xaa7   :  { %v2187_v27 = vmul.f32 %v12380_v57, %v12374_v51  ;;  %v2424_v13 = vpop.permute.xlu0 %2423 }
 0xaa8   :  { %11247 = vmatmul.mubr.msk.f32.vlgmr.msra.gmra.mrb[36].mxu0 %vm425_vm2, %v2189_v21  ;;  %v2455_v16 = vsel %vm425_vm2, %v12997_v44, %v2424_v13 }
 0xaa9   :  { %11242 = vmatmul.mubr.msk.f32.vlgmr.msra.gmra.mrb[26].mxu1 %vm425_vm2, %v2187_v27  ;;  %11274 = vmatprep.mubr.msk.f32.mxu0 %vm12628_vm1, %v12629_v30  ;;  %v2459_v17 = vsel %vm2457_vm4, %v2455_v16, %v2436_v11  ;;  %v2621_v11 = vld [vmem:[%s14923_s6 + $0x10] sm:$0xff] }
 0xaaa   :  { %11257 = vmatprep.mubr.msk.f32.mxu1 %vm12628_vm1, %v12629_v30  ;;  %11979 = vmatpush3.bf16.msra.mxu1 %v11978_v62 }
 0xaab   :  { %11980 = vmatprep.subr.bf16.mxu1 %v12627_v24 }
 0xaae   :  { %11982 = vmatpush3.bf16.msra.mxu1 %v11981_v0 }
 0xaaf   :  { %11989 = vmatprep.subr.bf16.mxu1 %v12627_v24 }
 0xb77   :  { %v2262_v1 = vpop.f32.mrb[34].mxu0 }
 0xb78   :  { %2445 = vrot.lane.b32.xlu1 %v2262_v1, %s14899_s24  ;;  %v11238_v3 = vpop.f32.mrb[35].mxu0 }
 0xb7b   :  { %v2414_v4 = vpop.f32.mrb[36].mxu0 }
 0xb7c   :  { %v2338_v5 = vpop.f32.mrb[26].mxu1  ;;  %2425 = vrot.lane.b32.xlu1 %v13057_v56, %s14903_s23  ;;  %v11248_v6 = vpop.f32.mrb[37].mxu0  ;;  %v2458_v56 = vsel %vm2457_vm4, %v2454_v12, %v2434_v10  ;;  %v2622_v12 = vld [vmem:[%s14923_s6 + $0x18] sm:$0xff]  ;;  %s14926_s23 = smov 112  }
 0xb7d   :  { %2447 = vrot.lane.b32.xlu0 %v2338_v5, %s14899_s24  ;;  %v11243_v7 = vpop.f32.mrb[27].mxu1  ;;  %v11987_v13 = vpack.c.bf16 %v2622_v12, %v2621_v11  ;;  %v2755_v11 = vld [vmem:[%s14924_s30 + $0x78] sm:$0xff] }
 0xb7e   :  { %v2619_v7 = vld [vmem:[%s14923_s6] sm:$0xff] }
 0xb7f   :  { %v11984_v10 = vpack.c.bf16 %v2620_v9, %v2619_v7  ;;  %v2753_v7 = vld [vmem:[%s14924_s30 + $0x68] sm:$0xff] }
 0xb80   :  { %2449 = vrot.lane.b32.xlu1 %v2414_v4, %s14899_s24  ;;  %s14930_s24 = smov 24  }
 0xb81   :  { %2437 = vrot.lane.b32.xlu0 %v13115_v2, %s14901_s1  ;;  %11985 = vmatpush3.bf16.msra.mxu0 %v11984_v10  ;;  %v2754_v10 = vld [vmem:[%s14924_s30 + $0x70] sm:$0xff]  ;;  %s14928_s1 = smov 8  }
 0xb82   :  { %11986 = vmatprep.subr.bf16.mxu0 %v12627_v24  ;;  %v12011_v12 = vpack.c.bf16 %v2755_v11, %v2754_v10 }
 0xb85   :  { %11988 = vmatpush3.bf16.msra.mxu0 %v11987_v13  ;;  %v13319_v13 = vsub.s32 6, %v12820_v36 }
 0xb86   :  { %12013 = vmatprep.subr.bf16.mxu0 %v12627_v24 }
 0xbea   :  { %v2446_v14 = vpop.permute.xlu1 %2445 }
 0xbeb   :  { %v2462_v15 = vsel %vm2461_vm5, %v2458_v56, %v2446_v14 }
 0xbec   :  { %11258 = vmatmul.mubr.msk.f32.vlgmr.msra.gmra.mrb[28].mxu1 %vm96_vm0, %v2462_v15 }
 0xbed   :  { %11260 = vmatprep.mubr.msk.f32.mxu1 %vm12628_vm1, %v12629_v30 }
 0xbee   :  { %v2426_v2 = vpop.permute.xlu1 %2425 }
 0xbef   :  { %v2448_v39 = vpop.permute.xlu0 %2447  ;;  %v2456_v44 = vsel %vm425_vm2, %v12999_v46, %v2426_v2  ;;  %v2473_v46 = vrot.slane %v13198_v32, %v13193_v8 }
 0xbf0   :  { %v2463_v20 = vsel %vm2461_vm5, %v2459_v17, %v2448_v39 }
 0xbf1   :  { %11261 = vmatmul.mubr.msk.f32.gmra.mrb[30].mxu1 %vm96_vm0, %v2463_v20  ;;  %v13244_v20 = vsub.s32 2, %v12820_v36 }
 0xbf2   :  { %v2450_v22 = vpop.permute.xlu1 %2449  ;;  %11263 = vmatprep.mubr.msk.f32.mxu1 %vm12628_vm1, %v12629_v30 }
 0xbf3   :  { %v2438_v18 = vpop.permute.xlu0 %2437 }
 0xbf4   :  { %v2460_v26 = vsel %vm2457_vm4, %v2456_v44, %v2438_v18  ;;  %v13247_v44 = vsub.s32 3, %v12820_v36 }
 0xbf5   :  { %v2464_v29 = vsel %vm2461_vm5, %v2460_v26, %v2450_v22  ;;  %v2608_v26 = vrot.slane %v13198_v32, %v13244_v20 }
 0xbf6   :  { %11264 = vmatmul.mubr.msk.f32.gmra.mrb[32].mxu1 %vm96_vm0, %v2464_v29 }
 0xbf7   :  { %11315 = vmatprep.mubr.msk.f32.mxu1 %vm12628_vm1, %v12629_v30 }
 0xcbf   :  { %v2549_v23 = vpop.f32.mrb[28].mxu1 }
 0xcc0   :  { %v2550_v34 = vadd.f32 %v2549_v23, %v2473_v46  ;;  %v11259_v38 = vpop.f32.mrb[29].mxu1  ;;  %v2615_v23 = vrot.slane %v13198_v32, %v13247_v44 }
 0xcc2   :  { %v13205_v45 = vadd.f32 %v12584_v43, %v2550_v34 }
 0xcc4   :  { %v2554_v47 = vpop.f32.mrb[30].mxu1  ;;  %v2566_v48 = vsel %vm96_vm0, %v13205_v45, 0.0 }
 0xcc5   :  { %v2555_v33 = vadd.f32 %v2554_v47, %v2473_v46  ;;  %v11262_v51 = vpop.f32.mrb[31].mxu1  ;;  %2567 = vadd.xlane.f32.xlu0 %v2566_v48 }
 0xcc7   :  { %v13212_v35 = vadd.f32 %v12585_v52, %v2555_v33 }
 0xcc9   :  { %v2559_v53 = vpop.f32.mrb[32].mxu1  ;;  %v2569_v25 = vsel %vm96_vm0, %v13212_v35, 0.0 }
 0xcca   :  { %v2560_v19 = vadd.f32 %v2559_v53, %v2473_v46  ;;  %2570 = vadd.xlane.f32.xlu1 %v2569_v25  ;;  %v11265_v55 = vpop.f32.mrb[33].mxu1 }
 0xccb   :  { %v2741_v55 = vld [vmem:[%s14924_s30 + $0x8] sm:$0xff] }
 0xccc   :  { %v13219_v28 = vadd.f32 %v12586_v54, %v2560_v19  ;;  %v2740_v19 = vld [vmem:[%s14924_s30] sm:$0xff] }
 0xccd   :  { %v11990_v54 = vpack.c.bf16 %v2741_v55, %v2740_v19 }
 0xcce   :  { %v2572_v58 = vsel %vm96_vm0, %v13219_v28, 0.0 }
 0xccf   :  { %2573 = vadd.xlane.f32.xlu0 %v2572_v58  ;;  %11991 = vmatpush3.bf16.msra.mxu1 %v11990_v54  ;;  %v2742_v58 = vld [vmem:[%s14924_s30 + $0x10] sm:$0xff] }
 0xcd0   :  { %11992 = vmatprep.subr.bf16.mxu1 %v12627_v24 }
 0xd52   :  { %v2568_v31 = vpop.xlane.xlu0 %2567 }
 0xd53   :  { %v2575_v57 = vmul.f32 0.03125, %v2568_v31  ;;  %v2743_v31 = vld [vmem:[%s14924_s30 + $0x18] sm:$0xff] }
 0xd55   :  { %v2578_v21 = vsub.f32 %v13205_v45, %v2575_v57  ;;  %v11993_v57 = vpack.c.bf16 %v2743_v31, %v2742_v58 }
 0xd57   :  { %v2571_v27 = vpop.xlane.xlu1 %2570  ;;  %v2581_v59 = vmul.f32 %v2578_v21, %v2578_v21  ;;  %11994 = vmatpush3.bf16.msra.mxu1 %v11993_v57  ;;  %v13330_v57 = vsub.s32 7, %v12820_v36 }
 0xd58   :  { %v2576_v60 = vmul.f32 0.03125, %v2571_v27  ;;  %11995 = vmatprep.subr.bf16.mxu1 %v12627_v24  ;;  %v2745_v27 = vld [vmem:[%s14924_s30 + $0x28] sm:$0xff] }
 0xd59   :  { %v2584_v61 = vsel %vm96_vm0, %v2581_v59, 0.0 }
 0xd5a   :  { %v2579_v62 = vsub.f32 %v13212_v35, %v2576_v60  ;;  %2585 = vadd.xlane.f32.xlu0 %v2584_v61  ;;  %v2746_v60 = vld [vmem:[%s14924_s30 + $0x30] sm:$0xff]  ;;  %v2747_v61 = vld [vmem:[%s14924_s30 + $0x38] sm:$0xff] }
 0xd5c   :  { %v2574_v63 = vpop.xlane.xlu0 %2573  ;;  %v2582_v0 = vmul.f32 %v2579_v62, %v2579_v62 }
 0xd5d   :  { %v2577_v1 = vmul.f32 0.03125, %v2574_v63  ;;  %v2748_v63 = vld [vmem:[%s14924_s30 + $0x40] sm:$0xff] }
 0xd5e   :  { %v2587_v3 = vsel %vm96_vm0, %v2582_v0, 0.0  ;;  %v2749_v0 = vld [vmem:[%s14924_s30 + $0x48] sm:$0xff] }
 0xd5f   :  { %v2580_v4 = vsub.f32 %v13219_v28, %v2577_v1  ;;  %2588 = vadd.xlane.f32.xlu0 %v2587_v3  ;;  %v12002_v1 = vpack.c.bf16 %v2749_v0, %v2748_v63  ;;  %v2750_v3 = vld [vmem:[%s14924_s30 + $0x50] sm:$0xff] }
 0xd61   :  { %v2583_v5 = vmul.f32 %v2580_v4, %v2580_v4 }
 0xd63   :  { %v2590_v6 = vsel %vm96_vm0, %v2583_v5, 0.0 }
 0xd64   :  { %2591 = vadd.xlane.f32.xlu1 %v2590_v6  ;;  %v2752_v6 = vld [vmem:[%s14924_s30 + $0x60] sm:$0xff] }
 0xd65   :  { %v12008_v9 = vpack.c.bf16 %v2753_v7, %v2752_v6 }
 0xde7   :  { %v2586_v56 = vpop.xlane.xlu0 %2585 }
 0xde8   :  { %v2593_v14 = vmul.f32 0.03125, %v2586_v56  ;;  %v2626_v56 = vrot.slane %v13198_v32, %v13319_v13 }
 0xdea   :  { %v2596_v15 = vadd.f32 1e-05, %v2593_v14 }
 0xdec   :  { %12381 = vrsqrt.f32 %v2596_v15  ;;  %v2589_v16 = vpop.xlane.xlu0 %2588 }
 0xded   :  { %v2594_v2 = vmul.f32 0.03125, %v2589_v16 }
 0xdef   :  { %v2597_v17 = vadd.f32 1e-05, %v2594_v2 }
 0xdf1   :  { %12383 = vrsqrt.f32 %v2597_v17  ;;  %v2592_v39 = vpop.xlane.xlu1 %2591 }
 0xdf2   :  { %v2595_v22 = vmul.f32 0.03125, %v2592_v39 }
 0xdf4   :  { %v2598_v18 = vadd.f32 1e-05, %v2595_v22 }
 0xdf6   :  { %v12382_v29 = vpop.eup %12381  ;;  %12385 = vrsqrt.f32 %v2598_v18 }
 0xdf7   :  { %v2602_v46 = vmul.f32 %v12382_v29, %v2578_v21  ;;  %v2744_v21 = vld [vmem:[%s14924_s30 + $0x20] sm:$0xff] }
 0xdf8   :  { %v11996_v59 = vpack.c.bf16 %v2745_v27, %v2744_v21  ;;  %v2759_v21 = vrot.slane %v13198_v32, %v13330_v57  ;;  %v2843_v27 = vld [vmem:[%s14925_s25] sm:$0x3] }
 0xdf9   :  { %v2609_v34 = vmul.f32 %v2608_v26, %v2602_v46  ;;  %v2861_v0 = vrot.slane %v2843_v27, %v12836_v49 }
 0xdfa   :  { %11997 = vmatpush3.bf16.msra.mxu1 %v11996_v59  ;;  %v13338_v59 = vand.u32 7, %v12820_v36 }
 0xdfb   :  { %v12384_v38 = vpop.eup %12383  ;;  %v2616_v43 = vadd.f32 %v2615_v23, %v2609_v34  ;;  %11998 = vmatprep.subr.bf16.mxu1 %v12627_v24 }
 0xdfc   :  { %v2603_v47 = vmul.f32 %v12384_v38, %v2579_v62  ;;  %v11999_v62 = vpack.c.bf16 %v2747_v61, %v2746_v60  ;;  %v2844_v60 = vadd.s32 8, %v12820_v36  ;;  %vm2849_vm6 = vcmp.eq.s32.totalorder %v13338_v59, 1 }
 0xdfd   :  { %11275 = vmatmul.mubr.msk.f32.vlgmr.msra.gmra.mrb[38].mxu0 %vm96_vm0, %v2616_v43  ;;  %vm2865_vm7 = vcmp.eq.s32.totalorder %v13338_v59, 2 }
 0xdfe   :  { %11277 = vmatprep.mubr.msk.f32.mxu0 %vm12628_vm1, %v12629_v30  ;;  %v2610_v48 = vmul.f32 %v2608_v26, %v2603_v47  ;;  %12000 = vmatpush3.bf16.msra.mxu1 %v11999_v62 }
 0xdff   :  { %12001 = vmatprep.subr.bf16.mxu1 %v12627_v24 }
 0xe00   :  { %v12386_v33 = vpop.eup %12385  ;;  %v2617_v51 = vadd.f32 %v2615_v23, %v2610_v48 }
 0xe01   :  { %v2604_v52 = vmul.f32 %v12386_v33, %v2580_v4  ;;  %v2751_v4 = vld [vmem:[%s14924_s30 + $0x58] sm:$0xff] }
 0xe02   :  { %11278 = vmatmul.mubr.msk.f32.gmra.mrb[40].mxu0 %vm96_vm0, %v2617_v51  ;;  %12003 = vmatpush3.bf16.msra.mxu1 %v12002_v1  ;;  %v12005_v5 = vpack.c.bf16 %v2751_v4, %v2750_v3  ;;  %v2877_v1 = vrot.slane %v2843_v27, %v12839_v50  ;;  %v13346_v3 = vand.u32 7, %v2844_v60  ;;  %v2845_v4 = vadd.s32 16, %v12820_v36 }
 0xe03   :  { %11280 = vmatprep.mubr.msk.f32.mxu0 %vm12628_vm1, %v12629_v30  ;;  %v2611_v53 = vmul.f32 %v2608_v26, %v2604_v52  ;;  %12004 = vmatprep.subr.bf16.mxu1 %v12627_v24 }
 0xe04   :  { %vm2850_vm8 = vcmp.eq.s32.totalorder %v13346_v3, 1  ;;  %vm2866_vm9 = vcmp.eq.s32.totalorder %v13346_v3, 2 }
 0xe05   :  { %v2618_v25 = vadd.f32 %v2615_v23, %v2611_v53 }
 0xe06   :  { %12006 = vmatpush3.bf16.msra.mxu1 %v12005_v5 }
 0xe07   :  { %11281 = vmatmul.mubr.msk.f32.gmra.mrb[42].mxu0 %vm96_vm0, %v2618_v25  ;;  %12007 = vmatprep.subr.bf16.mxu1 %v12627_v24 }
 0xe08   :  { %11332 = vmatprep.mubr.msk.f32.mxu0 %vm12628_vm1, %v12629_v30 }
 0xe0a   :  { %12009 = vmatpush3.bf16.msra.mxu1 %v12008_v9 }
 0xe0b   :  { %12010 = vmatprep.subr.bf16.mxu1 %v12627_v24 }
 0xe0e   :  { %12012 = vmatpush3.bf16.msra.mxu1 %v12011_v12 }
 0xe0f   :  { %11375 = vmatprep.subr.mxu1 %v12629_v30 }
 0xed0   :  { %v2702_v14 = vpop.f32.mrb[38].mxu0 }
 0xed1   :  { %v2703_v15 = vadd.f32 %v2702_v14, %v2626_v56  ;;  %v11276_v16 = vpop.f32.mrb[39].mxu0 }
 0xed3   :  { %v10454_v2 = vmul.f32 -1.702, %v2703_v15 }
 0xed5   :  { %v2722_v17 = vmul.f32 1.442695, %v10454_v2  ;;  %v2707_v39 = vpop.f32.mrb[40].mxu0 }
 0xed6   :  { %v2708_v22 = vadd.f32 %v2707_v39, %v2626_v56  ;;  %v11279_v18 = vpop.f32.mrb[41].mxu0 }
 0xed7   :  { %12387 = vpow2.f32 %v2722_v17 }
 0xed8   :  { %v10455_v26 = vmul.f32 -1.702, %v2708_v22 }
 0xeda   :  { %v2724_v29 = vmul.f32 1.442695, %v10455_v26  ;;  %v2712_v46 = vpop.f32.mrb[42].mxu0 }
 0xedb   :  { %v2713_v23 = vadd.f32 %v2712_v46, %v2626_v56  ;;  %v11282_v34 = vpop.f32.mrb[43].mxu0 }
 0xedc   :  { %12389 = vpow2.f32 %v2724_v29 }
 0xedd   :  { %v10456_v38 = vmul.f32 -1.702, %v2713_v23 }
 0xedf   :  { %v2726_v43 = vmul.f32 1.442695, %v10456_v38 }
 0xee1   :  { %v12388_v47 = vpop.eup %12387  ;;  %12391 = vpow2.f32 %v2726_v43 }
 0xee2   :  { %v2728_v48 = vadd.f32 1.0, %v12388_v47 }
 0xee4   :  { %12393 = vrcp.f32 %v2728_v48 }
 0xee6   :  { %v12390_v33 = vpop.eup %12389 }
 0xee7   :  { %v2729_v51 = vadd.f32 1.0, %v12390_v33 }
 0xee9   :  { %12395 = vrcp.f32 %v2729_v51 }
 0xeeb   :  { %v12392_v52 = vpop.eup %12391 }
 0xeec   :  { %v2730_v53 = vadd.f32 1.0, %v12392_v52 }
 0xeee   :  { %v12394_v25 = vpop.eup %12393  ;;  %12397 = vrcp.f32 %v2730_v53 }
 0xeef   :  { %v2737_v19 = vmul.f32 %v12394_v25, %v2703_v15  ;;  %v10458_v25 = vld [vmem:[%s14922_s3 + $0x80] sm:$0xff] }
 0xef1   :  { %11316 = vmatmul.mubr.f32.vlgmr.msra.gmra.mrb[34].mxu1 %v2737_v19  ;;  %v10459_v19 = vld [vmem:[%s14922_s3 + $0x88] sm:$0xff] }
 0xef2   :  { %11318 = vmatprep.mubr.msk.f32.mxu1 %vm12628_vm1, %v12629_v30 }
 0xef3   :  { %v12396_v55 = vpop.eup %12395 }
 0xef4   :  { %v2738_v54 = vmul.f32 %v12396_v55, %v2708_v22  ;;  %v12014_v55 = vpack.c.bf16 %v10459_v19, %v10458_v25 }
 0xef6   :  { %11319 = vmatmul.mubr.f32.gmra.mrb[36].mxu1 %v2738_v54  ;;  %12015 = vmatpush3.bf16.msra.mxu0 %v12014_v55  ;;  %v10460_v54 = vld [vmem:[%s14922_s3 + $0x90] sm:$0xff] }
 0xef7   :  { %11321 = vmatprep.mubr.msk.f32.mxu1 %vm12628_vm1, %v12629_v30  ;;  %12016 = vmatprep.subr.bf16.mxu0 %v12627_v24 }
 0xef8   :  { %v12398_v58 = vpop.eup %12397 }
 0xef9   :  { %v2739_v31 = vmul.f32 %v12398_v58, %v2713_v23  ;;  %v10461_v58 = vld [vmem:[%s14922_s3 + $0x98] sm:$0xff] }
 0xefb   :  { %11322 = vmatmul.mubr.f32.gmra.mrb[38].mxu1 %v2739_v31  ;;  %v12017_v31 = vpack.c.bf16 %v10461_v58, %v10460_v54 }
 0xefc   :  { %11377 = vmatprep.mubr.msk.f32.mxu1 %vm12628_vm1, %v12629_v30 }
 0xefd   :  { %12018 = vmatpush3.bf16.msra.mxu0 %v12017_v31 }
 0xefe   :  { %12019 = vmatprep.subr.bf16.mxu0 %v12627_v24 }
 0xfc4   :  { %v2826_v61 = vpop.f32.mrb[34].mxu1 }
 0xfc5   :  { %v2827_v62 = vadd.f32 %v2826_v61, %v2759_v21  ;;  %v11317_v63 = vpop.f32.mrb[35].mxu1 }
 0xfc7   :  { %v2840_v32 = vadd.f32 %v2827_v62, %v13205_v45  ;;  %v2848_v45 = vand.u32 7, %v2845_v4 }
 0xfc9   :  { %v2831_v5 = vpop.f32.mrb[36].mxu1  ;;  %v2862_v6 = vsel %vm2849_vm6, %v2861_v0, %v2840_v32  ;;  %vm2851_vm10 = vcmp.eq.s32.totalorder %v2848_v45, 1  ;;  %vm2867_vm11 = vcmp.eq.s32.totalorder %v2848_v45, 2  ;;  %v10466_v45 = vld [vmem:[%s14922_s3 + $0xa8] sm:$0xff]  ;;  %vm6033_vm6 = vcmask 1046528  }
 0xfca   :  { %v2832_v7 = vadd.f32 %v2831_v5, %v2759_v21  ;;  %v11320_v9 = vpop.f32.mrb[37].mxu1  ;;  %v13349_v10 = vsel %vm2865_vm7, %v2877_v1, %v2862_v6  ;;  %vm6157_vm7 = vcmp.lt.s32.totalorder %v12946_v40, 7 }
 0xfcb   :  { %v2883_v11 = vsel %vm96_vm0, %v13349_v10, 0.0 }
 0xfcc   :  { %v2841_v12 = vadd.f32 %v2832_v7, %v13212_v35  ;;  %2884 = vadd.xlane.f32.xlu0 %v2883_v11 }
 0xfce   :  { %v2836_v56 = vpop.f32.mrb[38].mxu1  ;;  %v2863_v14 = vsel %vm2850_vm8, %v2861_v0, %v2841_v12  ;;  %v10465_v12 = vld [vmem:[%s14922_s3 + $0xa0] sm:$0xff]  ;;  %vm8145_vm8 = vcmp.eq.s32.totalorder %v13346_v3, 5 }
 0xfcf   :  { %v2837_v36 = vadd.f32 %v2836_v56, %v2759_v21  ;;  %v11323_v15 = vpop.f32.mrb[39].mxu1  ;;  %v13356_v16 = vsel %vm2866_vm9, %v2877_v1, %v2863_v14  ;;  %v10457_v21 = vld [vmem:[%s14874_s7 + $0x8] sm:$0xff]  ;;  %v12020_v14 = vpack.c.bf16 %v10466_v45, %v10465_v12  ;;  %vm8157_vm9 = vcmp.eq.s32.totalorder %v13346_v3, 6 }
 0xfd0   :  { %v2886_v2 = vsel %vm96_vm0, %v13356_v16, 0.0  ;;  %v13389_v27 = vrot.slane %v10457_v21, %v12823_v37  ;;  %v2925_v6 = vrot.slane %v10457_v21, %v12836_v49  ;;  %v2932_v11 = vrot.slane %v10457_v21, %v12839_v50 }
 0xfd1   :  { %v2842_v17 = vadd.f32 %v2837_v36, %v13219_v28  ;;  %2887 = vadd.xlane.f32.xlu1 %v2886_v2 }
 0xfd3   :  { %v2864_v39 = vsel %vm2851_vm10, %v2861_v0, %v2842_v17  ;;  %v10467_v17 = vld [vmem:[%s14922_s3 + $0xb0] sm:$0xff]  ;;  %vm8144_vm10 = vcmp.eq.s32.totalorder %v13338_v59, 5 }
 0xfd4   :  { %v13361_v35 = vsel %vm2867_vm11, %v2877_v1, %v2864_v39  ;;  %v10468_v39 = vld [vmem:[%s14922_s3 + $0xb8] sm:$0xff]  ;;  %vm8156_vm11 = vcmp.eq.s32.totalorder %v13338_v59, 6 }
 0xfd5   :  { %v2889_v22 = vsel %vm96_vm0, %v13361_v35, 0.0 }
 0xfd6   :  { %2890 = vadd.xlane.f32.xlu0 %v2889_v22 }
0x1059   :  { %v2885_v18 = vpop.xlane.xlu0 %2884 }
0x105a   :  { %v2892_v26 = vmul.f32 0.03125, %v2885_v18  ;;  %v12023_v18 = vpack.c.bf16 %v10468_v39, %v10467_v17 }
0x105c   :  { %v2895_v29 = vsub.f32 %v13349_v10, %v2892_v26 }
0x105e   :  { %v2888_v46 = vpop.xlane.xlu1 %2887  ;;  %v2898_v23 = vmul.f32 %v2895_v29, %v2895_v29 }
0x105f   :  { %v2893_v34 = vmul.f32 0.03125, %v2888_v46 }
0x1060   :  { %v2901_v38 = vsel %vm96_vm0, %v2898_v23, 0.0 }
0x1061   :  { %v2896_v28 = vsub.f32 %v13356_v16, %v2893_v34  ;;  %2902 = vadd.xlane.f32.xlu1 %v2901_v38  ;;  %v10472_v38 = vld [vmem:[%s14922_s3 + $0xc0] sm:$0xff] }
0x1063   :  { %v2891_v43 = vpop.xlane.xlu0 %2890  ;;  %v2899_v47 = vmul.f32 %v2896_v28, %v2896_v28 }
0x1064   :  { %v2894_v48 = vmul.f32 0.03125, %v2891_v43 }
0x1065   :  { %v2904_v33 = vsel %vm96_vm0, %v2899_v47, 0.0  ;;  %v10474_v47 = vld [vmem:[%s14922_s3 + $0xd0] sm:$0xff] }
0x1066   :  { %v2897_v51 = vsub.f32 %v13361_v35, %v2894_v48  ;;  %2905 = vadd.xlane.f32.xlu0 %v2904_v33  ;;  %v10475_v48 = vld [vmem:[%s14922_s3 + $0xd8] sm:$0xff] }
0x1067   :  { %v12029_v33 = vpack.c.bf16 %v10475_v48, %v10474_v47 }
0x1068   :  { %v2900_v52 = vmul.f32 %v2897_v51, %v2897_v51 }
0x106a   :  { %v2907_v53 = vsel %vm96_vm0, %v2900_v52, 0.0 }
0x106b   :  { %2908 = vadd.xlane.f32.xlu1 %v2907_v53 }
0x107c   :  { %3040 = vrot.lane.b32.xlu0 %v13389_v27, %s14909_s4  ;;  %s5631_s4 = sld [smem:[#allocation4]] }
0x1080   :  { %3128 = vrot.lane.b32.xlu0 %v13389_v27, %s14905_s0 }
0x1082   :  { %s5632_s5 = scalar_lea.vmem [#allocation2], %s5631_s4 }
0x10ee   :  { %v2903_v60 = vpop.xlane.xlu1 %2902 }
0x10ef   :  { %v2910_v61 = vmul.f32 0.03125, %v2903_v60 }
0x10f1   :  { %v2913_v62 = vadd.f32 1e-05, %v2910_v61 }
0x10f3   :  { %12399 = vrsqrt.f32 %v2913_v62  ;;  %v2906_v63 = vpop.xlane.xlu0 %2905 }
0x10f4   :  { %v2911_v0 = vmul.f32 0.03125, %v2906_v63 }
0x10f6   :  { %v2914_v1 = vadd.f32 1e-05, %v2911_v0 }
0x10f7   :  { %v3041_v58 = vpop.permute.xlu0 %3040 }
0x10f8   :  { %12401 = vrsqrt.f32 %v2914_v1  ;;  %v2909_v32 = vpop.xlane.xlu1 %2908 }
0x10f9   :  { %v2912_v4 = vmul.f32 0.03125, %v2909_v32 }
0x10fb   :  { %v2915_v5 = vadd.f32 1e-05, %v2912_v4 }
0x10fd   :  { %v12400_v7 = vpop.eup %12399  ;;  %12403 = vrsqrt.f32 %v2915_v5  ;;  %v13480_v5 = vpop.permute.xlu0 %3128 }
0x10fe   :  { %v2919_v9 = vmul.f32 %v12400_v7, %v2895_v29 }
0x1100   :  { %v2926_v56 = vmul.f32 %v2925_v6, %v2919_v9 }
0x1102   :  { %v12402_v36 = vpop.eup %12401  ;;  %v2933_v15 = vadd.f32 %v2932_v11, %v2926_v56 }
0x1103   :  { %v2920_v2 = vmul.f32 %v12402_v36, %v2896_v28  ;;  %v10473_v28 = vld [vmem:[%s14922_s3 + $0xc8] sm:$0xff] }
0x1104   :  { %11333 = vmatmul.mubr.msk.f32.vlgmr.msra.gmra.mrb[44].mxu0 %vm96_vm0, %v2933_v15  ;;  %v12026_v43 = vpack.c.bf16 %v10473_v28, %v10472_v38 }
0x1105   :  { %11335 = vmatprep.mubr.msk.f32.mxu0 %vm12628_vm1, %v12629_v30  ;;  %v2927_v22 = vmul.f32 %v2925_v6, %v2920_v2  ;;  %12021 = vmatpush3.bf16.msra.mxu0 %v12020_v14 }
0x1106   :  { %12022 = vmatprep.subr.bf16.mxu0 %v12627_v24 }
0x1107   :  { %v12404_v26 = vpop.eup %12403  ;;  %v2934_v29 = vadd.f32 %v2932_v11, %v2927_v22 }
0x1108   :  { %v2921_v46 = vmul.f32 %v12404_v26, %v2897_v51 }
0x1109   :  { %11336 = vmatmul.mubr.msk.f32.gmra.mrb[46].mxu0 %vm96_vm0, %v2934_v29 }
0x110a   :  { %11338 = vmatprep.mubr.msk.f32.mxu0 %vm12628_vm1, %v12629_v30  ;;  %v2928_v23 = vmul.f32 %v2925_v6, %v2921_v46  ;;  %12024 = vmatpush3.bf16.msra.mxu0 %v12023_v18 }
0x110b   :  { %12025 = vmatprep.subr.bf16.mxu0 %v12627_v24 }
0x110c   :  { %v2935_v34 = vadd.f32 %v2932_v11, %v2928_v23 }
0x110e   :  { %11339 = vmatmul.mubr.msk.f32.gmra.mrb[48].mxu0 %vm96_vm0, %v2935_v34 }
0x110f   :  { %11349 = vmatprep.mubr.msk.f32.mxu0 %vm12628_vm1, %v12629_v30 }
0x1112   :  { %11350 = vmatmul.mubr.msk.f32.vlgmr.msra.gmra.mrb[50].mxu0 %vm96_vm0, %v2933_v15 }
0x1113   :  { %11352 = vmatprep.mubr.msk.f32.mxu0 %vm12628_vm1, %v12629_v30  ;;  %12027 = vmatpush3.bf16.msra.mxu0 %v12026_v43 }
0x1114   :  { %12028 = vmatprep.subr.bf16.mxu0 %v12627_v24 }
0x1116   :  { %11353 = vmatmul.mubr.msk.f32.gmra.mrb[52].mxu0 %vm96_vm0, %v2934_v29 }
0x1117   :  { %11355 = vmatprep.mubr.msk.f32.mxu0 %vm12628_vm1, %v12629_v30  ;;  %12030 = vmatpush3.bf16.msra.mxu0 %v12029_v33 }
0x1118   :  { %11385 = vmatprep.subr.mxu0 %v12629_v30 }
0x111a   :  { %11356 = vmatmul.mubr.msk.f32.gmra.mrb[54].mxu0 %vm96_vm0, %v2935_v34 }
0x111b   :  { %11366 = vmatprep.mubr.msk.f32.mxu0 %vm12628_vm1, %v12629_v30 }
0x111e   :  { %11367 = vmatmul.mubr.msk.f32.vlgmr.msra.gmra.mrb[56].mxu0 %vm96_vm0, %v2933_v15 }
0x111f   :  { %11369 = vmatprep.mubr.msk.f32.mxu0 %vm12628_vm1, %v12629_v30 }
0x1122   :  { %11370 = vmatmul.mubr.msk.f32.gmra.mrb[58].mxu0 %vm96_vm0, %v2934_v29 }
0x1123   :  { %11372 = vmatprep.mubr.msk.f32.mxu0 %vm12628_vm1, %v12629_v30 }
0x1126   :  { %11373 = vmatmul.mubr.msk.f32.gmra.mrb[60].mxu0 %vm96_vm0, %v2935_v34 }
0x1127   :  { %11387 = vmatprep.mubr.msk.f32.mxu0 %vm12628_vm1, %v12629_v30 }
0x11d7   :  { %v3020_v51 = vpop.f32.mrb[44].mxu0 }
0x11d8   :  { %v13453_v52 = vadd.f32 %v3020_v51, %v13389_v27  ;;  %v11334_v53 = vpop.f32.mrb[45].mxu0 }
0x11da   :  { %3697 = vrot.lane.b32.xlu0 %v13453_v52, %s14907_s28 }
0x11dc   :  { %v3025_v25 = vpop.f32.mrb[46].mxu0 }
0x11dd   :  { %v11337_v19 = vpop.f32.mrb[47].mxu0  ;;  %v13471_v0 = vadd.f32 %v3025_v25, %v13389_v27 }
0x11e1   :  { %v3030_v55 = vpop.f32.mrb[48].mxu0 }
0x11e2   :  { %v11340_v54 = vpop.f32.mrb[49].mxu0  ;;  %v13487_v6 = vadd.f32 %v3030_v55, %v13389_v27 }
0x11e5   :  { %v3109_v31 = vpop.f32.mrb[50].mxu0 }
0x11e6   :  { %v13457_v21 = vadd.f32 %v3109_v31, %v3041_v58  ;;  %v11351_v60 = vpop.f32.mrb[51].mxu0 }
0x11e8   :  { %11376 = vmatpush3.xpose.msk.msra.mxu1 %vm425_vm2, %v13457_v21 }
0x11e9   :  { %v3114_v61 = vpop.f32.mrb[52].mxu0  ;;  %11380 = vmatprep.subr.mxu1 %v12629_v30 }
0x11ea   :  { %v13462_v62 = vadd.f32 %v3114_v61, %v3041_v58  ;;  %v11354_v63 = vpop.f32.mrb[53].mxu0 }
0x11eb   :  { %11378 = vmatmul.mubr.msk.f32.vlgmr.msra.gmra.mrb[40].mxu1 %vm425_vm2, %v13453_v52 }
0x11ec   :  { %3777 = vrot.lane.b32.xlu0 %v13462_v62, %s14907_s28  ;;  %11381 = vmatpush3.xpose.msk.msra.mxu1 %vm425_vm2, %v13462_v62 }
0x11ed   :  { %v3119_v1 = vpop.f32.mrb[54].mxu0  ;;  %11382 = vmatprep.mubr.msk.f32.mxu1 %vm12628_vm1, %v12629_v30  ;;  %11390 = vmatprep.subr.mxu1 %v12629_v30 }
0x11ee   :  { %v13476_v32 = vadd.f32 %v3119_v1, %v3041_v58  ;;  %v11357_v4 = vpop.f32.mrb[55].mxu0 }
0x11ef   :  { %11383 = vmatmul.mubr.msk.f32.vlgmr.msra.gmra.mrb[42].mxu1 %vm425_vm2, %v13471_v0 }
0x11f0   :  { %11386 = vmatpush3.xpose.msk.msra.mxu0 %vm425_vm2, %v13476_v32  ;;  %3855 = vrot.lane.b32.xlu0 %v13476_v32, %s14907_s28 }
0x11f1   :  { %v3197_v7 = vpop.f32.mrb[56].mxu0  ;;  %11395 = vmatprep.subr.mxu0 %v12629_v30  ;;  %11392 = vmatprep.mubr.msk.f32.mxu1 %vm12628_vm1, %v12629_v30 }
0x11f2   :  { %v13493_v9 = vadd.f32 %v3197_v7, %v13480_v5  ;;  %v11368_v11 = vpop.f32.mrb[57].mxu0 }
0x11f3   :  { %11388 = vmatmul.mubr.msk.f32.vlgmr.msra.gmra.mrb[62].mxu0 %vm425_vm2, %v13487_v6 }
0x11f4   :  { %3775 = vrot.lane.b32.xlu0 %v13471_v0, %s14907_s28  ;;  %11391 = vmatpush3.msra.mxu1 %v13493_v9 }
0x11f5   :  { %v3202_v27 = vpop.f32.mrb[58].mxu0  ;;  %11400 = vmatprep.subr.mxu1 %v12629_v30  ;;  %11397 = vmatprep.mubr.msk.f32.mxu0 %vm12628_vm1, %v12629_v30 }
0x11f6   :  { %v13504_v12 = vadd.f32 %v3202_v27, %v13480_v5  ;;  %v11371_v45 = vpop.f32.mrb[59].mxu0 }
0x11f8   :  { %11396 = vmatpush3.msra.mxu0 %v13504_v12 }
0x11f9   :  { %v3207_v56 = vpop.f32.mrb[60].mxu0  ;;  %11405 = vmatprep.subr.mxu0 %v12629_v30 }
0x11fa   :  { %v11374_v14 = vpop.f32.mrb[61].mxu0 }
0x124c   :  { %v3698_v45 = vpop.permute.xlu0 %3697 }
0x12be   :  { %v3283_v36 = vpop.f32.mrb[40].mxu1 }
0x12bf   :  { %v3439_v15 = vmul.f32 0.35355338, %v3283_v36  ;;  %v11379_v2 = vpop.f32.mrb[41].mxu1 }
0x12c0   :  { %v3778_v2 = vpop.permute.xlu0 %3777 }
0x12c1   :  { %v3442_v17 = vadd.f32 %v3439_v15, %v12951_v42  ;;  %v13522_v15 = vadd.f32 %v3207_v56, %v13480_v5 }
0x12c2   :  { %v3359_v39 = vpop.f32.mrb[42].mxu1 }
0x12c3   :  { %v3440_v22 = vmul.f32 0.35355338, %v3359_v39  ;;  %v11384_v18 = vpop.f32.mrb[43].mxu1  ;;  %v3445_v26 = vsel %vm425_vm2, %v3442_v17, -inf }
0x12c4   :  { %3446 = vmax.xlane.f32.xlu1 %v3445_v26  ;;  %v3856_v18 = vpop.permute.xlu0 %3855 }
0x12c5   :  { %v3443_v29 = vadd.f32 %v3440_v22, %v12951_v42 }
0x12c6   :  { %v3435_v46 = vpop.f32.mrb[62].mxu0 }
0x12c7   :  { %v3441_v23 = vmul.f32 0.35355338, %v3435_v46  ;;  %v11389_v34 = vpop.f32.mrb[63].mxu0  ;;  %v3448_v38 = vsel %vm425_vm2, %v3443_v29, -inf }
0x12c8   :  { %3449 = vmax.xlane.f32.xlu1 %v3448_v38  ;;  %v3776_v56 = vpop.permute.xlu0 %3775 }
0x12c9   :  { %v3444_v28 = vadd.f32 %v3441_v23, %v12951_v42 }
0x12cb   :  { %v3451_v43 = vsel %vm425_vm2, %v3444_v28, -inf }
0x12cc   :  { %3452 = vmax.xlane.f32.xlu1 %v3451_v43 }
0x12dd   :  { %3699 = vrot.lane.b32.xlu1 %v13457_v21, %s14907_s28 }
0x1351   :  { %v3447_v47 = vpop.xlane.xlu1 %3446 }
0x1352   :  { %v3454_v48 = vsub.f32 %v3442_v17, %v3447_v47 }
0x1354   :  { %v3457_v33 = vmul.f32 1.442695, %v3454_v48 }
0x1355   :  { %v3450_v51 = vpop.xlane.xlu1 %3449 }
0x1356   :  { %12405 = vpow2.f32 %v3457_v33  ;;  %v3455_v53 = vsub.f32 %v3443_v29, %v3450_v51 }
0x1358   :  { %v3459_v25 = vmul.f32 1.442695, %v3455_v53 }
0x1359   :  { %v3453_v19 = vpop.xlane.xlu1 %3452 }
0x135a   :  { %12407 = vpow2.f32 %v3459_v25  ;;  %v3456_v55 = vsub.f32 %v3444_v28, %v3453_v19 }
0x135c   :  { %v3461_v54 = vmul.f32 1.442695, %v3456_v55 }
0x135d   :  { %v3700_v4 = vpop.permute.xlu1 %3699 }
0x135e   :  { %12409 = vpow2.f32 %v3461_v54 }
0x1360   :  { %v12406_v58 = vpop.eup %12405 }
0x1361   :  { %v3463_v31 = vsel %vm425_vm2, %v12406_v58, 0.0 }
0x1362   :  { %3464 = vadd.xlane.f32.xlu1 %v3463_v31 }
0x1364   :  { %v12408_v60 = vpop.eup %12407 }
0x1365   :  { %v3466_v61 = vsel %vm425_vm2, %v12408_v60, 0.0 }
0x1366   :  { %3467 = vadd.xlane.f32.xlu1 %v3466_v61 }
0x1368   :  { %v12410_v63 = vpop.eup %12409 }
0x1369   :  { %v3469_v1 = vsel %vm425_vm2, %v12410_v63, 0.0 }
0x136a   :  { %3470 = vadd.xlane.f32.xlu1 %v3469_v1 }
0x137b   :  { %3853 = vrot.lane.b32.xlu1 %v13487_v6, %s14907_s28 }
0x13ef   :  { %v3465_v7 = vpop.xlane.xlu1 %3464 }
0x13f0   :  { %12411 = vrcp.f32 %v3465_v7 }
0x13f3   :  { %v3468_v11 = vpop.xlane.xlu1 %3467 }
0x13f4   :  { %12413 = vrcp.f32 %v3468_v11 }
0x13f7   :  { %v3471_v27 = vpop.xlane.xlu1 %3470 }
0x13f8   :  { %12415 = vrcp.f32 %v3471_v27 }
0x13fa   :  { %v12412_v14 = vpop.eup %12411 }
0x13fb   :  { %v3473_v36 = vmul.f32 %v12412_v14, %v12406_v58  ;;  %v3854_v26 = vpop.permute.xlu1 %3853 }
0x13fd   :  { %11393 = vmatmul.mubr.msk.f32.vlgmr.msra.gmra.mrb[44].mxu1 %vm425_vm2, %v3473_v36 }
0x13fe   :  { %v12414_v17 = vpop.eup %12413  ;;  %11401 = vmatpush3.msra.mxu1 %v13522_v15  ;;  %11402 = vmatprep.mubr.msk.f32.mxu1 %vm12628_vm1, %v12629_v30 }
0x13ff   :  { %v3475_v39 = vmul.f32 %v12414_v17, %v12408_v60  ;;  %11410 = vmatprep.subr.mxu1 %v12629_v30 }
0x1401   :  { %11398 = vmatmul.mubr.msk.f32.vlgmr.msra.gmra.mrb[64].mxu0 %vm425_vm2, %v3475_v39 }
0x1402   :  { %v12416_v22 = vpop.eup %12415  ;;  %11406 = vmatpush3.xpose.msk.msra.mxu0 %vm425_vm2, %v3700_v4  ;;  %11407 = vmatprep.mubr.msk.f32.mxu0 %vm12628_vm1, %v12629_v30 }
0x1403   :  { %11415 = vmatprep.subr.mxu0 %v12629_v30  ;;  %v3477_v5 = vmul.f32 %v12416_v22, %v12410_v63 }
0x1405   :  { %11403 = vmatmul.mubr.msk.f32.vlgmr.msra.gmra.mrb[46].mxu1 %vm425_vm2, %v3477_v5  ;;  %11408 = vmatmul.mubr.msk.f32.vlgmr.msra.gmra.mrb[66].mxu0 %vm425_vm2, %v3698_v45 }
0x1406   :  { %11411 = vmatpush3.xpose.msk.msra.mxu1 %vm425_vm2, %v3778_v2  ;;  %11416 = vmatpush3.xpose.msk.msra.mxu0 %vm425_vm2, %v3856_v18 }
0x1407   :  { %11412 = vmatprep.mubr.msk.f32.mxu1 %vm12628_vm1, %v12629_v30  ;;  %11417 = vmatprep.mubr.msk.f32.mxu0 %vm12628_vm1, %v12629_v30 }
0x1408   :  { %11420 = vmatprep.subr.mxu1 %v12629_v30  ;;  %11425 = vmatprep.subr.mxu0 %v12629_v30 }
0x1409   :  { %11413 = vmatmul.mubr.msk.f32.vlgmr.msra.gmra.mrb[48].mxu1 %vm425_vm2, %v3776_v56  ;;  %11418 = vmatmul.mubr.msk.f32.vlgmr.msra.gmra.mrb[68].mxu0 %vm425_vm2, %v3854_v26 }
0x140a   :  { %11422 = vmatprep.mubr.msk.f32.mxu1 %vm12628_vm1, %v12629_v30  ;;  %11427 = vmatprep.mubr.msk.f32.mxu0 %vm12628_vm1, %v12629_v30 }
0x14d0   :  { %v13550_v29 = vpop.f32.mrb[44].mxu1 }
0x14d1   :  { %v11394_v46 = vpop.f32.mrb[45].mxu1 }
0x14d4   :  { %v13552_v23 = vpop.f32.mrb[64].mxu0 }
0x14d5   :  { %v11399_v34 = vpop.f32.mrb[65].mxu0 }
0x14d8   :  { %v13554_v38 = vpop.f32.mrb[46].mxu1  ;;  %v3771_v28 = vpop.f32.mrb[66].mxu0 }
0x14d9   :  { %v3931_v43 = vmul.f32 0.35355338, %v3771_v28  ;;  %v11404_v47 = vpop.f32.mrb[47].mxu1  ;;  %v11409_v48 = vpop.f32.mrb[67].mxu0 }
0x14db   :  { %v3934_v33 = vadd.f32 %v3931_v43, %v12951_v42 }
0x14dc   :  { %v3849_v51 = vpop.f32.mrb[48].mxu1  ;;  %v3927_v53 = vpop.f32.mrb[68].mxu0 }
0x14dd   :  { %v3932_v25 = vmul.f32 0.35355338, %v3849_v51  ;;  %v3933_v19 = vmul.f32 0.35355338, %v3927_v53  ;;  %v11414_v55 = vpop.f32.mrb[49].mxu1  ;;  %v11419_v54 = vpop.f32.mrb[69].mxu0 }
0x14de   :  { %v3937_v58 = vsel %vm425_vm2, %v3934_v33, -inf }
0x14df   :  { %3938 = vmax.xlane.f32.xlu0 %v3937_v58  ;;  %v3936_v31 = vadd.f32 %v3933_v19, %v12951_v42  ;;  %v3935_v60 = vadd.f32 %v3932_v25, %v12951_v42 }
0x14e1   :  { %v3943_v61 = vsel %vm425_vm2, %v3936_v31, -inf  ;;  %v3940_v63 = vsel %vm425_vm2, %v3935_v60, -inf }
0x14e2   :  { %3941 = vmax.xlane.f32.xlu1 %v3940_v63 }
0x14e3   :  { %3944 = vmax.xlane.f32.xlu0 %v3943_v61 }
0x14f3   :  { %4048 = vrot.lane.b32.xlu1 %v13504_v12, %s14907_s28 }
0x14f7   :  { %4125 = vrot.lane.b32.xlu1 %v13522_v15, %s14907_s28 }
0x14f9   :  { %3971 = vrot.lane.b32.xlu0 %v13493_v9, %s14907_s28 }
0x14fb   :  { %4203 = vrot.lane.b32.xlu1 %v13457_v21, %s14926_s23 }
0x14ff   :  { %4201 = vrot.lane.b32.xlu1 %v13453_v52, %s14926_s23 }
0x156c   :  { %v3939_v1 = vpop.xlane.xlu0 %3938 }
0x156d   :  { %v3946_v4 = vsub.f32 %v3934_v33, %v3939_v1 }
0x156f   :  { %v3949_v7 = vmul.f32 1.442695, %v3946_v4  ;;  %v3942_v11 = vpop.xlane.xlu1 %3941 }
0x1570   :  { %v3947_v27 = vsub.f32 %v3935_v60, %v3942_v11  ;;  %v3945_v45 = vpop.xlane.xlu0 %3944 }
0x1571   :  { %12417 = vpow2.f32 %v3949_v7  ;;  %v3948_v14 = vsub.f32 %v3936_v31, %v3945_v45 }
0x1572   :  { %v3951_v36 = vmul.f32 1.442695, %v3947_v27 }
0x1573   :  { %v3953_v2 = vmul.f32 1.442695, %v3948_v14  ;;  %v4049_v17 = vpop.permute.xlu1 %4048 }
0x1574   :  { %12419 = vpow2.f32 %v3951_v36  ;;  %v3972_v39 = vpop.permute.xlu0 %3971  ;;  %11426 = vmatpush3.msra.mxu0 %v4049_v17 }
0x1575   :  { %12421 = vpow2.f32 %v3953_v2  ;;  %11421 = vmatpush3.msra.mxu1 %v3972_v39  ;;  %11435 = vmatprep.subr.mxu0 %v12629_v30 }
0x1576   :  { %11430 = vmatprep.subr.mxu1 %v12629_v30 }
0x1577   :  { %v4126_v34 = vpop.permute.xlu1 %4125 }
0x157b   :  { %v12418_v22 = vpop.eup %12417  ;;  %v4204_v28 = vpop.permute.xlu1 %4203 }
0x157c   :  { %v3955_v18 = vsel %vm425_vm2, %v12418_v22, 0.0 }
0x157d   :  { %3956 = vadd.xlane.f32.xlu0 %v3955_v18 }
0x157e   :  { %v12420_v5 = vpop.eup %12419 }
0x157f   :  { %v12422_v56 = vpop.eup %12421  ;;  %v3958_v26 = vsel %vm425_vm2, %v12420_v5, 0.0  ;;  %v4202_v43 = vpop.permute.xlu1 %4201 }
0x1580   :  { %v3961_v46 = vsel %vm425_vm2, %v12422_v56, 0.0 }
0x1581   :  { %3959 = vadd.xlane.f32.xlu0 %v3958_v26  ;;  %3962 = vadd.xlane.f32.xlu1 %v3961_v46 }
0x1592   :  { %4359 = vrot.lane.b32.xlu1 %v13476_v32, %s14926_s23 }
0x1597   :  { %4281 = vrot.lane.b32.xlu0 %v13462_v62, %s14926_s23 }
0x159b   :  { %4279 = vrot.lane.b32.xlu0 %v13471_v0, %s14926_s23 }
0x159f   :  { %4357 = vrot.lane.b32.xlu0 %v13487_v6, %s14926_s23 }
0x160a   :  { %v3957_v47 = vpop.xlane.xlu0 %3956 }
0x160b   :  { %12423 = vrcp.f32 %v3957_v47 }
0x160e   :  { %v3963_v48 = vpop.xlane.xlu1 %3962  ;;  %v3960_v33 = vpop.xlane.xlu0 %3959 }
0x160f   :  { %12425 = vrcp.f32 %v3963_v48 }
0x1610   :  { %12427 = vrcp.f32 %v3960_v33 }
0x1612   :  { %v4282_v25 = vpop.permute.xlu0 %4281  ;;  %v4360_v60 = vpop.permute.xlu1 %4359 }
0x1615   :  { %v12424_v51 = vpop.eup %12423 }
0x1616   :  { %v3965_v53 = vmul.f32 %v12424_v51, %v12418_v22  ;;  %v4280_v31 = vpop.permute.xlu0 %4279 }
0x1618   :  { %11423 = vmatmul.mubr.msk.f32.vlgmr.msra.gmra.mrb[50].mxu1 %vm425_vm2, %v3965_v53 }
0x1619   :  { %v12426_v19 = vpop.eup %12425  ;;  %11431 = vmatpush3.msra.mxu1 %v4126_v34  ;;  %11432 = vmatprep.mubr.msk.f32.mxu1 %vm12628_vm1, %v12629_v30 }
0x161a   :  { %v12428_v55 = vpop.eup %12427  ;;  %v3969_v54 = vmul.f32 %v12426_v19, %v12422_v56  ;;  %11440 = vmatprep.subr.mxu1 %v12629_v30  ;;  %v4358_v61 = vpop.permute.xlu0 %4357 }
0x161b   :  { %v3967_v58 = vmul.f32 %v12428_v55, %v12420_v5 }
0x161c   :  { %11433 = vmatmul.mubr.msk.f32.vlgmr.msra.gmra.mrb[52].mxu1 %vm425_vm2, %v3969_v54 }
0x161d   :  { %11428 = vmatmul.mubr.msk.f32.vlgmr.msra.gmra.mrb[70].mxu0 %vm425_vm2, %v3967_v58  ;;  %11442 = vmatprep.mubr.msk.f32.mxu1 %vm12628_vm1, %v12629_v30 }
0x161e   :  { %11436 = vmatpush3.xpose.msk.msra.mxu0 %vm425_vm2, %v4204_v28  ;;  %11437 = vmatprep.mubr.msk.f32.mxu0 %vm12628_vm1, %v12629_v30 }
0x161f   :  { %11445 = vmatprep.subr.mxu0 %v12629_v30 }
0x1620   :  { %11441 = vmatpush3.xpose.msk.msra.mxu1 %vm425_vm2, %v4282_v25 }
0x1621   :  { %11438 = vmatmul.mubr.msk.f32.vlgmr.msra.gmra.mrb[72].mxu0 %vm425_vm2, %v4202_v43  ;;  %11450 = vmatprep.subr.mxu1 %v12629_v30 }
0x1622   :  { %11446 = vmatpush3.xpose.msk.msra.mxu0 %vm425_vm2, %v4360_v60  ;;  %11447 = vmatprep.mubr.msk.f32.mxu0 %vm12628_vm1, %v12629_v30 }
0x1623   :  { %11443 = vmatmul.mubr.msk.f32.vlgmr.msra.gmra.mrb[54].mxu1 %vm425_vm2, %v4280_v31  ;;  %11455 = vmatprep.subr.mxu0 %v12629_v30 }
0x1624   :  { %11452 = vmatprep.mubr.msk.f32.mxu1 %vm12628_vm1, %v12629_v30 }
0x1625   :  { %11448 = vmatmul.mubr.msk.f32.vlgmr.msra.gmra.mrb[74].mxu0 %vm425_vm2, %v4358_v61 }
0x1626   :  { %11457 = vmatprep.mubr.msk.f32.mxu0 %vm12628_vm1, %v12629_v30 }
0x16eb   :  { %v13610_v63 = vpop.f32.mrb[50].mxu1 }
0x16ec   :  { %v11424_v1 = vpop.f32.mrb[51].mxu1 }
0x16ef   :  { %v13612_v4 = vpop.f32.mrb[52].mxu1 }
0x16f0   :  { %v13614_v7 = vpop.f32.mrb[70].mxu0  ;;  %v11434_v11 = vpop.f32.mrb[53].mxu1 }
0x16f1   :  { %v11429_v27 = vpop.f32.mrb[71].mxu0 }
0x16f4   :  { %v4275_v45 = vpop.f32.mrb[72].mxu0 }
0x16f5   :  { %v4435_v14 = vmul.f32 0.35355338, %v4275_v45  ;;  %v11439_v36 = vpop.f32.mrb[73].mxu0 }
0x16f6   :  { %v4353_v2 = vpop.f32.mrb[54].mxu1 }
0x16f7   :  { %v4438_v17 = vadd.f32 %v4435_v14, %v12951_v42  ;;  %v4436_v39 = vmul.f32 0.35355338, %v4353_v2  ;;  %v11444_v22 = vpop.f32.mrb[55].mxu1 }
0x16f8   :  { %v4431_v18 = vpop.f32.mrb[74].mxu0 }
0x16f9   :  { %v4439_v5 = vadd.f32 %v4436_v39, %v12951_v42  ;;  %v4437_v56 = vmul.f32 0.35355338, %v4431_v18  ;;  %v11449_v26 = vpop.f32.mrb[75].mxu0  ;;  %v4441_v46 = vsel %vm425_vm2, %v4438_v17, -inf }
0x16fa   :  { %4442 = vmax.xlane.f32.xlu1 %v4441_v46 }
0x16fb   :  { %v4440_v34 = vadd.f32 %v4437_v56, %v12951_v42  ;;  %v4444_v28 = vsel %vm425_vm2, %v4439_v5, -inf }
0x16fc   :  { %4445 = vmax.xlane.f32.xlu0 %v4444_v28 }
0x16fd   :  { %v4447_v43 = vsel %vm425_vm2, %v4440_v34, -inf }
0x1700   :  { %4448 = vmax.xlane.f32.xlu0 %v4447_v43 }
0x170b   :  { %4550 = vrot.lane.b32.xlu1 %v13504_v12, %s14926_s23 }
0x170f   :  { %4626 = vrot.lane.b32.xlu1 %v13522_v15, %s14926_s23 }
0x1713   :  { %4704 = vrot.lane.b32.xlu1 %v13457_v21, %s14927_s27 }
0x1716   :  { %4474 = vrot.lane.b32.xlu0 %v13493_v9, %s14926_s23 }
0x1717   :  { %4702 = vrot.lane.b32.xlu1 %v13453_v52, %s14927_s27 }
0x1787   :  { %v4443_v47 = vpop.xlane.xlu1 %4442 }
0x1788   :  { %v4450_v48 = vsub.f32 %v4438_v17, %v4443_v47 }
0x1789   :  { %v4446_v33 = vpop.xlane.xlu0 %4445 }
0x178a   :  { %v4453_v51 = vmul.f32 1.442695, %v4450_v48  ;;  %v4451_v53 = vsub.f32 %v4439_v5, %v4446_v33 }
0x178b   :  { %v4551_v25 = vpop.permute.xlu1 %4550 }
0x178c   :  { %12429 = vpow2.f32 %v4453_v51  ;;  %v4455_v19 = vmul.f32 1.442695, %v4451_v53  ;;  %11456 = vmatpush3.msra.mxu0 %v4551_v25 }
0x178d   :  { %v4449_v55 = vpop.xlane.xlu0 %4448  ;;  %11465 = vmatprep.subr.mxu0 %v12629_v30 }
0x178e   :  { %12431 = vpow2.f32 %v4455_v19  ;;  %v4452_v21 = vsub.f32 %v4440_v34, %v4449_v55 }
0x178f   :  { %v4627_v27 = vpop.permute.xlu1 %4626 }
0x1790   :  { %v4457_v54 = vmul.f32 1.442695, %v4452_v21 }
0x1791   :  { %v4475_v58 = vpop.permute.xlu0 %4474 }
0x1792   :  { %12433 = vpow2.f32 %v4457_v54  ;;  %11451 = vmatpush3.msra.mxu1 %v4475_v58 }
0x1793   :  { %11460 = vmatprep.subr.mxu1 %v12629_v30  ;;  %v4705_v45 = vpop.permute.xlu1 %4704 }
0x1796   :  { %v12430_v52 = vpop.eup %12429 }
0x1797   :  { %v4459_v31 = vsel %vm425_vm2, %v12430_v52, 0.0  ;;  %v4703_v14 = vpop.permute.xlu1 %4702 }
0x1798   :  { %v12432_v60 = vpop.eup %12431  ;;  %4460 = vadd.xlane.f32.xlu0 %v4459_v31 }
0x1799   :  { %v4462_v61 = vsel %vm425_vm2, %v12432_v60, 0.0 }
0x179a   :  { %4463 = vadd.xlane.f32.xlu1 %v4462_v61 }
0x179c   :  { %v12434_v1 = vpop.eup %12433 }
0x179d   :  { %v4465_v11 = vsel %vm425_vm2, %v12434_v1, 0.0 }
0x179e   :  { %4466 = vadd.xlane.f32.xlu0 %v4465_v11 }
0x17ab   :  { %4780 = vrot.lane.b32.xlu1 %v13471_v0, %s14927_s27 }
0x17af   :  { %4858 = vrot.lane.b32.xlu1 %v13487_v6, %s14927_s27 }
0x17b4   :  { %4782 = vrot.lane.b32.xlu0 %v13462_v62, %s14927_s27 }
0x17b8   :  { %4860 = vrot.lane.b32.xlu0 %v13476_v32, %s14927_s27 }
0x1825   :  { %v4461_v36 = vpop.xlane.xlu0 %4460 }
0x1826   :  { %12435 = vrcp.f32 %v4461_v36 }
0x1827   :  { %v4464_v2 = vpop.xlane.xlu1 %4463 }
0x1828   :  { %12437 = vrcp.f32 %v4464_v2 }
0x182b   :  { %v4467_v17 = vpop.xlane.xlu0 %4466  ;;  %v4781_v32 = vpop.permute.xlu1 %4780 }
0x182c   :  { %12439 = vrcp.f32 %v4467_v17 }
0x182f   :  { %v4783_v18 = vpop.permute.xlu0 %4782  ;;  %v4859_v26 = vpop.permute.xlu1 %4858 }
0x1830   :  { %v12436_v39 = vpop.eup %12435 }
0x1831   :  { %v4469_v0 = vmul.f32 %v12436_v39, %v12430_v52 }
0x1832   :  { %v12438_v22 = vpop.eup %12437 }
0x1833   :  { %11453 = vmatmul.mubr.msk.f32.vlgmr.msra.gmra.mrb[56].mxu1 %vm425_vm2, %v4469_v0  ;;  %v4471_v6 = vmul.f32 %v12438_v22, %v12432_v60  ;;  %v4861_v56 = vpop.permute.xlu0 %4860 }
0x1834   :  { %11461 = vmatpush3.msra.mxu1 %v4627_v27  ;;  %11462 = vmatprep.mubr.msk.f32.mxu1 %vm12628_vm1, %v12629_v30 }
0x1835   :  { %11458 = vmatmul.mubr.msk.f32.vlgmr.msra.gmra.mrb[76].mxu0 %vm425_vm2, %v4471_v6  ;;  %11470 = vmatprep.subr.mxu1 %v12629_v30 }
0x1836   :  { %v12440_v62 = vpop.eup %12439  ;;  %11466 = vmatpush3.xpose.msk.msra.mxu0 %vm425_vm2, %v4705_v45  ;;  %11467 = vmatprep.mubr.msk.f32.mxu0 %vm12628_vm1, %v12629_v30 }
0x1837   :  { %11475 = vmatprep.subr.mxu0 %v12629_v30  ;;  %v4473_v5 = vmul.f32 %v12440_v62, %v12434_v1 }
0x1839   :  { %11463 = vmatmul.mubr.msk.f32.vlgmr.msra.gmra.mrb[58].mxu1 %vm425_vm2, %v4473_v5  ;;  %11468 = vmatmul.mubr.msk.f32.vlgmr.msra.gmra.mrb[78].mxu0 %vm425_vm2, %v4703_v14 }
0x183a   :  { %11476 = vmatpush3.xpose.msk.msra.mxu0 %vm425_vm2, %v4861_v56  ;;  %11472 = vmatprep.mubr.msk.f32.mxu1 %vm12628_vm1, %v12629_v30 }
0x183b   :  { %11471 = vmatpush3.xpose.msk.msra.mxu1 %vm425_vm2, %v4783_v18  ;;  %11477 = vmatprep.mubr.msk.f32.mxu0 %vm12628_vm1, %v12629_v30 }
0x183c   :  { %11485 = vmatprep.subr.mxu0 %v12629_v30  ;;  %11480 = vmatprep.subr.mxu1 %v12629_v30 }
0x183d   :  { %11478 = vmatmul.mubr.msk.f32.vlgmr.msra.gmra.mrb[80].mxu0 %vm425_vm2, %v4859_v26 }
0x183e   :  { %11473 = vmatmul.mubr.msk.f32.vlgmr.msra.gmra.mrb[60].mxu1 %vm425_vm2, %v4781_v32  ;;  %11487 = vmatprep.mubr.msk.f32.mxu0 %vm12628_vm1, %v12629_v30 }
0x183f   :  { %11482 = vmatprep.mubr.msk.f32.mxu1 %vm12628_vm1, %v12629_v30 }
0x1906   :  { %v4546_v46 = vpop.f32.mrb[56].mxu1 }
0x1907   :  { %v11454_v34 = vpop.f32.mrb[57].mxu1 }
0x1908   :  { %v4622_v28 = vpop.f32.mrb[76].mxu0 }
0x1909   :  { %v11459_v43 = vpop.f32.mrb[77].mxu0 }
0x190c   :  { %v13670_v47 = vpop.f32.mrb[58].mxu1  ;;  %v4776_v48 = vpop.f32.mrb[78].mxu0 }
0x190d   :  { %v4936_v33 = vmul.f32 0.35355338, %v4776_v48  ;;  %v11464_v51 = vpop.f32.mrb[59].mxu1  ;;  %v11469_v53 = vpop.f32.mrb[79].mxu0 }
0x190e   :  { %v10516_v51 = vld [vmem:[%s14922_s3 + $0xe8] sm:$0xff]  ;;  %v10517_v53 = vld [vmem:[%s14922_s3 + $0xf0] sm:$0xff] }
0x190f   :  { %v4939_v25 = vadd.f32 %v4936_v33, %v12951_v42  ;;  %v10515_v33 = vld [vmem:[%s14922_s3 + $0xe0] sm:$0xff] }
0x1910   :  { %v4932_v19 = vpop.f32.mrb[80].mxu0 }
0x1911   :  { %v4854_v55 = vpop.f32.mrb[60].mxu1  ;;  %v4938_v21 = vmul.f32 0.35355338, %v4932_v19  ;;  %v11479_v54 = vpop.f32.mrb[81].mxu0  ;;  %v4942_v58 = vsel %vm425_vm2, %v4939_v25, -inf  ;;  %v10518_v19 = vld [vmem:[%s14922_s3 + $0xf8] sm:$0xff] }
0x1912   :  { %v4937_v52 = vmul.f32 0.35355338, %v4854_v55  ;;  %v11474_v31 = vpop.f32.mrb[61].mxu1  ;;  %4943 = vmax.xlane.f32.xlu0 %v4942_v58  ;;  %v12035_v55 = vpack.c.bf16 %v10518_v19, %v10517_v53 }
0x1913   :  { %v4941_v60 = vadd.f32 %v4938_v21, %v12951_v42 }
0x1914   :  { %v4940_v61 = vadd.f32 %v4937_v52, %v12951_v42 }
0x1915   :  { %v4948_v1 = vsel %vm425_vm2, %v4941_v60, -inf }
0x1916   :  { %v4945_v11 = vsel %vm425_vm2, %v4940_v61, -inf  ;;  %4949 = vmax.xlane.f32.xlu0 %v4948_v1 }
0x1917   :  { %4946 = vmax.xlane.f32.xlu1 %v4945_v11 }
0x1928   :  { %5051 = vrot.lane.b32.xlu1 %v13504_v12, %s14927_s27 }
0x199f   :  { %v4944_v27 = vpop.xlane.xlu0 %4943 }
0x19a0   :  { %v4951_v45 = vsub.f32 %v4939_v25, %v4944_v27  ;;  %v12032_v25 = vpack.c.bf16 %v10516_v51, %v10515_v33 }
0x19a2   :  { %v4954_v14 = vmul.f32 1.442695, %v4951_v45 }
0x19a3   :  { %v4950_v36 = vpop.xlane.xlu0 %4949 }
0x19a4   :  { %12441 = vpow2.f32 %v4954_v14  ;;  %v4947_v2 = vpop.xlane.xlu1 %4946  ;;  %v4953_v17 = vsub.f32 %v4941_v60, %v4950_v36 }
0x19a5   :  { %v4952_v39 = vsub.f32 %v4940_v61, %v4947_v2 }
0x19a6   :  { %v4958_v0 = vmul.f32 1.442695, %v4953_v17 }
0x19a7   :  { %v4956_v22 = vmul.f32 1.442695, %v4952_v39 }
0x19a8   :  { %12443 = vpow2.f32 %v4958_v0  ;;  %v5052_v42 = vpop.permute.xlu1 %5051 }
0x19a9   :  { %12445 = vpow2.f32 %v4956_v22  ;;  %11486 = vmatpush3.msra.mxu0 %v5052_v42 }
0x19aa   :  { %12031 = vmatprep.subr.bf16.mxu0 %v12627_v24 }
0x19ae   :  { %v12442_v18 = vpop.eup %12441 }
0x19af   :  { %v4960_v6 = vsel %vm425_vm2, %v12442_v18, 0.0 }
0x19b0   :  { %4961 = vadd.xlane.f32.xlu0 %v4960_v6  ;;  %v13750_v6 = vld [vmem:[%s14874_s7 + $0x8] sm:$0xff]  ;;  %s10549_s7 = sld [smem:[#allocation4 + $0x2]] }
0x19b2   :  { %v12444_v12 = vpop.eup %12443 }
0x19b3   :  { %v12446_v62 = vpop.eup %12445  ;;  %v4966_v32 = vsel %vm425_vm2, %v12444_v12, 0.0 }
0x19b4   :  { %v4963_v5 = vsel %vm425_vm2, %v12446_v62, 0.0  ;;  %4967 = vadd.xlane.f32.xlu1 %v4966_v32 }
0x19b5   :  { %4964 = vadd.xlane.f32.xlu0 %v4963_v5 }
0x19b6   :  { %s5638_s28 = scalar_lea.vmem [#allocation2], %s10549_s7 }
0x19c5   :  { %5127 = vrot.lane.b32.xlu1 %v13522_v15, %s14927_s27 }
0x19c9   :  { %5206 = vrot.lane.b32.xlu1 %v13610_v63, %s14928_s1 }
0x19cb   :  { %4975 = vrot.lane.b32.xlu0 %v13493_v9, %s14927_s27 }
0x19cd   :  { %5220 = vrot.lane.b32.xlu1 %v4622_v28, %s14929_s29 }
0x19cf   :  { %5218 = vrot.lane.b32.xlu0 %v4546_v46, %s14929_s29 }
0x19d3   :  { %5208 = vrot.lane.b32.xlu0 %v13614_v7, %s14928_s1 }
0x1a3d   :  { %v4962_v56 = vpop.xlane.xlu0 %4961 }
0x1a3e   :  { %12447 = vrcp.f32 %v4962_v56 }
0x1a41   :  { %v4968_v26 = vpop.xlane.xlu1 %4967 }
0x1a42   :  { %12449 = vrcp.f32 %v4968_v26  ;;  %v4965_v34 = vpop.xlane.xlu0 %4964 }
0x1a43   :  { %12451 = vrcp.f32 %v4965_v34 }
0x1a45   :  { %v5128_v9 = vpop.permute.xlu1 %5127 }
0x1a46   :  { %v4976_v15 = vpop.permute.xlu0 %4975 }
0x1a47   :  { %11481 = vmatpush3.msra.mxu1 %v4976_v15 }
0x1a48   :  { %v12448_v43 = vpop.eup %12447  ;;  %11490 = vmatprep.subr.mxu1 %v12629_v30 }
0x1a49   :  { %v4970_v63 = vmul.f32 %v12448_v43, %v12442_v18  ;;  %v5207_v61 = vpop.permute.xlu1 %5206 }
0x1a4a   :  { %v5219_v1 = vpop.permute.xlu0 %5218  ;;  %v5239_v27 = vsel %vm425_vm2, %v13550_v29, %v5207_v61  ;;  %v10522_v61 = vld [vmem:[%s14923_s6 + $0x20] sm:$0xff] }
0x1a4b   :  { %11483 = vmatmul.mubr.msk.f32.vlgmr.msra.gmra.mrb[62].mxu1 %vm425_vm2, %v4970_v63  ;;  %v5242_v14 = vsel %vm2457_vm4, %v5239_v27, %v5219_v1  ;;  %v10523_v1 = vld [vmem:[%s14923_s6 + $0x28] sm:$0xff]  ;;  %v10524_v27 = vld [vmem:[%s14923_s6 + $0x30] sm:$0xff] }
0x1a4c   :  { %v12450_v28 = vpop.eup %12449  ;;  %11491 = vmatpush3.msra.mxu1 %v5128_v9  ;;  %11492 = vmatprep.mubr.msk.f32.mxu1 %vm12628_vm1, %v12629_v30 }
0x1a4d   :  { %v12452_v7 = vpop.eup %12451  ;;  %v4974_v46 = vmul.f32 %v12450_v28, %v12444_v12  ;;  %12037 = vmatprep.subr.bf16.mxu1 %v12627_v24  ;;  %v5221_v11 = vpop.permute.xlu1 %5220  ;;  %v5256_v12 = vrot.slane %v13750_v6, %v13193_v8 }
0x1a4e   :  { %v4972_v48 = vmul.f32 %v12452_v7, %v12446_v62  ;;  %v5209_v45 = vpop.permute.xlu0 %5208 }
0x1a4f   :  { %11493 = vmatmul.mubr.msk.f32.vlgmr.msra.gmra.mrb[64].mxu1 %vm425_vm2, %v4974_v46  ;;  %v5240_v2 = vsel %vm425_vm2, %v13552_v23, %v5209_v45  ;;  %v10525_v45 = vld [vmem:[%s14923_s6 + $0x38] sm:$0xff] }
0x1a50   :  { %11488 = vmatmul.mubr.msk.f32.vlgmr.msra.gmra.mrb[82].mxu0 %vm425_vm2, %v4972_v48  ;;  %11520 = vmatprep.mubr.msk.f32.mxu1 %vm12628_vm1, %v12629_v30  ;;  %v5243_v17 = vsel %vm2457_vm4, %v5240_v2, %v5221_v11  ;;  %v12038_v11 = vpack.c.bf16 %v10523_v1, %v10522_v61  ;;  %v10544_v1 = vld [vmem:[%s14924_s30 + $0xe0] sm:$0xff] }
0x1a51   :  { %11503 = vmatprep.mubr.msk.f32.mxu0 %vm12628_vm1, %v12629_v30  ;;  %12033 = vmatpush3.bf16.msra.mxu0 %v12032_v25 }
0x1a52   :  { %12034 = vmatprep.subr.bf16.mxu0 %v12627_v24  ;;  %12039 = vmatpush3.bf16.msra.mxu1 %v12038_v11  ;;  %v10545_v11 = vld [vmem:[%s14924_s30 + $0xe8] sm:$0xff] }
0x1a53   :  { %12040 = vmatprep.subr.bf16.mxu1 %v12627_v24 }
0x1a55   :  { %12036 = vmatpush3.bf16.msra.mxu0 %v12035_v55 }
0x1a56   :  { %12043 = vmatprep.subr.bf16.mxu0 %v12627_v24 }
0x1b1e   :  { %v5047_v21 = vpop.f32.mrb[62].mxu1 }
0x1b1f   :  { %5230 = vrot.lane.b32.xlu1 %v5047_v21, %s14930_s24  ;;  %v11484_v54 = vpop.f32.mrb[63].mxu1 }
0x1b22   :  { %v5199_v58 = vpop.f32.mrb[64].mxu1 }
0x1b23   :  { %v5123_v52 = vpop.f32.mrb[82].mxu0  ;;  %5210 = vrot.lane.b32.xlu1 %v13612_v4, %s14928_s1  ;;  %v11494_v31 = vpop.f32.mrb[65].mxu1 }
0x1b24   :  { %5232 = vrot.lane.b32.xlu0 %v5123_v52, %s14930_s24  ;;  %v11489_v60 = vpop.f32.mrb[83].mxu0 }
0x1b27   :  { %5234 = vrot.lane.b32.xlu1 %v5199_v58, %s14930_s24 }
0x1b28   :  { %5222 = vrot.lane.b32.xlu0 %v13670_v47, %s14929_s29 }
0x1b91   :  { %v5231_v36 = vpop.permute.xlu1 %5230 }
0x1b92   :  { %v5245_v4 = vsel %vm2461_vm5, %v5242_v14, %v5231_v36  ;;  %v12041_v14 = vpack.c.bf16 %v10525_v45, %v10524_v27  ;;  %v12062_v27 = vpack.c.bf16 %v10545_v11, %v10544_v1  ;;  %v10546_v45 = vld [vmem:[%s14924_s30 + $0xf0] sm:$0xff] }
0x1b93   :  { %11504 = vmatmul.mubr.msk.f32.vlgmr.msra.gmra.mrb[84].mxu0 %vm96_vm0, %v5245_v4 }
0x1b94   :  { %11506 = vmatprep.mubr.msk.f32.mxu0 %vm12628_vm1, %v12629_v30  ;;  %12042 = vmatpush3.bf16.msra.mxu1 %v12041_v14  ;;  %v10547_v14 = vld [vmem:[%s14924_s30 + $0xf8] sm:$0xff] }
0x1b95   :  { %v5211_v47 = vpop.permute.xlu1 %5210  ;;  %12067 = vmatprep.subr.bf16.mxu1 %v12627_v24 }
0x1b96   :  { %v5233_v39 = vpop.permute.xlu0 %5232  ;;  %v5241_v23 = vsel %vm425_vm2, %v13554_v38, %v5211_v47 }
0x1b97   :  { %v5246_v29 = vsel %vm2461_vm5, %v5243_v17, %v5233_v39 }
0x1b98   :  { %11507 = vmatmul.mubr.msk.f32.gmra.mrb[86].mxu0 %vm96_vm0, %v5246_v29 }
0x1b99   :  { %v5235_v0 = vpop.permute.xlu1 %5234  ;;  %11509 = vmatprep.mubr.msk.f32.mxu0 %vm12628_vm1, %v12629_v30 }
0x1b9a   :  { %v5223_v22 = vpop.permute.xlu0 %5222 }
0x1b9b   :  { %v5244_v42 = vsel %vm2457_vm4, %v5241_v23, %v5223_v22  ;;  %v5391_v22 = vrot.slane %v13750_v6, %v13244_v20 }
0x1b9c   :  { %v5247_v18 = vsel %vm2461_vm5, %v5244_v42, %v5235_v0 }
0x1b9d   :  { %11510 = vmatmul.mubr.msk.f32.gmra.mrb[88].mxu0 %vm96_vm0, %v5247_v18 }
0x1b9e   :  { %11561 = vmatprep.mubr.msk.f32.mxu0 %vm12628_vm1, %v12629_v30 }
0x1c66   :  { %v5332_v62 = vpop.f32.mrb[84].mxu0 }
0x1c67   :  { %v5333_v38 = vadd.f32 %v5332_v62, %v5256_v12  ;;  %v11505_v32 = vpop.f32.mrb[85].mxu0 }
0x1c69   :  { %v13755_v5 = vadd.f32 %v5333_v38, %v13349_v10 }
0x1c6b   :  { %v5337_v56 = vpop.f32.mrb[86].mxu0  ;;  %v5349_v26 = vsel %vm96_vm0, %v13755_v5, 0.0 }
0x1c6c   :  { %v5338_v34 = vadd.f32 %v5337_v56, %v5256_v12  ;;  %v11508_v15 = vpop.f32.mrb[87].mxu0  ;;  %5350 = vadd.xlane.f32.xlu0 %v5349_v26 }
0x1c6e   :  { %v13760_v43 = vadd.f32 %v5338_v34, %v13356_v16 }
0x1c70   :  { %v5342_v63 = vpop.f32.mrb[88].mxu0  ;;  %v5352_v9 = vsel %vm96_vm0, %v13760_v43, 0.0 }
0x1c71   :  { %v5343_v28 = vadd.f32 %v5342_v63, %v5256_v12  ;;  %5353 = vadd.xlane.f32.xlu1 %v5352_v9  ;;  %v11511_v7 = vpop.f32.mrb[89].mxu0  ;;  %v5398_v12 = vrot.slane %v13750_v6, %v13247_v44 }
0x1c72   :  { %v10532_v7 = vld [vmem:[%s14924_s30 + $0x80] sm:$0xff] }
0x1c73   :  { %v13765_v10 = vadd.f32 %v5343_v28, %v13361_v35 }
0x1c75   :  { %v5355_v46 = vsel %vm96_vm0, %v13765_v10, 0.0 }
0x1c76   :  { %5356 = vadd.xlane.f32.xlu0 %v5355_v46  ;;  %v10533_v46 = vld [vmem:[%s14924_s30 + $0x88] sm:$0xff] }
0x1cf9   :  { %v5351_v48 = vpop.xlane.xlu0 %5350 }
0x1cfa   :  { %v5358_v33 = vmul.f32 0.03125, %v5351_v48  ;;  %v12044_v48 = vpack.c.bf16 %v10533_v46, %v10532_v7 }
0x1cfc   :  { %v5361_v51 = vsub.f32 %v13755_v5, %v5358_v33  ;;  %12045 = vmatpush3.bf16.msra.mxu0 %v12044_v48  ;;  %v10534_v33 = vld [vmem:[%s14924_s30 + $0x90] sm:$0xff] }
0x1cfd   :  { %12046 = vmatprep.subr.bf16.mxu0 %v12627_v24 }
0x1cfe   :  { %v5354_v16 = vpop.xlane.xlu1 %5353  ;;  %v5364_v53 = vmul.f32 %v5361_v51, %v5361_v51 }
0x1cff   :  { %v5359_v25 = vmul.f32 0.03125, %v5354_v16 }
0x1d00   :  { %v5367_v19 = vsel %vm96_vm0, %v5364_v53, 0.0  ;;  %v10536_v53 = vld [vmem:[%s14924_s30 + $0xa0] sm:$0xff] }
0x1d01   :  { %v5362_v55 = vsub.f32 %v13760_v43, %v5359_v25  ;;  %5368 = vadd.xlane.f32.xlu0 %v5367_v19  ;;  %v10537_v25 = vld [vmem:[%s14924_s30 + $0xa8] sm:$0xff] }
0x1d02   :  { %v12050_v19 = vpack.c.bf16 %v10537_v25, %v10536_v53  ;;  %v5544_v53 = vrot.slane %v13750_v6, %v13330_v57 }
0x1d03   :  { %v5357_v21 = vpop.xlane.xlu0 %5356  ;;  %v5365_v54 = vmul.f32 %v5362_v55, %v5362_v55 }
0x1d04   :  { %v5360_v35 = vmul.f32 0.03125, %v5357_v21  ;;  %v10539_v21 = vld [vmem:[%s14924_s30 + $0xb8] sm:$0xff] }
0x1d05   :  { %v5370_v58 = vsel %vm96_vm0, %v5365_v54, 0.0 }
0x1d06   :  { %v5363_v52 = vsub.f32 %v13765_v10, %v5360_v35  ;;  %5371 = vadd.xlane.f32.xlu0 %v5370_v58  ;;  %v10540_v35 = vld [vmem:[%s14924_s30 + $0xc0] sm:$0xff]  ;;  %v10541_v58 = vld [vmem:[%s14924_s30 + $0xc8] sm:$0xff] }
0x1d08   :  { %v5366_v31 = vmul.f32 %v5363_v52, %v5363_v52 }
0x1d0a   :  { %v5373_v60 = vsel %vm96_vm0, %v5366_v31, 0.0  ;;  %v10542_v31 = vld [vmem:[%s14924_s30 + $0xd0] sm:$0xff] }
0x1d0b   :  { %5374 = vadd.xlane.f32.xlu1 %v5373_v60  ;;  %v10543_v60 = vld [vmem:[%s14924_s30 + $0xd8] sm:$0xff] }
0x1d0c   :  { %v12059_v61 = vpack.c.bf16 %v10543_v60, %v10542_v31 }
0x1d8e   :  { %v5369_v36 = vpop.xlane.xlu0 %5368 }
0x1d8f   :  { %v5376_v4 = vmul.f32 0.03125, %v5369_v36  ;;  %v12065_v36 = vpack.c.bf16 %v10547_v14, %v10546_v45 }
0x1d91   :  { %v5379_v2 = vadd.f32 1e-05, %v5376_v4  ;;  %v5410_v4 = vrot.slane %v13750_v6, %v13319_v13 }
0x1d93   :  { %12453 = vrsqrt.f32 %v5379_v2  ;;  %v5372_v47 = vpop.xlane.xlu0 %5371 }
0x1d94   :  { %v5377_v17 = vmul.f32 0.03125, %v5372_v47 }
0x1d96   :  { %v5380_v39 = vadd.f32 1e-05, %v5377_v17 }
0x1d98   :  { %12455 = vrsqrt.f32 %v5380_v39  ;;  %v5375_v29 = vpop.xlane.xlu1 %5374 }
0x1d99   :  { %v5378_v0 = vmul.f32 0.03125, %v5375_v29 }
0x1d9b   :  { %v5381_v23 = vadd.f32 1e-05, %v5378_v0 }
0x1d9d   :  { %v12454_v42 = vpop.eup %12453  ;;  %12457 = vrsqrt.f32 %v5381_v23 }
0x1d9e   :  { %v5385_v18 = vmul.f32 %v12454_v42, %v5361_v51  ;;  %v10535_v51 = vld [vmem:[%s14924_s30 + $0x98] sm:$0xff] }
0x1d9f   :  { %v12047_v16 = vpack.c.bf16 %v10535_v51, %v10534_v33 }
0x1da0   :  { %v5392_v62 = vmul.f32 %v5391_v22, %v5385_v18 }
0x1da1   :  { %12048 = vmatpush3.bf16.msra.mxu0 %v12047_v16 }
0x1da2   :  { %v12456_v38 = vpop.eup %12455  ;;  %v5399_v32 = vadd.f32 %v5398_v12, %v5392_v62  ;;  %12049 = vmatprep.subr.bf16.mxu0 %v12627_v24 }
0x1da3   :  { %v5386_v56 = vmul.f32 %v12456_v38, %v5362_v55  ;;  %v10538_v55 = vld [vmem:[%s14924_s30 + $0xb0] sm:$0xff]  ;;  %s10548_s30 = sld [smem:[#allocation4 + $0x1]] }
0x1da4   :  { %11521 = vmatmul.mubr.msk.f32.vlgmr.msra.gmra.mrb[66].mxu1 %vm96_vm0, %v5399_v32  ;;  %v12053_v54 = vpack.c.bf16 %v10539_v21, %v10538_v55 }
0x1da5   :  { %11523 = vmatprep.mubr.msk.f32.mxu1 %vm12628_vm1, %v12629_v30  ;;  %v5393_v26 = vmul.f32 %v5391_v22, %v5386_v56  ;;  %12051 = vmatpush3.bf16.msra.mxu0 %v12050_v19 }
0x1da6   :  { %12052 = vmatprep.subr.bf16.mxu0 %v12627_v24 }
0x1da7   :  { %v12458_v34 = vpop.eup %12457  ;;  %v5400_v15 = vadd.f32 %v5398_v12, %v5393_v26 }
0x1da8   :  { %v5387_v63 = vmul.f32 %v12458_v34, %v5363_v52  ;;  %v12056_v52 = vpack.c.bf16 %v10541_v58, %v10540_v35 }
0x1da9   :  { %11524 = vmatmul.mubr.msk.f32.gmra.mrb[68].mxu1 %vm96_vm0, %v5400_v15  ;;  %12054 = vmatpush3.bf16.msra.mxu0 %v12053_v54  ;;  %s5635_s0 = scalar_lea.vmem [#allocation2], %s10548_s30  ;;  %s14931_s30 = smov 96  }
0x1daa   :  { %11526 = vmatprep.mubr.msk.f32.mxu1 %vm12628_vm1, %v12629_v30  ;;  %v5394_v9 = vmul.f32 %v5391_v22, %v5387_v63  ;;  %12055 = vmatprep.subr.bf16.mxu0 %v12627_v24 }
0x1dac   :  { %v5401_v28 = vadd.f32 %v5398_v12, %v5394_v9 }
0x1dad   :  { %12057 = vmatpush3.bf16.msra.mxu0 %v12056_v52 }
0x1dae   :  { %11527 = vmatmul.mubr.msk.f32.gmra.mrb[70].mxu1 %vm96_vm0, %v5401_v28  ;;  %12058 = vmatprep.subr.bf16.mxu0 %v12627_v24 }
0x1daf   :  { %11578 = vmatprep.mubr.msk.f32.mxu1 %vm12628_vm1, %v12629_v30 }
0x1db1   :  { %12060 = vmatpush3.bf16.msra.mxu0 %v12059_v61 }
0x1db2   :  { %12061 = vmatprep.subr.bf16.mxu0 %v12627_v24 }
0x1db5   :  { %12063 = vmatpush3.bf16.msra.mxu0 %v12062_v27 }
0x1db6   :  { %12064 = vmatprep.subr.bf16.mxu0 %v12627_v24 }
0x1db9   :  { %12066 = vmatpush3.bf16.msra.mxu0 %v12065_v36 }
0x1dba   :  { %12121 = vmatprep.subr.bf16.mxu0 %v12627_v24 }
0x1e77   :  { %v5486_v2 = vpop.f32.mrb[66].mxu1 }
0x1e78   :  { %v5487_v47 = vadd.f32 %v5486_v2, %v5410_v4  ;;  %v11522_v17 = vpop.f32.mrb[67].mxu1  ;;  %v5922_v2 = vld [vmem:[%s14878_s11 + $0x10] sm:$0xff] }
0x1e79   :  { %v5923_v17 = vld [vmem:[%s14878_s11 + $0x18] sm:$0xff] }
0x1e7a   :  { %v10529_v39 = vmul.f32 -1.702, %v5487_v47 }
0x1e7c   :  { %v5506_v29 = vmul.f32 1.442695, %v10529_v39  ;;  %v5491_v0 = vpop.f32.mrb[68].mxu1  ;;  %v13889_v39 = vpack.c.bf16 %v5923_v17, %v5922_v2  ;;  %v10550_v17 = vld [vmem:[%s14875_s8] ss:$0 sm:$0xff] }
0x1e7d   :  { %v5492_v23 = vadd.f32 %v5491_v0, %v5410_v4  ;;  %v11525_v22 = vpop.f32.mrb[69].mxu1  ;;  %v5925_v0 = vld [vmem:[%s14878_s11 + $0x28] sm:$0xff] }
0x1e7e   :  { %12459 = vpow2.f32 %v5506_v29  ;;  %v5924_v29 = vld [vmem:[%s14878_s11 + $0x20] sm:$0xff]  ;;  %v5926_v22 = vld [vmem:[%s14878_s11 + $0x30] sm:$0xff] }
0x1e7f   :  { %v10530_v42 = vmul.f32 -1.702, %v5492_v23 }
0x1e81   :  { %v5508_v18 = vmul.f32 1.442695, %v10530_v42  ;;  %v5496_v12 = vpop.f32.mrb[70].mxu1  ;;  %v5927_v42 = vld [vmem:[%s14878_s11 + $0x38] sm:$0xff] }
0x1e82   :  { %v5497_v62 = vadd.f32 %v5496_v12, %v5410_v4  ;;  %v11528_v38 = vpop.f32.mrb[71].mxu1  ;;  %v5921_v4 = vld [vmem:[%s14878_s11 + $0x8] sm:$0xff]  ;;  %v5928_v12 = vld [vmem:[%s14878_s11 + $0x40] sm:$0xff] }
0x1e83   :  { %12461 = vpow2.f32 %v5508_v18  ;;  %v13909_v18 = vpack.c.bf16 %v5927_v42, %v5926_v22  ;;  %v5755_v22 = vld [vmem:[%s14881_s14 + $0x8] sm:$0xff]  ;;  %v10551_v42 = vld [vmem:[%s14875_s8 + $0x1] ss:$0 sm:$0xff] }
0x1e84   :  { %v10531_v32 = vmul.f32 -1.702, %v5497_v62 }
0x1e86   :  { %v5510_v56 = vmul.f32 1.442695, %v10531_v32 }
0x1e88   :  { %v12460_v26 = vpop.eup %12459  ;;  %12463 = vpow2.f32 %v5510_v56 }
0x1e89   :  { %v5512_v34 = vadd.f32 1.0, %v12460_v26 }
0x1e8b   :  { %12465 = vrcp.f32 %v5512_v34 }
0x1e8d   :  { %v12462_v15 = vpop.eup %12461 }
0x1e8e   :  { %v5513_v63 = vadd.f32 1.0, %v12462_v15 }
0x1e90   :  { %12467 = vrcp.f32 %v5513_v63  ;;  %v5930_v63 = vld [vmem:[%s14878_s11 + $0x50] sm:$0xff] }
0x1e92   :  { %v12464_v9 = vpop.eup %12463 }
0x1e93   :  { %v5514_v28 = vadd.f32 1.0, %v12464_v9  ;;  %v5931_v9 = vld [vmem:[%s14878_s11 + $0x58] sm:$0xff] }
0x1e95   :  { %v12466_v7 = vpop.eup %12465  ;;  %12469 = vrcp.f32 %v5514_v28  ;;  %v13931_v28 = vpack.c.bf16 %v5931_v9, %v5930_v63  ;;  %v10556_v63 = vld [vmem:[%s14881_s14 + $0x28] sm:$0xff]  ;;  %v5753_v9 = vld [vmem:[%s14880_s13] sm:$0x3] }
0x1e96   :  { %v5521_v46 = vmul.f32 %v12466_v7, %v5487_v47  ;;  %v5932_v7 = vld [vmem:[%s14878_s11 + $0x60] sm:$0xff] }
0x1e98   :  { %11562 = vmatmul.mubr.f32.vlgmr.msra.gmra.mrb[90].mxu0 %v5521_v46  ;;  %v5933_v46 = vld [vmem:[%s14878_s11 + $0x68] sm:$0xff] }
0x1e99   :  { %11564 = vmatprep.mubr.msk.f32.mxu0 %vm12628_vm1, %v12629_v30 }
0x1e9a   :  { %v12468_v48 = vpop.eup %12467 }
0x1e9b   :  { %v5522_v33 = vmul.f32 %v12468_v48, %v5492_v23  ;;  %v13899_v23 = vpack.c.bf16 %v5925_v0, %v5924_v29  ;;  %v13941_v48 = vpack.c.bf16 %v5933_v46, %v5932_v7  ;;  %v5754_v0 = vld [vmem:[%s14881_s14] sm:$0xff]  ;;  %v10557_v46 = vld [vmem:[%s14881_s14 + $0x30] sm:$0xff] }
0x1e9d   :  { %11565 = vmatmul.mubr.f32.gmra.mrb[92].mxu0 %v5522_v33  ;;  %v5934_v33 = vld [vmem:[%s14878_s11 + $0x70] sm:$0xff] }
0x1e9e   :  { %11567 = vmatprep.mubr.msk.f32.mxu0 %vm12628_vm1, %v12629_v30 }
0x1e9f   :  { %v12470_v51 = vpop.eup %12469 }
0x1ea0   :  { %v5523_v16 = vmul.f32 %v12470_v51, %v5497_v62  ;;  %v5929_v62 = vld [vmem:[%s14878_s11 + $0x48] sm:$0xff]  ;;  %v5935_v51 = vld [vmem:[%s14878_s11 + $0x78] sm:$0xff] }
0x1ea1   :  { %v13919_v38 = vpack.c.bf16 %v5929_v62, %v5928_v12  ;;  %v12074_v62 = vpack.c.bf16 %v5755_v22, %v5754_v0 }
0x1ea2   :  { %11568 = vmatmul.mubr.f32.gmra.mrb[94].mxu0 %v5523_v16  ;;  %v13951_v16 = vpack.c.bf16 %v5935_v51, %v5934_v33  ;;  %v10558_v33 = vld [vmem:[%s14881_s14 + $0x38] sm:$0xff] }
0x1ea3   :  { %v12083_v51 = vpack.c.bf16 %v10558_v33, %v10557_v46 }
0x1f6b   :  { %v5611_v25 = vpop.f32.mrb[90].mxu0 }
0x1f6c   :  { %v5612_v19 = vadd.f32 %v5611_v25, %v5544_v53  ;;  %v11563_v55 = vpop.f32.mrb[91].mxu0  ;;  %v5937_v25 = vld [vmem:[%s14878_s11 + $0x88] sm:$0xff] }
0x1f6d   :  { %v5676_v55 = vld [vmem:[%s14876_s9] sm:$0xff] }
0x1f6e   :  { %v5625_v21 = vadd.f32 %v5612_v19, %v13755_v5 }
0x1f70   :  { %5628 = vst.msk [vmem:[#allocation2] sm:$0xff] %vm96_vm0, %v5625_v21  ;;  %v5616_v54 = vpop.f32.mrb[92].mxu0  ;;  %v5677_v21 = vld [vmem:[%s14876_s9 + $0x8] sm:$0xff] }
0x1f71   :  { %v5617_v35 = vadd.f32 %v5616_v54, %v5544_v53  ;;  %v11566_v58 = vpop.f32.mrb[93].mxu0  ;;  %v12068_v54 = vpack.c.bf16 %v5677_v21, %v5676_v55 }
0x1f72   :  { %v5939_v58 = vld [vmem:[%s14878_s11 + $0x98] sm:$0xff] }
0x1f73   :  { %v5626_v52 = vadd.f32 %v5617_v35, %v13760_v43  ;;  %12069 = vmatpush3.bf16.msra.mxu1 %v12068_v54  ;;  %v5938_v35 = vld [vmem:[%s14878_s11 + $0x90] sm:$0xff] }
0x1f74   :  { %12070 = vmatprep.subr.bf16.mxu1 %v12627_v24 }
0x1f75   :  { %5629 = vst.msk [vmem:[#allocation2 + $0x8] sm:$0xff] %vm96_vm0, %v5626_v52  ;;  %v5621_v31 = vpop.f32.mrb[94].mxu0  ;;  %v13978_v52 = vpack.c.bf16 %v5939_v58, %v5938_v35 }
0x1f76   :  { %v5622_v60 = vadd.f32 %v5621_v31, %v5544_v53  ;;  %v11569_v61 = vpop.f32.mrb[95].mxu0  ;;  %v5936_v53 = vld [vmem:[%s14878_s11 + $0x80] sm:$0xff]  ;;  %v5678_v31 = vld [vmem:[%s14876_s9 + $0x10] sm:$0xff] }
0x1f77   :  { %v13961_v19 = vpack.c.bf16 %v5937_v25, %v5936_v53  ;;  %v5945_v53 = vld [vmem:[%s14877_s10] sm:$0xff] }
0x1f78   :  { %v5627_v6 = vadd.f32 %v5622_v60, %v13765_v10  ;;  %v5920_v10 = vld [vmem:[%s14878_s11] sm:$0xff]  ;;  %v5679_v60 = vld [vmem:[%s14876_s9 + $0x18] sm:$0xff]  ;;  %v5947_v55 = vcombine.high %v5945_v53, %v5945_v53 }
0x1f79   :  { %v13883_v47 = vpack.c.bf16 %v5921_v4, %v5920_v10  ;;  %v12071_v61 = vpack.c.bf16 %v5679_v60, %v5678_v31  ;;  %v5836_v25 = vld [vmem:[%s14925_s25] sm:$0x3] }
0x1f7a   :  { %5630 = vst.msk [vmem:[#allocation2 + $0x10] sm:$0xff] %vm96_vm0, %v5627_v6  ;;  %v5940_v6 = vld [vmem:[%s14878_s11 + $0xa0] sm:$0xff] }
0x1f7b   :  { %12123 = vmatpush1.bf16.msra.mxu0 %v13883_v47  ;;  %12072 = vmatpush3.bf16.msra.mxu1 %v12071_v61 }
0x1f7c   :  { %12124 = vmatprep.subr.bf16.mxu0 %v12627_v24  ;;  %12073 = vmatprep.subr.bf16.mxu1 %v12627_v24 }
0x1f7f   :  { %12126 = vmatpush1.bf16.msra.mxu0 %v13889_v39 }
0x1f80   :  { %12127 = vmatprep.subr.bf16.mxu0 %v12627_v24 }
0x1f81   :  { %v5636_v5 = vld [vmem:[%s5635_s0] sm:$0x1]  ;;  %s14932_s0 = smov 120  }
0x1f82   :  { %v5639_v1 = vld [vmem:[%s5638_s28] sm:$0x1]  ;;  %v5641_v11 = vrot.slane %v5636_v5, 7  ;;  %v5941_v5 = vld [vmem:[%s14878_s11 + $0xa8] sm:$0xff]  ;;  %s14933_s28 = smov 64  }
0x1f83   :  { %v5644_v27 = vrot.slane %v5639_v1, 6  ;;  %v5633_v43 = vld [vmem:[%s5632_s5] sm:$0x1]  ;;  %12129 = vmatpush1.bf16.msra.mxu0 %v13899_v23  ;;  %v13995_v1 = vpack.c.bf16 %v5941_v5, %v5940_v6 }
0x1f84   :  { %v5647_v45 = vsel %vm5646_vm12, %v5633_v43, %v5641_v11  ;;  %12130 = vmatprep.subr.bf16.mxu0 %v12627_v24  ;;  %v5942_v11 = vld [vmem:[%s14878_s11 + $0xb0] sm:$0xff] }
0x1f85   :  { %v5649_v14 = vsel %vm5648_vm13, %v5647_v45, %v5644_v27  ;;  %v5943_v27 = vld [vmem:[%s14878_s11 + $0xb8] sm:$0xff]  ;;  %v10562_v45 = vld [vmem:[%s14877_s10 + $0x8] sm:$0xff] }
0x1f86   :  { %v5653_v36 = vsel %vm5652_vm14, %v5649_v14, 0.0  ;;  %v14005_v43 = vpack.c.bf16 %v5943_v27, %v5942_v11 }
0x1f87   :  { %5654 = vadd.xlane.f32.xlu0 %v5653_v36  ;;  %12132 = vmatpush1.bf16.msra.mxu0 %v13909_v18 }
0x1f88   :  { %12133 = vmatprep.subr.bf16.mxu0 %v12627_v24 }
0x1f8b   :  { %12135 = vmatpush1.bf16.msra.mxu0 %v13919_v38 }
0x1f8c   :  { %12136 = vmatprep.subr.bf16.mxu0 %v12627_v24 }
0x1f8f   :  { %12138 = vmatpush1.bf16.msra.mxu0 %v13931_v28 }
0x1f90   :  { %12139 = vmatprep.subr.bf16.mxu0 %v12627_v24 }
0x1f93   :  { %12141 = vmatpush1.bf16.msra.mxu0 %v13941_v48 }
0x1f94   :  { %12142 = vmatprep.subr.bf16.mxu0 %v12627_v24 }
0x1f97   :  { %12144 = vmatpush1.bf16.msra.mxu0 %v13951_v16 }
0x1f98   :  { %12145 = vmatprep.subr.bf16.mxu0 %v12627_v24 }
0x1f9b   :  { %12147 = vmatpush1.bf16.msra.mxu0 %v13961_v19 }
0x1f9c   :  { %12148 = vmatprep.subr.bf16.mxu0 %v12627_v24 }
0x1f9f   :  { %12150 = vmatpush1.bf16.msra.mxu0 %v13978_v52 }
0x1fa0   :  { %12151 = vmatprep.subr.bf16.mxu0 %v12627_v24 }
0x1fa3   :  { %12153 = vmatpush1.bf16.msra.mxu0 %v13995_v1 }
0x1fa4   :  { %12154 = vmatprep.subr.bf16.mxu0 %v12627_v24 }
0x1fa7   :  { %12156 = vmatpush1.bf16.msra.mxu0 %v14005_v43 }
0x2014   :  { %v5655_v32 = vpop.xlane.xlu0 %5654 }
0x2015   :  { %v5656_v56 = vmul.f32 0.03125, %v5655_v32 }
0x2017   :  { %v5657_v26 = vsub.f32 %v5649_v14, %v5656_v56  ;;  %v6038_v14 = vcombine.high %v10562_v45, %v10562_v45  ;;  %v5756_v56 = vld [vmem:[%s14881_s14 + $0x10] sm:$0xff] }
0x2019   :  { %v5658_v34 = vmul.f32 %v5657_v26, %v5657_v26  ;;  %10563 = vmatprep.mubr.msk.f32.mxu0 %vm5951_vm15, %v6038_v14 }
0x201a   :  { %6106 = vmatmul.mubr.f32.vlgmr.msra.gmra.mrb[96].mxu0 %v10562_v45 }
0x201b   :  { %v5659_v15 = vsel %vm5652_vm14, %v5658_v34, 0.0  ;;  %vm10265_vm14 = vcmask 123904  }
0x201c   :  { %5660 = vadd.xlane.f32.xlu1 %v5659_v15  ;;  %v10555_v15 = vld [vmem:[%s14881_s14 + $0x20] sm:$0xff] }
0x201d   :  { %v12080_v7 = vpack.c.bf16 %v10556_v63, %v10555_v15  ;;  %v10564_v63 = vld [vmem:[%s14887_s20] ss:$0 sm:$0xff] }
0x20a9   :  { %v5661_v36 = vpop.xlane.xlu1 %5660 }
0x20aa   :  { %v5662_v10 = vmul.f32 0.03125, %v5661_v36 }
0x20ac   :  { %v5663_v4 = vadd.f32 1e-05, %v5662_v10 }
0x20ae   :  { %12471 = vrsqrt.f32 %v5663_v4 }
0x20b8   :  { %v12472_v2 = vpop.eup %12471 }
0x20b9   :  { %v5665_v29 = vmul.f32 %v12472_v2, %v5657_v26  ;;  %v5757_v26 = vld [vmem:[%s14881_s14 + $0x18] sm:$0xff] }
0x20ba   :  { %v12077_v34 = vpack.c.bf16 %v5757_v26, %v5756_v56 }
0x20bb   :  { %v5670_v12 = vmul.f32 %v10550_v17, %v5665_v29 }
0x20bd   :  { %v5675_v32 = vadd.f32 %v10551_v42, %v5670_v12 }
0x20bf   :  { %11579 = vmatmul.mubr.msk.f32.vlgmr.msra.gmra.mrb[72].mxu1 %vm96_vm0, %v5675_v32 }
0x20c0   :  { %12075 = vmatpush3.bf16.msra.mxu1 %v12074_v62  ;;  %11589 = vmatprep.mubr.msk.f32.mxu1 %vm12628_vm1, %v12629_v30 }
0x20c1   :  { %12076 = vmatprep.subr.bf16.mxu1 %v12627_v24 }
0x20c4   :  { %12078 = vmatpush3.bf16.msra.mxu1 %v12077_v34 }
0x20c5   :  { %12079 = vmatprep.subr.bf16.mxu1 %v12627_v24 }
0x20c7   :  { %11590 = vmatmul.mubr.msk.f32.vlgmr.msra.gmra.mrb[74].mxu1 %vm96_vm0, %v5753_v9 }
0x20c8   :  { %12081 = vmatpush3.bf16.msra.mxu1 %v12080_v7  ;;  %11600 = vmatprep.mubr.msk.f32.mxu1 %vm12628_vm1, %v12629_v30  ;;  %v10565_v7 = vld [vmem:[%s14887_s20 + $0x1] ss:$0 sm:$0xff] }
0x20c9   :  { %12082 = vmatprep.subr.bf16.mxu1 %v12627_v24 }
0x20cc   :  { %12084 = vmatpush3.bf16.msra.mxu1 %v12083_v51 }
0x20cd   :  { %12085 = vmatprep.subr.bf16.mxu1 %v12627_v24 }
0x20cf   :  { %11601 = vmatmul.mubr.msk.f32.vlgmr.msra.gmra.mrb[76].mxu1 %vm96_vm0, %v5836_v25 }
0x20d0   :  { %12087 = vmatpush1.bf16.msra.mxu1 %v13883_v47  ;;  %10561 = vmatprep.mubr.msk.f32.mxu1 %vm5951_vm15, %v5947_v55 }
0x20d1   :  { %12088 = vmatprep.subr.bf16.mxu1 %v12627_v24 }
0x20d4   :  { %12090 = vmatpush1.bf16.msra.mxu1 %v13889_v39 }
0x20d5   :  { %12091 = vmatprep.subr.bf16.mxu1 %v12627_v24 }
0x20d8   :  { %12093 = vmatpush1.bf16.msra.mxu1 %v13899_v23  ;;  %v5944_v23 = vld [vmem:[%s14879_s12] sm:$0x1f] }
0x20d9   :  { %12094 = vmatprep.subr.bf16.mxu1 %v12627_v24 }
0x20dc   :  { %12096 = vmatpush1.bf16.msra.mxu1 %v13909_v18  ;;  %v5949_v18 = vrot.slane %v5944_v23, 1 }
0x20dd   :  { %12097 = vmatprep.subr.bf16.mxu1 %v12627_v24 }
0x20e0   :  { %12099 = vmatpush1.bf16.msra.mxu1 %v13919_v38 }
0x20e1   :  { %12100 = vmatprep.subr.bf16.mxu1 %v12627_v24 }
0x20e4   :  { %12102 = vmatpush1.bf16.msra.mxu1 %v13931_v28 }
0x20e5   :  { %12103 = vmatprep.subr.bf16.mxu1 %v12627_v24 }
0x20e8   :  { %12105 = vmatpush1.bf16.msra.mxu1 %v13941_v48 }
0x20e9   :  { %12106 = vmatprep.subr.bf16.mxu1 %v12627_v24 }
0x20ec   :  { %12108 = vmatpush1.bf16.msra.mxu1 %v13951_v16 }
0x20ed   :  { %12109 = vmatprep.subr.bf16.mxu1 %v12627_v24  ;;  %v6107_v47 = vpop.f32.mrb[96].mxu0 }
0x20ee   :  { %v6109_v39 = vpop.f32.mrb[97].mxu0  ;;  %v6108_v48 = vadd.f32 %v6107_v47, %v5949_v18 }
0x20f0   :  { %12111 = vmatpush1.bf16.msra.mxu1 %v13961_v19  ;;  %v6112_v16 = vrot.slane %v6108_v48, 7  ;;  %v10553_v19 = vld [vmem:[%s14882_s15] ss:$0 sm:$0xff] }
0x20f1   :  { %12112 = vmatprep.subr.bf16.mxu1 %v12627_v24 }
0x20f2   :  { %v6114_v58 = vsel %vm5646_vm12, %v5944_v23, %v6112_v16 }
0x20f4   :  { %12114 = vmatpush1.bf16.msra.mxu1 %v13978_v52 }
0x20f5   :  { %12115 = vmatprep.subr.bf16.mxu1 %v12627_v24 }
0x20f8   :  { %12117 = vmatpush1.bf16.msra.mxu1 %v13995_v1 }
0x20f9   :  { %12118 = vmatprep.subr.bf16.mxu1 %v12627_v24 }
0x20fc   :  { %12120 = vmatpush1.bf16.msra.mxu1 %v14005_v43 }
0x20ff   :  { %6019 = vmatmul.mubr.f32.vlgmr.msra.gmra.mrb[78].mxu1 %v5945_v53 }
0x2192   :  { %v14089_v38 = vpop.f32.mrb[72].mxu1 }
0x2193   :  { %v11580_v28 = vpop.f32.mrb[73].mxu1 }
0x219a   :  { %v5832_v21 = vpop.f32.mrb[74].mxu1 }
0x219b   :  { %v5833_v54 = vadd.f32 %v10553_v19, %v5832_v21  ;;  %v11591_v35 = vpop.f32.mrb[75].mxu1 }
0x219d   :  { %v6028_v52 = vrot.slane %v5833_v54, 3 }
0x219f   :  { %v6115_v31 = vsel %vm6031_vm3, %v6114_v58, %v6028_v52 }
0x21a0   :  { %v6116_v60 = vsel %vm6033_vm6, %v6115_v31, 0.0 }
0x21a1   :  { %v6122_v61 = vsel %vm96_vm0, %v6116_v60, 0.0 }
0x21a2   :  { %6123 = vadd.xlane.f32.xlu1 %v6122_v61  ;;  %v14096_v6 = vpop.f32.mrb[76].mxu1  ;;  %v6198_v61 = vld [vmem:[%s14883_s16] sm:$0xff] }
0x21a3   :  { %v11602_v5 = vpop.f32.mrb[77].mxu1 }
0x21a4   :  { %v6199_v5 = vld [vmem:[%s14883_s16 + $0x8] sm:$0xff] }
0x21d2   :  { %v6020_v1 = vpop.f32.mrb[78].mxu1 }
0x21d3   :  { %v6021_v11 = vadd.f32 %v6020_v1, %v5949_v18  ;;  %v6022_v27 = vpop.f32.mrb[79].mxu1  ;;  %v10568_v1 = vld [vmem:[%s14883_s16 + $0x20] sm:$0xff] }
0x21d4   :  { %v10569_v27 = vld [vmem:[%s14883_s16 + $0x28] sm:$0xff] }
0x21d5   :  { %v6025_v43 = vrot.slane %v6021_v11, 7  ;;  %v12157_v11 = vpack.c.bf16 %v6199_v5, %v6198_v61  ;;  %v14215_v5 = vsel %vm6157_vm7, 0.0, %v12633_v41 }
0x21d7   :  { %v6030_v45 = vsel %vm5646_vm12, %v5944_v23, %v6025_v43  ;;  %v6200_v43 = vld [vmem:[%s14883_s16 + $0x10] sm:$0xff]  ;;  %12158 = vmatprep.subr.bf16.mxu1 %v12157_v11 }
0x21d8   :  { %v6032_v14 = vsel %vm6031_vm3, %v6030_v45, %v6028_v52  ;;  %v6201_v45 = vld [vmem:[%s14883_s16 + $0x18] sm:$0xff]  ;;  %12160 = vmatpush3.bf16.msra.mxu1 %v12157_v11 }
0x21d9   :  { %v6034_v36 = vsel %vm6033_vm6, %v6032_v14, 0.0  ;;  %v12165_v14 = vpack.c.bf16 %v10569_v27, %v10568_v1 }
0x21da   :  { %v6119_v10 = vsel %vm96_vm0, %v6034_v36, 0.0 }
0x21db   :  { %6120 = vadd.xlane.f32.xlu0 %v6119_v10  ;;  %v10570_v10 = vld [vmem:[%s14883_s16 + $0x30] sm:$0xff]  ;;  %12166 = vmatprep.subr.bf16.mxu0 %v12165_v14 }
0x21dc   :  { %12168 = vmatpush3.bf16.msra.mxu0 %v12165_v14 }
0x222f   :  { %v6124_v4 = vpop.xlane.xlu1 %6123 }
0x2230   :  { %v6126_v2 = vmul.f32 0.03125, %v6124_v4  ;;  %v10571_v4 = vld [vmem:[%s14883_s16 + $0x38] sm:$0xff] }
0x2232   :  { %v6128_v17 = vsub.f32 %v6116_v60, %v6126_v2  ;;  %v12169_v2 = vpack.c.bf16 %v10571_v4, %v10570_v10 }
0x2234   :  { %v6130_v29 = vmul.f32 %v6128_v17, %v6128_v17  ;;  %12170 = vmatprep.subr.bf16.mxu0 %v12169_v2 }
0x2235   :  { %12172 = vmatpush3.bf16.msra.mxu0 %v12169_v2 }
0x2236   :  { %v6134_v0 = vsel %vm96_vm0, %v6130_v29, 0.0  ;;  %11636 = vmatprep.subr.mxu0 %v12629_v30  ;;  %v10575_v29 = vld [vmem:[%s14883_s16 + $0x48] sm:$0xff] }
0x2237   :  { %6135 = vadd.xlane.f32.xlu1 %v6134_v0 }
0x2268   :  { %v6121_v22 = vpop.xlane.xlu0 %6120 }
0x2269   :  { %v6125_v42 = vmul.f32 0.03125, %v6121_v22  ;;  %v14154_v22 = vld [vmem:[%s14886_s19] sm:$0xff] }
0x226b   :  { %v6127_v12 = vsub.f32 %v6034_v36, %v6125_v42  ;;  %v12161_v36 = vpack.c.bf16 %v6201_v45, %v6200_v43  ;;  %v14158_v42 = vrot.slane %v14154_v22, %v12823_v37 }
0x226d   :  { %v6129_v62 = vmul.f32 %v6127_v12, %v6127_v12  ;;  %12162 = vmatprep.subr.bf16.mxu1 %v12161_v36 }
0x226e   :  { %12164 = vmatpush3.bf16.msra.mxu1 %v12161_v36 }
0x226f   :  { %v6131_v32 = vsel %vm96_vm0, %v6129_v62, 0.0 }
0x2270   :  { %6132 = vadd.xlane.f32.xlu0 %v6131_v32 }
0x22c4   :  { %v6136_v56 = vpop.xlane.xlu1 %6135 }
0x22c5   :  { %v6138_v26 = vmul.f32 0.03125, %v6136_v56 }
0x22c7   :  { %v6140_v34 = vadd.f32 1e-05, %v6138_v26 }
0x22c9   :  { %12473 = vrsqrt.f32 %v6140_v34 }
0x22d3   :  { %v12474_v15 = vpop.eup %12473 }
0x22d4   :  { %v6144_v9 = vmul.f32 %v12474_v15, %v6128_v17  ;;  %v10574_v17 = vld [vmem:[%s14883_s16 + $0x40] sm:$0xff] }
0x22d5   :  { %v12173_v0 = vpack.c.bf16 %v10575_v29, %v10574_v17 }
0x22d6   :  { %v6150_v46 = vmul.f32 %v10564_v63, %v6144_v9  ;;  %v6189_v9 = vrot.slane %v14154_v22, %v12836_v49 }
0x22d7   :  { %12174 = vmatprep.subr.bf16.mxu1 %v12173_v0 }
0x22d8   :  { %v14108_v33 = vadd.f32 %v10565_v7, %v6150_v46 }
0x22da   :  { %v6163_v51 = vsel %vm96_vm0, %v14108_v33, 0.0 }
0x22db   :  { %6164 = vadd.xlane.f32.xlu1 %v6163_v51 }
0x22fd   :  { %v6133_v53 = vpop.xlane.xlu0 %6132 }
0x22fe   :  { %v6137_v25 = vmul.f32 0.03125, %v6133_v53  ;;  %v6195_v53 = vrot.slane %v14154_v22, %v12839_v50 }
0x2300   :  { %v6139_v55 = vadd.f32 1e-05, %v6137_v25 }
0x2302   :  { %12475 = vrsqrt.f32 %v6139_v55  ;;  %v10576_v55 = vld [vmem:[%s14883_s16 + $0x50] sm:$0xff] }
0x230c   :  { %v12476_v47 = vpop.eup %12475 }
0x230d   :  { %v6143_v39 = vmul.f32 %v12476_v47, %v6127_v12  ;;  %v10577_v47 = vld [vmem:[%s14883_s16 + $0x58] sm:$0xff] }
0x230f   :  { %v6149_v23 = vmul.f32 %v10564_v63, %v6143_v39 }
0x2311   :  { %v14112_v18 = vadd.f32 %v10565_v7, %v6149_v23 }
0x2313   :  { %v6160_v28 = vsel %vm96_vm0, %v14112_v18, 0.0 }
0x2314   :  { %6161 = vadd.xlane.f32.xlu0 %v6160_v28  ;;  %v12177_v28 = vpack.c.bf16 %v10577_v47, %v10576_v55 }
0x2368   :  { %v6165_v48 = vpop.xlane.xlu1 %6164 }
0x2369   :  { %v6167_v16 = vmul.f32 0.03125, %v6165_v48 }
0x236b   :  { %v6169_v19 = vsub.f32 %v14108_v33, %v6167_v16 }
0x236d   :  { %v6171_v21 = vmul.f32 %v6169_v19, %v6169_v19 }
0x236f   :  { %v6175_v54 = vsel %vm96_vm0, %v6171_v21, 0.0 }
0x2370   :  { %6176 = vadd.xlane.f32.xlu1 %v6175_v54 }
0x23a1   :  { %v6162_v35 = vpop.xlane.xlu0 %6161 }
0x23a2   :  { %v6166_v58 = vmul.f32 0.03125, %v6162_v35 }
0x23a4   :  { %v6168_v52 = vsub.f32 %v14112_v18, %v6166_v58 }
0x23a6   :  { %v6170_v31 = vmul.f32 %v6168_v52, %v6168_v52 }
0x23a8   :  { %v6172_v60 = vsel %vm96_vm0, %v6170_v31, 0.0 }
0x23a9   :  { %6173 = vadd.xlane.f32.xlu0 %v6172_v60 }
0x23bf   :  { %6293 = vrot.lane.b32.xlu0 %v14158_v42, %s14931_s30 }
0x23fd   :  { %v6177_v12 = vpop.xlane.xlu1 %6176 }
0x23fe   :  { %v6179_v62 = vmul.f32 0.03125, %v6177_v12 }
0x2400   :  { %v6181_v32 = vadd.f32 1e-05, %v6179_v62 }
0x2402   :  { %12477 = vrsqrt.f32 %v6181_v32 }
0x240c   :  { %v12478_v15 = vpop.eup %12477 }
0x240d   :  { %v6185_v63 = vmul.f32 %v12478_v15, %v6169_v19 }
0x240f   :  { %v6191_v51 = vmul.f32 %v6189_v9, %v6185_v63 }
0x2411   :  { %v6197_v23 = vadd.f32 %v6195_v53, %v6191_v51 }
0x2436   :  { %v6174_v56 = vpop.xlane.xlu0 %6173 }
0x2437   :  { %v6178_v26 = vmul.f32 0.03125, %v6174_v56 }
0x2439   :  { %v6180_v34 = vadd.f32 1e-05, %v6178_v26 }
0x243a   :  { %v6294_v48 = vpop.permute.xlu0 %6293 }
0x243b   :  { %12479 = vrsqrt.f32 %v6180_v34 }
0x2445   :  { %v12480_v7 = vpop.eup %12479 }
0x2446   :  { %v6184_v46 = vmul.f32 %v12480_v7, %v6168_v52 }
0x2448   :  { %v6190_v25 = vmul.f32 %v6189_v9, %v6184_v46 }
0x244a   :  { %v6196_v39 = vadd.f32 %v6195_v53, %v6190_v25 }
0x244c   :  { %11611 = vmatprep.mubr.msk.f32.mxu1 %vm96_vm0, %v6196_v39  ;;  %11622 = vmatprep.mubr.msk.f32.mxu0 %vm96_vm0, %v6196_v39 }
0x244d   :  { %11612 = vmatmul.mubr.msk.f32.vlgmr.msra.gmra.mrb[80].mxu1 %vm96_vm0, %v6197_v23  ;;  %11623 = vmatmul.mubr.msk.f32.vlgmr.msra.gmra.mrb[98].mxu0 %vm96_vm0, %v6197_v23 }
0x244e   :  { %12176 = vmatpush3.bf16.msra.mxu1 %v12173_v0  ;;  %11633 = vmatprep.mubr.msk.f32.mxu1 %vm96_vm0, %v6196_v39 }
0x244f   :  { %12178 = vmatprep.subr.bf16.mxu1 %v12177_v28  ;;  %11638 = vmatprep.mubr.msk.f32.mxu0 %vm12628_vm1, %v12629_v30 }
0x2452   :  { %12180 = vmatpush3.bf16.msra.mxu1 %v12177_v28 }
0x2453   :  { %11646 = vmatprep.subr.mxu1 %v12629_v30 }
0x2455   :  { %11634 = vmatmul.mubr.msk.f32.vlgmr.msra.gmra.mrb[82].mxu1 %vm96_vm0, %v6197_v23 }
0x2456   :  { %11648 = vmatprep.mubr.msk.f32.mxu1 %vm12628_vm1, %v12629_v30 }
0x2520   :  { %v11613_v16 = vpop.f32.mrb[80].mxu1  ;;  %v11624_v19 = vpop.f32.mrb[98].mxu0 }
0x2521   :  { %v6278_v21 = vpop.f32.mrb[81].mxu1  ;;  %v6362_v54 = vpop.f32.mrb[99].mxu0  ;;  %v14193_v52 = vadd.f32 %v11624_v19, %v6294_v48  ;;  %v14202_v60 = vadd.f32 %v11613_v16, %v14158_v42 }
0x2522   :  { %v14183_v35 = vadd.f32 %v6362_v54, %v6294_v48  ;;  %v14190_v58 = vadd.f32 %v6278_v21, %v14158_v42 }
0x2524   :  { %6780 = vrot.lane.b32.xlu0 %v14183_v35, %s14932_s0  ;;  %11637 = vmatpush3.xpose.msk.msra.mxu0 %vm425_vm2, %v14183_v35 }
0x2525   :  { %11641 = vmatprep.subr.mxu0 %v12629_v30 }
0x2527   :  { %11639 = vmatmul.mubr.msk.f32.vlgmr.msra.gmra.mrb[100].mxu0 %vm425_vm2, %v14190_v58 }
0x2528   :  { %v11635_v31 = vpop.f32.mrb[82].mxu1  ;;  %6858 = vrot.lane.b32.xlu0 %v14193_v52, %s14932_s0  ;;  %11642 = vmatpush3.xpose.msk.msra.mxu0 %vm425_vm2, %v14193_v52 }
0x2529   :  { %v6445_v61 = vpop.f32.mrb[83].mxu1  ;;  %11643 = vmatprep.mubr.msk.f32.mxu0 %vm12628_vm1, %v12629_v30  ;;  %11651 = vmatprep.subr.mxu0 %v12629_v30 }
0x252b   :  { %11644 = vmatmul.mubr.msk.f32.vlgmr.msra.gmra.mrb[102].mxu0 %vm425_vm2, %v14202_v60 }
0x252c   :  { %6778 = vrot.lane.b32.xlu0 %v14190_v58, %s14932_s0  ;;  %11653 = vmatprep.mubr.msk.f32.mxu0 %vm12628_vm1, %v12629_v30 }
0x2596   :  { %v6781_v7 = vpop.permute.xlu0 %6780 }
0x259a   :  { %v6859_v51 = vpop.permute.xlu0 %6858 }
0x259e   :  { %v6779_v47 = vpop.permute.xlu0 %6778 }
0x25fa   :  { %v6526_v1 = vpop.f32.mrb[100].mxu0 }
0x25fb   :  { %v6606_v11 = vmul.f32 0.35355338, %v6526_v1  ;;  %v11640_v27 = vpop.f32.mrb[101].mxu0 }
0x25fd   :  { %v6608_v43 = vadd.f32 %v6606_v11, %v14215_v5 }
0x25fe   :  { %v6602_v45 = vpop.f32.mrb[102].mxu0 }
0x25ff   :  { %v6607_v14 = vmul.f32 0.35355338, %v6602_v45  ;;  %v11645_v36 = vpop.f32.mrb[103].mxu0  ;;  %v6610_v10 = vsel %vm425_vm2, %v6608_v43, -inf }
0x2600   :  { %6611 = vmax.xlane.f32.xlu1 %v6610_v10 }
0x2601   :  { %v6609_v4 = vadd.f32 %v6607_v14, %v14215_v5 }
0x2603   :  { %v6613_v2 = vsel %vm425_vm2, %v6609_v4, -inf }
0x2604   :  { %6614 = vmax.xlane.f32.xlu1 %v6613_v2 }
0x2615   :  { %6376 = vrot.lane.b32.xlu1 %v14158_v42, %s14933_s28 }
0x268d   :  { %v6612_v40 = vpop.xlane.xlu1 %6611 }
0x268e   :  { %v6616_v41 = vsub.f32 %v6608_v43, %v6612_v40 }
0x2690   :  { %v6618_v17 = vmul.f32 1.442695, %v6616_v41 }
0x2691   :  { %v6615_v29 = vpop.xlane.xlu1 %6614 }
0x2692   :  { %12481 = vpow2.f32 %v6618_v17  ;;  %v6617_v0 = vsub.f32 %v6609_v4, %v6615_v29 }
0x2694   :  { %v6620_v12 = vmul.f32 1.442695, %v6617_v0 }
0x2695   :  { %v6377_v62 = vpop.permute.xlu1 %6376 }
0x2696   :  { %12483 = vpow2.f32 %v6620_v12  ;;  %v14223_v32 = vadd.f32 %v6445_v61, %v6377_v62  ;;  %v14225_v56 = vadd.f32 %v11635_v31, %v6377_v62 }
0x2698   :  { %11647 = vmatpush3.msra.mxu1 %v14223_v32  ;;  %11652 = vmatpush3.msra.mxu0 %v14225_v56 }
0x2699   :  { %11656 = vmatprep.subr.mxu1 %v12629_v30  ;;  %11661 = vmatprep.subr.mxu0 %v12629_v30 }
0x269c   :  { %v12482_v42 = vpop.eup %12481 }
0x269d   :  { %v6622_v26 = vsel %vm425_vm2, %v12482_v42, 0.0 }
0x269e   :  { %6623 = vadd.xlane.f32.xlu1 %v6622_v26 }
0x26a0   :  { %v12484_v34 = vpop.eup %12483 }
0x26a1   :  { %v6625_v15 = vsel %vm425_vm2, %v12484_v34, 0.0 }
0x26a2   :  { %6626 = vadd.xlane.f32.xlu1 %v6625_v15 }
0x26b3   :  { %6856 = vrot.lane.b32.xlu1 %v14202_v60, %s14932_s0 }
0x272b   :  { %v6624_v63 = vpop.xlane.xlu1 %6623 }
0x272c   :  { %12485 = vrcp.f32 %v6624_v63 }
0x272f   :  { %v6627_v9 = vpop.xlane.xlu1 %6626 }
0x2730   :  { %12487 = vrcp.f32 %v6627_v9 }
0x2733   :  { %v6857_v39 = vpop.permute.xlu1 %6856 }
0x2736   :  { %v12486_v46 = vpop.eup %12485 }
0x2737   :  { %v6629_v53 = vmul.f32 %v12486_v46, %v12482_v42 }
0x2739   :  { %11649 = vmatmul.mubr.msk.f32.vlgmr.msra.gmra.mrb[84].mxu1 %vm425_vm2, %v6629_v53 }
0x273a   :  { %v12488_v25 = vpop.eup %12487  ;;  %11657 = vmatpush3.xpose.msk.msra.mxu1 %vm425_vm2, %v6781_v7  ;;  %11658 = vmatprep.mubr.msk.f32.mxu1 %vm12628_vm1, %v12629_v30 }
0x273b   :  { %v6631_v55 = vmul.f32 %v12488_v25, %v12484_v34  ;;  %11666 = vmatprep.subr.mxu1 %v12629_v30 }
0x273d   :  { %11654 = vmatmul.mubr.msk.f32.vlgmr.msra.gmra.mrb[104].mxu0 %vm425_vm2, %v6631_v55  ;;  %11659 = vmatmul.mubr.msk.f32.vlgmr.msra.gmra.mrb[86].mxu1 %vm425_vm2, %v6779_v47 }
0x273e   :  { %11662 = vmatpush3.xpose.msk.msra.mxu0 %vm425_vm2, %v6859_v51  ;;  %11663 = vmatprep.mubr.msk.f32.mxu0 %vm12628_vm1, %v12629_v30 }
0x273f   :  { %11671 = vmatprep.subr.mxu0 %v12629_v30  ;;  %11668 = vmatprep.mubr.msk.f32.mxu1 %vm12628_vm1, %v12629_v30 }
0x2741   :  { %11664 = vmatmul.mubr.msk.f32.vlgmr.msra.gmra.mrb[106].mxu0 %vm425_vm2, %v6857_v39 }
0x2742   :  { %11673 = vmatprep.mubr.msk.f32.mxu0 %vm12628_vm1, %v12629_v30 }
0x280c   :  { %v14251_v23 = vpop.f32.mrb[84].mxu1 }
0x280d   :  { %v11650_v28 = vpop.f32.mrb[85].mxu1 }
0x2810   :  { %v14253_v48 = vpop.f32.mrb[104].mxu0  ;;  %v6852_v16 = vpop.f32.mrb[86].mxu1 }
0x2811   :  { %v6934_v19 = vmul.f32 0.35355338, %v6852_v16  ;;  %v11655_v21 = vpop.f32.mrb[105].mxu0  ;;  %v11660_v54 = vpop.f32.mrb[87].mxu1 }
0x2813   :  { %v6936_v31 = vadd.f32 %v6934_v19, %v14215_v5 }
0x2814   :  { %v6930_v61 = vpop.f32.mrb[106].mxu0 }
0x2815   :  { %v6935_v1 = vmul.f32 0.35355338, %v6930_v61  ;;  %v11665_v11 = vpop.f32.mrb[107].mxu0  ;;  %v6938_v27 = vsel %vm425_vm2, %v6936_v31, -inf }
0x2816   :  { %6939 = vmax.xlane.f32.xlu0 %v6938_v27 }
0x2817   :  { %v6937_v43 = vadd.f32 %v6935_v1, %v14215_v5 }
0x2819   :  { %v6941_v45 = vsel %vm425_vm2, %v6937_v43, -inf }
0x281a   :  { %6942 = vmax.xlane.f32.xlu1 %v6941_v45 }
0x282b   :  { %7038 = vrot.lane.b32.xlu1 %v14225_v56, %s14932_s0 }
0x282c   :  { %6961 = vrot.lane.b32.xlu0 %v14223_v32, %s14932_s0 }
0x282f   :  { %7116 = vrot.lane.b32.xlu1 %v14183_v35, %s14926_s23 }
0x2833   :  { %7194 = vrot.lane.b32.xlu1 %v14193_v52, %s14926_s23 }
0x2837   :  { %7192 = vrot.lane.b32.xlu1 %v14202_v60, %s14926_s23 }
0x28a3   :  { %v6940_v14 = vpop.xlane.xlu0 %6939 }
0x28a4   :  { %v6944_v36 = vsub.f32 %v6936_v31, %v6940_v14 }
0x28a6   :  { %v6946_v10 = vmul.f32 1.442695, %v6944_v36 }
0x28a7   :  { %v6962_v4 = vpop.permute.xlu0 %6961  ;;  %v6943_v2 = vpop.xlane.xlu1 %6942 }
0x28a8   :  { %12489 = vpow2.f32 %v6946_v10  ;;  %v6945_v40 = vsub.f32 %v6937_v43, %v6943_v2  ;;  %11667 = vmatpush3.msra.mxu1 %v6962_v4 }
0x28a9   :  { %11676 = vmatprep.subr.mxu1 %v12629_v30 }
0x28aa   :  { %v6948_v41 = vmul.f32 1.442695, %v6945_v40 }
0x28ab   :  { %v7039_v17 = vpop.permute.xlu1 %7038 }
0x28ac   :  { %12491 = vpow2.f32 %v6948_v41  ;;  %11672 = vmatpush3.msra.mxu0 %v7039_v17 }
0x28ad   :  { %11681 = vmatprep.subr.mxu0 %v12629_v30 }
0x28af   :  { %v7117_v34 = vpop.permute.xlu1 %7116 }
0x28b2   :  { %v12490_v29 = vpop.eup %12489 }
0x28b3   :  { %v6950_v0 = vsel %vm425_vm2, %v12490_v29, 0.0  ;;  %v7195_v7 = vpop.permute.xlu1 %7194 }
0x28b4   :  { %6951 = vadd.xlane.f32.xlu0 %v6950_v0 }
0x28b6   :  { %v12492_v12 = vpop.eup %12491 }
0x28b7   :  { %v6953_v62 = vsel %vm425_vm2, %v12492_v12, 0.0  ;;  %v7193_v53 = vpop.permute.xlu1 %7192 }
0x28b8   :  { %6954 = vadd.xlane.f32.xlu0 %v6953_v62 }
0x28ce   :  { %7114 = vrot.lane.b32.xlu0 %v14190_v58, %s14926_s23 }
0x2941   :  { %v6952_v42 = vpop.xlane.xlu0 %6951 }
0x2942   :  { %12493 = vrcp.f32 %v6952_v42 }
0x2945   :  { %v6955_v26 = vpop.xlane.xlu0 %6954 }
0x2946   :  { %12495 = vrcp.f32 %v6955_v26 }
0x2949   :  { %v7115_v51 = vpop.permute.xlu0 %7114 }
0x294c   :  { %v12494_v15 = vpop.eup %12493 }
0x294d   :  { %v6957_v63 = vmul.f32 %v12494_v15, %v12490_v29 }
0x294f   :  { %11669 = vmatmul.mubr.msk.f32.vlgmr.msra.gmra.mrb[88].mxu1 %vm425_vm2, %v6957_v63 }
0x2950   :  { %v12496_v9 = vpop.eup %12495  ;;  %11677 = vmatpush3.xpose.msk.msra.mxu1 %vm425_vm2, %v7117_v34  ;;  %11678 = vmatprep.mubr.msk.f32.mxu1 %vm12628_vm1, %v12629_v30 }
0x2951   :  { %v6959_v46 = vmul.f32 %v12496_v9, %v12492_v12  ;;  %11686 = vmatprep.subr.mxu1 %v12629_v30 }
0x2953   :  { %11674 = vmatmul.mubr.msk.f32.vlgmr.msra.gmra.mrb[108].mxu0 %vm425_vm2, %v6959_v46  ;;  %11679 = vmatmul.mubr.msk.f32.vlgmr.msra.gmra.mrb[90].mxu1 %vm425_vm2, %v7115_v51 }
0x2954   :  { %11682 = vmatpush3.xpose.msk.msra.mxu0 %vm425_vm2, %v7195_v7  ;;  %11683 = vmatprep.mubr.msk.f32.mxu0 %vm12628_vm1, %v12629_v30 }
0x2955   :  { %11691 = vmatprep.subr.mxu0 %v12629_v30  ;;  %11688 = vmatprep.mubr.msk.f32.mxu1 %vm12628_vm1, %v12629_v30 }
0x2957   :  { %11684 = vmatmul.mubr.msk.f32.vlgmr.msra.gmra.mrb[110].mxu0 %vm425_vm2, %v7193_v53 }
0x2958   :  { %11693 = vmatprep.mubr.msk.f32.mxu0 %vm12628_vm1, %v12629_v30 }
0x2a22   :  { %v14291_v25 = vpop.f32.mrb[88].mxu1 }
0x2a23   :  { %v11670_v55 = vpop.f32.mrb[89].mxu1 }
0x2a26   :  { %v14293_v47 = vpop.f32.mrb[108].mxu0  ;;  %v7188_v39 = vpop.f32.mrb[90].mxu1 }
0x2a27   :  { %v7270_v28 = vmul.f32 0.35355338, %v7188_v39  ;;  %v11675_v16 = vpop.f32.mrb[109].mxu0  ;;  %v11680_v19 = vpop.f32.mrb[91].mxu1 }
0x2a29   :  { %v7272_v21 = vadd.f32 %v7270_v28, %v14215_v5 }
0x2a2a   :  { %v7266_v54 = vpop.f32.mrb[110].mxu0 }
0x2a2b   :  { %v7271_v31 = vmul.f32 0.35355338, %v7266_v54  ;;  %v11685_v61 = vpop.f32.mrb[111].mxu0  ;;  %v7274_v1 = vsel %vm425_vm2, %v7272_v21, -inf }
0x2a2c   :  { %7275 = vmax.xlane.f32.xlu0 %v7274_v1 }
0x2a2d   :  { %v7273_v11 = vadd.f32 %v7271_v31, %v14215_v5 }
0x2a2f   :  { %v7277_v27 = vsel %vm425_vm2, %v7273_v11, -inf }
0x2a30   :  { %7278 = vmax.xlane.f32.xlu1 %v7277_v27 }
0x2a41   :  { %7372 = vrot.lane.b32.xlu1 %v14225_v56, %s14926_s23 }
0x2a42   :  { %7296 = vrot.lane.b32.xlu0 %v14223_v32, %s14926_s23 }
0x2a45   :  { %7450 = vrot.lane.b32.xlu1 %v14183_v35, %s14927_s27 }
0x2a49   :  { %7528 = vrot.lane.b32.xlu1 %v14193_v52, %s14927_s27 }
0x2a4d   :  { %7526 = vrot.lane.b32.xlu1 %v14202_v60, %s14927_s27 }
0x2ab9   :  { %v7276_v43 = vpop.xlane.xlu0 %7275 }
0x2aba   :  { %v7280_v45 = vsub.f32 %v7272_v21, %v7276_v43 }
0x2abc   :  { %v7282_v14 = vmul.f32 1.442695, %v7280_v45 }
0x2abd   :  { %v7297_v36 = vpop.permute.xlu0 %7296  ;;  %v7279_v10 = vpop.xlane.xlu1 %7278 }
0x2abe   :  { %12497 = vpow2.f32 %v7282_v14  ;;  %v7281_v4 = vsub.f32 %v7273_v11, %v7279_v10  ;;  %11687 = vmatpush3.msra.mxu1 %v7297_v36 }
0x2abf   :  { %11696 = vmatprep.subr.mxu1 %v12629_v30 }
0x2ac0   :  { %v7284_v2 = vmul.f32 1.442695, %v7281_v4 }
0x2ac1   :  { %v7373_v40 = vpop.permute.xlu1 %7372 }
0x2ac2   :  { %12499 = vpow2.f32 %v7284_v2  ;;  %11692 = vmatpush3.msra.mxu0 %v7373_v40 }
0x2ac3   :  { %11701 = vmatprep.subr.mxu0 %v12629_v30 }
0x2ac5   :  { %v7451_v0 = vpop.permute.xlu1 %7450 }
0x2ac8   :  { %v12498_v35 = vpop.eup %12497 }
0x2ac9   :  { %v7286_v52 = vsel %vm425_vm2, %v12498_v35, 0.0  ;;  %v7529_v26 = vpop.permute.xlu1 %7528 }
0x2aca   :  { %7287 = vadd.xlane.f32.xlu0 %v7286_v52 }
0x2acc   :  { %v12500_v60 = vpop.eup %12499 }
0x2acd   :  { %v7289_v41 = vsel %vm425_vm2, %v12500_v60, 0.0  ;;  %v7527_v15 = vpop.permute.xlu1 %7526 }
0x2ace   :  { %7290 = vadd.xlane.f32.xlu0 %v7289_v41  ;;  %v10605_v41 = vld [vmem:[%s14883_s16 + $0x68] sm:$0xff] }
0x2ae4   :  { %7448 = vrot.lane.b32.xlu0 %v14190_v58, %s14927_s27 }
0x2b57   :  { %v7288_v17 = vpop.xlane.xlu0 %7287 }
0x2b58   :  { %12501 = vrcp.f32 %v7288_v17 }
0x2b5b   :  { %v7291_v29 = vpop.xlane.xlu0 %7290 }
0x2b5c   :  { %12503 = vrcp.f32 %v7291_v29  ;;  %v10606_v29 = vld [vmem:[%s14883_s16 + $0x70] sm:$0xff] }
0x2b5f   :  { %v7449_v58 = vpop.permute.xlu0 %7448 }
0x2b62   :  { %v12502_v12 = vpop.eup %12501 }
0x2b63   :  { %v7293_v62 = vmul.f32 %v12502_v12, %v12498_v35 }
0x2b65   :  { %11689 = vmatmul.mubr.msk.f32.vlgmr.msra.gmra.mrb[92].mxu1 %vm425_vm2, %v7293_v62 }
0x2b66   :  { %v12504_v42 = vpop.eup %12503  ;;  %11697 = vmatpush3.xpose.msk.msra.mxu1 %vm425_vm2, %v7451_v0  ;;  %11698 = vmatprep.mubr.msk.f32.mxu1 %vm12628_vm1, %v12629_v30  ;;  %v10607_v0 = vld [vmem:[%s14883_s16 + $0x78] sm:$0xff] }
0x2b67   :  { %v7295_v34 = vmul.f32 %v12504_v42, %v12500_v60  ;;  %11706 = vmatprep.subr.mxu1 %v12629_v30  ;;  %v12185_v12 = vpack.c.bf16 %v10607_v0, %v10606_v29 }
0x2b69   :  { %11694 = vmatmul.mubr.msk.f32.vlgmr.msra.gmra.mrb[112].mxu0 %vm425_vm2, %v7295_v34  ;;  %11699 = vmatmul.mubr.msk.f32.vlgmr.msra.gmra.mrb[94].mxu1 %vm425_vm2, %v7449_v58 }
0x2b6a   :  { %11702 = vmatpush3.xpose.msk.msra.mxu0 %vm425_vm2, %v7529_v26  ;;  %11703 = vmatprep.mubr.msk.f32.mxu0 %vm12628_vm1, %v12629_v30 }
0x2b6b   :  { %11711 = vmatprep.subr.mxu0 %v12629_v30  ;;  %11708 = vmatprep.mubr.msk.f32.mxu1 %vm12628_vm1, %v12629_v30 }
0x2b6d   :  { %11704 = vmatmul.mubr.msk.f32.vlgmr.msra.gmra.mrb[114].mxu0 %vm425_vm2, %v7527_v15 }
0x2b6e   :  { %11713 = vmatprep.mubr.msk.f32.mxu0 %vm12628_vm1, %v12629_v30 }
0x2c38   :  { %v7368_v63 = vpop.f32.mrb[92].mxu1 }
0x2c39   :  { %v11690_v9 = vpop.f32.mrb[93].mxu1 }
0x2c3c   :  { %v7444_v7 = vpop.f32.mrb[112].mxu0  ;;  %v7522_v46 = vpop.f32.mrb[94].mxu1 }
0x2c3d   :  { %v7604_v51 = vmul.f32 0.35355338, %v7522_v46  ;;  %v11695_v53 = vpop.f32.mrb[113].mxu0  ;;  %v11700_v55 = vpop.f32.mrb[95].mxu1 }
0x2c3f   :  { %v7606_v39 = vadd.f32 %v7604_v51, %v14215_v5 }
0x2c40   :  { %v7600_v28 = vpop.f32.mrb[114].mxu0 }
0x2c41   :  { %v7605_v16 = vmul.f32 0.35355338, %v7600_v28  ;;  %v11705_v19 = vpop.f32.mrb[115].mxu0  ;;  %v7608_v21 = vsel %vm425_vm2, %v7606_v39, -inf }
0x2c42   :  { %7609 = vmax.xlane.f32.xlu0 %v7608_v21 }
0x2c43   :  { %v7607_v54 = vadd.f32 %v7605_v16, %v14215_v5 }
0x2c45   :  { %v7611_v31 = vsel %vm425_vm2, %v7607_v54, -inf }
0x2c46   :  { %7612 = vmax.xlane.f32.xlu1 %v7611_v31 }
0x2c57   :  { %7706 = vrot.lane.b32.xlu1 %v14225_v56, %s14927_s27 }
0x2c5b   :  { %7784 = vrot.lane.b32.xlu1 %v14291_v25, %s14928_s1 }
0x2c5f   :  { %7786 = vrot.lane.b32.xlu1 %v14293_v47, %s14928_s1 }
0x2c63   :  { %7794 = vrot.lane.b32.xlu1 %v7444_v7, %s14929_s29 }
0x2ccf   :  { %v7610_v61 = vpop.xlane.xlu0 %7609 }
0x2cd0   :  { %v7614_v1 = vsub.f32 %v7606_v39, %v7610_v61 }
0x2cd2   :  { %v7616_v11 = vmul.f32 1.442695, %v7614_v1 }
0x2cd3   :  { %v7613_v27 = vpop.xlane.xlu1 %7612 }
0x2cd4   :  { %12505 = vpow2.f32 %v7616_v11  ;;  %v7615_v43 = vsub.f32 %v7607_v54, %v7613_v27 }
0x2cd6   :  { %v7618_v45 = vmul.f32 1.442695, %v7615_v43 }
0x2cd7   :  { %v7707_v14 = vpop.permute.xlu1 %7706 }
0x2cd8   :  { %12507 = vpow2.f32 %v7618_v45  ;;  %11712 = vmatpush3.msra.mxu0 %v7707_v14 }
0x2cdb   :  { %v7785_v58 = vpop.permute.xlu1 %7784 }
0x2cdc   :  { %v7806_v9 = vsel %vm425_vm2, %v14251_v23, %v7785_v58  ;;  %v7820_v23 = vrot.slane %v14154_v22, %v13193_v8 }
0x2cde   :  { %v12506_v36 = vpop.eup %12505 }
0x2cdf   :  { %v7620_v56 = vsel %vm425_vm2, %v12506_v36, 0.0  ;;  %v7787_v15 = vpop.permute.xlu1 %7786 }
0x2ce0   :  { %7621 = vadd.xlane.f32.xlu0 %v7620_v56  ;;  %v7807_v55 = vsel %vm425_vm2, %v14253_v48, %v7787_v15 }
0x2ce2   :  { %v12508_v25 = vpop.eup %12507 }
0x2ce3   :  { %v7623_v10 = vsel %vm425_vm2, %v12508_v25, 0.0  ;;  %v7795_v7 = vpop.permute.xlu1 %7794 }
0x2ce4   :  { %7624 = vadd.xlane.f32.xlu0 %v7623_v10  ;;  %v7809_v39 = vsel %vm2457_vm4, %v7807_v55, %v7795_v7  ;;  %v8049_v55 = vld [vmem:[%s14885_s18 + $0x10] sm:$0xff] }
0x2cfa   :  { %7630 = vrot.lane.b32.xlu0 %v14223_v32, %s14927_s27  ;;  %v10604_v32 = vld [vmem:[%s14883_s16 + $0x60] sm:$0xff] }
0x2cfb   :  { %v12181_v17 = vpack.c.bf16 %v10605_v41, %v10604_v32 }
0x2cfe   :  { %7792 = vrot.lane.b32.xlu0 %v7368_v63, %s14929_s29 }
0x2d6d   :  { %v7622_v47 = vpop.xlane.xlu0 %7621 }
0x2d6e   :  { %12509 = vrcp.f32 %v7622_v47  ;;  %v7942_v47 = vld [vmem:[%s14884_s17] sm:$0xff] }
0x2d71   :  { %v7625_v4 = vpop.xlane.xlu0 %7624 }
0x2d72   :  { %12511 = vrcp.f32 %v7625_v4  ;;  %v7943_v4 = vld [vmem:[%s14884_s17 + $0x8] sm:$0xff] }
0x2d75   :  { %v7631_v2 = vpop.permute.xlu0 %7630 }
0x2d76   :  { %11707 = vmatpush3.msra.mxu1 %v7631_v2  ;;  %v12189_v2 = vpack.c.bf16 %v7943_v4, %v7942_v47  ;;  %v7949_v47 = vrot.slane %v14154_v22, %v13319_v13 }
0x2d77   :  { %12182 = vmatprep.subr.bf16.mxu1 %v12181_v17 }
0x2d78   :  { %v12510_v40 = vpop.eup %12509  ;;  %12190 = vmatprep.subr.bf16.mxu0 %v12189_v2 }
0x2d79   :  { %v7627_v35 = vmul.f32 %v12510_v40, %v12506_v36  ;;  %v7793_v63 = vpop.permute.xlu0 %7792  ;;  %v7944_v40 = vld [vmem:[%s14884_s17 + $0x10] sm:$0xff] }
0x2d7a   :  { %v7808_v46 = vsel %vm2457_vm4, %v7806_v9, %v7793_v63 }
0x2d7b   :  { %11709 = vmatmul.mubr.msk.f32.vlgmr.msra.gmra.mrb[96].mxu1 %vm425_vm2, %v7627_v35  ;;  %v7945_v35 = vld [vmem:[%s14884_s17 + $0x18] sm:$0xff] }
0x2d7c   :  { %v12512_v52 = vpop.eup %12511  ;;  %12184 = vmatpush3.bf16.msra.mxu1 %v12181_v17 }
0x2d7d   :  { %v7629_v60 = vmul.f32 %v12512_v52, %v12508_v25  ;;  %12186 = vmatprep.subr.bf16.mxu1 %v12185_v12  ;;  %v12193_v52 = vpack.c.bf16 %v7945_v35, %v7944_v40 }
0x2d7f   :  { %11714 = vmatmul.mubr.msk.f32.vlgmr.msra.gmra.mrb[116].mxu0 %vm425_vm2, %v7629_v60 }
0x2d80   :  { %12188 = vmatpush3.bf16.msra.mxu1 %v12185_v12  ;;  %12192 = vmatpush3.bf16.msra.mxu0 %v12189_v2  ;;  %v7933_v12 = vrot.slane %v14154_v22, %v13244_v20 }
0x2d81   :  { %12194 = vmatprep.subr.bf16.mxu0 %v12193_v52 }
0x2d84   :  { %12196 = vmatpush3.bf16.msra.mxu0 %v12193_v52 }
0x2e4e   :  { %v7702_v62 = vpop.f32.mrb[96].mxu1 }
0x2e4f   :  { %7800 = vrot.lane.b32.xlu0 %v7702_v62, %s14930_s24  ;;  %v11710_v42 = vpop.f32.mrb[97].mxu1 }
0x2e52   :  { %v7778_v26 = vpop.f32.mrb[116].mxu0 }
0x2e53   :  { %7802 = vrot.lane.b32.xlu1 %v7778_v26, %s14930_s24  ;;  %v11715_v34 = vpop.f32.mrb[117].mxu0  ;;  %v7939_v26 = vrot.slane %v14154_v22, %v13247_v44 }
0x2ec1   :  { %v7801_v51 = vpop.permute.xlu0 %7800 }
0x2ec2   :  { %v7810_v53 = vsel %vm2461_vm5, %v7808_v46, %v7801_v51  ;;  %v8047_v46 = vld [vmem:[%s14885_s18] sm:$0xff]  ;;  %v8048_v51 = vld [vmem:[%s14885_s18 + $0x8] sm:$0xff] }
0x2ec3   :  { %11724 = vmatprep.mubr.msk.f32.mxu1 %vm96_vm0, %v7810_v53  ;;  %v12197_v53 = vpack.c.bf16 %v8048_v51, %v8047_v46 }
0x2ec5   :  { %v7803_v28 = vpop.permute.xlu1 %7802  ;;  %12198 = vmatprep.subr.bf16.mxu1 %v12197_v53 }
0x2ec6   :  { %v7811_v16 = vsel %vm2461_vm5, %v7809_v39, %v7803_v28  ;;  %v8050_v39 = vld [vmem:[%s14885_s18 + $0x18] sm:$0xff] }
0x2ec7   :  { %11725 = vmatmul.mubr.msk.f32.vlgmr.msra.gmra.mrb[98].mxu1 %vm96_vm0, %v7811_v16  ;;  %v12201_v28 = vpack.c.bf16 %v8050_v39, %v8049_v55  ;;  %v8051_v16 = vld [vmem:[%s14885_s18 + $0x20] sm:$0xff] }
0x2ec8   :  { %12200 = vmatpush3.bf16.msra.mxu1 %v12197_v53 }
0x2ec9   :  { %12202 = vmatprep.subr.bf16.mxu1 %v12201_v28 }
0x2ecc   :  { %12204 = vmatpush3.bf16.msra.mxu1 %v12201_v28 }
0x2f9a   :  { %v11726_v19 = vpop.f32.mrb[98].mxu1 }
0x2f9b   :  { %v7899_v21 = vadd.f32 %v11726_v19, %v7820_v23  ;;  %v7893_v54 = vpop.f32.mrb[99].mxu1 }
0x2f9c   :  { %v7894_v31 = vadd.f32 %v7893_v54, %v7820_v23  ;;  %v8052_v23 = vld [vmem:[%s14885_s18 + $0x28] sm:$0xff]  ;;  %v8054_v54 = vld [vmem:[%s14885_s18 + $0x38] sm:$0xff] }
0x2f9d   :  { %v14376_v61 = vadd.f32 %v7899_v21, %v14108_v33  ;;  %v12205_v19 = vpack.c.bf16 %v8052_v23, %v8051_v16  ;;  %v8053_v21 = vld [vmem:[%s14885_s18 + $0x30] sm:$0xff] }
0x2f9e   :  { %v14379_v1 = vadd.f32 %v7894_v31, %v14112_v18  ;;  %v12209_v31 = vpack.c.bf16 %v8054_v54, %v8053_v21 }
0x2f9f   :  { %v7907_v48 = vsel %vm96_vm0, %v14376_v61, 0.0  ;;  %12206 = vmatprep.subr.bf16.mxu1 %v12205_v19 }
0x2fa0   :  { %7908 = vadd.xlane.f32.xlu1 %v7907_v48  ;;  %v7904_v11 = vsel %vm96_vm0, %v14379_v1, 0.0  ;;  %12208 = vmatpush3.bf16.msra.mxu1 %v12205_v19  ;;  %v8055_v48 = vld [vmem:[%s14885_s18 + $0x40] sm:$0xff] }
0x2fa1   :  { %7905 = vadd.xlane.f32.xlu0 %v7904_v11  ;;  %12210 = vmatprep.subr.bf16.mxu1 %v12209_v31  ;;  %v8056_v11 = vld [vmem:[%s14885_s18 + $0x48] sm:$0xff] }
0x2fa4   :  { %12212 = vmatpush3.bf16.msra.mxu1 %v12209_v31 }
0x302d   :  { %v7909_v27 = vpop.xlane.xlu1 %7908 }
0x302e   :  { %v7911_v43 = vmul.f32 0.03125, %v7909_v27  ;;  %v7906_v45 = vpop.xlane.xlu0 %7905  ;;  %v12213_v27 = vpack.c.bf16 %v8056_v11, %v8055_v48 }
0x302f   :  { %v7910_v14 = vmul.f32 0.03125, %v7906_v45  ;;  %v8058_v45 = vld [vmem:[%s14885_s18 + $0x58] sm:$0xff] }
0x3030   :  { %v7913_v36 = vsub.f32 %v14376_v61, %v7911_v43  ;;  %12214 = vmatprep.subr.bf16.mxu1 %v12213_v27  ;;  %v8057_v43 = vld [vmem:[%s14885_s18 + $0x50] sm:$0xff] }
0x3031   :  { %v7912_v33 = vsub.f32 %v14379_v1, %v7910_v14  ;;  %12216 = vmatpush3.bf16.msra.mxu1 %v12213_v27  ;;  %v12217_v14 = vpack.c.bf16 %v8058_v45, %v8057_v43  ;;  %v10615_v45 = vld [vmem:[%s14883_s16 + $0x80] sm:$0xff] }
0x3032   :  { %v7915_v25 = vmul.f32 %v7913_v36, %v7913_v36 }
0x3033   :  { %v7914_v56 = vmul.f32 %v7912_v33, %v7912_v33  ;;  %12218 = vmatprep.subr.bf16.mxu1 %v12217_v14 }
0x3034   :  { %v7919_v10 = vsel %vm96_vm0, %v7915_v25, 0.0  ;;  %v8062_v25 = vld [vmem:[%s14885_s18 + $0x78] sm:$0xff] }
0x3035   :  { %v7916_v18 = vsel %vm96_vm0, %v7914_v56, 0.0  ;;  %12220 = vmatpush3.bf16.msra.mxu1 %v12217_v14  ;;  %v10616_v14 = vld [vmem:[%s14883_s16 + $0x88] sm:$0xff] }
0x3036   :  { %7917 = vadd.xlane.f32.xlu0 %v7916_v18  ;;  %v8061_v18 = vld [vmem:[%s14885_s18 + $0x70] sm:$0xff] }
0x303a   :  { %7920 = vadd.xlane.f32.xlu0 %v7919_v10  ;;  %v12225_v10 = vpack.c.bf16 %v8062_v25, %v8061_v18  ;;  %v10621_v25 = vld [vmem:[%s14883_s16 + $0xa0] sm:$0xff] }
0x30c3   :  { %v7918_v60 = vpop.xlane.xlu0 %7917 }
0x30c4   :  { %v7922_v32 = vmul.f32 0.03125, %v7918_v60 }
0x30c6   :  { %v7924_v41 = vadd.f32 1e-05, %v7922_v32 }
0x30c7   :  { %v7921_v17 = vpop.xlane.xlu0 %7920 }
0x30c8   :  { %12513 = vrsqrt.f32 %v7924_v41  ;;  %v7923_v29 = vmul.f32 0.03125, %v7921_v17 }
0x30ca   :  { %v7925_v0 = vadd.f32 1e-05, %v7923_v29 }
0x30cc   :  { %12515 = vrsqrt.f32 %v7925_v0 }
0x30d2   :  { %v12514_v62 = vpop.eup %12513 }
0x30d3   :  { %v7928_v42 = vmul.f32 %v12514_v62, %v7912_v33  ;;  %v8060_v33 = vld [vmem:[%s14885_s18 + $0x68] sm:$0xff] }
0x30d5   :  { %v7934_v34 = vmul.f32 %v7933_v12, %v7928_v42 }
0x30d6   :  { %v12516_v58 = vpop.eup %12515 }
0x30d7   :  { %v7929_v15 = vmul.f32 %v12516_v58, %v7913_v36  ;;  %v7940_v63 = vadd.f32 %v7939_v26, %v7934_v34  ;;  %v8059_v36 = vld [vmem:[%s14885_s18 + $0x60] sm:$0xff] }
0x30d8   :  { %v12221_v56 = vpack.c.bf16 %v8060_v33, %v8059_v36  ;;  %v10559_v58 = vld [vmem:[%s14882_s15 + $0x1] ss:$0 sm:$0xff]  ;;  %v12229_v36 = vpack.c.bf16 %v10616_v14, %v10615_v45  ;;  %v10617_v33 = vld [vmem:[%s14883_s16 + $0x90] sm:$0xff] }
0x30d9   :  { %v7935_v9 = vmul.f32 %v7933_v12, %v7929_v15  ;;  %11735 = vmatprep.mubr.msk.f32.mxu0 %vm96_vm0, %v7940_v63  ;;  %v8066_v15 = vrot.slane %v14154_v22, %v13330_v57  ;;  %v5917_v63 = vadd.f32 %v10559_v58, %v14096_v6  ;;  %v10624_v58 = vld [vmem:[%s14883_s16 + $0xb8] sm:$0xff] }
0x30da   :  { %12222 = vmatprep.subr.bf16.mxu1 %v12221_v56  ;;  %12230 = vmatprep.subr.bf16.mxu0 %v12229_v36 }
0x30db   :  { %v7941_v7 = vadd.f32 %v7939_v26, %v7935_v9  ;;  %12224 = vmatpush3.bf16.msra.mxu1 %v12221_v56  ;;  %v8153_v53 = vrot.slane %v5917_v63, %v12836_v49  ;;  %v8165_v39 = vrot.slane %v5917_v63, %v12839_v50  ;;  %v10618_v56 = vld [vmem:[%s14883_s16 + $0x98] sm:$0xff] }
0x30dc   :  { %12226 = vmatprep.subr.bf16.mxu1 %v12225_v10  ;;  %v12233_v18 = vpack.c.bf16 %v10618_v56, %v10617_v33 }
0x30dd   :  { %11736 = vmatmul.mubr.msk.f32.vlgmr.msra.gmra.mrb[118].mxu0 %vm96_vm0, %v7941_v7 }
0x30de   :  { %12232 = vmatpush3.bf16.msra.mxu0 %v12229_v36 }
0x30df   :  { %12228 = vmatpush3.bf16.msra.mxu1 %v12225_v10  ;;  %12234 = vmatprep.subr.bf16.mxu0 %v12233_v18  ;;  %v10622_v10 = vld [vmem:[%s14883_s16 + $0xa8] sm:$0xff] }
0x30e0   :  { %11816 = vmatprep.subr.mxu1 %v12629_v30 }
0x30e2   :  { %12236 = vmatpush3.bf16.msra.mxu0 %v12233_v18 }
0x31b0   :  { %v11737_v4 = vpop.f32.mrb[118].mxu0 }
0x31b1   :  { %v8028_v2 = vadd.f32 %v11737_v4, %v7949_v47  ;;  %v8022_v40 = vpop.f32.mrb[119].mxu0  ;;  %v14507_v4 = vld [vmem:[%s14886_s19 + $0x8] sm:$0xff] }
0x31b2   :  { %v8023_v35 = vadd.f32 %v8022_v40, %v7949_v47  ;;  %v12237_v47 = vpack.c.bf16 %v10622_v10, %v10621_v25 }
0x31b3   :  { %v10613_v52 = vmul.f32 -1.702, %v8028_v2 }
0x31b4   :  { %v10612_v60 = vmul.f32 -1.702, %v8023_v35  ;;  %12238 = vmatprep.subr.bf16.mxu0 %v12237_v47 }
0x31b5   :  { %v8037_v32 = vmul.f32 1.442695, %v10613_v52 }
0x31b6   :  { %v8035_v41 = vmul.f32 1.442695, %v10612_v60 }
0x31b7   :  { %12517 = vpow2.f32 %v8037_v32 }
0x31b8   :  { %12519 = vpow2.f32 %v8035_v41 }
0x31c1   :  { %v12518_v17 = vpop.eup %12517 }
0x31c2   :  { %v12520_v29 = vpop.eup %12519  ;;  %v8040_v0 = vadd.f32 1.0, %v12518_v17  ;;  %v8199_v17 = vrot.slane %v14507_v4, %v12836_v49 }
0x31c3   :  { %v8039_v12 = vadd.f32 1.0, %v12520_v29 }
0x31c4   :  { %12521 = vrcp.f32 %v8040_v0 }
0x31c5   :  { %12523 = vrcp.f32 %v8039_v12 }
0x31ce   :  { %v12522_v62 = vpop.eup %12521 }
0x31cf   :  { %v12524_v42 = vpop.eup %12523  ;;  %v8046_v34 = vmul.f32 %v12522_v62, %v8028_v2  ;;  %v14511_v2 = vrot.slane %v14507_v4, %v12823_v37  ;;  %v8205_v37 = vrot.slane %v14507_v4, %v12839_v50  ;;  %v10628_v50 = vld [vmem:[%s14883_s16 + $0xc8] sm:$0xff] }
0x31d0   :  { %v8045_v26 = vmul.f32 %v12524_v42, %v8023_v35 }
0x31d2   :  { %11770 = vmatprep.mubr.f32.mxu1 %v8045_v26 }
0x31d3   :  { %11771 = vmatmul.mubr.f32.vlgmr.msra.gmra.mrb[100].mxu1 %v8046_v34  ;;  %v10623_v34 = vld [vmem:[%s14883_s16 + $0xb0] sm:$0xff] }
0x31d4   :  { %11818 = vmatprep.mubr.msk.f32.mxu1 %vm12628_vm1, %v12629_v30  ;;  %v12241_v49 = vpack.c.bf16 %v10624_v58, %v10623_v34 }
0x32a6   :  { %v11772_v9 = vpop.f32.mrb[100].mxu1 }
0x32a7   :  { %v8139_v7 = vadd.f32 %v11772_v9, %v8066_v15  ;;  %v8133_v46 = vpop.f32.mrb[101].mxu1  ;;  %v10627_v9 = vld [vmem:[%s14883_s16 + $0xc0] sm:$0xff] }
0x32a8   :  { %v8134_v51 = vadd.f32 %v8133_v46, %v8066_v15  ;;  %v10629_v46 = vld [vmem:[%s14883_s16 + $0xd0] sm:$0xff] }
0x32a9   :  { %v8143_v55 = vadd.f32 %v8139_v7, %v14376_v61  ;;  %v12245_v7 = vpack.c.bf16 %v10628_v50, %v10627_v9 }
0x32aa   :  { %v8142_v22 = vadd.f32 %v8134_v51, %v14379_v1  ;;  %v10630_v51 = vld [vmem:[%s14883_s16 + $0xd8] sm:$0xff] }
0x32ab   :  { %v8155_v6 = vsel %vm8145_vm8, %v8153_v53, %v8143_v55 }
0x32ac   :  { %v14474_v28 = vsel %vm8157_vm9, %v8165_v39, %v8155_v6  ;;  %v8154_v16 = vsel %vm8144_vm10, %v8153_v53, %v8142_v22  ;;  %v12249_v53 = vpack.c.bf16 %v10630_v51, %v10629_v46 }
0x32ad   :  { %v8173_v23 = vsel %vm96_vm0, %v14474_v28, 0.0  ;;  %v14478_v19 = vsel %vm8156_vm11, %v8165_v39, %v8154_v16 }
0x32ae   :  { %8174 = vadd.xlane.f32.xlu1 %v8173_v23  ;;  %v8170_v3 = vsel %vm96_vm0, %v14478_v19, 0.0 }
0x32af   :  { %8171 = vadd.xlane.f32.xlu0 %v8170_v3 }
0x333b   :  { %v8175_v61 = vpop.xlane.xlu1 %8174 }
0x333c   :  { %v8177_v21 = vmul.f32 0.03125, %v8175_v61  ;;  %v8172_v54 = vpop.xlane.xlu0 %8171 }
0x333d   :  { %v8176_v1 = vmul.f32 0.03125, %v8172_v54 }
0x333e   :  { %v8179_v59 = vsub.f32 %v14474_v28, %v8177_v21 }
0x333f   :  { %v8178_v31 = vsub.f32 %v14478_v19, %v8176_v1 }
0x3340   :  { %v8181_v48 = vmul.f32 %v8179_v59, %v8179_v59 }
0x3341   :  { %v8180_v11 = vmul.f32 %v8178_v31, %v8178_v31 }
0x3342   :  { %v8185_v27 = vsel %vm96_vm0, %v8181_v48, 0.0 }
0x3343   :  { %8186 = vadd.xlane.f32.xlu1 %v8185_v27  ;;  %v8182_v43 = vsel %vm96_vm0, %v8180_v11, 0.0 }
0x3344   :  { %8183 = vadd.xlane.f32.xlu0 %v8182_v43 }
0x335a   :  { %8304 = vrot.lane.b32.xlu0 %v14511_v2, %s14931_s30 }
0x33d0   :  { %v8187_v40 = vpop.xlane.xlu1 %8186 }
0x33d1   :  { %v8189_v35 = vmul.f32 0.03125, %v8187_v40  ;;  %v8184_v52 = vpop.xlane.xlu0 %8183 }
0x33d2   :  { %v8188_v60 = vmul.f32 0.03125, %v8184_v52 }
0x33d3   :  { %v8191_v32 = vadd.f32 1e-05, %v8189_v35 }
0x33d4   :  { %v8190_v41 = vadd.f32 1e-05, %v8188_v60 }
0x33d5   :  { %12525 = vrsqrt.f32 %v8191_v32  ;;  %v8305_v22 = vpop.permute.xlu0 %8304 }
0x33d6   :  { %12527 = vrsqrt.f32 %v8190_v41 }
0x33df   :  { %v12526_v29 = vpop.eup %12525 }
0x33e0   :  { %v12528_v0 = vpop.eup %12527  ;;  %v8195_v12 = vmul.f32 %v12526_v29, %v8179_v59 }
0x33e1   :  { %v8194_v62 = vmul.f32 %v12528_v0, %v8178_v31 }
0x33e2   :  { %v8201_v42 = vmul.f32 %v8199_v17, %v8195_v12 }
0x33e3   :  { %v8200_v26 = vmul.f32 %v8199_v17, %v8194_v62 }
0x33e4   :  { %v8207_v63 = vadd.f32 %v8205_v37, %v8201_v42 }
0x33e5   :  { %v8206_v15 = vadd.f32 %v8205_v37, %v8200_v26 }
0x33e7   :  { %11781 = vmatprep.mubr.msk.f32.mxu0 %vm96_vm0, %v8206_v15 }
0x33e8   :  { %11782 = vmatmul.mubr.msk.f32.vlgmr.msra.gmra.mrb[120].mxu0 %vm96_vm0, %v8207_v63 }
0x33e9   :  { %12240 = vmatpush3.bf16.msra.mxu0 %v12237_v47  ;;  %11792 = vmatprep.mubr.msk.f32.mxu0 %vm96_vm0, %v8206_v15 }
0x33ea   :  { %12242 = vmatprep.subr.bf16.mxu0 %v12241_v49 }
0x33ed   :  { %12244 = vmatpush3.bf16.msra.mxu0 %v12241_v49 }
0x33ee   :  { %12246 = vmatprep.subr.bf16.mxu0 %v12245_v7 }
0x33f0   :  { %11793 = vmatmul.mubr.msk.f32.vlgmr.msra.gmra.mrb[122].mxu0 %vm96_vm0, %v8207_v63 }
0x33f1   :  { %12248 = vmatpush3.bf16.msra.mxu0 %v12245_v7  ;;  %11803 = vmatprep.mubr.msk.f32.mxu0 %vm96_vm0, %v8206_v15 }
0x33f2   :  { %12250 = vmatprep.subr.bf16.mxu0 %v12249_v53 }
0x33f5   :  { %12252 = vmatpush3.bf16.msra.mxu0 %v12249_v53 }
0x33f6   :  { %11806 = vmatprep.subr.mxu0 %v12629_v30 }
0x33f8   :  { %11804 = vmatmul.mubr.msk.f32.vlgmr.msra.gmra.mrb[124].mxu0 %vm96_vm0, %v8207_v63 }
0x33f9   :  { %11808 = vmatprep.mubr.msk.f32.mxu0 %vm12628_vm1, %v12629_v30 }
0x34bb   :  { %v11783_v55 = vpop.f32.mrb[120].mxu0 }
0x34bc   :  { %v8289_v39 = vpop.f32.mrb[121].mxu0  ;;  %v14565_v54 = vadd.f32 %v11783_v55, %v14511_v2 }
0x34bd   :  { %v14553_v3 = vadd.f32 %v8289_v39, %v14511_v2 }
0x34c3   :  { %v11794_v6 = vpop.f32.mrb[122].mxu0 }
0x34c4   :  { %v8373_v16 = vpop.f32.mrb[123].mxu0  ;;  %v14556_v61 = vadd.f32 %v11794_v6, %v8305_v22 }
0x34c5   :  { %v14546_v23 = vadd.f32 %v8373_v16, %v8305_v22 }
0x34c7   :  { %8791 = vrot.lane.b32.xlu0 %v14546_v23, %s14932_s0  ;;  %11807 = vmatpush3.xpose.msk.msra.mxu0 %vm425_vm2, %v14546_v23 }
0x34c8   :  { %11811 = vmatprep.subr.mxu0 %v12629_v30 }
0x34ca   :  { %11809 = vmatmul.mubr.msk.f32.vlgmr.msra.gmra.mrb[126].mxu0 %vm425_vm2, %v14553_v3 }
0x34cb   :  { %v11805_v21 = vpop.f32.mrb[124].mxu0  ;;  %8869 = vrot.lane.b32.xlu0 %v14556_v61, %s14932_s0  ;;  %11812 = vmatpush3.xpose.msk.msra.mxu0 %vm425_vm2, %v14556_v61 }
0x34cc   :  { %v8456_v1 = vpop.f32.mrb[125].mxu0  ;;  %11813 = vmatprep.mubr.msk.f32.mxu0 %vm12628_vm1, %v12629_v30  ;;  %11821 = vmatprep.subr.mxu0 %v12629_v30 }
0x34ce   :  { %11814 = vmatmul.mubr.msk.f32.vlgmr.msra.gmra.mrb[128].mxu0 %vm425_vm2, %v14565_v54 }
0x34cf   :  { %8789 = vrot.lane.b32.xlu0 %v14553_v3, %s14932_s0  ;;  %11823 = vmatprep.mubr.msk.f32.mxu0 %vm12628_vm1, %v12629_v30 }
0x3539   :  { %v8792_v12 = vpop.permute.xlu0 %8791 }
0x353d   :  { %v8870_v37 = vpop.permute.xlu0 %8869 }
0x3541   :  { %v8790_v58 = vpop.permute.xlu0 %8789 }
0x359d   :  { %v8537_v59 = vpop.f32.mrb[126].mxu0 }
0x359e   :  { %v8617_v31 = vmul.f32 0.35355338, %v8537_v59  ;;  %v11810_v48 = vpop.f32.mrb[127].mxu0 }
0x35a0   :  { %v8619_v11 = vadd.f32 %v8617_v31, %v14215_v5 }
0x35a1   :  { %v8613_v27 = vpop.f32.mrb[128].mxu0 }
0x35a2   :  { %v8618_v43 = vmul.f32 0.35355338, %v8613_v27  ;;  %v11815_v45 = vpop.f32.mrb[129].mxu0  ;;  %v8621_v14 = vsel %vm425_vm2, %v8619_v11, -inf }
0x35a3   :  { %8622 = vmax.xlane.f32.xlu1 %v8621_v14 }
0x35a4   :  { %v8620_v36 = vadd.f32 %v8618_v43, %v14215_v5 }
0x35a6   :  { %v8624_v33 = vsel %vm425_vm2, %v8620_v36, -inf }
0x35a7   :  { %8625 = vmax.xlane.f32.xlu1 %v8624_v33 }
0x35b8   :  { %8387 = vrot.lane.b32.xlu1 %v14511_v2, %s14933_s28 }
0x3630   :  { %v8623_v56 = vpop.xlane.xlu1 %8622 }
0x3631   :  { %v8627_v18 = vsub.f32 %v8619_v11, %v8623_v56 }
0x3633   :  { %v8629_v25 = vmul.f32 1.442695, %v8627_v18 }
0x3634   :  { %v8626_v10 = vpop.xlane.xlu1 %8625 }
0x3635   :  { %12529 = vpow2.f32 %v8629_v25  ;;  %v8628_v47 = vsub.f32 %v8620_v36, %v8626_v10 }
0x3637   :  { %v8631_v40 = vmul.f32 1.442695, %v8628_v47 }
0x3638   :  { %v8388_v35 = vpop.permute.xlu1 %8387 }
0x3639   :  { %12531 = vpow2.f32 %v8631_v40  ;;  %v14582_v52 = vadd.f32 %v8456_v1, %v8388_v35  ;;  %v14584_v60 = vadd.f32 %v11805_v21, %v8388_v35 }
0x363b   :  { %11817 = vmatpush3.msra.mxu1 %v14582_v52  ;;  %11822 = vmatpush3.msra.mxu0 %v14584_v60 }
0x363c   :  { %11826 = vmatprep.subr.mxu1 %v12629_v30  ;;  %11831 = vmatprep.subr.mxu0 %v12629_v30 }
0x363f   :  { %v12530_v2 = vpop.eup %12529 }
0x3640   :  { %v8633_v32 = vsel %vm425_vm2, %v12530_v2, 0.0 }
0x3641   :  { %8634 = vadd.xlane.f32.xlu1 %v8633_v32 }
0x3643   :  { %v12532_v41 = vpop.eup %12531 }
0x3644   :  { %v8636_v17 = vsel %vm425_vm2, %v12532_v41, 0.0 }
0x3645   :  { %8637 = vadd.xlane.f32.xlu1 %v8636_v17 }
0x3656   :  { %8867 = vrot.lane.b32.xlu1 %v14565_v54, %s14932_s0 }
0x36ce   :  { %v8635_v29 = vpop.xlane.xlu1 %8634 }
0x36cf   :  { %12533 = vrcp.f32 %v8635_v29 }
0x36d2   :  { %v8638_v0 = vpop.xlane.xlu1 %8637 }
0x36d3   :  { %12535 = vrcp.f32 %v8638_v0 }
0x36d6   :  { %v8868_v15 = vpop.permute.xlu1 %8867 }
0x36d9   :  { %v12534_v62 = vpop.eup %12533 }
0x36da   :  { %v8640_v42 = vmul.f32 %v12534_v62, %v12530_v2 }
0x36dc   :  { %11819 = vmatmul.mubr.msk.f32.vlgmr.msra.gmra.mrb[102].mxu1 %vm425_vm2, %v8640_v42 }
0x36dd   :  { %v12536_v26 = vpop.eup %12535  ;;  %11827 = vmatpush3.xpose.msk.msra.mxu1 %vm425_vm2, %v8792_v12  ;;  %11828 = vmatprep.mubr.msk.f32.mxu1 %vm12628_vm1, %v12629_v30 }
0x36de   :  { %v8642_v34 = vmul.f32 %v12536_v26, %v12532_v41  ;;  %11836 = vmatprep.subr.mxu1 %v12629_v30 }
0x36e0   :  { %11824 = vmatmul.mubr.msk.f32.vlgmr.msra.gmra.mrb[130].mxu0 %vm425_vm2, %v8642_v34  ;;  %11829 = vmatmul.mubr.msk.f32.vlgmr.msra.gmra.mrb[104].mxu1 %vm425_vm2, %v8790_v58 }
0x36e1   :  { %11832 = vmatpush3.xpose.msk.msra.mxu0 %vm425_vm2, %v8870_v37  ;;  %11833 = vmatprep.mubr.msk.f32.mxu0 %vm12628_vm1, %v12629_v30 }
0x36e2   :  { %11841 = vmatprep.subr.mxu0 %v12629_v30  ;;  %11838 = vmatprep.mubr.msk.f32.mxu1 %vm12628_vm1, %v12629_v30 }
0x36e4   :  { %11834 = vmatmul.mubr.msk.f32.vlgmr.msra.gmra.mrb[132].mxu0 %vm425_vm2, %v8868_v15 }
0x36e5   :  { %11843 = vmatprep.mubr.msk.f32.mxu0 %vm12628_vm1, %v12629_v30 }
0x37af   :  { %v14610_v63 = vpop.f32.mrb[102].mxu1 }
0x37b0   :  { %v11820_v49 = vpop.f32.mrb[103].mxu1 }
0x37b3   :  { %v14612_v9 = vpop.f32.mrb[130].mxu0  ;;  %v8863_v50 = vpop.f32.mrb[104].mxu1 }
0x37b4   :  { %v8945_v7 = vmul.f32 0.35355338, %v8863_v50  ;;  %v11825_v46 = vpop.f32.mrb[131].mxu0  ;;  %v11830_v51 = vpop.f32.mrb[105].mxu1 }
0x37b6   :  { %v8947_v53 = vadd.f32 %v8945_v7, %v14215_v5 }
0x37b7   :  { %v8941_v55 = vpop.f32.mrb[132].mxu0 }
0x37b8   :  { %v8946_v39 = vmul.f32 0.35355338, %v8941_v55  ;;  %v11835_v22 = vpop.f32.mrb[133].mxu0  ;;  %v8949_v6 = vsel %vm425_vm2, %v8947_v53, -inf }
0x37b9   :  { %8950 = vmax.xlane.f32.xlu0 %v8949_v6 }
0x37ba   :  { %v8948_v16 = vadd.f32 %v8946_v39, %v14215_v5 }
0x37bc   :  { %v8952_v21 = vsel %vm425_vm2, %v8948_v16, -inf }
0x37bd   :  { %8953 = vmax.xlane.f32.xlu1 %v8952_v21 }
0x37ce   :  { %9049 = vrot.lane.b32.xlu1 %v14584_v60, %s14932_s0 }
0x37cf   :  { %8972 = vrot.lane.b32.xlu0 %v14582_v52, %s14932_s0  ;;  %s12639_s0 = smov [#allocation7]  }
0x37d0   :  { %s10379_s28 = sshll.u32 %s12639_s0, 4  ;;  %s10380_s28 = int_to_ptr.vmem [resolvable:$true] %s10379_s28 }
0x37d1   :  { %s12600_s22 = scalar_lea.vmem %s10380_s28, 32  ;;  %p12605_p6 = scmp.lt.s32.totalorder %s10380_s28, %s10380_s28 }
0x37d2   :  { %9127 = vrot.lane.b32.xlu1 %v14546_v23, %s14926_s23  ;;  %p12601_p5 = scmp.ne.s32.totalorder %s10380_s28, %s12600_s22  ;;  %p12606_p7 = scmp.lt.s32.totalorder %s12600_s22, %s12600_s22 }
0x37d4   :  { %p12607_p8 = por %p12606_p7, %p12605_p6 }
0x37d6   :  { %9205 = vrot.lane.b32.xlu1 %v14556_v61, %s14926_s23  ;;  %p12608_p9 = pnand %p12607_p8, %p12601_p5 }
0x37da   :  { %9203 = vrot.lane.b32.xlu1 %v14565_v54, %s14926_s23 }
0x3846   :  { %v8951_v1 = vpop.xlane.xlu0 %8950 }
0x3847   :  { %v8955_v59 = vsub.f32 %v8947_v53, %v8951_v1 }
0x3849   :  { %v8957_v31 = vmul.f32 1.442695, %v8955_v59 }
0x384a   :  { %v8973_v48 = vpop.permute.xlu0 %8972  ;;  %v8954_v11 = vpop.xlane.xlu1 %8953 }
0x384b   :  { %12537 = vpow2.f32 %v8957_v31  ;;  %v8956_v27 = vsub.f32 %v8948_v16, %v8954_v11  ;;  %11837 = vmatpush3.msra.mxu1 %v8973_v48 }
0x384c   :  { %11846 = vmatprep.subr.mxu1 %v12629_v30 }
0x384d   :  { %v8959_v43 = vmul.f32 1.442695, %v8956_v27 }
0x384e   :  { %v9050_v45 = vpop.permute.xlu1 %9049 }
0x384f   :  { %12539 = vpow2.f32 %v8959_v43  ;;  %11842 = vmatpush3.msra.mxu0 %v9050_v45 }
0x3850   :  { %11851 = vmatprep.subr.mxu0 %v12629_v30 }
0x3852   :  { %v9128_v10 = vpop.permute.xlu1 %9127 }
0x3855   :  { %v12538_v14 = vpop.eup %12537 }
0x3856   :  { %v8961_v36 = vsel %vm425_vm2, %v12538_v14, 0.0  ;;  %v9206_v2 = vpop.permute.xlu1 %9205 }
0x3857   :  { %8962 = vadd.xlane.f32.xlu0 %v8961_v36 }
0x3859   :  { %v12540_v33 = vpop.eup %12539 }
0x385a   :  { %v8964_v56 = vsel %vm425_vm2, %v12540_v33, 0.0  ;;  %v9204_v17 = vpop.permute.xlu1 %9203 }
0x385b   :  { %8965 = vadd.xlane.f32.xlu0 %v8964_v56 }
0x3871   :  { %9125 = vrot.lane.b32.xlu0 %v14553_v3, %s14926_s23 }
0x38e4   :  { %v8963_v18 = vpop.xlane.xlu0 %8962 }
0x38e5   :  { %12541 = vrcp.f32 %v8963_v18 }
0x38e8   :  { %v8966_v25 = vpop.xlane.xlu0 %8965 }
0x38e9   :  { %12543 = vrcp.f32 %v8966_v25 }
0x38ec   :  { %v9126_v41 = vpop.permute.xlu0 %9125 }
0x38ef   :  { %v12542_v47 = vpop.eup %12541 }
0x38f0   :  { %v8968_v40 = vmul.f32 %v12542_v47, %v12538_v14 }
0x38f2   :  { %11839 = vmatmul.mubr.msk.f32.vlgmr.msra.gmra.mrb[106].mxu1 %vm425_vm2, %v8968_v40 }
0x38f3   :  { %v12544_v35 = vpop.eup %12543  ;;  %11847 = vmatpush3.xpose.msk.msra.mxu1 %vm425_vm2, %v9128_v10  ;;  %11848 = vmatprep.mubr.msk.f32.mxu1 %vm12628_vm1, %v12629_v30 }
0x38f4   :  { %v8970_v32 = vmul.f32 %v12544_v35, %v12540_v33  ;;  %11856 = vmatprep.subr.mxu1 %v12629_v30 }
0x38f6   :  { %11844 = vmatmul.mubr.msk.f32.vlgmr.msra.gmra.mrb[134].mxu0 %vm425_vm2, %v8970_v32  ;;  %11849 = vmatmul.mubr.msk.f32.vlgmr.msra.gmra.mrb[108].mxu1 %vm425_vm2, %v9126_v41 }
0x38f7   :  { %11852 = vmatpush3.xpose.msk.msra.mxu0 %vm425_vm2, %v9206_v2  ;;  %11853 = vmatprep.mubr.msk.f32.mxu0 %vm12628_vm1, %v12629_v30 }
0x38f8   :  { %11861 = vmatprep.subr.mxu0 %v12629_v30  ;;  %11858 = vmatprep.mubr.msk.f32.mxu1 %vm12628_vm1, %v12629_v30 }
0x38fa   :  { %11854 = vmatmul.mubr.msk.f32.vlgmr.msra.gmra.mrb[136].mxu0 %vm425_vm2, %v9204_v17 }
0x38fb   :  { %11863 = vmatprep.mubr.msk.f32.mxu0 %vm12628_vm1, %v12629_v30 }
0x39c5   :  { %v14650_v29 = vpop.f32.mrb[106].mxu1 }
0x39c6   :  { %v11840_v0 = vpop.f32.mrb[107].mxu1 }
0x39c9   :  { %v14652_v12 = vpop.f32.mrb[134].mxu0  ;;  %v9199_v62 = vpop.f32.mrb[108].mxu1 }
0x39ca   :  { %v9281_v37 = vmul.f32 0.35355338, %v9199_v62  ;;  %v11845_v42 = vpop.f32.mrb[135].mxu0  ;;  %v11850_v26 = vpop.f32.mrb[109].mxu1 }
0x39cc   :  { %v9283_v34 = vadd.f32 %v9281_v37, %v14215_v5 }
0x39cd   :  { %v9277_v58 = vpop.f32.mrb[136].mxu0 }
0x39ce   :  { %v9282_v15 = vmul.f32 0.35355338, %v9277_v58  ;;  %v11855_v49 = vpop.f32.mrb[137].mxu0  ;;  %v9285_v50 = vsel %vm425_vm2, %v9283_v34, -inf }
0x39cf   :  { %9286 = vmax.xlane.f32.xlu0 %v9285_v50 }
0x39d0   :  { %v9284_v7 = vadd.f32 %v9282_v15, %v14215_v5 }
0x39d2   :  { %v9288_v46 = vsel %vm425_vm2, %v9284_v7, -inf }
0x39d3   :  { %9289 = vmax.xlane.f32.xlu1 %v9288_v46 }
0x39e4   :  { %9383 = vrot.lane.b32.xlu1 %v14584_v60, %s14926_s23 }
0x39e5   :  { %9307 = vrot.lane.b32.xlu0 %v14582_v52, %s14926_s23 }
0x39e8   :  { %9461 = vrot.lane.b32.xlu1 %v14546_v23, %s14927_s27 }
0x39ec   :  { %9539 = vrot.lane.b32.xlu1 %v14556_v61, %s14927_s27 }
0x39f0   :  { %9537 = vrot.lane.b32.xlu1 %v14565_v54, %s14927_s27 }
0x3a5c   :  { %v9287_v51 = vpop.xlane.xlu0 %9286 }
0x3a5d   :  { %v9291_v53 = vsub.f32 %v9283_v34, %v9287_v51 }
0x3a5f   :  { %v9293_v55 = vmul.f32 1.442695, %v9291_v53 }
0x3a60   :  { %v9308_v39 = vpop.permute.xlu0 %9307  ;;  %v9290_v22 = vpop.xlane.xlu1 %9289 }
0x3a61   :  { %12545 = vpow2.f32 %v9293_v55  ;;  %v9292_v6 = vsub.f32 %v9284_v7, %v9290_v22  ;;  %11857 = vmatpush3.msra.mxu1 %v9308_v39  ;;  %v10658_v22 = vld [vmem:[%s14883_s16 + $0xe8] sm:$0xff] }
0x3a62   :  { %11866 = vmatprep.subr.mxu1 %v12629_v30 }
0x3a63   :  { %v9295_v16 = vmul.f32 1.442695, %v9292_v6 }
0x3a64   :  { %v9384_v21 = vpop.permute.xlu1 %9383 }
0x3a65   :  { %12547 = vpow2.f32 %v9295_v16  ;;  %11862 = vmatpush3.msra.mxu0 %v9384_v21  ;;  %v10659_v16 = vld [vmem:[%s14883_s16 + $0xf0] sm:$0xff]  ;;  %v10660_v21 = vld [vmem:[%s14883_s16 + $0xf8] sm:$0xff] }
0x3a66   :  { %11871 = vmatprep.subr.mxu0 %v12629_v30 }
0x3a68   :  { %v9462_v48 = vpop.permute.xlu1 %9461 }
0x3a6b   :  { %v12546_v23 = vpop.eup %12545 }
0x3a6c   :  { %v9297_v61 = vsel %vm425_vm2, %v12546_v23, 0.0  ;;  %v9540_v45 = vpop.permute.xlu1 %9539 }
0x3a6d   :  { %9298 = vadd.xlane.f32.xlu0 %v9297_v61 }
0x3a6f   :  { %v12548_v54 = vpop.eup %12547 }
0x3a70   :  { %v9300_v1 = vsel %vm425_vm2, %v12548_v54, 0.0  ;;  %v9538_v36 = vpop.permute.xlu1 %9537 }
0x3a71   :  { %9301 = vadd.xlane.f32.xlu0 %v9300_v1 }
0x3a87   :  { %9459 = vrot.lane.b32.xlu0 %v14553_v3, %s14927_s27 }
0x3afa   :  { %v9299_v59 = vpop.xlane.xlu0 %9298 }
0x3afb   :  { %12549 = vrcp.f32 %v9299_v59 }
0x3afe   :  { %v9302_v31 = vpop.xlane.xlu0 %9301 }
0x3aff   :  { %12551 = vrcp.f32 %v9302_v31 }
0x3b02   :  { %v9460_v3 = vpop.permute.xlu0 %9459 }
0x3b05   :  { %v12550_v11 = vpop.eup %12549 }
0x3b06   :  { %v9304_v27 = vmul.f32 %v12550_v11, %v12546_v23  ;;  %v12257_v23 = vpack.c.bf16 %v10660_v21, %v10659_v16 }
0x3b08   :  { %11859 = vmatmul.mubr.msk.f32.vlgmr.msra.gmra.mrb[110].mxu1 %vm425_vm2, %v9304_v27 }
0x3b09   :  { %v12552_v43 = vpop.eup %12551  ;;  %11867 = vmatpush3.xpose.msk.msra.mxu1 %vm425_vm2, %v9462_v48  ;;  %11868 = vmatprep.mubr.msk.f32.mxu1 %vm12628_vm1, %v12629_v30 }
0x3b0a   :  { %v9306_v14 = vmul.f32 %v12552_v43, %v12548_v54  ;;  %11876 = vmatprep.subr.mxu1 %v12629_v30 }
0x3b0c   :  { %11864 = vmatmul.mubr.msk.f32.vlgmr.msra.gmra.mrb[138].mxu0 %vm425_vm2, %v9306_v14  ;;  %11869 = vmatmul.mubr.msk.f32.vlgmr.msra.gmra.mrb[112].mxu1 %vm425_vm2, %v9460_v3 }
0x3b0d   :  { %11872 = vmatpush3.xpose.msk.msra.mxu0 %vm425_vm2, %v9540_v45  ;;  %11873 = vmatprep.mubr.msk.f32.mxu0 %vm12628_vm1, %v12629_v30 }
0x3b0e   :  { %11881 = vmatprep.subr.mxu0 %v12629_v30  ;;  %11878 = vmatprep.mubr.msk.f32.mxu1 %vm12628_vm1, %v12629_v30 }
0x3b10   :  { %11874 = vmatmul.mubr.msk.f32.vlgmr.msra.gmra.mrb[140].mxu0 %vm425_vm2, %v9538_v36 }
0x3b11   :  { %11883 = vmatprep.mubr.msk.f32.mxu0 %vm12628_vm1, %v12629_v30 }
0x3bdb   :  { %v9379_v33 = vpop.f32.mrb[110].mxu1 }
0x3bdc   :  { %v11860_v56 = vpop.f32.mrb[111].mxu1 }
0x3bdf   :  { %v9455_v18 = vpop.f32.mrb[138].mxu0  ;;  %v9533_v25 = vpop.f32.mrb[112].mxu1 }
0x3be0   :  { %v9615_v10 = vmul.f32 0.35355338, %v9533_v25  ;;  %v11865_v47 = vpop.f32.mrb[139].mxu0  ;;  %v11870_v40 = vpop.f32.mrb[113].mxu1 }
0x3be2   :  { %v9617_v35 = vadd.f32 %v9615_v10, %v14215_v5 }
0x3be3   :  { %v9611_v2 = vpop.f32.mrb[140].mxu0 }
0x3be4   :  { %v9616_v32 = vmul.f32 0.35355338, %v9611_v2  ;;  %v11875_v41 = vpop.f32.mrb[141].mxu0  ;;  %v9619_v17 = vsel %vm425_vm2, %v9617_v35, -inf }
0x3be5   :  { %9620 = vmax.xlane.f32.xlu0 %v9619_v17 }
0x3be6   :  { %v9618_v0 = vadd.f32 %v9616_v32, %v14215_v5 }
0x3be8   :  { %v9622_v62 = vsel %vm425_vm2, %v9618_v0, -inf }
0x3be9   :  { %9623 = vmax.xlane.f32.xlu1 %v9622_v62 }
0x3bfa   :  { %9717 = vrot.lane.b32.xlu1 %v14584_v60, %s14927_s27 }
0x3bfe   :  { %9795 = vrot.lane.b32.xlu1 %v14650_v29, %s14928_s1 }
0x3c02   :  { %9797 = vrot.lane.b32.xlu1 %v14652_v12, %s14928_s1 }
0x3c06   :  { %9805 = vrot.lane.b32.xlu1 %v9455_v18, %s14929_s29 }
0x3c72   :  { %v9621_v37 = vpop.xlane.xlu0 %9620 }
0x3c73   :  { %v9625_v42 = vsub.f32 %v9617_v35, %v9621_v37 }
0x3c75   :  { %v9627_v26 = vmul.f32 1.442695, %v9625_v42 }
0x3c76   :  { %v9624_v34 = vpop.xlane.xlu1 %9623 }
0x3c77   :  { %12553 = vpow2.f32 %v9627_v26  ;;  %v9626_v5 = vsub.f32 %v9618_v0, %v9624_v34  ;;  %v10663_v34 = vld [vmem:[%s14884_s17 + $0x20] sm:$0xff] }
0x3c79   :  { %v9629_v58 = vmul.f32 1.442695, %v9626_v5  ;;  %v10664_v5 = vld [vmem:[%s14884_s17 + $0x28] sm:$0xff] }
0x3c7a   :  { %v9718_v15 = vpop.permute.xlu1 %9717 }
0x3c7b   :  { %12555 = vpow2.f32 %v9629_v58  ;;  %11882 = vmatpush3.msra.mxu0 %v9718_v15  ;;  %v12261_v58 = vpack.c.bf16 %v10664_v5, %v10663_v34  ;;  %v10665_v15 = vld [vmem:[%s14884_s17 + $0x30] sm:$0xff] }
0x3c7d   :  { %12262 = vmatprep.subr.bf16.mxu0 %v12261_v58 }
0x3c7e   :  { %v9796_v31 = vpop.permute.xlu1 %9795 }
0x3c7f   :  { %v9817_v27 = vsel %vm425_vm2, %v14610_v63, %v9796_v31  ;;  %v9831_v63 = vrot.slane %v14507_v4, %v13193_v8 }
0x3c81   :  { %v12554_v49 = vpop.eup %12553 }
0x3c82   :  { %v9631_v60 = vsel %vm425_vm2, %v12554_v49, 0.0  ;;  %v9798_v48 = vpop.permute.xlu1 %9797 }
0x3c83   :  { %9632 = vadd.xlane.f32.xlu0 %v9631_v60  ;;  %v9818_v36 = vsel %vm425_vm2, %v14612_v9, %v9798_v48  ;;  %v10675_v48 = vld [vmem:[%s14885_s18 + $0xa0] sm:$0xff] }
0x3c85   :  { %v12556_v29 = vpop.eup %12555 }
0x3c86   :  { %v9634_v50 = vsel %vm425_vm2, %v12556_v29, 0.0  ;;  %v9806_v43 = vpop.permute.xlu1 %9805 }
0x3c87   :  { %9635 = vadd.xlane.f32.xlu0 %v9634_v50 }
0x3c9d   :  { %9641 = vrot.lane.b32.xlu0 %v14582_v52, %s14927_s27  ;;  %v10657_v52 = vld [vmem:[%s14883_s16 + $0xe0] sm:$0xff] }
0x3c9e   :  { %v12253_v6 = vpack.c.bf16 %v10658_v22, %v10657_v52  ;;  %v9950_v52 = vrot.slane %v14507_v4, %v13247_v44  ;;  %v10672_v44 = vld [vmem:[%s14885_s18 + $0x88] sm:$0xff] }
0x3ca1   :  { %9803 = vrot.lane.b32.xlu0 %v9379_v33, %s14929_s29  ;;  %v9820_v33 = vsel %vm2457_vm4, %v9818_v36, %v9806_v43  ;;  %v10677_v43 = vld [vmem:[%s14885_s18 + $0xb0] sm:$0xff]  ;;  %v10680_v36 = vld [vmem:[%s14885_s18 + $0xc8] sm:$0xff]  ;;  %s14934_s29 = sld [smem:[#allocation11_spill]] }
0x3d10   :  { %v9633_v12 = vpop.xlane.xlu0 %9632 }
0x3d11   :  { %12557 = vrcp.f32 %v9633_v12 }
0x3d14   :  { %v9636_v7 = vpop.xlane.xlu0 %9635 }
0x3d15   :  { %12559 = vrcp.f32 %v9636_v7 }
0x3d18   :  { %v9642_v46 = vpop.permute.xlu0 %9641 }
0x3d19   :  { %11877 = vmatpush3.msra.mxu1 %v9642_v46 }
0x3d1a   :  { %12254 = vmatprep.subr.bf16.mxu1 %v12253_v6 }
0x3d1b   :  { %v12558_v51 = vpop.eup %12557 }
0x3d1c   :  { %v9638_v53 = vmul.f32 %v12558_v51, %v12554_v49  ;;  %v9804_v11 = vpop.permute.xlu0 %9803  ;;  %v10666_v49 = vld [vmem:[%s14884_s17 + $0x38] sm:$0xff] }
0x3d1d   :  { %v9819_v45 = vsel %vm2457_vm4, %v9817_v27, %v9804_v11  ;;  %v12265_v60 = vpack.c.bf16 %v10666_v49, %v10665_v15  ;;  %v10676_v11 = vld [vmem:[%s14885_s18 + $0xa8] sm:$0xff] }
0x3d1e   :  { %11879 = vmatmul.mubr.msk.f32.vlgmr.msra.gmra.mrb[114].mxu1 %vm425_vm2, %v9638_v53  ;;  %v9944_v53 = vrot.slane %v14507_v4, %v13244_v20  ;;  %v10671_v20 = vld [vmem:[%s14885_s18 + $0x80] sm:$0xff]  ;;  %v12277_v27 = vpack.c.bf16 %v10676_v11, %v10675_v48 }
0x3d1f   :  { %v12560_v55 = vpop.eup %12559  ;;  %12256 = vmatpush3.bf16.msra.mxu1 %v12253_v6 }
0x3d20   :  { %v9640_v39 = vmul.f32 %v12560_v55, %v12556_v29  ;;  %12258 = vmatprep.subr.bf16.mxu1 %v12257_v23 }
0x3d22   :  { %11884 = vmatmul.mubr.msk.f32.vlgmr.msra.gmra.mrb[142].mxu0 %vm425_vm2, %v9640_v39  ;;  %vm10163_vm2 = vcmask 254976  }
0x3d23   :  { %12260 = vmatpush3.bf16.msra.mxu1 %v12257_v23  ;;  %12264 = vmatpush3.bf16.msra.mxu0 %v12261_v58 }
0x3d24   :  { %12266 = vmatprep.subr.bf16.mxu0 %v12265_v60 }
0x3d27   :  { %12268 = vmatpush3.bf16.msra.mxu0 %v12265_v60 }
0x3d28   :  { %12301 = vmatprep.subr.bf16.mxu0 %v12627_v24 }
0x3df1   :  { %v9713_v61 = vpop.f32.mrb[114].mxu1 }
0x3df2   :  { %9811 = vrot.lane.b32.xlu0 %v9713_v61, %s14930_s24  ;;  %v11880_v54 = vpop.f32.mrb[115].mxu1 }
0x3df3   :  { %v12269_v54 = vpack.c.bf16 %v10672_v44, %v10671_v20  ;;  %v10189_v20 = vld [vmem:[%s14888_s21 + $0x10] sm:$0xff]  ;;  %v10190_v44 = vld [vmem:[%s14888_s21 + $0x18] sm:$0xff] }
0x3df5   :  { %v9789_v1 = vpop.f32.mrb[142].mxu0  ;;  %12270 = vmatprep.subr.bf16.mxu1 %v12269_v54 }
0x3df6   :  { %9813 = vrot.lane.b32.xlu1 %v9789_v1, %s14930_s24  ;;  %v11885_v59 = vpop.f32.mrb[143].mxu0  ;;  %v10673_v1 = vld [vmem:[%s14885_s18 + $0x90] sm:$0xff] }
0x3df7   :  { %v10674_v59 = vld [vmem:[%s14885_s18 + $0x98] sm:$0xff] }
0x3df8   :  { %v12273_v31 = vpack.c.bf16 %v10674_v59, %v10673_v1 }
0x3e64   :  { %v9812_v14 = vpop.permute.xlu0 %9811 }
0x3e65   :  { %v9821_v3 = vsel %vm2461_vm5, %v9819_v45, %v9812_v14  ;;  %v10678_v45 = vld [vmem:[%s14885_s18 + $0xb8] sm:$0xff] }
0x3e66   :  { %11894 = vmatprep.mubr.msk.f32.mxu1 %vm96_vm0, %v9821_v3  ;;  %v12281_v14 = vpack.c.bf16 %v10678_v45, %v10677_v43  ;;  %v10679_v3 = vld [vmem:[%s14885_s18 + $0xc0] sm:$0xff] }
0x3e68   :  { %v9814_v56 = vpop.permute.xlu1 %9813 }
0x3e69   :  { %v9822_v18 = vsel %vm2461_vm5, %v9820_v33, %v9814_v56  ;;  %v12285_v33 = vpack.c.bf16 %v10680_v36, %v10679_v3  ;;  %v10681_v56 = vld [vmem:[%s14885_s18 + $0xd0] sm:$0xff]  ;;  %vm10279_vm5 = vcmask 124928   ;;  %v10687_v3 = vld [vmem:[%s14887_s20 + $0x2] ss:$0 sm:$0xff] }
0x3e6a   :  { %11895 = vmatmul.mubr.msk.f32.vlgmr.msra.gmra.mrb[116].mxu1 %vm96_vm0, %v9822_v18  ;;  %v10682_v18 = vld [vmem:[%s14885_s18 + $0xd8] sm:$0xff] }
0x3e6b   :  { %12272 = vmatpush3.bf16.msra.mxu1 %v12269_v54  ;;  %v12305_v54 = vpack.c.bf16 %v10190_v44, %v10189_v20 }
0x3e6c   :  { %12274 = vmatprep.subr.bf16.mxu1 %v12273_v31 }
0x3e6f   :  { %12276 = vmatpush3.bf16.msra.mxu1 %v12273_v31 }
0x3e70   :  { %12278 = vmatprep.subr.bf16.mxu1 %v12277_v27 }
0x3e73   :  { %12280 = vmatpush3.bf16.msra.mxu1 %v12277_v27 }
0x3e74   :  { %12282 = vmatprep.subr.bf16.mxu1 %v12281_v14 }
0x3e77   :  { %12284 = vmatpush3.bf16.msra.mxu1 %v12281_v14 }
0x3e78   :  { %12286 = vmatprep.subr.bf16.mxu1 %v12285_v33 }
0x3e7b   :  { %12288 = vmatpush3.bf16.msra.mxu1 %v12285_v33  ;;  %v10688_v33 = vld [vmem:[%s14887_s20 + $0x3] ss:$0 sm:$0xff] }
0x3f3d   :  { %v11896_v25 = vpop.f32.mrb[116].mxu1 }
0x3f3e   :  { %v9910_v10 = vadd.f32 %v11896_v25, %v9831_v63  ;;  %v9904_v47 = vpop.f32.mrb[117].mxu1  ;;  %v10683_v25 = vld [vmem:[%s14885_s18 + $0xe0] sm:$0xff] }
0x3f3f   :  { %v9905_v40 = vadd.f32 %v9904_v47, %v9831_v63  ;;  %v12289_v63 = vpack.c.bf16 %v10682_v18, %v10681_v56 }
0x3f40   :  { %v14735_v35 = vadd.f32 %v9910_v10, %v14474_v28  ;;  %v10684_v10 = vld [vmem:[%s14885_s18 + $0xe8] sm:$0xff] }
0x3f41   :  { %v14738_v2 = vadd.f32 %v9905_v40, %v14478_v19  ;;  %12290 = vmatprep.subr.bf16.mxu1 %v12289_v63  ;;  %v12293_v47 = vpack.c.bf16 %v10684_v10, %v10683_v25  ;;  %v10685_v40 = vld [vmem:[%s14885_s18 + $0xf0] sm:$0xff] }
0x3f42   :  { %v9918_v9 = vsel %vm96_vm0, %v14735_v35, 0.0  ;;  %12292 = vmatpush3.bf16.msra.mxu1 %v12289_v63 }
0x3f43   :  { %9919 = vadd.xlane.f32.xlu1 %v9918_v9  ;;  %v9915_v32 = vsel %vm96_vm0, %v14738_v2, 0.0  ;;  %12294 = vmatprep.subr.bf16.mxu1 %v12293_v47  ;;  %v10686_v9 = vld [vmem:[%s14885_s18 + $0xf8] sm:$0xff] }
0x3f44   :  { %9916 = vadd.xlane.f32.xlu0 %v9915_v32  ;;  %v12297_v32 = vpack.c.bf16 %v10686_v9, %v10685_v40 }
0x3f46   :  { %12296 = vmatpush3.bf16.msra.mxu1 %v12293_v47 }
0x3f47   :  { %12298 = vmatprep.subr.bf16.mxu1 %v12297_v32 }
0x3f4a   :  { %12300 = vmatpush3.bf16.msra.mxu1 %v12297_v32 }
0x3fd0   :  { %v9920_v41 = vpop.xlane.xlu1 %9919 }
0x3fd1   :  { %v9922_v8 = vmul.f32 0.03125, %v9920_v41  ;;  %v9917_v17 = vpop.xlane.xlu0 %9916  ;;  %v9961_v41 = vrot.slane %v14507_v4, %v13319_v13 }
0x3fd2   :  { %v9921_v0 = vmul.f32 0.03125, %v9917_v17 }
0x3fd3   :  { %v9924_v62 = vsub.f32 %v14735_v35, %v9922_v8 }
0x3fd4   :  { %v9923_v28 = vsub.f32 %v14738_v2, %v9921_v0 }
0x3fd5   :  { %v9926_v42 = vmul.f32 %v9924_v62, %v9924_v62 }
0x3fd6   :  { %v9925_v37 = vmul.f32 %v9923_v28, %v9923_v28 }
0x3fd7   :  { %v9930_v26 = vsel %vm96_vm0, %v9926_v42, 0.0 }
0x3fd8   :  { %v9927_v19 = vsel %vm96_vm0, %v9925_v37, 0.0 }
0x3fd9   :  { %9928 = vadd.xlane.f32.xlu0 %v9927_v19 }
0x3fdd   :  { %9931 = vadd.xlane.f32.xlu0 %v9930_v26 }
0x4066   :  { %v9929_v29 = vpop.xlane.xlu0 %9928 }
0x4067   :  { %v9933_v50 = vmul.f32 0.03125, %v9929_v29  ;;  %v10079_v29 = vrot.slane %v14507_v4, %v13330_v57 }
0x4069   :  { %v9935_v12 = vadd.f32 1e-05, %v9933_v50 }
0x406a   :  { %v9932_v7 = vpop.xlane.xlu0 %9931 }
0x406b   :  { %12561 = vrsqrt.f32 %v9935_v12  ;;  %v9934_v46 = vmul.f32 0.03125, %v9932_v7 }
0x406d   :  { %v9936_v51 = vadd.f32 1e-05, %v9934_v46 }
0x406f   :  { %12563 = vrsqrt.f32 %v9936_v51 }
0x4075   :  { %v12562_v55 = vpop.eup %12561 }
0x4076   :  { %v9939_v39 = vmul.f32 %v12562_v55, %v9923_v28 }
0x4078   :  { %v9945_v22 = vmul.f32 %v9944_v53, %v9939_v39 }
0x4079   :  { %v12564_v6 = vpop.eup %12563 }
0x407a   :  { %v9940_v16 = vmul.f32 %v12564_v6, %v9924_v62  ;;  %v9951_v21 = vadd.f32 %v9950_v52, %v9945_v22 }
0x407c   :  { %v9946_v23 = vmul.f32 %v9944_v53, %v9940_v16  ;;  %11905 = vmatprep.mubr.msk.f32.mxu0 %vm96_vm0, %v9951_v21 }
0x407e   :  { %v9952_v61 = vadd.f32 %v9950_v52, %v9946_v23  ;;  %v10278_v52 = vmul.f32 %v14089_v38, %v14089_v38 }
0x4080   :  { %11906 = vmatmul.mubr.msk.f32.vlgmr.msra.gmra.mrb[144].mxu0 %vm96_vm0, %v9952_v61  ;;  %v10280_v6 = vsel %vm10279_vm5, %v10278_v52, 0.0 }
0x4081   :  { %11951 = vmatprep.mubr.msk.f32.mxu0 %vm12628_vm1, %v12629_v30 }
0x4153   :  { %v11907_v8 = vpop.f32.mrb[144].mxu0 }
0x4154   :  { %v10040_v17 = vadd.f32 %v11907_v8, %v9961_v41  ;;  %v10034_v0 = vpop.f32.mrb[145].mxu0 }
0x4155   :  { %v10035_v62 = vadd.f32 %v10034_v0, %v9961_v41 }
0x4156   :  { %v10670_v28 = vmul.f32 -1.702, %v10040_v17 }
0x4157   :  { %v10669_v37 = vmul.f32 -1.702, %v10035_v62 }
0x4158   :  { %v10049_v19 = vmul.f32 1.442695, %v10670_v28 }
0x4159   :  { %v10047_v42 = vmul.f32 1.442695, %v10669_v37 }
0x415a   :  { %12565 = vpow2.f32 %v10049_v19 }
0x415b   :  { %12567 = vpow2.f32 %v10047_v42 }
0x4164   :  { %v12566_v26 = vpop.eup %12565 }
0x4165   :  { %v12568_v34 = vpop.eup %12567  ;;  %v10052_v5 = vadd.f32 1.0, %v12566_v26 }
0x4166   :  { %v10051_v58 = vadd.f32 1.0, %v12568_v34 }
0x4167   :  { %12569 = vrcp.f32 %v10052_v5 }
0x4168   :  { %12571 = vrcp.f32 %v10051_v58 }
0x4171   :  { %v12570_v15 = vpop.eup %12569 }
0x4172   :  { %v12572_v49 = vpop.eup %12571  ;;  %v10058_v13 = vmul.f32 %v12570_v15, %v10040_v17 }
0x4173   :  { %v10057_v60 = vmul.f32 %v12572_v49, %v10035_v62 }
0x4175   :  { %11940 = vmatprep.mubr.f32.mxu1 %v10057_v60 }
0x4176   :  { %11941 = vmatmul.mubr.f32.vlgmr.msra.gmra.mrb[118].mxu1 %v10058_v13 }
0x4249   :  { %v11942_v50 = vpop.f32.mrb[118].mxu1 }
0x424a   :  { %v10152_v12 = vadd.f32 %v11942_v50, %v10079_v29  ;;  %v10146_v7 = vpop.f32.mrb[119].mxu1 }
0x424b   :  { %v10147_v46 = vadd.f32 %v10146_v7, %v10079_v29 }
0x424c   :  { %v10156_v51 = vadd.f32 %v10152_v12, %v14735_v35  ;;  %v10187_v35 = vld [vmem:[%s14888_s21] sm:$0xff] }
0x424d   :  { %v10155_v53 = vadd.f32 %v10147_v46, %v14738_v2  ;;  %v10188_v2 = vld [vmem:[%s14888_s21 + $0x8] sm:$0xff] }
0x424e   :  { %v10158_v55 = vrot.slane %v10156_v51, 7  ;;  %v12302_v61 = vpack.c.bf16 %v10188_v2, %v10187_v35 }
0x4250   :  { %v10160_v39 = vsel %vm5646_vm12, %v10155_v53, %v10158_v55  ;;  %12303 = vmatpush3.bf16.msra.mxu0 %v12302_v61 }
0x4251   :  { %v10164_v22 = vsel %vm10163_vm2, %v10160_v39, 0.0  ;;  %12304 = vmatprep.subr.bf16.mxu0 %v12627_v24 }
0x4252   :  { %10165 = vadd.xlane.f32.xlu0 %v10164_v22 }
0x4254   :  { %12306 = vmatpush3.bf16.msra.mxu0 %v12305_v54 }
0x4255   :  { %11954 = vmatprep.subr.mxu0 %v12629_v30 }
0x4256   :  { %10281 = vadd.xlane.f32.xlu0 %v10280_v6 }
0x42df   :  { %v10166_v57 = vpop.xlane.xlu0 %10165 }
0x42e0   :  { %v10167_v4 = vmul.f32 0.03125, %v10166_v57 }
0x42e2   :  { %v10168_v16 = vsub.f32 %v10160_v39, %v10167_v4 }
0x42e3   :  { %v10282_v1 = vpop.xlane.xlu0 %10281 }
0x42e4   :  { %v10169_v21 = vmul.f32 %v10168_v16, %v10168_v16  ;;  %12573 = vrsqrt.f32 %v10282_v1  ;;  %vm10285_vm12 = vcmp.eq.f32.partialorder %v10282_v1, inf  ;;  %v10288_v27 = vand.u32 2147483648, %v10282_v1 }
0x42e5   :  { %vm10287_vm13 = vcmp.eq.f32.partialorder %v10282_v1, 0.0 }
0x42e6   :  { %v10170_v23 = vsel %vm10163_vm2, %v10169_v21, 0.0 }
0x42e7   :  { %10171 = vadd.xlane.f32.xlu1 %v10170_v23 }
0x42ee   :  { %v12574_v59 = vpop.eup %12573 }
0x42ef   :  { %v10284_v31 = vmul.f32 %v12574_v59, %v10282_v1 }
0x42f1   :  { %v10286_v24 = vsel %vm10285_vm12, %v10282_v1, %v10284_v31 }
0x42f2   :  { %v10289_v45 = vsel %vm10287_vm13, %v10288_v27, %v10286_v24 }
0x4374   :  { %v10172_v48 = vpop.xlane.xlu1 %10171 }
0x4375   :  { %v10173_v11 = vmul.f32 0.03125, %v10172_v48 }
0x4377   :  { %v10174_v43 = vadd.f32 1e-05, %v10173_v11 }
0x4379   :  { %12575 = vrsqrt.f32 %v10174_v43 }
0x437a   :  { %12577 = vrcp.f32 %v10289_v45 }
0x4383   :  { %v12576_v14 = vpop.eup %12575 }
0x4384   :  { %v10176_v36 = vmul.f32 %v12576_v14, %v10168_v16  ;;  %v12578_v56 = vpop.eup %12577 }
0x4385   :  { %v10291_v25 = vmul.f32 %v12578_v56, %v14089_v38 }
0x4386   :  { %v10181_v18 = vmul.f32 %v10687_v3, %v10176_v36 }
0x4388   :  { %v10186_v63 = vadd.f32 %v10688_v33, %v10181_v18 }
0x438a   :  { %11952 = vmatmul.mubr.msk.f32.vlgmr.msra.gmra.mrb[146].mxu0 %vm96_vm0, %v10186_v63  ;;  %vm10371_vm0 = vcmask 17408  }
0x438b   :  { %11955 = vmatpush3.xpose.msk.msra.mxu0 %vm2457_vm4, %v10291_v25  ;;  %11956 = vmatprep.mubr.msk.f32.mxu0 %vm12628_vm1, %v12629_v30  ;;  %v10369_v30 = vstv %s14934_s29 }
0x445d   :  { %v10260_v10 = vpop.f32.mrb[146].mxu0 }
0x445e   :  { %v10264_v47 = vmul.f32 %v10260_v10, %v10260_v10  ;;  %v11953_v40 = vpop.f32.mrb[147].mxu0 }
0x4460   :  { %v10266_v9 = vsel %vm10265_vm14, %v10264_v47, 0.0 }
0x4461   :  { %10267 = vadd.xlane.f32.xlu1 %v10266_v9 }
0x44ee   :  { %v10268_v32 = vpop.xlane.xlu1 %10267 }
0x44ef   :  { %12579 = vrsqrt.f32 %v10268_v32  ;;  %vm10271_vm15 = vcmp.eq.f32.partialorder %v10268_v32, inf  ;;  %v10274_v17 = vand.u32 2147483648, %v10268_v32  ;;  %vm10273_vm3 = vcmp.eq.f32.partialorder %v10268_v32, 0.0 }
0x44f9   :  { %v12580_v41 = vpop.eup %12579 }
0x44fa   :  { %v10270_v8 = vmul.f32 %v12580_v41, %v10268_v32 }
0x44fc   :  { %v10272_v38 = vsel %vm10271_vm15, %v10268_v32, %v10270_v8 }
0x44fd   :  { %v10275_v0 = vsel %vm10273_vm3, %v10274_v17, %v10272_v38 }
0x44fe   :  { %12581 = vrcp.f32 %v10275_v0 }
0x4508   :  { %v12582_v62 = vpop.eup %12581 }
0x4509   :  { %v10277_v28 = vmul.f32 %v12582_v62, %v10260_v10 }
0x450b   :  { %11957 = vmatmul.mubr.msk.f32.vlgmr.msra.gmra.mrb[148].mxu0 %vm2457_vm4, %v10277_v28 }
0x45de   :  { %v10364_v37 = vpop.f32.mrb[148].mxu0 }
0x45df   :  { %v10370_v19 = vmul.f32 %v10369_v30, %v10364_v37  ;;  %v11958_v42 = vpop.f32.mrb[149].mxu0 }
0x45e1   :  { %10372 = vst.msk [vmem:[#allocation7] sm:$0x3] %vm10371_vm0, %v10370_v19 }
0x45e2   :  { %12611 = shalt.err (!%p12608_p9)
}
0x45e3   :  { %s14935_s24 = sld [smem:[#allocation17_spill]] }
0x45e9   :  { %s12612_s6 = scalar_lea.hbm %s14935_s24, 32 }
0x45ea   :  { %p12613_p10 = scmp.ne.s32.totalorder %s14935_s24, %s12612_s6  ;;  %p12616_p11 = scmp.lt.u32.totalorder %s12612_s6, %s14935_s24 }
0x45ec   :  { %p12618_p12 = pnand %p12616_p11, %p12613_p10 }
0x45ee   :  { %12621 = shalt.err (!%p12618_p12)
}
0x45ef   :  { %10382 = dma.vmem_to_hbm [thread:$0]  %s10380_s28, 32, %s14935_s24, [#allocation5]  }
0x45f0   :  { %12624 = dma.done.wait [#allocation5], 32  }
0x45f1   :  { %12625 = vsyncadd [#allocation5], 4294967264 }
0x45f2   :  { %10386 = vsyncpa [#allocation5], 1 }
0x45f3   :  { %10387 = vsyncpa [#allocation6], 1 }

</bundles_post_ra>
